<compile_context>
chip_gen: v5e
topology: v5e:2x2
jax: 0.10.0
libtpu: 0.0.40
codegen_flags: <defaults>
</compile_context>

<pallas_src>
import functools
import math

import jax
import jax.numpy as jnp
from jax.experimental import pallas as pl
from jax.experimental.pallas import tpu as pltpu


# ----------------------------------------------------------------------------
# Options (synthetic, small)
# ----------------------------------------------------------------------------
class Options:
    input_res = 16
    patch_size = 4
    dim = 32
    num_heads = 4
    num_blocks = 2
    num_input_views = 2
    input_normal = False
    input_coord = False
    input_mr = False
    llama_style = False
    grad_checkpoint = False


def _round_up(x, m):
    return ((x + m - 1) // m) * m


# ----------------------------------------------------------------------------
# Fused Pallas kernel: embed -> transformer blocks -> ln_out -> fused heads
# ----------------------------------------------------------------------------
def _gsrecon_fused_kernel(
    x_ref, emb_w_ref, emb_b_ref,
    qkv_w_ref, proj_w_ref, fc1_w_ref, fc2_w_ref, blk_bias_ref,
    heads_w_ref, heads_b_ref,
    out_ref, *, num_blocks, num_heads, dim, hidden, batch, seq, eps,
):
    D = dim
    HD = D // num_heads

    def norm(x):
        # gamma/beta are folded into the following matmul; only normalize here.
        mu = jnp.mean(x, axis=-1, keepdims=True)
        xc = x - mu
        var = jnp.mean(xc * xc, axis=-1, keepdims=True)
        return xc * jax.lax.rsqrt(var + eps)

    def gelu_tanh(x):
        c = math.sqrt(2.0 / math.pi)
        return 0.5 * x * (1.0 + jnp.tanh(c * (x + 0.044715 * x * x * x)))

    # x_embedder: (BL, Cin) @ (Cin, D) + (1, D)  -- full 64-row slab
    h = jnp.dot(x_ref[...], emb_w_ref[...],
                preferred_element_type=jnp.float32) + emb_b_ref[...]

    for blk in range(num_blocks):                      # statically unrolled
        bias = blk_bias_ref[blk]                       # (4, BPAD)
        qkv_b = bias[0:1, :3 * D]
        proj_b = bias[1:2, :D]
        fc1_b = bias[2:3, :hidden]
        fc2_b = bias[3:4, :D]

        # ---------------- attention ----------------
        # ln1 gamma/beta and 1/sqrt(HD) already folded into qkv_w / qkv_b.
        y = norm(h)
        qkv = jnp.dot(y, qkv_w_ref[blk],
                      preferred_element_type=jnp.float32) + qkv_b   # (BL, 3D)

        proj_w = proj_w_ref[blk]                                    # (D, D)
        attn_rows = []
        for b in range(batch):                    # static, sublane-aligned slab
            rows = qkv[b * seq:(b + 1) * seq]     # (seq, 3D)
            acc = None
            for hh in range(num_heads):           # statically unrolled
                q = rows[:, hh * HD:(hh + 1) * HD]
                k = rows[:, D + hh * HD:D + (hh + 1) * HD]
                v = rows[:, 2 * D + hh * HD:2 * D + (hh + 1) * HD]
                # contract shared last dim directly: no k.T materialised
                s = jax.lax.dot_general(
                    q, k, (((1,), (1,)), ((), ())),
                    preferred_element_type=jnp.float32)             # (seq, seq)
                s = s - jnp.max(s, axis=-1, keepdims=True)
                p = jnp.exp(s)
                p = p * pl.reciprocal(jnp.sum(p, axis=-1, keepdims=True),
                                      approx=True)
                o = jnp.dot(p, v, preferred_element_type=jnp.float32)  # (seq, HD)
                # accumulate straight through the projection (8-row slices)
                contrib = jnp.dot(o, proj_w[hh * HD:(hh + 1) * HD, :],
                                  preferred_element_type=jnp.float32)
                acc = contrib if acc is None else acc + contrib
            attn_rows.append(acc)
        attn = jnp.concatenate(attn_rows, axis=0) + proj_b          # (BL, D)
        h = h + attn

        # ---------------- MLP ----------------
        # ln2 gamma/beta folded into fc1_w / fc1_b.
        y = norm(h)
        y = gelu_tanh(jnp.dot(y, fc1_w_ref[blk],
                              preferred_element_type=jnp.float32) + fc1_b)
        y = jnp.dot(y, fc2_w_ref[blk],
                    preferred_element_type=jnp.float32) + fc2_b
        h = h + y

    # ln_out (folded into heads) + fused heads -> lane-dense (BL, 256) store
    h = norm(h)
    out_ref[...] = jnp.dot(h, heads_w_ref[...],
                           preferred_element_type=jnp.float32) + heads_b_ref[...]


def gsrecon_core(x_tokens, packed, *, batch, seq, num_blocks, num_heads, dim,
                 eps=1e-5):
    """x_tokens: (batch*seq, Cin) f32 -> (batch*seq, out_pad) f32 (padded)."""
    BL, Cin = x_tokens.shape
    assert BL == batch * seq
    D = dim
    hidden = packed["fc1_w"].shape[-1]
    out_pad = packed["heads_w"].shape[-1]
    bpad = packed["blk_bias"].shape[-1]

    kernel = functools.partial(
        _gsrecon_fused_kernel,
        num_blocks=num_blocks, num_heads=num_heads, dim=dim, hidden=hidden,
        batch=batch, seq=seq, eps=eps)

    f2 = lambda i: (0, 0)
    f3 = lambda i: (0, 0, 0)

    return pl.pallas_call(
        kernel,
        out_shape=jax.ShapeDtypeStruct((BL, out_pad), jnp.float32),
        grid=(1,),                                   # single fused step
        in_specs=[
            pl.BlockSpec((BL, Cin), f2),             # tokens (full slab)
            pl.BlockSpec((Cin, D), f2),              # emb_w
            pl.BlockSpec((1, D), f2),                # emb_b
            pl.BlockSpec((num_blocks, D, 3 * D), f3),      # qkv_w (folded)
            pl.BlockSpec((num_blocks, D, D), f3),          # proj_w
            pl.BlockSpec((num_blocks, D, hidden), f3),     # fc1_w (folded)
            pl.BlockSpec((num_blocks, hidden, D), f3),     # fc2_w
            pl.BlockSpec((num_blocks, 4, bpad), f3),       # merged biases
            pl.BlockSpec((D, out_pad), f2),          # fused head weights (folded)
            pl.BlockSpec((1, out_pad), f2),          # fused head bias (from ln_out beta)
        ],
        out_specs=pl.BlockSpec((BL, out_pad), f2),
        compiler_params=pltpu.CompilerParams(
            dimension_semantics=("arbitrary",)),
    )(x_tokens,
      packed["emb_w"], packed["emb_b"],
      packed["qkv_w"], packed["proj_w"], packed["fc1_w"], packed["fc2_w"],
      packed["blk_bias"], packed["heads_w"], packed["heads_b"])


# ----------------------------------------------------------------------------
# Plain-JAX glue: plucker rays, patchify / unpatchify
# ----------------------------------------------------------------------------
def plucker_ray(H, W, C2W, fxfycxcy):
    """C2W: (B, V, 4, 4), fxfycxcy: (B, V, 4) -> plucker (B, V, 6, H, W)."""
    fx = fxfycxcy[..., 0][..., None, None]
    fy = fxfycxcy[..., 1][..., None, None]
    cx = fxfycxcy[..., 2][..., None, None]
    cy = fxfycxcy[..., 3][..., None, None]
    yy, xx = jnp.meshgrid(
        jnp.arange(H, dtype=jnp.float32) + 0.5,
        jnp.arange(W, dtype=jnp.float32) + 0.5,
        indexing="ij",
    )
    dx = (xx[None, None] - cx) / fx
    dy = (yy[None, None] - cy) / fy
    dz = jnp.ones_like(dx)
    dirs_cam = jnp.stack([dx, dy, dz], axis=-1)              # (B, V, H, W, 3)
    R = C2W[..., :3, :3]
    t = C2W[..., :3, 3]
    dirs_w = jnp.einsum("bvij,bvhwj->bvhwi", R, dirs_cam)
    dirs_w = dirs_w / (jnp.linalg.norm(dirs_w, axis=-1, keepdims=True) + 1e-8)
    origins = t[:, :, None, None, :]
    moment = jnp.cross(jnp.broadcast_to(origins, dirs_w.shape), dirs_w)
    plucker = jnp.concatenate([moment, dirs_w], axis=-1)     # (B, V, H, W, 6)
    plucker = jnp.transpose(plucker, (0, 1, 4, 2, 3))        # (B, V, 6, H, W)
    return plucker, (origins, dirs_w)


def patchify(x, p):
    """(BV, C, H, W) -> (BV, N, C*p*p), feature order (c, p1, p2)."""
    bv, c, h, w = x.shape
    x = x.reshape(bv, c, h // p, p, w // p, p)
    x = jnp.transpose(x, (0, 2, 4, 1, 3, 5))
    return x.reshape(bv, (h // p) * (w // p), c * p * p)


def unpatchify(x, p, hw):
    """(BV, N, C*p*p) -> (BV, C, hw*p, hw*p)."""
    bv, n, cpp = x.shape
    c = cpp // (p * p)
    x = x.reshape(bv, hw, hw, c, p, p)
    x = jnp.transpose(x, (0, 3, 1, 4, 2, 5))
    return x.reshape(bv, c, hw * p, hw * p)


# ----------------------------------------------------------------------------
# Parameter init (deterministic, synthetic) + packing / folding for the kernel
# ----------------------------------------------------------------------------
def _xavier(key, shape):
    fan_in, fan_out = shape
    limit = math.sqrt(6.0 / (fan_in + fan_out))
    return jax.random.uniform(key, shape, jnp.float32, -limit, limit)


def init_params(key, opt: Options):
    d = opt.dim
    p2 = opt.patch_size ** 2
    in_channels = 3 + 6
    if opt.input_normal:
        in_channels += 3
    if opt.input_coord:
        in_channels += 3
    if opt.input_mr:
        in_channels += 2
    embed_in = in_channels * p2

    keys = iter(jax.random.split(key, 8 + 8 * opt.num_blocks))
    params = {
        "x_embedder_w": _xavier(next(keys), (embed_in, d)),
        "x_embedder_b": jnp.zeros((d,), jnp.float32),
        "ln_out_g": jnp.ones((d,), jnp.float32),
        "ln_out_b": jnp.zeros((d,), jnp.float32),
        "out_depth_w": jnp.zeros((d, 1 * p2), jnp.float32),
        "out_rgb_w": _xavier(next(keys), (d, 3 * p2)),
        "out_scale_w": jnp.zeros((d, 3 * p2), jnp.float32),
        "out_rotation_w": _xavier(next(keys), (d, 4 * p2)),
        "out_opacity_w": jnp.zeros((d, 1 * p2), jnp.float32),
        "blocks": [],
    }
    for _ in range(opt.num_blocks):
        blk = {
            "ln1_g": jnp.ones((d,), jnp.float32),
            "ln1_b": jnp.zeros((d,), jnp.float32),
            "qkv_w": _xavier(next(keys), (d, 3 * d)),
            "qkv_b": jnp.zeros((3 * d,), jnp.float32),
            "proj_w": _xavier(next(keys), (d, d)),
            "proj_b": jnp.zeros((d,), jnp.float32),
            "ln2_g": jnp.ones((d,), jnp.float32),
            "ln2_b": jnp.zeros((d,), jnp.float32),
            "fc1_w": _xavier(next(keys), (d, 4 * d)),
            "fc1_b": jnp.zeros((4 * d,), jnp.float32),
            "fc2_w": _xavier(next(keys), (4 * d, d)),
            "fc2_b": jnp.zeros((d,), jnp.float32),
        }
        params["blocks"].append(blk)
    return params, in_channels


def pack_params(params, opt: Options):
    """Fold LN gamma/beta + attention scale into weights; merge/pad biases."""
    d = opt.dim
    p2 = opt.patch_size ** 2
    hd = d // opt.num_heads
    scale = 1.0 / math.sqrt(hd)
    hidden = params["blocks"][0]["fc1_w"].shape[-1]
    bpad = _round_up(max(3 * d, d, hidden), 128)

    # per-Q-column scaling mask for the folded attention scale
    col_scale = jnp.concatenate(
        [jnp.full((d,), scale, jnp.float32), jnp.ones((2 * d,), jnp.float32)])

    qkv_w_l, proj_w_l, fc1_w_l, fc2_w_l, bias_l = [], [], [], [], []
    for blk in params["blocks"]:
        # ln1 gamma/beta -> qkv;  attention scale -> Q columns
        qw = (blk["ln1_g"][:, None] * blk["qkv_w"]) * col_scale[None, :]
        qb = (blk["ln1_b"] @ blk["qkv_w"] + blk["qkv_b"]) * col_scale
        # ln2 gamma/beta -> fc1
        f1w = blk["ln2_g"][:, None] * blk["fc1_w"]
        f1b = blk["ln2_b"] @ blk["fc1_w"] + blk["fc1_b"]

        qkv_w_l.append(qw)
        proj_w_l.append(blk["proj_w"])
        fc1_w_l.append(f1w)
        fc2_w_l.append(blk["fc2_w"])

        rows = [
            jnp.pad(qb, (0, bpad - 3 * d)),
            jnp.pad(blk["proj_b"], (0, bpad - d)),
            jnp.pad(f1b, (0, bpad - hidden)),
            jnp.pad(blk["fc2_b"], (0, bpad - d)),
        ]
        bias_l.append(jnp.stack(rows, axis=0))            # (4, bpad)

    # concatenated heads: depth | rgb | scale | rotation | opacity  (192 cols)
    heads = jnp.concatenate(
        [params["out_depth_w"], params["out_rgb_w"], params["out_scale_w"],
         params["out_rotation_w"], params["out_opacity_w"]], axis=1)
    out_dim = heads.shape[-1]
    out_pad = _round_up(out_dim, 128)                     # 192 -> 256
    heads_w = params["ln_out_g"][:, None] * heads         # fold ln_out gamma
    heads_b = params["ln_out_b"] @ heads                  # fold ln_out beta
    heads_w = jnp.pad(heads_w, ((0, 0), (0, out_pad - out_dim)))
    heads_b = jnp.pad(heads_b, (0, out_pad - out_dim)).reshape(1, out_pad)

    packed = {
        "emb_w": params["x_embedder_w"],
        "emb_b": params["x_embedder_b"].reshape(1, d),
        "qkv_w": jnp.stack(qkv_w_l, axis=0),
        "proj_w": jnp.stack(proj_w_l, axis=0),
        "fc1_w": jnp.stack(fc1_w_l, axis=0),
        "fc2_w": jnp.stack(fc2_w_l, axis=0),
        "blk_bias": jnp.stack(bias_l, axis=0),             # (nb, 4, bpad)
        "heads_w": heads_w,
        "heads_b": heads_b,
        "out_dim": out_dim,
    }
    out_dim_static = packed.pop("out_dim")
    packed = jax.tree_util.tree_map(lambda a: a.astype(jnp.float32), packed)
    packed["out_dim"] = out_dim_static
    return packed


# ----------------------------------------------------------------------------
# Model forward (forward_gaussians)
# ----------------------------------------------------------------------------
def forward_gaussians(packed, opt: Options, input_images, input_C2W, input_fxfycxcy):
    """
    input_images: (B, V_in, C, H, W)
    input_C2W:    (B, V_in, 4, 4)
    input_fxfycxcy: (B, V_in, 4)
    """
    assert not opt.llama_style  # standard pre-LN transformer path only
    B, V_in, _, H, W = input_images.shape
    p = opt.patch_size
    p2 = p * p
    inter_res = opt.input_res // p

    plucker, _ = plucker_ray(H, W, input_C2W, input_fxfycxcy)
    images_plucker = jnp.concatenate([input_images * 2.0 - 1.0, plucker], axis=2)
    images_plucker = images_plucker.reshape(B * V_in, images_plucker.shape[2], H, W)

    x = patchify(images_plucker, p)                    # (BV, N, Cin*p*p)
    n_patches = x.shape[1]
    L = V_in * n_patches
    x_tokens = x.reshape(B * L, x.shape[2]).astype(jnp.float32)

    # One fused Pallas kernel for embed / transformer / ln_out / fused heads.
    out_pad = gsrecon_core(
        x_tokens, packed, batch=B, seq=L,
        num_blocks=opt.num_blocks, num_heads=opt.num_heads, dim=opt.dim)
    out2d = out_pad[:, :packed["out_dim"]]             # drop lane pad (256->192)

    # Split concatenated head outputs: depth(1), rgb(3), scale(3), rot(4), opac(1)
    sizes = [1 * p2, 3 * p2, 3 * p2, 4 * p2, 1 * p2]
    offs = [0]
    for s in sizes:
        offs.append(offs[-1] + s)

    def _head(i):
        y = out2d[:, offs[i]:offs[i + 1]]              # (B*L, c*p*p)
        y = y.reshape(B * V_in, n_patches, -1)         # '(b v) (h w) d'
        y = unpatchify(y, p, inter_res)                # (BV, c, H, W)
        return y.reshape(B, V_in, -1, H, W)

    depth, rgb, scale, rotation, opacity = (_head(i) for i in range(5))

    depth = jax.nn.sigmoid(depth) * 2.0 - 1.0
    rgb = jax.nn.sigmoid(rgb) * 2.0 - 1.0
    scale = jax.nn.sigmoid(scale) * 2.0 - 1.0
    rot_norm = jnp.linalg.norm(rotation, axis=2, keepdims=True)
    rotation = rotation / jnp.maximum(rot_norm, 1e-12)
    opacity = jax.nn.sigmoid(opacity - 2.0) * 2.0 - 1.0

    return {
        "depth": depth,
        "rgb": rgb,
        "scale": scale,
        "rotation": rotation,
        "opacity": opacity,
    }


# ----------------------------------------------------------------------------
# Main
# ----------------------------------------------------------------------------
if __name__ == "__main__":
    opt = Options()
    key = jax.random.PRNGKey(0)
    k_param, k_img = jax.random.split(key)

    params, in_channels = init_params(k_param, opt)
    packed = pack_params(params, opt)

    B, V_in = 2, opt.num_input_views
    H = W = opt.input_res

    input_images = jax.random.uniform(k_img, (B, V_in, 3, H, W), jnp.float32)

    # deterministic camera-to-world: identity rotation, per-view translation
    eye = jnp.eye(4, dtype=jnp.float32)
    trans = jnp.array(
        [[[0.0, 0.0, -2.0], [0.5, 0.0, -2.0]],
         [[0.0, 0.5, -2.0], [-0.5, 0.0, -2.0]]], jnp.float32)   # (B, V, 3)
    input_C2W = jnp.broadcast_to(eye, (B, V_in, 4, 4))
    input_C2W = input_C2W.at[..., :3, 3].set(trans)

    input_fxfycxcy = jnp.broadcast_to(
        jnp.array([float(H), float(H), H / 2.0, W / 2.0], jnp.float32), (B, V_in, 4))

    fwd = jax.jit(functools.partial(forward_gaussians, packed, opt))
    out = fwd(input_images, input_C2W, input_fxfycxcy)
    out = jax.tree_util.tree_map(jax.block_until_ready, out)

    # basic shape sanity
    assert out["depth"].shape == (B, V_in, 1, H, W)
    assert out["rgb"].shape == (B, V_in, 3, H, W)
    assert out["scale"].shape == (B, V_in, 3, H, W)
    assert out["rotation"].shape == (B, V_in, 4, H, W)
    assert out["opacity"].shape == (B, V_in, 1, H, W)
    for k, v in out.items():
        assert bool(jnp.all(jnp.isfinite(v))), f"non-finite values in {k}"

    print("KERNEL_OK")
</pallas_src>

<mosaic_0001>
module attributes {stable_mosaic.version = 11 : i64} {
  func.func @_gsrecon_fused_kernel(%arg0: i32, %arg1: memref<64x144xf32, #tpu.memory_space<vmem>>, %arg2: memref<144x32xf32, #tpu.memory_space<vmem>>, %arg3: memref<1x32xf32, #tpu.memory_space<vmem>>, %arg4: memref<2x32x96xf32, #tpu.memory_space<vmem>>, %arg5: memref<2x32x32xf32, #tpu.memory_space<vmem>>, %arg6: memref<2x32x128xf32, #tpu.memory_space<vmem>>, %arg7: memref<2x128x32xf32, #tpu.memory_space<vmem>>, %arg8: memref<2x4x128xf32, #tpu.memory_space<vmem>>, %arg9: memref<32x256xf32, #tpu.memory_space<vmem>>, %arg10: memref<1x256xf32, #tpu.memory_space<vmem>>, %arg11: memref<64x256xf32, #tpu.memory_space<vmem>>) attributes {dimension_semantics = [#tpu.dimension_semantics<arbitrary>], iteration_bounds = array<i64: 1>, scalar_prefetch = 0 : i64, scratch_operands = 0 : i64, tpu.core_type = #tpu.core_type<tc>, window_params = [{pipeline_mode = #tpu.pipeline_mode<synchronous>, transform_indices = @transform_0, window_bounds = array<i64: 64, 144>}, {pipeline_mode = #tpu.pipeline_mode<synchronous>, transform_indices = @transform_1, window_bounds = array<i64: 144, 32>}, {pipeline_mode = #tpu.pipeline_mode<synchronous>, transform_indices = @transform_2, window_bounds = array<i64: 1, 32>}, {pipeline_mode = #tpu.pipeline_mode<synchronous>, transform_indices = @transform_3, window_bounds = array<i64: 2, 32, 96>}, {pipeline_mode = #tpu.pipeline_mode<synchronous>, transform_indices = @transform_4, window_bounds = array<i64: 2, 32, 32>}, {pipeline_mode = #tpu.pipeline_mode<synchronous>, transform_indices = @transform_5, window_bounds = array<i64: 2, 32, 128>}, {pipeline_mode = #tpu.pipeline_mode<synchronous>, transform_indices = @transform_6, window_bounds = array<i64: 2, 128, 32>}, {pipeline_mode = #tpu.pipeline_mode<synchronous>, transform_indices = @transform_7, window_bounds = array<i64: 2, 4, 128>}, {pipeline_mode = #tpu.pipeline_mode<synchronous>, transform_indices = @transform_8, window_bounds = array<i64: 32, 256>}, {pipeline_mode = #tpu.pipeline_mode<synchronous>, transform_indices = @transform_9, window_bounds = array<i64: 1, 256>}, {pipeline_mode = #tpu.pipeline_mode<synchronous>, transform_indices = @transform_10, window_bounds = array<i64: 64, 256>}]} {
    %c0 = arith.constant 0 : index
    %c0_0 = arith.constant 0 : index
    %0 = vector.load %arg1[%c0, %c0_0] : memref<64x144xf32, #tpu.memory_space<vmem>>, vector<64x144xf32>
    %c0_1 = arith.constant 0 : index
    %c0_2 = arith.constant 0 : index
    %1 = vector.load %arg2[%c0_1, %c0_2] : memref<144x32xf32, #tpu.memory_space<vmem>>, vector<144x32xf32>
    %cst = arith.constant dense<0.000000e+00> : vector<64x32xf32>
    %2 = tpu.matmul %0, %1, %cst {dimension_numbers = #tpu.dot_dimension_numbers<[1], [0], [0], [1], [0, 0, 1, 1], [], []>} : vector<64x144xf32>, vector<144x32xf32>, vector<64x32xf32> -> vector<64x32xf32>
    %c0_3 = arith.constant 0 : index
    %c0_4 = arith.constant 0 : index
    %3 = vector.load %arg3[%c0_3, %c0_4] : memref<1x32xf32, #tpu.memory_space<vmem>>, vector<1x32xf32>
    %4 = vector.broadcast %3 : vector<1x32xf32> to vector<64x32xf32>
    %5 = arith.addf %2, %4 : vector<64x32xf32>
    %c0_5 = arith.constant 0 : index
    %c0_6 = arith.constant 0 : index
    %c0_7 = arith.constant 0 : index
    %6 = vector.load %arg8[%c0_5, %c0_6, %c0_7] : memref<2x4x128xf32, #tpu.memory_space<vmem>>, vector<1x4x128xf32>
    %7 = vector.shape_cast %6 : vector<1x4x128xf32> to vector<4x128xf32>
    %8 = vector.extract_strided_slice %7 {offsets = [0, 0], sizes = [1, 96], strides = [1, 1]} : vector<4x128xf32> to vector<1x96xf32>
    %9 = vector.extract_strided_slice %7 {offsets = [1, 0], sizes = [1, 32], strides = [1, 1]} : vector<4x128xf32> to vector<1x32xf32>
    %10 = vector.extract_strided_slice %7 {offsets = [2, 0], sizes = [1, 128], strides = [1, 1]} : vector<4x128xf32> to vector<1x128xf32>
    %11 = vector.extract_strided_slice %7 {offsets = [3, 0], sizes = [1, 32], strides = [1, 1]} : vector<4x128xf32> to vector<1x32xf32>
    %cst_8 = arith.constant dense<0.000000e+00> : vector<64xf32>
    %12 = vector.multi_reduction <add>, %5, %cst_8 [1] : vector<64x32xf32> to vector<64xf32>
    %13 = vector.shape_cast %12 : vector<64xf32> to vector<64x1xf32>
    %cst_9 = arith.constant 3.200000e+01 : f32
    %14 = vector.broadcast %cst_9 : f32 to vector<64x1xf32>
    %15 = arith.divf %13, %14 : vector<64x1xf32>
    %16 = vector.broadcast %15 : vector<64x1xf32> to vector<64x32xf32>
    %17 = arith.subf %5, %16 : vector<64x32xf32>
    %18 = arith.mulf %17, %17 : vector<64x32xf32>
    %cst_10 = arith.constant dense<0.000000e+00> : vector<64xf32>
    %19 = vector.multi_reduction <add>, %18, %cst_10 [1] : vector<64x32xf32> to vector<64xf32>
    %20 = vector.shape_cast %19 : vector<64xf32> to vector<64x1xf32>
    %cst_11 = arith.constant 3.200000e+01 : f32
    %21 = vector.broadcast %cst_11 : f32 to vector<64x1xf32>
    %22 = arith.divf %20, %21 : vector<64x1xf32>
    %cst_12 = arith.constant 9.99999974E-6 : f32
    %23 = vector.broadcast %cst_12 : f32 to vector<64x1xf32>
    %24 = arith.addf %22, %23 : vector<64x1xf32>
    %25 = math.rsqrt %24 : vector<64x1xf32>
    %26 = vector.broadcast %25 : vector<64x1xf32> to vector<64x32xf32>
    %27 = arith.mulf %17, %26 : vector<64x32xf32>
    %c0_13 = arith.constant 0 : index
    %c0_14 = arith.constant 0 : index
    %c0_15 = arith.constant 0 : index
    %28 = vector.load %arg4[%c0_13, %c0_14, %c0_15] : memref<2x32x96xf32, #tpu.memory_space<vmem>>, vector<1x32x96xf32>
    %29 = vector.shape_cast %28 : vector<1x32x96xf32> to vector<32x96xf32>
    %cst_16 = arith.constant dense<0.000000e+00> : vector<64x96xf32>
    %30 = tpu.matmul %27, %29, %cst_16 {dimension_numbers = #tpu.dot_dimension_numbers<[1], [0], [0], [1], [0, 0, 1, 1], [], []>} : vector<64x32xf32>, vector<32x96xf32>, vector<64x96xf32> -> vector<64x96xf32>
    %31 = vector.broadcast %8 : vector<1x96xf32> to vector<64x96xf32>
    %32 = arith.addf %30, %31 : vector<64x96xf32>
    %c0_17 = arith.constant 0 : index
    %c0_18 = arith.constant 0 : index
    %c0_19 = arith.constant 0 : index
    %33 = vector.load %arg5[%c0_17, %c0_18, %c0_19] : memref<2x32x32xf32, #tpu.memory_space<vmem>>, vector<1x32x32xf32>
    %34 = vector.shape_cast %33 : vector<1x32x32xf32> to vector<32x32xf32>
    %35 = vector.extract_strided_slice %32 {offsets = [0, 0], sizes = [32, 96], strides = [1, 1]} : vector<64x96xf32> to vector<32x96xf32>
    %36 = vector.extract_strided_slice %35 {offsets = [0, 0], sizes = [32, 8], strides = [1, 1]} : vector<32x96xf32> to vector<32x8xf32>
    %37 = vector.extract_strided_slice %35 {offsets = [0, 32], sizes = [32, 8], strides = [1, 1]} : vector<32x96xf32> to vector<32x8xf32>
    %38 = vector.extract_strided_slice %35 {offsets = [0, 64], sizes = [32, 8], strides = [1, 1]} : vector<32x96xf32> to vector<32x8xf32>
    %cst_20 = arith.constant dense<0.000000e+00> : vector<32x32xf32>
    %39 = tpu.matmul %36, %37, %cst_20 {dimension_numbers = #tpu.dot_dimension_numbers<[1], [1], [0], [0], [0, 0, 1, 0], [], []>} : vector<32x8xf32>, vector<32x8xf32>, vector<32x32xf32> -> vector<32x32xf32>
    %cst_21 = arith.constant dense<0xFF800000> : vector<32xf32>
    %40 = vector.multi_reduction <maximumf>, %39, %cst_21 [1] : vector<32x32xf32> to vector<32xf32>
    %41 = vector.shape_cast %40 : vector<32xf32> to vector<32x1xf32>
    %42 = vector.broadcast %41 : vector<32x1xf32> to vector<32x32xf32>
    %43 = arith.subf %39, %42 : vector<32x32xf32>
    %44 = math.exp %43 : vector<32x32xf32>
    %cst_22 = arith.constant dense<0.000000e+00> : vector<32xf32>
    %45 = vector.multi_reduction <add>, %44, %cst_22 [1] : vector<32x32xf32> to vector<32xf32>
    %46 = vector.shape_cast %45 : vector<32xf32> to vector<32x1xf32>
    %47 = tpu.reciprocal %46 {approx = true} : vector<32x1xf32> -> vector<32x1xf32>
    %48 = vector.broadcast %47 : vector<32x1xf32> to vector<32x32xf32>
    %49 = arith.mulf %44, %48 : vector<32x32xf32>
    %cst_23 = arith.constant dense<0.000000e+00> : vector<32x8xf32>
    %50 = tpu.matmul %49, %38, %cst_23 {dimension_numbers = #tpu.dot_dimension_numbers<[1], [0], [0], [1], [0, 0, 1, 1], [], []>} : vector<32x32xf32>, vector<32x8xf32>, vector<32x8xf32> -> vector<32x8xf32>
    %51 = vector.extract_strided_slice %34 {offsets = [0, 0], sizes = [8, 32], strides = [1, 1]} : vector<32x32xf32> to vector<8x32xf32>
    %cst_24 = arith.constant dense<0.000000e+00> : vector<32x32xf32>
    %52 = tpu.matmul %50, %51, %cst_24 {dimension_numbers = #tpu.dot_dimension_numbers<[1], [0], [0], [1], [0, 0, 1, 1], [], []>} : vector<32x8xf32>, vector<8x32xf32>, vector<32x32xf32> -> vector<32x32xf32>
    %53 = vector.extract_strided_slice %35 {offsets = [0, 8], sizes = [32, 8], strides = [1, 1]} : vector<32x96xf32> to vector<32x8xf32>
    %54 = vector.extract_strided_slice %35 {offsets = [0, 40], sizes = [32, 8], strides = [1, 1]} : vector<32x96xf32> to vector<32x8xf32>
    %55 = vector.extract_strided_slice %35 {offsets = [0, 72], sizes = [32, 8], strides = [1, 1]} : vector<32x96xf32> to vector<32x8xf32>
    %cst_25 = arith.constant dense<0.000000e+00> : vector<32x32xf32>
    %56 = tpu.matmul %53, %54, %cst_25 {dimension_numbers = #tpu.dot_dimension_numbers<[1], [1], [0], [0], [0, 0, 1, 0], [], []>} : vector<32x8xf32>, vector<32x8xf32>, vector<32x32xf32> -> vector<32x32xf32>
    %cst_26 = arith.constant dense<0xFF800000> : vector<32xf32>
    %57 = vector.multi_reduction <maximumf>, %56, %cst_26 [1] : vector<32x32xf32> to vector<32xf32>
    %58 = vector.shape_cast %57 : vector<32xf32> to vector<32x1xf32>
    %59 = vector.broadcast %58 : vector<32x1xf32> to vector<32x32xf32>
    %60 = arith.subf %56, %59 : vector<32x32xf32>
    %61 = math.exp %60 : vector<32x32xf32>
    %cst_27 = arith.constant dense<0.000000e+00> : vector<32xf32>
    %62 = vector.multi_reduction <add>, %61, %cst_27 [1] : vector<32x32xf32> to vector<32xf32>
    %63 = vector.shape_cast %62 : vector<32xf32> to vector<32x1xf32>
    %64 = tpu.reciprocal %63 {approx = true} : vector<32x1xf32> -> vector<32x1xf32>
    %65 = vector.broadcast %64 : vector<32x1xf32> to vector<32x32xf32>
    %66 = arith.mulf %61, %65 : vector<32x32xf32>
    %cst_28 = arith.constant dense<0.000000e+00> : vector<32x8xf32>
    %67 = tpu.matmul %66, %55, %cst_28 {dimension_numbers = #tpu.dot_dimension_numbers<[1], [0], [0], [1], [0, 0, 1, 1], [], []>} : vector<32x32xf32>, vector<32x8xf32>, vector<32x8xf32> -> vector<32x8xf32>
    %68 = vector.extract_strided_slice %34 {offsets = [8, 0], sizes = [8, 32], strides = [1, 1]} : vector<32x32xf32> to vector<8x32xf32>
    %cst_29 = arith.constant dense<0.000000e+00> : vector<32x32xf32>
    %69 = tpu.matmul %67, %68, %cst_29 {dimension_numbers = #tpu.dot_dimension_numbers<[1], [0], [0], [1], [0, 0, 1, 1], [], []>} : vector<32x8xf32>, vector<8x32xf32>, vector<32x32xf32> -> vector<32x32xf32>
    %70 = arith.addf %52, %69 : vector<32x32xf32>
    %71 = vector.extract_strided_slice %35 {offsets = [0, 16], sizes = [32, 8], strides = [1, 1]} : vector<32x96xf32> to vector<32x8xf32>
    %72 = vector.extract_strided_slice %35 {offsets = [0, 48], sizes = [32, 8], strides = [1, 1]} : vector<32x96xf32> to vector<32x8xf32>
    %73 = vector.extract_strided_slice %35 {offsets = [0, 80], sizes = [32, 8], strides = [1, 1]} : vector<32x96xf32> to vector<32x8xf32>
    %cst_30 = arith.constant dense<0.000000e+00> : vector<32x32xf32>
    %74 = tpu.matmul %71, %72, %cst_30 {dimension_numbers = #tpu.dot_dimension_numbers<[1], [1], [0], [0], [0, 0, 1, 0], [], []>} : vector<32x8xf32>, vector<32x8xf32>, vector<32x32xf32> -> vector<32x32xf32>
    %cst_31 = arith.constant dense<0xFF800000> : vector<32xf32>
    %75 = vector.multi_reduction <maximumf>, %74, %cst_31 [1] : vector<32x32xf32> to vector<32xf32>
    %76 = vector.shape_cast %75 : vector<32xf32> to vector<32x1xf32>
    %77 = vector.broadcast %76 : vector<32x1xf32> to vector<32x32xf32>
    %78 = arith.subf %74, %77 : vector<32x32xf32>
    %79 = math.exp %78 : vector<32x32xf32>
    %cst_32 = arith.constant dense<0.000000e+00> : vector<32xf32>
    %80 = vector.multi_reduction <add>, %79, %cst_32 [1] : vector<32x32xf32> to vector<32xf32>
    %81 = vector.shape_cast %80 : vector<32xf32> to vector<32x1xf32>
    %82 = tpu.reciprocal %81 {approx = true} : vector<32x1xf32> -> vector<32x1xf32>
    %83 = vector.broadcast %82 : vector<32x1xf32> to vector<32x32xf32>
    %84 = arith.mulf %79, %83 : vector<32x32xf32>
    %cst_33 = arith.constant dense<0.000000e+00> : vector<32x8xf32>
    %85 = tpu.matmul %84, %73, %cst_33 {dimension_numbers = #tpu.dot_dimension_numbers<[1], [0], [0], [1], [0, 0, 1, 1], [], []>} : vector<32x32xf32>, vector<32x8xf32>, vector<32x8xf32> -> vector<32x8xf32>
    %86 = vector.extract_strided_slice %34 {offsets = [16, 0], sizes = [8, 32], strides = [1, 1]} : vector<32x32xf32> to vector<8x32xf32>
    %cst_34 = arith.constant dense<0.000000e+00> : vector<32x32xf32>
    %87 = tpu.matmul %85, %86, %cst_34 {dimension_numbers = #tpu.dot_dimension_numbers<[1], [0], [0], [1], [0, 0, 1, 1], [], []>} : vector<32x8xf32>, vector<8x32xf32>, vector<32x32xf32> -> vector<32x32xf32>
    %88 = arith.addf %70, %87 : vector<32x32xf32>
    %89 = vector.extract_strided_slice %35 {offsets = [0, 24], sizes = [32, 8], strides = [1, 1]} : vector<32x96xf32> to vector<32x8xf32>
    %90 = vector.extract_strided_slice %35 {offsets = [0, 56], sizes = [32, 8], strides = [1, 1]} : vector<32x96xf32> to vector<32x8xf32>
    %91 = vector.extract_strided_slice %35 {offsets = [0, 88], sizes = [32, 8], strides = [1, 1]} : vector<32x96xf32> to vector<32x8xf32>
    %cst_35 = arith.constant dense<0.000000e+00> : vector<32x32xf32>
    %92 = tpu.matmul %89, %90, %cst_35 {dimension_numbers = #tpu.dot_dimension_numbers<[1], [1], [0], [0], [0, 0, 1, 0], [], []>} : vector<32x8xf32>, vector<32x8xf32>, vector<32x32xf32> -> vector<32x32xf32>
    %cst_36 = arith.constant dense<0xFF800000> : vector<32xf32>
    %93 = vector.multi_reduction <maximumf>, %92, %cst_36 [1] : vector<32x32xf32> to vector<32xf32>
    %94 = vector.shape_cast %93 : vector<32xf32> to vector<32x1xf32>
    %95 = vector.broadcast %94 : vector<32x1xf32> to vector<32x32xf32>
    %96 = arith.subf %92, %95 : vector<32x32xf32>
    %97 = math.exp %96 : vector<32x32xf32>
    %cst_37 = arith.constant dense<0.000000e+00> : vector<32xf32>
    %98 = vector.multi_reduction <add>, %97, %cst_37 [1] : vector<32x32xf32> to vector<32xf32>
    %99 = vector.shape_cast %98 : vector<32xf32> to vector<32x1xf32>
    %100 = tpu.reciprocal %99 {approx = true} : vector<32x1xf32> -> vector<32x1xf32>
    %101 = vector.broadcast %100 : vector<32x1xf32> to vector<32x32xf32>
    %102 = arith.mulf %97, %101 : vector<32x32xf32>
    %cst_38 = arith.constant dense<0.000000e+00> : vector<32x8xf32>
    %103 = tpu.matmul %102, %91, %cst_38 {dimension_numbers = #tpu.dot_dimension_numbers<[1], [0], [0], [1], [0, 0, 1, 1], [], []>} : vector<32x32xf32>, vector<32x8xf32>, vector<32x8xf32> -> vector<32x8xf32>
    %104 = vector.extract_strided_slice %34 {offsets = [24, 0], sizes = [8, 32], strides = [1, 1]} : vector<32x32xf32> to vector<8x32xf32>
    %cst_39 = arith.constant dense<0.000000e+00> : vector<32x32xf32>
    %105 = tpu.matmul %103, %104, %cst_39 {dimension_numbers = #tpu.dot_dimension_numbers<[1], [0], [0], [1], [0, 0, 1, 1], [], []>} : vector<32x8xf32>, vector<8x32xf32>, vector<32x32xf32> -> vector<32x32xf32>
    %106 = arith.addf %88, %105 : vector<32x32xf32>
    %107 = vector.extract_strided_slice %32 {offsets = [32, 0], sizes = [32, 96], strides = [1, 1]} : vector<64x96xf32> to vector<32x96xf32>
    %108 = vector.extract_strided_slice %107 {offsets = [0, 0], sizes = [32, 8], strides = [1, 1]} : vector<32x96xf32> to vector<32x8xf32>
    %109 = vector.extract_strided_slice %107 {offsets = [0, 32], sizes = [32, 8], strides = [1, 1]} : vector<32x96xf32> to vector<32x8xf32>
    %110 = vector.extract_strided_slice %107 {offsets = [0, 64], sizes = [32, 8], strides = [1, 1]} : vector<32x96xf32> to vector<32x8xf32>
    %cst_40 = arith.constant dense<0.000000e+00> : vector<32x32xf32>
    %111 = tpu.matmul %108, %109, %cst_40 {dimension_numbers = #tpu.dot_dimension_numbers<[1], [1], [0], [0], [0, 0, 1, 0], [], []>} : vector<32x8xf32>, vector<32x8xf32>, vector<32x32xf32> -> vector<32x32xf32>
    %cst_41 = arith.constant dense<0xFF800000> : vector<32xf32>
    %112 = vector.multi_reduction <maximumf>, %111, %cst_41 [1] : vector<32x32xf32> to vector<32xf32>
    %113 = vector.shape_cast %112 : vector<32xf32> to vector<32x1xf32>
    %114 = vector.broadcast %113 : vector<32x1xf32> to vector<32x32xf32>
    %115 = arith.subf %111, %114 : vector<32x32xf32>
    %116 = math.exp %115 : vector<32x32xf32>
    %cst_42 = arith.constant dense<0.000000e+00> : vector<32xf32>
    %117 = vector.multi_reduction <add>, %116, %cst_42 [1] : vector<32x32xf32> to vector<32xf32>
    %118 = vector.shape_cast %117 : vector<32xf32> to vector<32x1xf32>
    %119 = tpu.reciprocal %118 {approx = true} : vector<32x1xf32> -> vector<32x1xf32>
    %120 = vector.broadcast %119 : vector<32x1xf32> to vector<32x32xf32>
    %121 = arith.mulf %116, %120 : vector<32x32xf32>
    %cst_43 = arith.constant dense<0.000000e+00> : vector<32x8xf32>
    %122 = tpu.matmul %121, %110, %cst_43 {dimension_numbers = #tpu.dot_dimension_numbers<[1], [0], [0], [1], [0, 0, 1, 1], [], []>} : vector<32x32xf32>, vector<32x8xf32>, vector<32x8xf32> -> vector<32x8xf32>
    %123 = vector.extract_strided_slice %34 {offsets = [0, 0], sizes = [8, 32], strides = [1, 1]} : vector<32x32xf32> to vector<8x32xf32>
    %cst_44 = arith.constant dense<0.000000e+00> : vector<32x32xf32>
    %124 = tpu.matmul %122, %123, %cst_44 {dimension_numbers = #tpu.dot_dimension_numbers<[1], [0], [0], [1], [0, 0, 1, 1], [], []>} : vector<32x8xf32>, vector<8x32xf32>, vector<32x32xf32> -> vector<32x32xf32>
    %125 = vector.extract_strided_slice %107 {offsets = [0, 8], sizes = [32, 8], strides = [1, 1]} : vector<32x96xf32> to vector<32x8xf32>
    %126 = vector.extract_strided_slice %107 {offsets = [0, 40], sizes = [32, 8], strides = [1, 1]} : vector<32x96xf32> to vector<32x8xf32>
    %127 = vector.extract_strided_slice %107 {offsets = [0, 72], sizes = [32, 8], strides = [1, 1]} : vector<32x96xf32> to vector<32x8xf32>
    %cst_45 = arith.constant dense<0.000000e+00> : vector<32x32xf32>
    %128 = tpu.matmul %125, %126, %cst_45 {dimension_numbers = #tpu.dot_dimension_numbers<[1], [1], [0], [0], [0, 0, 1, 0], [], []>} : vector<32x8xf32>, vector<32x8xf32>, vector<32x32xf32> -> vector<32x32xf32>
    %cst_46 = arith.constant dense<0xFF800000> : vector<32xf32>
    %129 = vector.multi_reduction <maximumf>, %128, %cst_46 [1] : vector<32x32xf32> to vector<32xf32>
    %130 = vector.shape_cast %129 : vector<32xf32> to vector<32x1xf32>
    %131 = vector.broadcast %130 : vector<32x1xf32> to vector<32x32xf32>
    %132 = arith.subf %128, %131 : vector<32x32xf32>
    %133 = math.exp %132 : vector<32x32xf32>
    %cst_47 = arith.constant dense<0.000000e+00> : vector<32xf32>
    %134 = vector.multi_reduction <add>, %133, %cst_47 [1] : vector<32x32xf32> to vector<32xf32>
    %135 = vector.shape_cast %134 : vector<32xf32> to vector<32x1xf32>
    %136 = tpu.reciprocal %135 {approx = true} : vector<32x1xf32> -> vector<32x1xf32>
    %137 = vector.broadcast %136 : vector<32x1xf32> to vector<32x32xf32>
    %138 = arith.mulf %133, %137 : vector<32x32xf32>
    %cst_48 = arith.constant dense<0.000000e+00> : vector<32x8xf32>
    %139 = tpu.matmul %138, %127, %cst_48 {dimension_numbers = #tpu.dot_dimension_numbers<[1], [0], [0], [1], [0, 0, 1, 1], [], []>} : vector<32x32xf32>, vector<32x8xf32>, vector<32x8xf32> -> vector<32x8xf32>
    %140 = vector.extract_strided_slice %34 {offsets = [8, 0], sizes = [8, 32], strides = [1, 1]} : vector<32x32xf32> to vector<8x32xf32>
    %cst_49 = arith.constant dense<0.000000e+00> : vector<32x32xf32>
    %141 = tpu.matmul %139, %140, %cst_49 {dimension_numbers = #tpu.dot_dimension_numbers<[1], [0], [0], [1], [0, 0, 1, 1], [], []>} : vector<32x8xf32>, vector<8x32xf32>, vector<32x32xf32> -> vector<32x32xf32>
    %142 = arith.addf %124, %141 : vector<32x32xf32>
    %143 = vector.extract_strided_slice %107 {offsets = [0, 16], sizes = [32, 8], strides = [1, 1]} : vector<32x96xf32> to vector<32x8xf32>
    %144 = vector.extract_strided_slice %107 {offsets = [0, 48], sizes = [32, 8], strides = [1, 1]} : vector<32x96xf32> to vector<32x8xf32>
    %145 = vector.extract_strided_slice %107 {offsets = [0, 80], sizes = [32, 8], strides = [1, 1]} : vector<32x96xf32> to vector<32x8xf32>
    %cst_50 = arith.constant dense<0.000000e+00> : vector<32x32xf32>
    %146 = tpu.matmul %143, %144, %cst_50 {dimension_numbers = #tpu.dot_dimension_numbers<[1], [1], [0], [0], [0, 0, 1, 0], [], []>} : vector<32x8xf32>, vector<32x8xf32>, vector<32x32xf32> -> vector<32x32xf32>
    %cst_51 = arith.constant dense<0xFF800000> : vector<32xf32>
    %147 = vector.multi_reduction <maximumf>, %146, %cst_51 [1] : vector<32x32xf32> to vector<32xf32>
    %148 = vector.shape_cast %147 : vector<32xf32> to vector<32x1xf32>
    %149 = vector.broadcast %148 : vector<32x1xf32> to vector<32x32xf32>
    %150 = arith.subf %146, %149 : vector<32x32xf32>
    %151 = math.exp %150 : vector<32x32xf32>
    %cst_52 = arith.constant dense<0.000000e+00> : vector<32xf32>
    %152 = vector.multi_reduction <add>, %151, %cst_52 [1] : vector<32x32xf32> to vector<32xf32>
    %153 = vector.shape_cast %152 : vector<32xf32> to vector<32x1xf32>
    %154 = tpu.reciprocal %153 {approx = true} : vector<32x1xf32> -> vector<32x1xf32>
    %155 = vector.broadcast %154 : vector<32x1xf32> to vector<32x32xf32>
    %156 = arith.mulf %151, %155 : vector<32x32xf32>
    %cst_53 = arith.constant dense<0.000000e+00> : vector<32x8xf32>
    %157 = tpu.matmul %156, %145, %cst_53 {dimension_numbers = #tpu.dot_dimension_numbers<[1], [0], [0], [1], [0, 0, 1, 1], [], []>} : vector<32x32xf32>, vector<32x8xf32>, vector<32x8xf32> -> vector<32x8xf32>
    %158 = vector.extract_strided_slice %34 {offsets = [16, 0], sizes = [8, 32], strides = [1, 1]} : vector<32x32xf32> to vector<8x32xf32>
    %cst_54 = arith.constant dense<0.000000e+00> : vector<32x32xf32>
    %159 = tpu.matmul %157, %158, %cst_54 {dimension_numbers = #tpu.dot_dimension_numbers<[1], [0], [0], [1], [0, 0, 1, 1], [], []>} : vector<32x8xf32>, vector<8x32xf32>, vector<32x32xf32> -> vector<32x32xf32>
    %160 = arith.addf %142, %159 : vector<32x32xf32>
    %161 = vector.extract_strided_slice %107 {offsets = [0, 24], sizes = [32, 8], strides = [1, 1]} : vector<32x96xf32> to vector<32x8xf32>
    %162 = vector.extract_strided_slice %107 {offsets = [0, 56], sizes = [32, 8], strides = [1, 1]} : vector<32x96xf32> to vector<32x8xf32>
    %163 = vector.extract_strided_slice %107 {offsets = [0, 88], sizes = [32, 8], strides = [1, 1]} : vector<32x96xf32> to vector<32x8xf32>
    %cst_55 = arith.constant dense<0.000000e+00> : vector<32x32xf32>
    %164 = tpu.matmul %161, %162, %cst_55 {dimension_numbers = #tpu.dot_dimension_numbers<[1], [1], [0], [0], [0, 0, 1, 0], [], []>} : vector<32x8xf32>, vector<32x8xf32>, vector<32x32xf32> -> vector<32x32xf32>
    %cst_56 = arith.constant dense<0xFF800000> : vector<32xf32>
    %165 = vector.multi_reduction <maximumf>, %164, %cst_56 [1] : vector<32x32xf32> to vector<32xf32>
    %166 = vector.shape_cast %165 : vector<32xf32> to vector<32x1xf32>
    %167 = vector.broadcast %166 : vector<32x1xf32> to vector<32x32xf32>
    %168 = arith.subf %164, %167 : vector<32x32xf32>
    %169 = math.exp %168 : vector<32x32xf32>
    %cst_57 = arith.constant dense<0.000000e+00> : vector<32xf32>
    %170 = vector.multi_reduction <add>, %169, %cst_57 [1] : vector<32x32xf32> to vector<32xf32>
    %171 = vector.shape_cast %170 : vector<32xf32> to vector<32x1xf32>
    %172 = tpu.reciprocal %171 {approx = true} : vector<32x1xf32> -> vector<32x1xf32>
    %173 = vector.broadcast %172 : vector<32x1xf32> to vector<32x32xf32>
    %174 = arith.mulf %169, %173 : vector<32x32xf32>
    %cst_58 = arith.constant dense<0.000000e+00> : vector<32x8xf32>
    %175 = tpu.matmul %174, %163, %cst_58 {dimension_numbers = #tpu.dot_dimension_numbers<[1], [0], [0], [1], [0, 0, 1, 1], [], []>} : vector<32x32xf32>, vector<32x8xf32>, vector<32x8xf32> -> vector<32x8xf32>
    %176 = vector.extract_strided_slice %34 {offsets = [24, 0], sizes = [8, 32], strides = [1, 1]} : vector<32x32xf32> to vector<8x32xf32>
    %cst_59 = arith.constant dense<0.000000e+00> : vector<32x32xf32>
    %177 = tpu.matmul %175, %176, %cst_59 {dimension_numbers = #tpu.dot_dimension_numbers<[1], [0], [0], [1], [0, 0, 1, 1], [], []>} : vector<32x8xf32>, vector<8x32xf32>, vector<32x32xf32> -> vector<32x32xf32>
    %178 = arith.addf %160, %177 : vector<32x32xf32>
    %179 = tpu.concatenate %106, %178 in 0 : vector<32x32xf32>, vector<32x32xf32> -> vector<64x32xf32>
    %180 = vector.broadcast %9 : vector<1x32xf32> to vector<64x32xf32>
    %181 = arith.addf %179, %180 : vector<64x32xf32>
    %182 = arith.addf %5, %181 : vector<64x32xf32>
    %cst_60 = arith.constant dense<0.000000e+00> : vector<64xf32>
    %183 = vector.multi_reduction <add>, %182, %cst_60 [1] : vector<64x32xf32> to vector<64xf32>
    %184 = vector.shape_cast %183 : vector<64xf32> to vector<64x1xf32>
    %cst_61 = arith.constant 3.200000e+01 : f32
    %185 = vector.broadcast %cst_61 : f32 to vector<64x1xf32>
    %186 = arith.divf %184, %185 : vector<64x1xf32>
    %187 = vector.broadcast %186 : vector<64x1xf32> to vector<64x32xf32>
    %188 = arith.subf %182, %187 : vector<64x32xf32>
    %189 = arith.mulf %188, %188 : vector<64x32xf32>
    %cst_62 = arith.constant dense<0.000000e+00> : vector<64xf32>
    %190 = vector.multi_reduction <add>, %189, %cst_62 [1] : vector<64x32xf32> to vector<64xf32>
    %191 = vector.shape_cast %190 : vector<64xf32> to vector<64x1xf32>
    %cst_63 = arith.constant 3.200000e+01 : f32
    %192 = vector.broadcast %cst_63 : f32 to vector<64x1xf32>
    %193 = arith.divf %191, %192 : vector<64x1xf32>
    %cst_64 = arith.constant 9.99999974E-6 : f32
    %194 = vector.broadcast %cst_64 : f32 to vector<64x1xf32>
    %195 = arith.addf %193, %194 : vector<64x1xf32>
    %196 = math.rsqrt %195 : vector<64x1xf32>
    %197 = vector.broadcast %196 : vector<64x1xf32> to vector<64x32xf32>
    %198 = arith.mulf %188, %197 : vector<64x32xf32>
    %c0_65 = arith.constant 0 : index
    %c0_66 = arith.constant 0 : index
    %c0_67 = arith.constant 0 : index
    %199 = vector.load %arg6[%c0_65, %c0_66, %c0_67] : memref<2x32x128xf32, #tpu.memory_space<vmem>>, vector<1x32x128xf32>
    %200 = vector.shape_cast %199 : vector<1x32x128xf32> to vector<32x128xf32>
    %cst_68 = arith.constant dense<0.000000e+00> : vector<64x128xf32>
    %201 = tpu.matmul %198, %200, %cst_68 {dimension_numbers = #tpu.dot_dimension_numbers<[1], [0], [0], [1], [0, 0, 1, 1], [], []>} : vector<64x32xf32>, vector<32x128xf32>, vector<64x128xf32> -> vector<64x128xf32>
    %202 = vector.broadcast %10 : vector<1x128xf32> to vector<64x128xf32>
    %203 = arith.addf %201, %202 : vector<64x128xf32>
    %cst_69 = arith.constant 5.000000e-01 : f32
    %204 = vector.broadcast %cst_69 : f32 to vector<64x128xf32>
    %205 = arith.mulf %204, %203 : vector<64x128xf32>
    %cst_70 = arith.constant 4.471500e-02 : f32
    %206 = vector.broadcast %cst_70 : f32 to vector<64x128xf32>
    %207 = arith.mulf %206, %203 : vector<64x128xf32>
    %208 = arith.mulf %207, %203 : vector<64x128xf32>
    %209 = arith.mulf %208, %203 : vector<64x128xf32>
    %210 = arith.addf %203, %209 : vector<64x128xf32>
    %cst_71 = arith.constant 0.797884583 : f32
    %211 = vector.broadcast %cst_71 : f32 to vector<64x128xf32>
    %212 = arith.mulf %211, %210 : vector<64x128xf32>
    %213 = math.tanh %212 : vector<64x128xf32>
    %cst_72 = arith.constant 1.000000e+00 : f32
    %214 = vector.broadcast %cst_72 : f32 to vector<64x128xf32>
    %215 = arith.addf %214, %213 : vector<64x128xf32>
    %216 = arith.mulf %205, %215 : vector<64x128xf32>
    %c0_73 = arith.constant 0 : index
    %c0_74 = arith.constant 0 : index
    %c0_75 = arith.constant 0 : index
    %217 = vector.load %arg7[%c0_73, %c0_74, %c0_75] : memref<2x128x32xf32, #tpu.memory_space<vmem>>, vector<1x128x32xf32>
    %218 = vector.shape_cast %217 : vector<1x128x32xf32> to vector<128x32xf32>
    %cst_76 = arith.constant dense<0.000000e+00> : vector<64x32xf32>
    %219 = tpu.matmul %216, %218, %cst_76 {dimension_numbers = #tpu.dot_dimension_numbers<[1], [0], [0], [1], [0, 0, 1, 1], [], []>} : vector<64x128xf32>, vector<128x32xf32>, vector<64x32xf32> -> vector<64x32xf32>
    %220 = vector.broadcast %11 : vector<1x32xf32> to vector<64x32xf32>
    %221 = arith.addf %219, %220 : vector<64x32xf32>
    %222 = arith.addf %182, %221 : vector<64x32xf32>
    %c1 = arith.constant 1 : index
    %c0_77 = arith.constant 0 : index
    %c0_78 = arith.constant 0 : index
    %223 = vector.load %arg8[%c1, %c0_77, %c0_78] : memref<2x4x128xf32, #tpu.memory_space<vmem>>, vector<1x4x128xf32>
    %224 = vector.shape_cast %223 : vector<1x4x128xf32> to vector<4x128xf32>
    %225 = vector.extract_strided_slice %224 {offsets = [0, 0], sizes = [1, 96], strides = [1, 1]} : vector<4x128xf32> to vector<1x96xf32>
    %226 = vector.extract_strided_slice %224 {offsets = [1, 0], sizes = [1, 32], strides = [1, 1]} : vector<4x128xf32> to vector<1x32xf32>
    %227 = vector.extract_strided_slice %224 {offsets = [2, 0], sizes = [1, 128], strides = [1, 1]} : vector<4x128xf32> to vector<1x128xf32>
    %228 = vector.extract_strided_slice %224 {offsets = [3, 0], sizes = [1, 32], strides = [1, 1]} : vector<4x128xf32> to vector<1x32xf32>
    %cst_79 = arith.constant dense<0.000000e+00> : vector<64xf32>
    %229 = vector.multi_reduction <add>, %222, %cst_79 [1] : vector<64x32xf32> to vector<64xf32>
    %230 = vector.shape_cast %229 : vector<64xf32> to vector<64x1xf32>
    %cst_80 = arith.constant 3.200000e+01 : f32
    %231 = vector.broadcast %cst_80 : f32 to vector<64x1xf32>
    %232 = arith.divf %230, %231 : vector<64x1xf32>
    %233 = vector.broadcast %232 : vector<64x1xf32> to vector<64x32xf32>
    %234 = arith.subf %222, %233 : vector<64x32xf32>
    %235 = arith.mulf %234, %234 : vector<64x32xf32>
    %cst_81 = arith.constant dense<0.000000e+00> : vector<64xf32>
    %236 = vector.multi_reduction <add>, %235, %cst_81 [1] : vector<64x32xf32> to vector<64xf32>
    %237 = vector.shape_cast %236 : vector<64xf32> to vector<64x1xf32>
    %cst_82 = arith.constant 3.200000e+01 : f32
    %238 = vector.broadcast %cst_82 : f32 to vector<64x1xf32>
    %239 = arith.divf %237, %238 : vector<64x1xf32>
    %cst_83 = arith.constant 9.99999974E-6 : f32
    %240 = vector.broadcast %cst_83 : f32 to vector<64x1xf32>
    %241 = arith.addf %239, %240 : vector<64x1xf32>
    %242 = math.rsqrt %241 : vector<64x1xf32>
    %243 = vector.broadcast %242 : vector<64x1xf32> to vector<64x32xf32>
    %244 = arith.mulf %234, %243 : vector<64x32xf32>
    %c1_84 = arith.constant 1 : index
    %c0_85 = arith.constant 0 : index
    %c0_86 = arith.constant 0 : index
    %245 = vector.load %arg4[%c1_84, %c0_85, %c0_86] : memref<2x32x96xf32, #tpu.memory_space<vmem>>, vector<1x32x96xf32>
    %246 = vector.shape_cast %245 : vector<1x32x96xf32> to vector<32x96xf32>
    %cst_87 = arith.constant dense<0.000000e+00> : vector<64x96xf32>
    %247 = tpu.matmul %244, %246, %cst_87 {dimension_numbers = #tpu.dot_dimension_numbers<[1], [0], [0], [1], [0, 0, 1, 1], [], []>} : vector<64x32xf32>, vector<32x96xf32>, vector<64x96xf32> -> vector<64x96xf32>
    %248 = vector.broadcast %225 : vector<1x96xf32> to vector<64x96xf32>
    %249 = arith.addf %247, %248 : vector<64x96xf32>
    %c1_88 = arith.constant 1 : index
    %c0_89 = arith.constant 0 : index
    %c0_90 = arith.constant 0 : index
    %250 = vector.load %arg5[%c1_88, %c0_89, %c0_90] : memref<2x32x32xf32, #tpu.memory_space<vmem>>, vector<1x32x32xf32>
    %251 = vector.shape_cast %250 : vector<1x32x32xf32> to vector<32x32xf32>
    %252 = vector.extract_strided_slice %249 {offsets = [0, 0], sizes = [32, 96], strides = [1, 1]} : vector<64x96xf32> to vector<32x96xf32>
    %253 = vector.extract_strided_slice %252 {offsets = [0, 0], sizes = [32, 8], strides = [1, 1]} : vector<32x96xf32> to vector<32x8xf32>
    %254 = vector.extract_strided_slice %252 {offsets = [0, 32], sizes = [32, 8], strides = [1, 1]} : vector<32x96xf32> to vector<32x8xf32>
    %255 = vector.extract_strided_slice %252 {offsets = [0, 64], sizes = [32, 8], strides = [1, 1]} : vector<32x96xf32> to vector<32x8xf32>
    %cst_91 = arith.constant dense<0.000000e+00> : vector<32x32xf32>
    %256 = tpu.matmul %253, %254, %cst_91 {dimension_numbers = #tpu.dot_dimension_numbers<[1], [1], [0], [0], [0, 0, 1, 0], [], []>} : vector<32x8xf32>, vector<32x8xf32>, vector<32x32xf32> -> vector<32x32xf32>
    %cst_92 = arith.constant dense<0xFF800000> : vector<32xf32>
    %257 = vector.multi_reduction <maximumf>, %256, %cst_92 [1] : vector<32x32xf32> to vector<32xf32>
    %258 = vector.shape_cast %257 : vector<32xf32> to vector<32x1xf32>
    %259 = vector.broadcast %258 : vector<32x1xf32> to vector<32x32xf32>
    %260 = arith.subf %256, %259 : vector<32x32xf32>
    %261 = math.exp %260 : vector<32x32xf32>
    %cst_93 = arith.constant dense<0.000000e+00> : vector<32xf32>
    %262 = vector.multi_reduction <add>, %261, %cst_93 [1] : vector<32x32xf32> to vector<32xf32>
    %263 = vector.shape_cast %262 : vector<32xf32> to vector<32x1xf32>
    %264 = tpu.reciprocal %263 {approx = true} : vector<32x1xf32> -> vector<32x1xf32>
    %265 = vector.broadcast %264 : vector<32x1xf32> to vector<32x32xf32>
    %266 = arith.mulf %261, %265 : vector<32x32xf32>
    %cst_94 = arith.constant dense<0.000000e+00> : vector<32x8xf32>
    %267 = tpu.matmul %266, %255, %cst_94 {dimension_numbers = #tpu.dot_dimension_numbers<[1], [0], [0], [1], [0, 0, 1, 1], [], []>} : vector<32x32xf32>, vector<32x8xf32>, vector<32x8xf32> -> vector<32x8xf32>
    %268 = vector.extract_strided_slice %251 {offsets = [0, 0], sizes = [8, 32], strides = [1, 1]} : vector<32x32xf32> to vector<8x32xf32>
    %cst_95 = arith.constant dense<0.000000e+00> : vector<32x32xf32>
    %269 = tpu.matmul %267, %268, %cst_95 {dimension_numbers = #tpu.dot_dimension_numbers<[1], [0], [0], [1], [0, 0, 1, 1], [], []>} : vector<32x8xf32>, vector<8x32xf32>, vector<32x32xf32> -> vector<32x32xf32>
    %270 = vector.extract_strided_slice %252 {offsets = [0, 8], sizes = [32, 8], strides = [1, 1]} : vector<32x96xf32> to vector<32x8xf32>
    %271 = vector.extract_strided_slice %252 {offsets = [0, 40], sizes = [32, 8], strides = [1, 1]} : vector<32x96xf32> to vector<32x8xf32>
    %272 = vector.extract_strided_slice %252 {offsets = [0, 72], sizes = [32, 8], strides = [1, 1]} : vector<32x96xf32> to vector<32x8xf32>
    %cst_96 = arith.constant dense<0.000000e+00> : vector<32x32xf32>
    %273 = tpu.matmul %270, %271, %cst_96 {dimension_numbers = #tpu.dot_dimension_numbers<[1], [1], [0], [0], [0, 0, 1, 0], [], []>} : vector<32x8xf32>, vector<32x8xf32>, vector<32x32xf32> -> vector<32x32xf32>
    %cst_97 = arith.constant dense<0xFF800000> : vector<32xf32>
    %274 = vector.multi_reduction <maximumf>, %273, %cst_97 [1] : vector<32x32xf32> to vector<32xf32>
    %275 = vector.shape_cast %274 : vector<32xf32> to vector<32x1xf32>
    %276 = vector.broadcast %275 : vector<32x1xf32> to vector<32x32xf32>
    %277 = arith.subf %273, %276 : vector<32x32xf32>
    %278 = math.exp %277 : vector<32x32xf32>
    %cst_98 = arith.constant dense<0.000000e+00> : vector<32xf32>
    %279 = vector.multi_reduction <add>, %278, %cst_98 [1] : vector<32x32xf32> to vector<32xf32>
    %280 = vector.shape_cast %279 : vector<32xf32> to vector<32x1xf32>
    %281 = tpu.reciprocal %280 {approx = true} : vector<32x1xf32> -> vector<32x1xf32>
    %282 = vector.broadcast %281 : vector<32x1xf32> to vector<32x32xf32>
    %283 = arith.mulf %278, %282 : vector<32x32xf32>
    %cst_99 = arith.constant dense<0.000000e+00> : vector<32x8xf32>
    %284 = tpu.matmul %283, %272, %cst_99 {dimension_numbers = #tpu.dot_dimension_numbers<[1], [0], [0], [1], [0, 0, 1, 1], [], []>} : vector<32x32xf32>, vector<32x8xf32>, vector<32x8xf32> -> vector<32x8xf32>
    %285 = vector.extract_strided_slice %251 {offsets = [8, 0], sizes = [8, 32], strides = [1, 1]} : vector<32x32xf32> to vector<8x32xf32>
    %cst_100 = arith.constant dense<0.000000e+00> : vector<32x32xf32>
    %286 = tpu.matmul %284, %285, %cst_100 {dimension_numbers = #tpu.dot_dimension_numbers<[1], [0], [0], [1], [0, 0, 1, 1], [], []>} : vector<32x8xf32>, vector<8x32xf32>, vector<32x32xf32> -> vector<32x32xf32>
    %287 = arith.addf %269, %286 : vector<32x32xf32>
    %288 = vector.extract_strided_slice %252 {offsets = [0, 16], sizes = [32, 8], strides = [1, 1]} : vector<32x96xf32> to vector<32x8xf32>
    %289 = vector.extract_strided_slice %252 {offsets = [0, 48], sizes = [32, 8], strides = [1, 1]} : vector<32x96xf32> to vector<32x8xf32>
    %290 = vector.extract_strided_slice %252 {offsets = [0, 80], sizes = [32, 8], strides = [1, 1]} : vector<32x96xf32> to vector<32x8xf32>
    %cst_101 = arith.constant dense<0.000000e+00> : vector<32x32xf32>
    %291 = tpu.matmul %288, %289, %cst_101 {dimension_numbers = #tpu.dot_dimension_numbers<[1], [1], [0], [0], [0, 0, 1, 0], [], []>} : vector<32x8xf32>, vector<32x8xf32>, vector<32x32xf32> -> vector<32x32xf32>
    %cst_102 = arith.constant dense<0xFF800000> : vector<32xf32>
    %292 = vector.multi_reduction <maximumf>, %291, %cst_102 [1] : vector<32x32xf32> to vector<32xf32>
    %293 = vector.shape_cast %292 : vector<32xf32> to vector<32x1xf32>
    %294 = vector.broadcast %293 : vector<32x1xf32> to vector<32x32xf32>
    %295 = arith.subf %291, %294 : vector<32x32xf32>
    %296 = math.exp %295 : vector<32x32xf32>
    %cst_103 = arith.constant dense<0.000000e+00> : vector<32xf32>
    %297 = vector.multi_reduction <add>, %296, %cst_103 [1] : vector<32x32xf32> to vector<32xf32>
    %298 = vector.shape_cast %297 : vector<32xf32> to vector<32x1xf32>
    %299 = tpu.reciprocal %298 {approx = true} : vector<32x1xf32> -> vector<32x1xf32>
    %300 = vector.broadcast %299 : vector<32x1xf32> to vector<32x32xf32>
    %301 = arith.mulf %296, %300 : vector<32x32xf32>
    %cst_104 = arith.constant dense<0.000000e+00> : vector<32x8xf32>
    %302 = tpu.matmul %301, %290, %cst_104 {dimension_numbers = #tpu.dot_dimension_numbers<[1], [0], [0], [1], [0, 0, 1, 1], [], []>} : vector<32x32xf32>, vector<32x8xf32>, vector<32x8xf32> -> vector<32x8xf32>
    %303 = vector.extract_strided_slice %251 {offsets = [16, 0], sizes = [8, 32], strides = [1, 1]} : vector<32x32xf32> to vector<8x32xf32>
    %cst_105 = arith.constant dense<0.000000e+00> : vector<32x32xf32>
    %304 = tpu.matmul %302, %303, %cst_105 {dimension_numbers = #tpu.dot_dimension_numbers<[1], [0], [0], [1], [0, 0, 1, 1], [], []>} : vector<32x8xf32>, vector<8x32xf32>, vector<32x32xf32> -> vector<32x32xf32>
    %305 = arith.addf %287, %304 : vector<32x32xf32>
    %306 = vector.extract_strided_slice %252 {offsets = [0, 24], sizes = [32, 8], strides = [1, 1]} : vector<32x96xf32> to vector<32x8xf32>
    %307 = vector.extract_strided_slice %252 {offsets = [0, 56], sizes = [32, 8], strides = [1, 1]} : vector<32x96xf32> to vector<32x8xf32>
    %308 = vector.extract_strided_slice %252 {offsets = [0, 88], sizes = [32, 8], strides = [1, 1]} : vector<32x96xf32> to vector<32x8xf32>
    %cst_106 = arith.constant dense<0.000000e+00> : vector<32x32xf32>
    %309 = tpu.matmul %306, %307, %cst_106 {dimension_numbers = #tpu.dot_dimension_numbers<[1], [1], [0], [0], [0, 0, 1, 0], [], []>} : vector<32x8xf32>, vector<32x8xf32>, vector<32x32xf32> -> vector<32x32xf32>
    %cst_107 = arith.constant dense<0xFF800000> : vector<32xf32>
    %310 = vector.multi_reduction <maximumf>, %309, %cst_107 [1] : vector<32x32xf32> to vector<32xf32>
    %311 = vector.shape_cast %310 : vector<32xf32> to vector<32x1xf32>
    %312 = vector.broadcast %311 : vector<32x1xf32> to vector<32x32xf32>
    %313 = arith.subf %309, %312 : vector<32x32xf32>
    %314 = math.exp %313 : vector<32x32xf32>
    %cst_108 = arith.constant dense<0.000000e+00> : vector<32xf32>
    %315 = vector.multi_reduction <add>, %314, %cst_108 [1] : vector<32x32xf32> to vector<32xf32>
    %316 = vector.shape_cast %315 : vector<32xf32> to vector<32x1xf32>
    %317 = tpu.reciprocal %316 {approx = true} : vector<32x1xf32> -> vector<32x1xf32>
    %318 = vector.broadcast %317 : vector<32x1xf32> to vector<32x32xf32>
    %319 = arith.mulf %314, %318 : vector<32x32xf32>
    %cst_109 = arith.constant dense<0.000000e+00> : vector<32x8xf32>
    %320 = tpu.matmul %319, %308, %cst_109 {dimension_numbers = #tpu.dot_dimension_numbers<[1], [0], [0], [1], [0, 0, 1, 1], [], []>} : vector<32x32xf32>, vector<32x8xf32>, vector<32x8xf32> -> vector<32x8xf32>
    %321 = vector.extract_strided_slice %251 {offsets = [24, 0], sizes = [8, 32], strides = [1, 1]} : vector<32x32xf32> to vector<8x32xf32>
    %cst_110 = arith.constant dense<0.000000e+00> : vector<32x32xf32>
    %322 = tpu.matmul %320, %321, %cst_110 {dimension_numbers = #tpu.dot_dimension_numbers<[1], [0], [0], [1], [0, 0, 1, 1], [], []>} : vector<32x8xf32>, vector<8x32xf32>, vector<32x32xf32> -> vector<32x32xf32>
    %323 = arith.addf %305, %322 : vector<32x32xf32>
    %324 = vector.extract_strided_slice %249 {offsets = [32, 0], sizes = [32, 96], strides = [1, 1]} : vector<64x96xf32> to vector<32x96xf32>
    %325 = vector.extract_strided_slice %324 {offsets = [0, 0], sizes = [32, 8], strides = [1, 1]} : vector<32x96xf32> to vector<32x8xf32>
    %326 = vector.extract_strided_slice %324 {offsets = [0, 32], sizes = [32, 8], strides = [1, 1]} : vector<32x96xf32> to vector<32x8xf32>
    %327 = vector.extract_strided_slice %324 {offsets = [0, 64], sizes = [32, 8], strides = [1, 1]} : vector<32x96xf32> to vector<32x8xf32>
    %cst_111 = arith.constant dense<0.000000e+00> : vector<32x32xf32>
    %328 = tpu.matmul %325, %326, %cst_111 {dimension_numbers = #tpu.dot_dimension_numbers<[1], [1], [0], [0], [0, 0, 1, 0], [], []>} : vector<32x8xf32>, vector<32x8xf32>, vector<32x32xf32> -> vector<32x32xf32>
    %cst_112 = arith.constant dense<0xFF800000> : vector<32xf32>
    %329 = vector.multi_reduction <maximumf>, %328, %cst_112 [1] : vector<32x32xf32> to vector<32xf32>
    %330 = vector.shape_cast %329 : vector<32xf32> to vector<32x1xf32>
    %331 = vector.broadcast %330 : vector<32x1xf32> to vector<32x32xf32>
    %332 = arith.subf %328, %331 : vector<32x32xf32>
    %333 = math.exp %332 : vector<32x32xf32>
    %cst_113 = arith.constant dense<0.000000e+00> : vector<32xf32>
    %334 = vector.multi_reduction <add>, %333, %cst_113 [1] : vector<32x32xf32> to vector<32xf32>
    %335 = vector.shape_cast %334 : vector<32xf32> to vector<32x1xf32>
    %336 = tpu.reciprocal %335 {approx = true} : vector<32x1xf32> -> vector<32x1xf32>
    %337 = vector.broadcast %336 : vector<32x1xf32> to vector<32x32xf32>
    %338 = arith.mulf %333, %337 : vector<32x32xf32>
    %cst_114 = arith.constant dense<0.000000e+00> : vector<32x8xf32>
    %339 = tpu.matmul %338, %327, %cst_114 {dimension_numbers = #tpu.dot_dimension_numbers<[1], [0], [0], [1], [0, 0, 1, 1], [], []>} : vector<32x32xf32>, vector<32x8xf32>, vector<32x8xf32> -> vector<32x8xf32>
    %340 = vector.extract_strided_slice %251 {offsets = [0, 0], sizes = [8, 32], strides = [1, 1]} : vector<32x32xf32> to vector<8x32xf32>
    %cst_115 = arith.constant dense<0.000000e+00> : vector<32x32xf32>
    %341 = tpu.matmul %339, %340, %cst_115 {dimension_numbers = #tpu.dot_dimension_numbers<[1], [0], [0], [1], [0, 0, 1, 1], [], []>} : vector<32x8xf32>, vector<8x32xf32>, vector<32x32xf32> -> vector<32x32xf32>
    %342 = vector.extract_strided_slice %324 {offsets = [0, 8], sizes = [32, 8], strides = [1, 1]} : vector<32x96xf32> to vector<32x8xf32>
    %343 = vector.extract_strided_slice %324 {offsets = [0, 40], sizes = [32, 8], strides = [1, 1]} : vector<32x96xf32> to vector<32x8xf32>
    %344 = vector.extract_strided_slice %324 {offsets = [0, 72], sizes = [32, 8], strides = [1, 1]} : vector<32x96xf32> to vector<32x8xf32>
    %cst_116 = arith.constant dense<0.000000e+00> : vector<32x32xf32>
    %345 = tpu.matmul %342, %343, %cst_116 {dimension_numbers = #tpu.dot_dimension_numbers<[1], [1], [0], [0], [0, 0, 1, 0], [], []>} : vector<32x8xf32>, vector<32x8xf32>, vector<32x32xf32> -> vector<32x32xf32>
    %cst_117 = arith.constant dense<0xFF800000> : vector<32xf32>
    %346 = vector.multi_reduction <maximumf>, %345, %cst_117 [1] : vector<32x32xf32> to vector<32xf32>
    %347 = vector.shape_cast %346 : vector<32xf32> to vector<32x1xf32>
    %348 = vector.broadcast %347 : vector<32x1xf32> to vector<32x32xf32>
    %349 = arith.subf %345, %348 : vector<32x32xf32>
    %350 = math.exp %349 : vector<32x32xf32>
    %cst_118 = arith.constant dense<0.000000e+00> : vector<32xf32>
    %351 = vector.multi_reduction <add>, %350, %cst_118 [1] : vector<32x32xf32> to vector<32xf32>
    %352 = vector.shape_cast %351 : vector<32xf32> to vector<32x1xf32>
    %353 = tpu.reciprocal %352 {approx = true} : vector<32x1xf32> -> vector<32x1xf32>
    %354 = vector.broadcast %353 : vector<32x1xf32> to vector<32x32xf32>
    %355 = arith.mulf %350, %354 : vector<32x32xf32>
    %cst_119 = arith.constant dense<0.000000e+00> : vector<32x8xf32>
    %356 = tpu.matmul %355, %344, %cst_119 {dimension_numbers = #tpu.dot_dimension_numbers<[1], [0], [0], [1], [0, 0, 1, 1], [], []>} : vector<32x32xf32>, vector<32x8xf32>, vector<32x8xf32> -> vector<32x8xf32>
    %357 = vector.extract_strided_slice %251 {offsets = [8, 0], sizes = [8, 32], strides = [1, 1]} : vector<32x32xf32> to vector<8x32xf32>
    %cst_120 = arith.constant dense<0.000000e+00> : vector<32x32xf32>
    %358 = tpu.matmul %356, %357, %cst_120 {dimension_numbers = #tpu.dot_dimension_numbers<[1], [0], [0], [1], [0, 0, 1, 1], [], []>} : vector<32x8xf32>, vector<8x32xf32>, vector<32x32xf32> -> vector<32x32xf32>
    %359 = arith.addf %341, %358 : vector<32x32xf32>
    %360 = vector.extract_strided_slice %324 {offsets = [0, 16], sizes = [32, 8], strides = [1, 1]} : vector<32x96xf32> to vector<32x8xf32>
    %361 = vector.extract_strided_slice %324 {offsets = [0, 48], sizes = [32, 8], strides = [1, 1]} : vector<32x96xf32> to vector<32x8xf32>
    %362 = vector.extract_strided_slice %324 {offsets = [0, 80], sizes = [32, 8], strides = [1, 1]} : vector<32x96xf32> to vector<32x8xf32>
    %cst_121 = arith.constant dense<0.000000e+00> : vector<32x32xf32>
    %363 = tpu.matmul %360, %361, %cst_121 {dimension_numbers = #tpu.dot_dimension_numbers<[1], [1], [0], [0], [0, 0, 1, 0], [], []>} : vector<32x8xf32>, vector<32x8xf32>, vector<32x32xf32> -> vector<32x32xf32>
    %cst_122 = arith.constant dense<0xFF800000> : vector<32xf32>
    %364 = vector.multi_reduction <maximumf>, %363, %cst_122 [1] : vector<32x32xf32> to vector<32xf32>
    %365 = vector.shape_cast %364 : vector<32xf32> to vector<32x1xf32>
    %366 = vector.broadcast %365 : vector<32x1xf32> to vector<32x32xf32>
    %367 = arith.subf %363, %366 : vector<32x32xf32>
    %368 = math.exp %367 : vector<32x32xf32>
    %cst_123 = arith.constant dense<0.000000e+00> : vector<32xf32>
    %369 = vector.multi_reduction <add>, %368, %cst_123 [1] : vector<32x32xf32> to vector<32xf32>
    %370 = vector.shape_cast %369 : vector<32xf32> to vector<32x1xf32>
    %371 = tpu.reciprocal %370 {approx = true} : vector<32x1xf32> -> vector<32x1xf32>
    %372 = vector.broadcast %371 : vector<32x1xf32> to vector<32x32xf32>
    %373 = arith.mulf %368, %372 : vector<32x32xf32>
    %cst_124 = arith.constant dense<0.000000e+00> : vector<32x8xf32>
    %374 = tpu.matmul %373, %362, %cst_124 {dimension_numbers = #tpu.dot_dimension_numbers<[1], [0], [0], [1], [0, 0, 1, 1], [], []>} : vector<32x32xf32>, vector<32x8xf32>, vector<32x8xf32> -> vector<32x8xf32>
    %375 = vector.extract_strided_slice %251 {offsets = [16, 0], sizes = [8, 32], strides = [1, 1]} : vector<32x32xf32> to vector<8x32xf32>
    %cst_125 = arith.constant dense<0.000000e+00> : vector<32x32xf32>
    %376 = tpu.matmul %374, %375, %cst_125 {dimension_numbers = #tpu.dot_dimension_numbers<[1], [0], [0], [1], [0, 0, 1, 1], [], []>} : vector<32x8xf32>, vector<8x32xf32>, vector<32x32xf32> -> vector<32x32xf32>
    %377 = arith.addf %359, %376 : vector<32x32xf32>
    %378 = vector.extract_strided_slice %324 {offsets = [0, 24], sizes = [32, 8], strides = [1, 1]} : vector<32x96xf32> to vector<32x8xf32>
    %379 = vector.extract_strided_slice %324 {offsets = [0, 56], sizes = [32, 8], strides = [1, 1]} : vector<32x96xf32> to vector<32x8xf32>
    %380 = vector.extract_strided_slice %324 {offsets = [0, 88], sizes = [32, 8], strides = [1, 1]} : vector<32x96xf32> to vector<32x8xf32>
    %cst_126 = arith.constant dense<0.000000e+00> : vector<32x32xf32>
    %381 = tpu.matmul %378, %379, %cst_126 {dimension_numbers = #tpu.dot_dimension_numbers<[1], [1], [0], [0], [0, 0, 1, 0], [], []>} : vector<32x8xf32>, vector<32x8xf32>, vector<32x32xf32> -> vector<32x32xf32>
    %cst_127 = arith.constant dense<0xFF800000> : vector<32xf32>
    %382 = vector.multi_reduction <maximumf>, %381, %cst_127 [1] : vector<32x32xf32> to vector<32xf32>
    %383 = vector.shape_cast %382 : vector<32xf32> to vector<32x1xf32>
    %384 = vector.broadcast %383 : vector<32x1xf32> to vector<32x32xf32>
    %385 = arith.subf %381, %384 : vector<32x32xf32>
    %386 = math.exp %385 : vector<32x32xf32>
    %cst_128 = arith.constant dense<0.000000e+00> : vector<32xf32>
    %387 = vector.multi_reduction <add>, %386, %cst_128 [1] : vector<32x32xf32> to vector<32xf32>
    %388 = vector.shape_cast %387 : vector<32xf32> to vector<32x1xf32>
    %389 = tpu.reciprocal %388 {approx = true} : vector<32x1xf32> -> vector<32x1xf32>
    %390 = vector.broadcast %389 : vector<32x1xf32> to vector<32x32xf32>
    %391 = arith.mulf %386, %390 : vector<32x32xf32>
    %cst_129 = arith.constant dense<0.000000e+00> : vector<32x8xf32>
    %392 = tpu.matmul %391, %380, %cst_129 {dimension_numbers = #tpu.dot_dimension_numbers<[1], [0], [0], [1], [0, 0, 1, 1], [], []>} : vector<32x32xf32>, vector<32x8xf32>, vector<32x8xf32> -> vector<32x8xf32>
    %393 = vector.extract_strided_slice %251 {offsets = [24, 0], sizes = [8, 32], strides = [1, 1]} : vector<32x32xf32> to vector<8x32xf32>
    %cst_130 = arith.constant dense<0.000000e+00> : vector<32x32xf32>
    %394 = tpu.matmul %392, %393, %cst_130 {dimension_numbers = #tpu.dot_dimension_numbers<[1], [0], [0], [1], [0, 0, 1, 1], [], []>} : vector<32x8xf32>, vector<8x32xf32>, vector<32x32xf32> -> vector<32x32xf32>
    %395 = arith.addf %377, %394 : vector<32x32xf32>
    %396 = tpu.concatenate %323, %395 in 0 : vector<32x32xf32>, vector<32x32xf32> -> vector<64x32xf32>
    %397 = vector.broadcast %226 : vector<1x32xf32> to vector<64x32xf32>
    %398 = arith.addf %396, %397 : vector<64x32xf32>
    %399 = arith.addf %222, %398 : vector<64x32xf32>
    %cst_131 = arith.constant dense<0.000000e+00> : vector<64xf32>
    %400 = vector.multi_reduction <add>, %399, %cst_131 [1] : vector<64x32xf32> to vector<64xf32>
    %401 = vector.shape_cast %400 : vector<64xf32> to vector<64x1xf32>
    %cst_132 = arith.constant 3.200000e+01 : f32
    %402 = vector.broadcast %cst_132 : f32 to vector<64x1xf32>
    %403 = arith.divf %401, %402 : vector<64x1xf32>
    %404 = vector.broadcast %403 : vector<64x1xf32> to vector<64x32xf32>
    %405 = arith.subf %399, %404 : vector<64x32xf32>
    %406 = arith.mulf %405, %405 : vector<64x32xf32>
    %cst_133 = arith.constant dense<0.000000e+00> : vector<64xf32>
    %407 = vector.multi_reduction <add>, %406, %cst_133 [1] : vector<64x32xf32> to vector<64xf32>
    %408 = vector.shape_cast %407 : vector<64xf32> to vector<64x1xf32>
    %cst_134 = arith.constant 3.200000e+01 : f32
    %409 = vector.broadcast %cst_134 : f32 to vector<64x1xf32>
    %410 = arith.divf %408, %409 : vector<64x1xf32>
    %cst_135 = arith.constant 9.99999974E-6 : f32
    %411 = vector.broadcast %cst_135 : f32 to vector<64x1xf32>
    %412 = arith.addf %410, %411 : vector<64x1xf32>
    %413 = math.rsqrt %412 : vector<64x1xf32>
    %414 = vector.broadcast %413 : vector<64x1xf32> to vector<64x32xf32>
    %415 = arith.mulf %405, %414 : vector<64x32xf32>
    %c1_136 = arith.constant 1 : index
    %c0_137 = arith.constant 0 : index
    %c0_138 = arith.constant 0 : index
    %416 = vector.load %arg6[%c1_136, %c0_137, %c0_138] : memref<2x32x128xf32, #tpu.memory_space<vmem>>, vector<1x32x128xf32>
    %417 = vector.shape_cast %416 : vector<1x32x128xf32> to vector<32x128xf32>
    %cst_139 = arith.constant dense<0.000000e+00> : vector<64x128xf32>
    %418 = tpu.matmul %415, %417, %cst_139 {dimension_numbers = #tpu.dot_dimension_numbers<[1], [0], [0], [1], [0, 0, 1, 1], [], []>} : vector<64x32xf32>, vector<32x128xf32>, vector<64x128xf32> -> vector<64x128xf32>
    %419 = vector.broadcast %227 : vector<1x128xf32> to vector<64x128xf32>
    %420 = arith.addf %418, %419 : vector<64x128xf32>
    %cst_140 = arith.constant 5.000000e-01 : f32
    %421 = vector.broadcast %cst_140 : f32 to vector<64x128xf32>
    %422 = arith.mulf %421, %420 : vector<64x128xf32>
    %cst_141 = arith.constant 4.471500e-02 : f32
    %423 = vector.broadcast %cst_141 : f32 to vector<64x128xf32>
    %424 = arith.mulf %423, %420 : vector<64x128xf32>
    %425 = arith.mulf %424, %420 : vector<64x128xf32>
    %426 = arith.mulf %425, %420 : vector<64x128xf32>
    %427 = arith.addf %420, %426 : vector<64x128xf32>
    %cst_142 = arith.constant 0.797884583 : f32
    %428 = vector.broadcast %cst_142 : f32 to vector<64x128xf32>
    %429 = arith.mulf %428, %427 : vector<64x128xf32>
    %430 = math.tanh %429 : vector<64x128xf32>
    %cst_143 = arith.constant 1.000000e+00 : f32
    %431 = vector.broadcast %cst_143 : f32 to vector<64x128xf32>
    %432 = arith.addf %431, %430 : vector<64x128xf32>
    %433 = arith.mulf %422, %432 : vector<64x128xf32>
    %c1_144 = arith.constant 1 : index
    %c0_145 = arith.constant 0 : index
    %c0_146 = arith.constant 0 : index
    %434 = vector.load %arg7[%c1_144, %c0_145, %c0_146] : memref<2x128x32xf32, #tpu.memory_space<vmem>>, vector<1x128x32xf32>
    %435 = vector.shape_cast %434 : vector<1x128x32xf32> to vector<128x32xf32>
    %cst_147 = arith.constant dense<0.000000e+00> : vector<64x32xf32>
    %436 = tpu.matmul %433, %435, %cst_147 {dimension_numbers = #tpu.dot_dimension_numbers<[1], [0], [0], [1], [0, 0, 1, 1], [], []>} : vector<64x128xf32>, vector<128x32xf32>, vector<64x32xf32> -> vector<64x32xf32>
    %437 = vector.broadcast %228 : vector<1x32xf32> to vector<64x32xf32>
    %438 = arith.addf %436, %437 : vector<64x32xf32>
    %439 = arith.addf %399, %438 : vector<64x32xf32>
    %cst_148 = arith.constant dense<0.000000e+00> : vector<64xf32>
    %440 = vector.multi_reduction <add>, %439, %cst_148 [1] : vector<64x32xf32> to vector<64xf32>
    %441 = vector.shape_cast %440 : vector<64xf32> to vector<64x1xf32>
    %cst_149 = arith.constant 3.200000e+01 : f32
    %442 = vector.broadcast %cst_149 : f32 to vector<64x1xf32>
    %443 = arith.divf %441, %442 : vector<64x1xf32>
    %444 = vector.broadcast %443 : vector<64x1xf32> to vector<64x32xf32>
    %445 = arith.subf %439, %444 : vector<64x32xf32>
    %446 = arith.mulf %445, %445 : vector<64x32xf32>
    %cst_150 = arith.constant dense<0.000000e+00> : vector<64xf32>
    %447 = vector.multi_reduction <add>, %446, %cst_150 [1] : vector<64x32xf32> to vector<64xf32>
    %448 = vector.shape_cast %447 : vector<64xf32> to vector<64x1xf32>
    %cst_151 = arith.constant 3.200000e+01 : f32
    %449 = vector.broadcast %cst_151 : f32 to vector<64x1xf32>
    %450 = arith.divf %448, %449 : vector<64x1xf32>
    %cst_152 = arith.constant 9.99999974E-6 : f32
    %451 = vector.broadcast %cst_152 : f32 to vector<64x1xf32>
    %452 = arith.addf %450, %451 : vector<64x1xf32>
    %453 = math.rsqrt %452 : vector<64x1xf32>
    %454 = vector.broadcast %453 : vector<64x1xf32> to vector<64x32xf32>
    %455 = arith.mulf %445, %454 : vector<64x32xf32>
    %c0_153 = arith.constant 0 : index
    %c0_154 = arith.constant 0 : index
    %456 = vector.load %arg9[%c0_153, %c0_154] : memref<32x256xf32, #tpu.memory_space<vmem>>, vector<32x256xf32>
    %cst_155 = arith.constant dense<0.000000e+00> : vector<64x256xf32>
    %457 = tpu.matmul %455, %456, %cst_155 {dimension_numbers = #tpu.dot_dimension_numbers<[1], [0], [0], [1], [0, 0, 1, 1], [], []>} : vector<64x32xf32>, vector<32x256xf32>, vector<64x256xf32> -> vector<64x256xf32>
    %c0_156 = arith.constant 0 : index
    %c0_157 = arith.constant 0 : index
    %458 = vector.load %arg10[%c0_156, %c0_157] : memref<1x256xf32, #tpu.memory_space<vmem>>, vector<1x256xf32>
    %459 = vector.broadcast %458 : vector<1x256xf32> to vector<64x256xf32>
    %460 = arith.addf %457, %459 : vector<64x256xf32>
    %c0_158 = arith.constant 0 : index
    %c0_159 = arith.constant 0 : index
    %461 = vector.load %arg11[%c0_158, %c0_159] : memref<64x256xf32, #tpu.memory_space<vmem>>, vector<64x256xf32>
    tpu.vector_store %arg11[%c0_158, %c0_159], %460 {strides = array<i32>} : memref<64x256xf32, #tpu.memory_space<vmem>>, vector<64x256xf32>,
    return
  }
  func.func @transform_0(%arg0: i32) -> (i32, i32) {
    %c0_i32 = arith.constant 0 : i32
    %c0_i32_0 = arith.constant 0 : i32
    %c0_i32_1 = arith.constant 0 : i32
    return %c0_i32, %c0_i32_0 : i32, i32
  }
  func.func @transform_1(%arg0: i32) -> (i32, i32) {
    %c0_i32 = arith.constant 0 : i32
    %c0_i32_0 = arith.constant 0 : i32
    %c0_i32_1 = arith.constant 0 : i32
    return %c0_i32, %c0_i32_0 : i32, i32
  }
  func.func @transform_2(%arg0: i32) -> (i32, i32) {
    %c0_i32 = arith.constant 0 : i32
    %c0_i32_0 = arith.constant 0 : i32
    %c0_i32_1 = arith.constant 0 : i32
    return %c0_i32, %c0_i32_0 : i32, i32
  }
  func.func @transform_3(%arg0: i32) -> (i32, i32, i32) {
    %c0_i32 = arith.constant 0 : i32
    %c0_i32_0 = arith.constant 0 : i32
    %c0_i32_1 = arith.constant 0 : i32
    %c0_i32_2 = arith.constant 0 : i32
    return %c0_i32, %c0_i32_0, %c0_i32_1 : i32, i32, i32
  }
  func.func @transform_4(%arg0: i32) -> (i32, i32, i32) {
    %c0_i32 = arith.constant 0 : i32
    %c0_i32_0 = arith.constant 0 : i32
    %c0_i32_1 = arith.constant 0 : i32
    %c0_i32_2 = arith.constant 0 : i32
    return %c0_i32, %c0_i32_0, %c0_i32_1 : i32, i32, i32
  }
  func.func @transform_5(%arg0: i32) -> (i32, i32, i32) {
    %c0_i32 = arith.constant 0 : i32
    %c0_i32_0 = arith.constant 0 : i32
    %c0_i32_1 = arith.constant 0 : i32
    %c0_i32_2 = arith.constant 0 : i32
    return %c0_i32, %c0_i32_0, %c0_i32_1 : i32, i32, i32
  }
  func.func @transform_6(%arg0: i32) -> (i32, i32, i32) {
    %c0_i32 = arith.constant 0 : i32
    %c0_i32_0 = arith.constant 0 : i32
    %c0_i32_1 = arith.constant 0 : i32
    %c0_i32_2 = arith.constant 0 : i32
    return %c0_i32, %c0_i32_0, %c0_i32_1 : i32, i32, i32
  }
  func.func @transform_7(%arg0: i32) -> (i32, i32, i32) {
    %c0_i32 = arith.constant 0 : i32
    %c0_i32_0 = arith.constant 0 : i32
    %c0_i32_1 = arith.constant 0 : i32
    %c0_i32_2 = arith.constant 0 : i32
    return %c0_i32, %c0_i32_0, %c0_i32_1 : i32, i32, i32
  }
  func.func @transform_8(%arg0: i32) -> (i32, i32) {
    %c0_i32 = arith.constant 0 : i32
    %c0_i32_0 = arith.constant 0 : i32
    %c0_i32_1 = arith.constant 0 : i32
    return %c0_i32, %c0_i32_0 : i32, i32
  }
  func.func @transform_9(%arg0: i32) -> (i32, i32) {
    %c0_i32 = arith.constant 0 : i32
    %c0_i32_0 = arith.constant 0 : i32
    %c0_i32_1 = arith.constant 0 : i32
    return %c0_i32, %c0_i32_0 : i32, i32
  }
  func.func @transform_10(%arg0: i32) -> (i32, i32) {
    %c0_i32 = arith.constant 0 : i32
    %c0_i32_0 = arith.constant 0 : i32
    %c0_i32_1 = arith.constant 0 : i32
    return %c0_i32, %c0_i32_0 : i32, i32
  }
}

</mosaic_0001>

<bundles_post_ra>
// kernel: forward_gaussians.1
= control target key start
LH: loop header
LB: loop body
LE: loop exit
PB: predicated region body
PF: predicated region fallthrough
CT: control target
= control target key end

     0   :  { %vm73_vm0 = vcmask 130048   ;;  %vm181_vm1 = vcmask 261120   ;;  %v5902_v47 = vmov 32.0   ;;  %s5903_s15 = smov 96   ;;  %vm451_vm15 = vcmask 64512   ;;  %s5904_s20 = smov 64   ;;  %s8293_s1 = inlined_call_operand.vmem [shape: f32[144,32], index: 1, kind: input, shape index: {}]   ;;  %s8294_s0 = inlined_call_operand.vmem [shape: f32[64,144], index: 0, kind: input, shape index: {}]   ;;  %s8295_s2 = inlined_call_operand.vmem [shape: f32[1,32], index: 2, kind: input, shape index: {}]   ;;  %s8296_s3 = inlined_call_operand.vmem [shape: f32[2,32,96], index: 3, kind: input, shape index: {}]   ;;  %s8297_s7 = inlined_call_operand.vmem [shape: f32[2,4,128], index: 7, kind: input, shape index: {}]   ;;  %s8298_s4 = inlined_call_operand.vmem [shape: f32[2,32,32], index: 4, kind: input, shape index: {}]   ;;  %s8299_s5 = inlined_call_operand.vmem [shape: f32[2,32,128], index: 5, kind: input, shape index: {}]   ;;  %s8300_s6 = inlined_call_operand.vmem [shape: f32[2,128,32], index: 6, kind: input, shape index: {}]   ;;  %s8301_s8 = inlined_call_operand.vmem [shape: f32[32,256], index: 8, kind: input, shape index: {}]   ;;  %s8302_s9 = inlined_call_operand.vmem [shape: f32[1,256], index: 9, kind: input, shape index: {}]   ;;  %s8303_s10 = inlined_call_operand.vmem [shape: f32[64,256], index: 10, kind: output, shape index: {}]  }
   0x1   :  { %v66_v0 = vld [vmem:[%s8293_s1 + $0x78] sm:$0xff]  ;;  %v65_v1 = vld [vmem:[%s8293_s1 + $0x70] sm:$0xff]  ;;  %v64_v2 = vld [vmem:[%s8293_s1 + $0x68] sm:$0xff]  ;;  %5529 = vrcp.f32 %v5902_v47  ;;  %s5905_s21 = smov 88   ;;  %s5908_s30 = smov 112  }
   0x2   :  { %98 = vmatpush.msra.mxu0 %v66_v0  ;;  %v63_v3 = vld [vmem:[%s8293_s1 + $0x60] sm:$0xff]  ;;  %v68_v4 = vld [vmem:[%s8293_s1 + $0x88] sm:$0xff]  ;;  %v62_v5 = vld [vmem:[%s8293_s1 + $0x58] sm:$0xff]  ;;  %s5909_s17 = smov 56   ;;  %s5910_s18 = smov 48  }
   0x3   :  { %153 = vmatpush.msra.mxu1 %v68_v4  ;;  %v67_v6 = vld [vmem:[%s8293_s1 + $0x80] sm:$0xff]  ;;  %v36_v7 = vld [vmem:[%s8294_s0 + $0x8] sm:$0xff]  ;;  %v61_v8 = vld [vmem:[%s8293_s1 + $0x50] sm:$0xff]  ;;  %s5911_s19 = smov 72   ;;  %s5912_s22 = smov 104  }
   0x4   :  { %99 = vmatpush.msra.mxu0 %v65_v1  ;;  %v60_v9 = vld [vmem:[%s8293_s1 + $0x48] sm:$0xff]  ;;  %v59_v10 = vld [vmem:[%s8293_s1 + $0x40] sm:$0xff]  ;;  %v58_v11 = vld [vmem:[%s8293_s1 + $0x38] sm:$0xff]  ;;  %s5913_s27 = smov 40  }
   0x5   :  { %154 = vmatpush.msra.mxu1 %v67_v6  ;;  %v38_v12 = vld [vmem:[%s8294_s0 + $0x18] sm:$0xff]  ;;  %v57_v13 = vld [vmem:[%s8293_s1 + $0x30] sm:$0xff]  ;;  %v56_v14 = vld [vmem:[%s8293_s1 + $0x28] sm:$0xff] }
   0x6   :  { %100 = vmatpush.msra.mxu0 %v64_v2  ;;  %5014 = vmatmul.msk.f32.vlgmr.msra.gmra.mxu1 %vm73_vm0, %v36_v7  ;;  %v55_v15 = vld [vmem:[%s8293_s1 + $0x20] sm:$0xff]  ;;  %v54_v16 = vld [vmem:[%s8293_s1 + $0x18] sm:$0xff]  ;;  %v40_v17 = vld [vmem:[%s8294_s0 + $0x28] sm:$0xff] }
   0x7   :  { %v53_v18 = vld [vmem:[%s8293_s1 + $0x10] sm:$0xff]  ;;  %v52_v19 = vld [vmem:[%s8293_s1 + $0x8] sm:$0xff]  ;;  %v51_v20 = vld [vmem:[%s8293_s1] sm:$0xff]  ;;  %v5530_v48 = vpop.eup %5529  ;;  %s5906_s1 = smov 120  }
   0x8   :  { %101 = vmatpush.msra.mxu0 %v63_v3  ;;  %v35_v21 = vld [vmem:[%s8294_s0] sm:$0xff]  ;;  %v42_v22 = vld [vmem:[%s8294_s0 + $0x38] sm:$0xff]  ;;  %v37_v23 = vld [vmem:[%s8294_s0 + $0x10] sm:$0xff]  ;;  %v207_v49 = vmul.f32 32.0, %v5530_v48  ;;  %vm211_vm2 = vweird.f32 %v5530_v48 }
   0x9   :  { %v39_v24 = vld [vmem:[%s8294_s0 + $0x20] sm:$0xff]  ;;  %v41_v25 = vld [vmem:[%s8294_s0 + $0x30] sm:$0xff] }
   0xa   :  { %102 = vmatpush.msra.mxu0 %v62_v5  ;;  %v6054_v27 = vld [vmem:[%s8295_s2] ss:$0 sm:$0xff]  ;;  %v208_v50 = vsub.f32 1.0, %v207_v49  ;;  %s5907_s2 = smov 80  }
   0xc   :  { %103 = vmatpush.msra.mxu0 %v61_v8  ;;  %v209_v51 = vmul.f32 %v5530_v48, %v208_v50 }
   0xe   :  { %104 = vmatpush.msra.mxu0 %v60_v9  ;;  %5015 = vmatmul.msk.f32.gmra.mxu1 %vm73_vm0, %v38_v12  ;;  %v210_v52 = vadd.f32 %v5530_v48, %v209_v51  ;;  %v366_v12 = vld [vmem:[%s8296_s3 + $0x8] sm:$0xff] }
  0x10   :  { %105 = vmatpush.msra.mxu0 %v59_v10  ;;  %v6076_v53 = vsel %vm211_vm2, %v5530_v48, %v210_v52  ;;  %v368_v10 = vld [vmem:[%s8296_s3 + $0x18] sm:$0xff] }
  0x11   :  { %406 = vmatpush.msra.mxu2 %v368_v10 }
  0x12   :  { %106 = vmatpush.msra.mxu0 %v58_v11  ;;  %v367_v11 = vld [vmem:[%s8296_s3 + $0x10] sm:$0xff] }
  0x13   :  { %407 = vmatpush.msra.mxu2 %v367_v11 }
  0x14   :  { %107 = vmatpush.msra.mxu0 %v57_v13  ;;  %v365_v13 = vld [vmem:[%s8296_s3] sm:$0xff] }
  0x15   :  { %408 = vmatpush.msra.mxu2 %v366_v12 }
  0x16   :  { %108 = vmatpush.msra.mxu0 %v56_v14  ;;  %5016 = vmatmul.msk.f32.gmra.mxu1 %vm73_vm0, %v40_v17 }
  0x17   :  { %409 = vmatpush.msra.mxu2 %v365_v13 }
  0x18   :  { %109 = vmatpush.msra.mxu0 %v55_v15 }
  0x1a   :  { %110 = vmatpush.msra.mxu0 %v54_v16 }
  0x1c   :  { %111 = vmatpush.msra.mxu0 %v53_v18 }
  0x1e   :  { %112 = vmatpush.msra.mxu0 %v52_v19  ;;  %5017 = vmatmul.msk.f32.gmra.mxu1 %vm73_vm0, %v42_v22 }
  0x20   :  { %113 = vmatpush.msra.mxu0 %v51_v20 }
  0x21   :  { %114 = vmatmul.f32.vlgmr.msra.gmra.mxu0 %v35_v21 }
  0x29   :  { %117 = vmatmul.f32.gmra.mxu0 %v37_v23 }
  0x31   :  { %120 = vmatmul.f32.gmra.mxu0 %v39_v24 }
  0x39   :  { %123 = vmatmul.f32.gmra.mxu0 %v41_v25 }
  0x83   :  { %v156_v26 = vpop.f32.mrf.mxu1 }
  0x8b   :  { %v159_v31 = vpop.f32.mrf.mxu1 }
  0x93   :  { %v162_v37 = vpop.f32.mrf.mxu1 }
  0x9b   :  { %v165_v43 = vpop.f32.mrf.mxu1 }
  0x9e   :  { %v115_v28 = vpop.f32.mrf.mxu0 }
  0x9f   :  { %v116_v29 = vadd.f32 %v6054_v27, %v115_v28 }
  0xa1   :  { %v6057_v30 = vadd.f32 %v156_v26, %v116_v29 }
  0xa3   :  { %v182_v32 = vsel %vm181_vm1, %v6057_v30, 0.0 }
  0xa4   :  { %183 = vadd.xlane.f32.xlu0 %v182_v32 }
  0xa6   :  { %v118_v33 = vpop.f32.mrf.mxu0 }
  0xa7   :  { %v119_v34 = vadd.f32 %v6054_v27, %v118_v33 }
  0xa9   :  { %v6062_v35 = vadd.f32 %v159_v31, %v119_v34 }
  0xab   :  { %v185_v36 = vsel %vm181_vm1, %v6062_v35, 0.0 }
  0xac   :  { %186 = vadd.xlane.f32.xlu0 %v185_v36 }
  0xae   :  { %v121_v38 = vpop.f32.mrf.mxu0 }
  0xaf   :  { %v122_v39 = vadd.f32 %v6054_v27, %v121_v38 }
  0xb1   :  { %v6067_v40 = vadd.f32 %v162_v37, %v122_v39 }
  0xb3   :  { %v188_v41 = vsel %vm181_vm1, %v6067_v40, 0.0 }
  0xb4   :  { %189 = vadd.xlane.f32.xlu1 %v188_v41 }
  0xb6   :  { %v124_v42 = vpop.f32.mrf.mxu0 }
  0xb7   :  { %v125_v44 = vadd.f32 %v6054_v27, %v124_v42 }
  0xb9   :  { %v6072_v45 = vadd.f32 %v165_v43, %v125_v44 }
  0xbb   :  { %v191_v46 = vsel %vm181_vm1, %v6072_v45, 0.0 }
  0xbc   :  { %192 = vadd.xlane.f32.xlu1 %v191_v46 }
 0x117   :  { %v184_v54 = vpop.xlane.xlu0 %183 }
 0x118   :  { %v213_v55 = vmul.f32 %v6076_v53, %v184_v54 }
 0x11a   :  { %v221_v56 = vsub.f32 %v6057_v30, %v213_v55 }
 0x11c   :  { %v229_v57 = vmul.f32 %v221_v56, %v221_v56 }
 0x11e   :  { %v237_v58 = vsel %vm181_vm1, %v229_v57, 0.0 }
 0x11f   :  { %238 = vadd.xlane.f32.xlu2 %v237_v58  ;;  %v187_v59 = vpop.xlane.xlu0 %186 }
 0x120   :  { %v214_v60 = vmul.f32 %v6076_v53, %v187_v59 }
 0x122   :  { %v6083_v61 = vsub.f32 %v6062_v35, %v214_v60 }
 0x124   :  { %v230_v62 = vmul.f32 %v6083_v61, %v6083_v61 }
 0x126   :  { %v240_v63 = vsel %vm181_vm1, %v230_v62, 0.0 }
 0x127   :  { %v190_v0 = vpop.xlane.xlu1 %189  ;;  %241 = vadd.xlane.f32.xlu2 %v240_v63 }
 0x128   :  { %v215_v1 = vmul.f32 %v6076_v53, %v190_v0 }
 0x12a   :  { %v6090_v2 = vsub.f32 %v6067_v40, %v215_v1  ;;  %v180_v1 = vld [vmem:[%s8297_s7] sm:$0xf] }
 0x12c   :  { %v231_v3 = vmul.f32 %v6090_v2, %v6090_v2 }
 0x12e   :  { %v243_v4 = vsel %vm181_vm1, %v231_v3, 0.0  ;;  %v6128_v3 = vperm.slane %v180_v1, 0 }
 0x12f   :  { %v193_v5 = vpop.xlane.xlu1 %192  ;;  %244 = vadd.xlane.f32.xlu0 %v243_v4 }
 0x130   :  { %v216_v6 = vmul.f32 %v6076_v53, %v193_v5 }
 0x132   :  { %v6097_v7 = vsub.f32 %v6072_v45, %v216_v6 }
 0x134   :  { %v232_v8 = vmul.f32 %v6097_v7, %v6097_v7 }
 0x136   :  { %v246_v9 = vsel %vm181_vm1, %v232_v8, 0.0 }
 0x137   :  { %247 = vadd.xlane.f32.xlu1 %v246_v9 }
 0x192   :  { %v239_v14 = vpop.xlane.xlu2 %238 }
 0x193   :  { %v261_v15 = vmul.f32 %v239_v14, %v6076_v53  ;;  %v43_v14 = vld [vmem:[%s8294_s0 + $0x40] sm:$0xff] }
 0x194   :  { %126 = vmatmul.f32.gmra.mxu0 %v43_v14 }
 0x195   :  { %v269_v16 = vadd.f32 1e-05, %v261_v15  ;;  %v44_v15 = vld [vmem:[%s8294_s0 + $0x48] sm:$0xff] }
 0x196   :  { %5018 = vmatmul.msk.f32.gmra.mxu1 %vm73_vm0, %v44_v15 }
 0x197   :  { %5531 = vrsqrt.f32 %v269_v16  ;;  %vm283_vm4 = vweird.f32 %v269_v16 }
 0x19a   :  { %v242_v17 = vpop.xlane.xlu2 %241 }
 0x19b   :  { %v262_v18 = vmul.f32 %v242_v17, %v6076_v53 }
 0x19d   :  { %v5532_v19 = vpop.eup %5531  ;;  %v270_v20 = vadd.f32 1e-05, %v262_v18 }
 0x19e   :  { %v278_v21 = vmul.f32 %v5532_v19, %v269_v16  ;;  %vm284_vm3 = vweird.f32 %v5532_v19 }
 0x19f   :  { %5533 = vrsqrt.f32 %v270_v20  ;;  %vm285_vm5 = vmor %vm283_vm4, %vm284_vm3  ;;  %vm293_vm7 = vweird.f32 %v270_v20 }
 0x1a0   :  { %v279_v22 = vmul.f32 %v5532_v19, %v278_v21 }
 0x1a2   :  { %v280_v23 = vmul.f32 0.5, %v279_v22  ;;  %v245_v24 = vpop.xlane.xlu0 %244 }
 0x1a3   :  { %v263_v25 = vmul.f32 %v245_v24, %v6076_v53 }
 0x1a4   :  { %v281_v26 = vsub.f32 1.5, %v280_v23 }
 0x1a5   :  { %v5534_v28 = vpop.eup %5533  ;;  %v271_v29 = vadd.f32 1e-05, %v263_v25 }
 0x1a6   :  { %v288_v31 = vmul.f32 %v5534_v28, %v270_v20  ;;  %v282_v32 = vmul.f32 %v5532_v19, %v281_v26  ;;  %vm294_vm6 = vweird.f32 %v5534_v28  ;;  %v45_v26 = vld [vmem:[%s8294_s0 + $0x50] sm:$0xff] }
 0x1a7   :  { %5535 = vrsqrt.f32 %v271_v29  ;;  %vm295_vm8 = vmor %vm293_vm7, %vm294_vm6  ;;  %vm303_vm10 = vweird.f32 %v271_v29  ;;  %129 = vmatmul.f32.gmra.mxu0 %v45_v26 }
 0x1a8   :  { %v289_v33 = vmul.f32 %v5534_v28, %v288_v31  ;;  %v286_v34 = vsel %vm285_vm5, %v5532_v19, %v282_v32  ;;  %v48_v31 = vld [vmem:[%s8294_s0 + $0x68] sm:$0xff] }
 0x1a9   :  { %v357_v36 = vmul.f32 %v286_v34, %v221_v56 }
 0x1aa   :  { %v290_v37 = vmul.f32 0.5, %v289_v33  ;;  %v248_v38 = vpop.xlane.xlu1 %247 }
 0x1ab   :  { %v264_v39 = vmul.f32 %v248_v38, %v6076_v53  ;;  %5022 = vmatmul.msk.f32.vlgmr.msra.gmra.mxu2 %vm181_vm1, %v357_v36 }
 0x1ac   :  { %v291_v41 = vsub.f32 1.5, %v290_v37  ;;  %v49_v37 = vld [vmem:[%s8294_s0 + $0x70] sm:$0xff] }
 0x1ad   :  { %v5536_v42 = vpop.eup %5535  ;;  %v272_v43 = vadd.f32 1e-05, %v264_v39 }
 0x1ae   :  { %v298_v44 = vmul.f32 %v5536_v42, %v271_v29  ;;  %v292_v46 = vmul.f32 %v5534_v28, %v291_v41  ;;  %vm304_vm9 = vweird.f32 %v5536_v42  ;;  %v47_v29 = vld [vmem:[%s8294_s0 + $0x60] sm:$0xff]  ;;  %v50_v41 = vld [vmem:[%s8294_s0 + $0x78] sm:$0xff] }
 0x1af   :  { %5537 = vrsqrt.f32 %v272_v43  ;;  %vm305_vm11 = vmor %vm303_vm10, %vm304_vm9  ;;  %vm313_vm13 = vweird.f32 %v272_v43  ;;  %132 = vmatmul.f32.gmra.mxu0 %v47_v29 }
 0x1b0   :  { %v299_v47 = vmul.f32 %v5536_v42, %v298_v44  ;;  %v296_v48 = vsel %vm295_vm8, %v5534_v28, %v292_v46  ;;  %v46_v28 = vld [vmem:[%s8294_s0 + $0x58] sm:$0xff] }
 0x1b1   :  { %v358_v49 = vmul.f32 %v296_v48, %v6083_v61  ;;  %5019 = vmatmul.msk.f32.gmra.mxu1 %vm73_vm0, %v46_v28 }
 0x1b2   :  { %v300_v50 = vmul.f32 0.5, %v299_v47 }
 0x1b3   :  { %5023 = vmatmul.msk.f32.gmra.mxu2 %vm181_vm1, %v358_v49 }
 0x1b4   :  { %v301_v51 = vsub.f32 1.5, %v300_v50 }
 0x1b5   :  { %v5538_v52 = vpop.eup %5537 }
 0x1b6   :  { %v308_v54 = vmul.f32 %v5538_v52, %v272_v43  ;;  %v302_v55 = vmul.f32 %v5536_v42, %v301_v51  ;;  %vm314_vm12 = vweird.f32 %v5538_v52 }
 0x1b7   :  { %vm315_vm14 = vmor %vm313_vm13, %vm314_vm12  ;;  %135 = vmatmul.f32.gmra.mxu0 %v49_v37 }
 0x1b8   :  { %v309_v56 = vmul.f32 %v5538_v52, %v308_v54  ;;  %v306_v57 = vsel %vm305_vm11, %v5536_v42, %v302_v55 }
 0x1b9   :  { %v359_v58 = vmul.f32 %v306_v57, %v6090_v2  ;;  %5020 = vmatmul.msk.f32.gmra.mxu1 %vm73_vm0, %v48_v31 }
 0x1ba   :  { %v310_v59 = vmul.f32 0.5, %v309_v56 }
 0x1bb   :  { %5024 = vmatmul.msk.f32.gmra.mxu2 %vm181_vm1, %v359_v58 }
 0x1bc   :  { %v311_v60 = vsub.f32 1.5, %v310_v59 }
 0x1be   :  { %v312_v61 = vmul.f32 %v5538_v52, %v311_v60 }
 0x1c0   :  { %v316_v62 = vsel %vm315_vm14, %v5538_v52, %v312_v61 }
 0x1c1   :  { %v360_v63 = vmul.f32 %v316_v62, %v6097_v7  ;;  %5021 = vmatmul.msk.f32.gmra.mxu1 %vm73_vm0, %v50_v41  ;;  %v435_v41 = vld [vmem:[%s8298_s4] sm:$0xff] }
 0x1c2   :  { %820 = vmatpush.msrb.mxu0 %v435_v41 }
 0x1c3   :  { %5025 = vmatmul.msk.f32.gmra.mxu2 %vm181_vm1, %v360_v63 }
 0x211   :  { %v127_v36 = vpop.f32.mrf.mxu0 }
 0x212   :  { %v128_v39 = vadd.f32 %v6054_v27, %v127_v36 }
 0x213   :  { %v168_v43 = vpop.f32.mrf.mxu1 }
 0x214   :  { %v6238_v48 = vadd.f32 %v168_v43, %v128_v39 }
 0x216   :  { %v194_v50 = vsel %vm181_vm1, %v6238_v48, 0.0 }
 0x224   :  { %v130_v14 = vpop.f32.mrf.mxu0 }
 0x22e   :  { %v411_v0 = vpop.f32.mrf.mxu2 }
 0x22f   :  { %v6146_v9 = vadd.f32 %v411_v0, %v6128_v3 }
 0x236   :  { %v414_v2 = vpop.f32.mrf.mxu2 }
 0x237   :  { %v6131_v4 = vadd.f32 %v414_v2, %v6128_v3 }
 0x239   :  { %445 = vrot.lane.b32.xlu1 %v6131_v4, %s5903_s15  ;;  %v6184_v25 = vpack.i.bf16 %v6146_v9, %v6131_v4 }
 0x23e   :  { %v417_v5 = vpop.f32.mrf.mxu2 }
 0x23f   :  { %v6136_v6 = vadd.f32 %v417_v5, %v6128_v3 }
 0x241   :  { %447 = vrot.lane.b32.xlu0 %v6136_v6, %s5903_s15 }
 0x246   :  { %v420_v7 = vpop.f32.mrf.mxu2 }
 0x247   :  { %v6141_v8 = vadd.f32 %v420_v7, %v6128_v3 }
 0x249   :  { %449 = vrot.lane.b32.xlu2 %v6141_v8, %s5903_s15  ;;  %v6178_v24 = vpack.i.bf16 %v6136_v6, %v6141_v8 }
 0x251   :  { %443 = vrot.lane.b32.xlu2 %v6146_v9, %s5903_s15 }
 0x2a3   :  { %v450_v10 = vpop.permute.xlu2 %449 }
 0x2a4   :  { %5030 = vmatpush.xpose.msk.msra.mxu3 %vm451_vm15, %v450_v10 }
 0x2ab   :  { %v446_v12 = vpop.permute.xlu1 %445  ;;  %v444_v13 = vpop.permute.xlu2 %443 }
 0x2b3   :  { %v448_v11 = vpop.permute.xlu0 %447 }
 0x2b4   :  { %5031 = vmatpush.xpose.msk.msra.mxu3 %vm451_vm15, %v448_v11 }
 0x2b8   :  { %5032 = vmatpush.xpose.msk.msra.mxu3 %vm451_vm15, %v446_v12 }
 0x2bc   :  { %5033 = vmatpush.xpose.msk.msra.mxu3 %vm451_vm15, %v444_v13 }
 0x2bf   :  { %5034 = vmatmul.msk.f32.vlgmr.msra.gmra.mxu3 %vm451_vm15, %v6146_v9 }
 0x2c7   :  { %5035 = vmatmul.msk.f32.gmra.mxu3 %vm451_vm15, %v6131_v4 }
 0x2cf   :  { %5036 = vmatmul.msk.f32.gmra.mxu3 %vm451_vm15, %v6136_v6 }
 0x2d7   :  { %5037 = vmatmul.msk.f32.gmra.mxu3 %vm451_vm15, %v6141_v8 }
 0x342   :  { %v485_v16 = vpop.f32.mrf.mxu3 }
 0x343   :  { %v497_v17 = vsel %vm181_vm1, %v485_v16, -inf }
 0x344   :  { %498 = vmax.xlane.f32.xlu0 %v497_v17  ;;  %v133_v17 = vpop.f32.mrf.mxu0 }
 0x34a   :  { %v488_v18 = vpop.f32.mrf.mxu3 }
 0x34b   :  { %v500_v19 = vsel %vm181_vm1, %v488_v18, -inf }
 0x34c   :  { %501 = vmax.xlane.f32.xlu2 %v500_v19  ;;  %v134_v19 = vadd.f32 %v6054_v27, %v133_v17 }
 0x352   :  { %v491_v20 = vpop.f32.mrf.mxu3 }
 0x353   :  { %v503_v21 = vsel %vm181_vm1, %v491_v20, -inf }
 0x354   :  { %504 = vmax.xlane.f32.xlu1 %v503_v21 }
 0x35a   :  { %v6172_v22 = vpop.f32.mrf.mxu3 }
 0x35b   :  { %v506_v23 = vsel %vm181_vm1, %v6172_v22, -inf }
 0x35c   :  { %507 = vmax.xlane.f32.xlu0 %v506_v23 }
 0x36d   :  { %5369 = vrot.lane.b32.xlu1 %v6178_v24, %s5904_s20 }
 0x370   :  { %5374 = vrot.lane.b32.xlu0 %v6184_v25, %s5904_s20 }
 0x375   :  { %606 = vrot.lane.b32.xlu1 %v6136_v6, %s5905_s21 }
 0x378   :  { %608 = vrot.lane.b32.xlu0 %v6141_v8, %s5905_s21 }
 0x37d   :  { %594 = vrot.lane.b32.xlu1 %v6146_v9, %s5906_s1 }
 0x380   :  { %602 = vrot.lane.b32.xlu0 %v6146_v9, %s5905_s21 }
 0x385   :  { %598 = vrot.lane.b32.xlu1 %v6136_v6, %s5906_s1 }
 0x388   :  { %596 = vrot.lane.b32.xlu0 %v6131_v4, %s5906_s1 }
 0x38d   :  { %848 = vrot.lane.b32.xlu1 %v6141_v8, %s5907_s2 }
 0x390   :  { %600 = vrot.lane.b32.xlu0 %v6141_v8, %s5906_s1 }
 0x395   :  { %842 = vrot.lane.b32.xlu1 %v6146_v9, %s5907_s2 }
 0x398   :  { %844 = vrot.lane.b32.xlu0 %v6131_v4, %s5907_s2 }
 0x39d   :  { %838 = vrot.lane.b32.xlu1 %v6136_v6, %s5908_s30 }
 0x3a0   :  { %836 = vrot.lane.b32.xlu0 %v6131_v4, %s5908_s30 }
 0x3b7   :  { %v499_v32 = vpop.xlane.xlu0 %498 }
 0x3b8   :  { %v509_v33 = vsub.f32 %v485_v16, %v499_v32  ;;  %v171_v16 = vpop.f32.mrf.mxu1  ;;  %v136_v32 = vpop.f32.mrf.mxu0 }
 0x3ba   :  { %v513_v34 = vmul.f32 1.442695, %v509_v33  ;;  %v137_v33 = vadd.f32 %v6054_v27, %v136_v32 }
 0x3bc   :  { %5539 = vpow2.f32 %v513_v34 }
 0x3bf   :  { %v502_v38 = vpop.xlane.xlu2 %501 }
 0x3c0   :  { %v510_v42 = vsub.f32 %v488_v18, %v502_v38  ;;  %v131_v18 = vadd.f32 %v6054_v27, %v130_v14  ;;  %v174_v21 = vpop.f32.mrf.mxu1 }
 0x3c1   :  { %v6271_v23 = vadd.f32 %v174_v21, %v134_v19 }
 0x3c2   :  { %v6234_v44 = vpop.eup %5539  ;;  %v515_v46 = vmul.f32 1.442695, %v510_v42 }
 0x3c3   :  { %v521_v47 = vsel %vm181_vm1, %v6234_v44, 0.0  ;;  %v200_v28 = vsel %vm181_vm1, %v6271_v23, 0.0 }
 0x3c4   :  { %5541 = vpow2.f32 %v515_v46  ;;  %522 = vadd.xlane.f32.xlu2 %v521_v47 }
 0x3c7   :  { %v505_v49 = vpop.xlane.xlu1 %504 }
 0x3c8   :  { %v511_v51 = vsub.f32 %v491_v20, %v505_v49  ;;  %v177_v36 = vpop.f32.mrf.mxu1 }
 0x3c9   :  { %v6281_v39 = vadd.f32 %v177_v36, %v137_v33 }
 0x3ca   :  { %v6242_v52 = vpop.eup %5541  ;;  %v517_v54 = vmul.f32 1.442695, %v511_v51  ;;  %195 = vadd.xlane.f32.xlu0 %v194_v50 }
 0x3cb   :  { %v524_v55 = vsel %vm181_vm1, %v6242_v52, 0.0  ;;  %v203_v27 = vsel %vm181_vm1, %v6281_v39, 0.0 }
 0x3cc   :  { %5543 = vpow2.f32 %v517_v54  ;;  %525 = vadd.xlane.f32.xlu2 %v524_v55 }
 0x3cf   :  { %v508_v56 = vpop.xlane.xlu0 %507 }
 0x3d0   :  { %v512_v57 = vsub.f32 %v6172_v22, %v508_v56  ;;  %v6269_v22 = vadd.f32 %v171_v16, %v131_v18 }
 0x3d2   :  { %v6247_v58 = vpop.eup %5543  ;;  %v519_v59 = vmul.f32 1.442695, %v512_v57  ;;  %v197_v26 = vsel %vm181_vm1, %v6269_v22, 0.0  ;;  %204 = vadd.xlane.f32.xlu0 %v203_v27 }
 0x3d3   :  { %v527_v60 = vsel %vm181_vm1, %v6247_v58, 0.0  ;;  %198 = vadd.xlane.f32.xlu1 %v197_v26 }
 0x3d4   :  { %5545 = vpow2.f32 %v519_v59  ;;  %528 = vadd.xlane.f32.xlu2 %v527_v60 }
 0x3da   :  { %v6251_v61 = vpop.eup %5545 }
 0x3db   :  { %v530_v62 = vsel %vm181_vm1, %v6251_v61, 0.0 }
 0x3dc   :  { %531 = vadd.xlane.f32.xlu2 %v530_v62 }
 0x3df   :  { %v5370_v63 = vpop.permute.xlu1 %5369 }
 0x3e0   :  { %v5371_v0 = vunpack.i.l.bf16 %v5370_v63  ;;  %v5372_v2 = vunpack.i.h.bf16 %v5370_v63 }
 0x3e2   :  { %577 = vmatpush.msrb.mxu3 %v5371_v0  ;;  %v5375_v1 = vpop.permute.xlu0 %5374 }
 0x3e3   :  { %v5376_v5 = vunpack.i.l.bf16 %v5375_v1  ;;  %v5377_v7 = vunpack.i.h.bf16 %v5375_v1 }
 0x3e4   :  { %578 = vmatpush.msrb.mxu3 %v5372_v2 }
 0x3e6   :  { %579 = vmatpush.msrb.mxu3 %v5376_v5 }
 0x3e7   :  { %v607_v11 = vpop.permute.xlu1 %606 }
 0x3e8   :  { %580 = vmatpush.msrb.mxu3 %v5377_v7 }
 0x3ea   :  { %v609_v10 = vpop.permute.xlu0 %608 }
 0x3eb   :  { %5042 = vmatpush.xpose.msk.msrb.mxu1 %vm451_vm15, %v609_v10 }
 0x3ef   :  { %5043 = vmatpush.xpose.msk.msrb.mxu1 %vm451_vm15, %v607_v11 }
 0x3f2   :  { %v603_v12 = vpop.permute.xlu0 %602 }
 0x3f4   :  { %604 = vrot.lane.b32.xlu2 %v6131_v4, %s5905_s21 }
 0x3fa   :  { %v597_v13 = vpop.permute.xlu0 %596 }
 0x3fc   :  { %846 = vrot.lane.b32.xlu2 %v6136_v6, %s5907_s2 }
 0x402   :  { %v6265_v15 = vpop.permute.xlu0 %600 }
 0x404   :  { %834 = vrot.lane.b32.xlu2 %v6146_v9, %s5908_s30 }
 0x40a   :  { %v845_v20 = vpop.permute.xlu0 %844 }
 0x40c   :  { %840 = vrot.lane.b32.xlu2 %v6141_v8, %s5908_s30 }
 0x412   :  { %v6277_v29 = vpop.permute.xlu0 %836 }
 0x435   :  { %201 = vadd.xlane.f32.xlu2 %v200_v28 }
 0x437   :  { %v523_v31 = vpop.xlane.xlu2 %522 }
 0x438   :  { %5547 = vrcp.f32 %v523_v31 }
 0x43d   :  { %v196_v34 = vpop.xlane.xlu0 %195 }
 0x43e   :  { %v5548_v37 = vpop.eup %5547  ;;  %v217_v38 = vmul.f32 %v6076_v53, %v196_v34 }
 0x43f   :  { %v526_v42 = vpop.xlane.xlu2 %525  ;;  %v537_v43 = vmul.f32 %v5548_v37, %v6234_v44  ;;  %v595_v44 = vpop.permute.xlu1 %594 }
 0x440   :  { %v225_v46 = vsub.f32 %v6238_v48, %v217_v38  ;;  %5549 = vrcp.f32 %v526_v42 }
 0x441   :  { %5038 = vmatmul.msk.f32.vlgmr.msrb.gmra.mxu3 %vm181_vm1, %v537_v43 }
 0x442   :  { %v233_v47 = vmul.f32 %v225_v46, %v225_v46 }
 0x444   :  { %v249_v49 = vsel %vm181_vm1, %v233_v47, 0.0 }
 0x445   :  { %250 = vadd.xlane.f32.xlu2 %v249_v49  ;;  %v205_v27 = vpop.xlane.xlu0 %204 }
 0x446   :  { %v5550_v50 = vpop.eup %5549  ;;  %v220_v47 = vmul.f32 %v6076_v53, %v205_v27 }
 0x447   :  { %v529_v51 = vpop.xlane.xlu2 %528  ;;  %v538_v54 = vmul.f32 %v5550_v50, %v6242_v52  ;;  %v599_v59 = vpop.permute.xlu1 %598 }
 0x448   :  { %5551 = vrcp.f32 %v529_v51  ;;  %v6333_v51 = vsub.f32 %v6281_v39, %v220_v47 }
 0x449   :  { %5039 = vmatmul.msk.f32.gmra.mxu3 %vm181_vm1, %v538_v54 }
 0x44e   :  { %v5552_v55 = vpop.eup %5551 }
 0x44f   :  { %v532_v56 = vpop.xlane.xlu2 %531  ;;  %v539_v57 = vmul.f32 %v5552_v55, %v6247_v58  ;;  %v849_v52 = vpop.permute.xlu1 %848  ;;  %v236_v55 = vmul.f32 %v6333_v51, %v6333_v51 }
 0x450   :  { %5553 = vrcp.f32 %v532_v56 }
 0x451   :  { %5040 = vmatmul.msk.f32.gmra.mxu3 %vm181_vm1, %v539_v57 }
 0x456   :  { %v5554_v60 = vpop.eup %5553 }
 0x457   :  { %v605_v62 = vpop.permute.xlu2 %604  ;;  %v540_v63 = vmul.f32 %v5554_v60, %v6251_v61  ;;  %v843_v61 = vpop.permute.xlu1 %842 }
 0x458   :  { %5044 = vmatpush.xpose.msk.msrb.mxu1 %vm451_vm15, %v605_v62 }
 0x459   :  { %5041 = vmatmul.msk.f32.gmra.mxu3 %vm181_vm1, %v540_v63 }
 0x45c   :  { %5045 = vmatpush.xpose.msk.msrb.mxu1 %vm451_vm15, %v603_v12 }
 0x45f   :  { %5046 = vmatmul.msk.f32.vlgmr.msrb.gmra.mxu1 %vm451_vm15, %v595_v44  ;;  %v847_v58 = vpop.permute.xlu2 %846  ;;  %v839_v19 = vpop.permute.xlu1 %838 }
 0x460   :  { %5355 = vmatpush.msra.mxu1 %v435_v41 }
 0x462   :  { %5062 = vmatpush.xpose.msk.msrb.mxu1 %vm451_vm15, %v849_v52 }
 0x466   :  { %5063 = vmatpush.xpose.msk.msrb.mxu1 %vm451_vm15, %v847_v58 }
 0x467   :  { %5047 = vmatmul.msk.f32.gmra.mxu1 %vm451_vm15, %v597_v13  ;;  %v835_v0 = vpop.permute.xlu2 %834  ;;  %v199_v28 = vpop.xlane.xlu1 %198 }
 0x468   :  { %v218_v31 = vmul.f32 %v6076_v53, %v199_v28 }
 0x46a   :  { %5064 = vmatpush.xpose.msk.msrb.mxu1 %vm451_vm15, %v845_v20  ;;  %v6316_v34 = vsub.f32 %v6269_v22, %v218_v31 }
 0x46c   :  { %v234_v38 = vmul.f32 %v6316_v34, %v6316_v34 }
 0x46e   :  { %5065 = vmatpush.xpose.msk.msrb.mxu1 %vm451_vm15, %v843_v61  ;;  %v252_v43 = vsel %vm181_vm1, %v234_v38, 0.0 }
 0x46f   :  { %5048 = vmatmul.msk.f32.gmra.mxu1 %vm451_vm15, %v599_v59  ;;  %v841_v1 = vpop.permute.xlu2 %840  ;;  %v258_v59 = vsel %vm181_vm1, %v236_v55, 0.0 }
 0x477   :  { %5049 = vmatmul.msk.f32.gmra.mxu1 %vm451_vm15, %v6265_v15 }
 0x4a8   :  { %v202_v2 = vpop.xlane.xlu2 %201 }
 0x4a9   :  { %v219_v37 = vmul.f32 %v6076_v53, %v202_v2 }
 0x4ab   :  { %v6324_v42 = vsub.f32 %v6271_v23, %v219_v37 }
 0x4ad   :  { %v235_v49 = vmul.f32 %v6324_v42, %v6324_v42 }
 0x4af   :  { %v255_v54 = vsel %vm181_vm1, %v235_v49, 0.0 }
 0x4b8   :  { %v251_v5 = vpop.xlane.xlu2 %250 }
 0x4b9   :  { %v265_v7 = vmul.f32 %v251_v5, %v6076_v53 }
 0x4bb   :  { %v273_v10 = vadd.f32 1e-05, %v265_v7 }
 0x4bd   :  { %5555 = vrsqrt.f32 %v273_v10  ;;  %vm323_vm0 = vweird.f32 %v273_v10 }
 0x4c3   :  { %v5556_v11 = vpop.eup %5555 }
 0x4c4   :  { %v318_v12 = vmul.f32 %v5556_v11, %v273_v10  ;;  %v582_v13 = vpop.f32.mrf.mxu3  ;;  %vm324_vm2 = vweird.f32 %v5556_v11 }
 0x4c5   :  { %5058 = vmatmul.msk.f32.vlgmr.msrb.gmra.mxu0 %vm451_vm15, %v582_v13  ;;  %vm325_vm3 = vmor %vm323_vm0, %vm324_vm2 }
 0x4c6   :  { %v319_v14 = vmul.f32 %v5556_v11, %v318_v12 }
 0x4c8   :  { %v320_v16 = vmul.f32 0.5, %v319_v14 }
 0x4ca   :  { %v321_v17 = vsub.f32 1.5, %v320_v16 }
 0x4cc   :  { %v585_v15 = vpop.f32.mrf.mxu3  ;;  %v322_v18 = vmul.f32 %v5556_v11, %v321_v17 }
 0x4cd   :  { %5059 = vmatmul.msk.f32.gmra.mxu0 %vm451_vm15, %v585_v15 }
 0x4ce   :  { %v326_v20 = vsel %vm325_vm3, %v5556_v11, %v322_v18 }
 0x4cf   :  { %v361_v21 = vmul.f32 %v326_v20, %v225_v46 }
 0x4d1   :  { %5026 = vmatmul.msk.f32.gmra.mxu2 %vm181_vm1, %v361_v21 }
 0x4d4   :  { %v588_v26 = vpop.f32.mrf.mxu3 }
 0x4d5   :  { %5060 = vmatmul.msk.f32.vlgmr.msra.gmra.mxu1 %vm451_vm15, %v588_v26 }
 0x4dc   :  { %v591_v32 = vpop.f32.mrf.mxu3  ;;  %v643_v33 = vpop.f32.mrf.mxu1 }
 0x4dd   :  { %5061 = vmatmul.msk.f32.gmra.mxu1 %vm451_vm15, %v591_v32  ;;  %v655_v36 = vsel %vm181_vm1, %v643_v33, -inf }
 0x4de   :  { %656 = vmax.xlane.f32.xlu1 %v655_v36 }
 0x4e4   :  { %v646_v41 = vpop.f32.mrf.mxu1 }
 0x4e5   :  { %5066 = vmatmul.msk.f32.vlgmr.msrb.gmra.mxu1 %vm451_vm15, %v835_v0  ;;  %v658_v46 = vsel %vm181_vm1, %v646_v41, -inf }
 0x4e6   :  { %253 = vadd.xlane.f32.xlu1 %v252_v43  ;;  %659 = vmax.xlane.f32.xlu0 %v658_v46 }
 0x4ec   :  { %v649_v50 = vpop.f32.mrf.mxu1 }
 0x4ed   :  { %5067 = vmatmul.msk.f32.gmra.mxu1 %vm451_vm15, %v6277_v29  ;;  %v661_v44 = vsel %vm181_vm1, %v649_v50, -inf }
 0x4ee   :  { %256 = vadd.xlane.f32.xlu0 %v255_v54  ;;  %662 = vmax.xlane.f32.xlu2 %v661_v44 }
 0x4f4   :  { %v6341_v56 = vpop.f32.mrf.mxu1 }
 0x4f5   :  { %5068 = vmatmul.msk.f32.gmra.mxu1 %vm451_vm15, %v839_v19  ;;  %v664_v57 = vsel %vm181_vm1, %v6341_v56, -inf }
 0x4f6   :  { %665 = vmax.xlane.f32.xlu1 %v664_v57  ;;  %259 = vadd.xlane.f32.xlu2 %v258_v59 }
 0x4fd   :  { %5069 = vmatmul.msk.f32.gmra.mxu1 %vm451_vm15, %v841_v1 }
 0x551   :  { %v657_v29 = vpop.xlane.xlu1 %656 }
 0x552   :  { %v667_v60 = vsub.f32 %v643_v33, %v657_v29  ;;  %v6348_v62 = vpop.f32.mrf.mxu1 }
 0x554   :  { %v671_v63 = vmul.f32 1.442695, %v667_v60 }
 0x556   :  { %5557 = vpow2.f32 %v671_v63 }
 0x559   :  { %v254_v52 = vpop.xlane.xlu1 %253  ;;  %v660_v58 = vpop.xlane.xlu0 %659 }
 0x55a   :  { %v266_v61 = vmul.f32 %v254_v52, %v6076_v53  ;;  %v668_v0 = vsub.f32 %v646_v41, %v660_v58  ;;  %v6351_v2 = vpop.f32.mrf.mxu1 }
 0x55c   :  { %v6353_v5 = vpop.eup %5557  ;;  %v274_v7 = vadd.f32 1e-05, %v266_v61  ;;  %v673_v10 = vmul.f32 1.442695, %v668_v0 }
 0x55d   :  { %v679_v1 = vsel %vm181_vm1, %v6353_v5, 0.0 }
 0x55e   :  { %5559 = vrsqrt.f32 %v274_v7  ;;  %680 = vadd.xlane.f32.xlu0 %v679_v1  ;;  %vm333_vm5 = vweird.f32 %v274_v7 }
 0x55f   :  { %5561 = vpow2.f32 %v673_v10 }
 0x561   :  { %v663_v11 = vpop.xlane.xlu2 %662  ;;  %v257_v12 = vpop.xlane.xlu0 %256 }
 0x562   :  { %v669_v13 = vsub.f32 %v649_v50, %v663_v11  ;;  %v267_v14 = vmul.f32 %v257_v12, %v6076_v53  ;;  %v6358_v16 = vpop.f32.mrf.mxu1 }
 0x563   :  { %v895_v21 = vsel %vm181_vm1, %v6358_v16, -inf }
 0x564   :  { %v5560_v17 = vpop.eup %5559  ;;  %v675_v15 = vmul.f32 1.442695, %v669_v13  ;;  %v275_v18 = vadd.f32 1e-05, %v267_v14 }
 0x565   :  { %v6360_v19 = vpop.eup %5561  ;;  %v328_v20 = vmul.f32 %v5560_v17, %v274_v7  ;;  %vm334_vm4 = vweird.f32 %v5560_v17 }
 0x566   :  { %5563 = vpow2.f32 %v675_v15  ;;  %v682_v26 = vsel %vm181_vm1, %v6360_v19, 0.0  ;;  %896 = vmax.xlane.f32.xlu0 %v895_v21  ;;  %vm335_vm6 = vmor %vm333_vm5, %vm334_vm4  ;;  %vm343_vm8 = vweird.f32 %v275_v18 }
 0x567   :  { %v329_v28 = vmul.f32 %v5560_v17, %v328_v20  ;;  %5565 = vrsqrt.f32 %v275_v18  ;;  %683 = vadd.xlane.f32.xlu2 %v682_v26 }
 0x569   :  { %v330_v31 = vmul.f32 0.5, %v329_v28  ;;  %v260_v32 = vpop.xlane.xlu2 %259 }
 0x56a   :  { %v268_v33 = vmul.f32 %v260_v32, %v6076_v53  ;;  %v6367_v36 = vpop.f32.mrf.mxu1 }
 0x56b   :  { %v331_v37 = vsub.f32 1.5, %v330_v31  ;;  %v898_v38 = vsel %vm181_vm1, %v6367_v36, -inf }
 0x56c   :  { %v6371_v41 = vpop.eup %5563  ;;  %v276_v43 = vadd.f32 1e-05, %v268_v33  ;;  %899 = vmax.xlane.f32.xlu1 %v898_v38 }
 0x56d   :  { %v5566_v46 = vpop.eup %5565  ;;  %v685_v27 = vsel %vm181_vm1, %v6371_v41, 0.0  ;;  %v332_v47 = vmul.f32 %v5560_v17, %v331_v37 }
 0x56e   :  { %v338_v49 = vmul.f32 %v5566_v46, %v275_v18  ;;  %5567 = vrsqrt.f32 %v276_v43  ;;  %vm344_vm7 = vweird.f32 %v5566_v46  ;;  %vm353_vm11 = vweird.f32 %v276_v43 }
 0x56f   :  { %686 = vadd.xlane.f32.xlu2 %v685_v27  ;;  %v336_v50 = vsel %vm335_vm6, %v5560_v17, %v332_v47  ;;  %vm345_vm9 = vmor %vm343_vm8, %vm344_vm7 }
 0x570   :  { %v339_v54 = vmul.f32 %v5566_v46, %v338_v49  ;;  %v362_v44 = vmul.f32 %v336_v50, %v6316_v34 }
 0x572   :  { %v340_v55 = vmul.f32 0.5, %v339_v54  ;;  %5027 = vmatmul.msk.f32.gmra.mxu2 %vm181_vm1, %v362_v44  ;;  %v6388_v12 = vpop.f32.mrf.mxu1 }
 0x573   :  { %v901_v14 = vsel %vm181_vm1, %v6388_v12, -inf }
 0x574   :  { %v341_v57 = vsub.f32 1.5, %v340_v55  ;;  %v5568_v59 = vpop.eup %5567 }
 0x575   :  { %v348_v29 = vmul.f32 %v5568_v59, %v276_v43  ;;  %vm354_vm10 = vweird.f32 %v5568_v59 }
 0x576   :  { %v342_v60 = vmul.f32 %v5566_v46, %v341_v57  ;;  %vm355_vm12 = vmor %vm353_vm11, %vm354_vm10 }
 0x577   :  { %v349_v63 = vmul.f32 %v5568_v59, %v348_v29 }
 0x578   :  { %v346_v52 = vsel %vm345_vm9, %v5566_v46, %v342_v60 }
 0x579   :  { %v363_v58 = vmul.f32 %v346_v52, %v6324_v42  ;;  %v350_v61 = vmul.f32 0.5, %v349_v63  ;;  %v666_v42 = vpop.xlane.xlu1 %665 }
 0x57a   :  { %5384 = vrot.lane.b32.xlu0 %v6184_v25, %s5909_s17  ;;  %v670_v1 = vsub.f32 %v6341_v56, %v666_v42  ;;  %v6396_v17 = vpop.f32.mrf.mxu1 }
 0x57b   :  { %5028 = vmatmul.msk.f32.gmra.mxu2 %vm181_vm1, %v363_v58  ;;  %v351_v34 = vsub.f32 1.5, %v350_v61  ;;  %v904_v15 = vsel %vm181_vm1, %v6396_v17, -inf }
 0x57c   :  { %v677_v11 = vmul.f32 1.442695, %v670_v1 }
 0x57d   :  { %v352_v0 = vmul.f32 %v5568_v59, %v351_v34 }
 0x57e   :  { %5569 = vpow2.f32 %v677_v11 }
 0x57f   :  { %v356_v7 = vsel %vm355_vm12, %v5568_v59, %v352_v0 }
 0x580   :  { %v364_v10 = vmul.f32 %v356_v7, %v6333_v51 }
 0x583   :  { %5029 = vmatmul.msk.f32.gmra.mxu2 %vm181_vm1, %v364_v10 }
 0x584   :  { %v6390_v13 = vpop.eup %5569 }
 0x585   :  { %5379 = vrot.lane.b32.xlu1 %v6178_v24, %s5909_s17  ;;  %v688_v51 = vsel %vm181_vm1, %v6390_v13, 0.0 }
 0x587   :  { %5389 = vrot.lane.b32.xlu2 %v6178_v24, %s5910_s18 }
 0x5af   :  { %689 = vadd.xlane.f32.xlu1 %v688_v51 }
 0x5b0   :  { %902 = vmax.xlane.f32.xlu2 %v901_v14 }
 0x5b8   :  { %905 = vmax.xlane.f32.xlu2 %v904_v15 }
 0x5d0   :  { %5394 = vrot.lane.b32.xlu2 %v6184_v25, %s5910_s18 }
 0x5d1   :  { %v681_v56 = vpop.xlane.xlu0 %680 }
 0x5d9   :  { %v897_v18 = vpop.xlane.xlu0 %896 }
 0x5da   :  { %v907_v20 = vsub.f32 %v6358_v16, %v897_v18  ;;  %v684_v33 = vpop.xlane.xlu2 %683 }
 0x5dc   :  { %v911_v21 = vmul.f32 1.442695, %v907_v20 }
 0x5de   :  { %5571 = vpow2.f32 %v911_v21 }
 0x5df   :  { %v900_v28 = vpop.xlane.xlu1 %899 }
 0x5e0   :  { %v908_v32 = vsub.f32 %v6367_v36, %v900_v28 }
 0x5e2   :  { %v913_v37 = vmul.f32 1.442695, %v908_v32  ;;  %v687_v38 = vpop.xlane.xlu2 %686 }
 0x5e4   :  { %v6403_v26 = vpop.eup %5571  ;;  %5573 = vpow2.f32 %v913_v37 }
 0x5e5   :  { %v919_v31 = vsel %vm181_vm1, %v6403_v26, 0.0  ;;  %5575 = vrcp.f32 %v681_v56 }
 0x5e6   :  { %920 = vadd.xlane.f32.xlu0 %v919_v31  ;;  %5577 = vrcp.f32 %v684_v33 }
 0x5e7   :  { %5579 = vrcp.f32 %v687_v38 }
 0x5ea   :  { %v6408_v43 = vpop.eup %5573  ;;  %v5390_v54 = vpop.permute.xlu2 %5389 }
 0x5eb   :  { %v922_v16 = vsel %vm181_vm1, %v6408_v43, 0.0  ;;  %v5576_v49 = vpop.eup %5575  ;;  %v5391_v57 = vunpack.i.l.bf16 %v5390_v54  ;;  %v5392_v59 = vunpack.i.h.bf16 %v5390_v54 }
 0x5ec   :  { %v5385_v47 = vpop.permute.xlu0 %5384  ;;  %v695_v55 = vmul.f32 %v5576_v49, %v6353_v5  ;;  %v5578_v29 = vpop.eup %5577 }
 0x5ed   :  { %v5386_v50 = vunpack.i.l.bf16 %v5385_v47  ;;  %v5387_v44 = vunpack.i.h.bf16 %v5385_v47  ;;  %v696_v60 = vmul.f32 %v5578_v29, %v6360_v19  ;;  %v5580_v63 = vpop.eup %5579  ;;  %v423_v5 = vpop.f32.mrf.mxu2 }
 0x5ee   :  { %v697_v52 = vmul.f32 %v5580_v63, %v6371_v41  ;;  %v6423_v58 = vadd.f32 %v423_v5, %v6128_v3 }
 0x5f7   :  { %v5380_v46 = vpop.permute.xlu1 %5379 }
 0x5f8   :  { %v5381_v27 = vunpack.i.l.bf16 %v5380_v46  ;;  %v5382_v36 = vunpack.i.h.bf16 %v5380_v46 }
 0x5f9   :  { %923 = vadd.xlane.f32.xlu2 %v922_v16 }
 0x5fa   :  { %1049 = vrot.lane.b32.xlu0 %v6136_v6, %s5911_s19  ;;  %735 = vmatpush.msrb.mxu2 %v5381_v27 }
 0x5fc   :  { %736 = vmatpush.msrb.mxu2 %v5382_v36 }
 0x5fe   :  { %737 = vmatpush.msrb.mxu2 %v5386_v50 }
 0x600   :  { %738 = vmatpush.msrb.mxu2 %v5387_v44 }
 0x601   :  { %5050 = vmatmul.msk.f32.vlgmr.msrb.gmra.mxu2 %vm181_vm1, %v695_v55 }
 0x602   :  { %975 = vmatpush.msra.mxu2 %v5391_v57 }
 0x604   :  { %976 = vmatpush.msra.mxu2 %v5392_v59 }
 0x609   :  { %5051 = vmatmul.msk.f32.gmra.mxu2 %vm181_vm1, %v696_v60 }
 0x611   :  { %1037 = vrot.lane.b32.xlu2 %v6146_v9, %s5912_s22  ;;  %5052 = vmatmul.msk.f32.gmra.mxu2 %vm181_vm1, %v697_v52 }
 0x619   :  { %1244 = vrot.lane.b32.xlu2 %v6423_v58, %s5903_s15 }
 0x622   :  { %v690_v61 = vpop.xlane.xlu1 %689 }
 0x623   :  { %5581 = vrcp.f32 %v690_v61  ;;  %v903_v19 = vpop.xlane.xlu2 %902 }
 0x624   :  { %v909_v34 = vsub.f32 %v6388_v12, %v903_v19 }
 0x626   :  { %v915_v0 = vmul.f32 1.442695, %v909_v34 }
 0x628   :  { %5583 = vpow2.f32 %v915_v0 }
 0x629   :  { %v5582_v41 = vpop.eup %5581 }
 0x62a   :  { %v698_v7 = vmul.f32 %v5582_v41, %v6390_v13  ;;  %v426_v13 = vpop.f32.mrf.mxu2 }
 0x62b   :  { %v906_v10 = vpop.xlane.xlu2 %905 }
 0x62c   :  { %v910_v42 = vsub.f32 %v6396_v17, %v906_v10  ;;  %5053 = vmatmul.msk.f32.gmra.mxu2 %vm181_vm1, %v698_v7  ;;  %v6491_v7 = vpop.f32.mrf.mxu0 }
 0x62e   :  { %v5584_v1 = vpop.eup %5583  ;;  %v917_v11 = vmul.f32 1.442695, %v910_v42 }
 0x62f   :  { %v925_v51 = vsel %vm181_vm1, %v5584_v1, 0.0 }
 0x630   :  { %5585 = vpow2.f32 %v917_v11  ;;  %926 = vadd.xlane.f32.xlu1 %v925_v51 }
 0x632   :  { %v429_v17 = vpop.f32.mrf.mxu2 }
 0x633   :  { %v5395_v14 = vpop.permute.xlu2 %5394 }
 0x634   :  { %v5396_v15 = vunpack.i.l.bf16 %v5395_v14  ;;  %v5397_v12 = vunpack.i.h.bf16 %v5395_v14  ;;  %v6494_v42 = vpop.f32.mrf.mxu0 }
 0x636   :  { %v5586_v56 = vpop.eup %5585  ;;  %977 = vmatpush.msra.mxu2 %v5396_v15 }
 0x637   :  { %v928_v18 = vsel %vm181_vm1, %v5586_v56, 0.0 }
 0x638   :  { %929 = vadd.xlane.f32.xlu0 %v928_v18  ;;  %978 = vmatpush.msra.mxu2 %v5397_v12 }
 0x63a   :  { %v432_v21 = vpop.f32.mrf.mxu2 }
 0x63b   :  { %v6446_v28 = vadd.f32 %v432_v21, %v6128_v3 }
 0x649   :  { %1051 = vrot.lane.b32.xlu1 %v6141_v8, %s5911_s19 }
 0x64c   :  { %1047 = vrot.lane.b32.xlu0 %v6131_v4, %s5911_s19 }
 0x651   :  { %1045 = vrot.lane.b32.xlu1 %v6146_v9, %s5911_s19 }
 0x654   :  { %1039 = vrot.lane.b32.xlu0 %v6131_v4, %s5912_s22  ;;  %v6452_v4 = vadd.f32 %v429_v17, %v6128_v3 }
 0x659   :  { %1041 = vrot.lane.b32.xlu1 %v6136_v6, %s5912_s22  ;;  %v921_v20 = vpop.xlane.xlu0 %920  ;;  %v436_v6 = vld [vmem:[%s8298_s4 + $0x8] sm:$0xff] }
 0x65a   :  { %5587 = vrcp.f32 %v921_v20  ;;  %779 = vmatpush.msra.mxu3 %v436_v6 }
 0x65c   :  { %1043 = vrot.lane.b32.xlu0 %v6141_v8, %s5912_s22  ;;  %v6461_v8 = vadd.f32 %v426_v13, %v6128_v3 }
 0x660   :  { %v5588_v31 = vpop.eup %5587 }
 0x661   :  { %v935_v32 = vmul.f32 %v5588_v31, %v6403_v26  ;;  %1250 = vrot.lane.b32.xlu1 %v6446_v28, %s5903_s15 }
 0x663   :  { %5070 = vmatmul.msk.f32.vlgmr.msra.gmra.mxu2 %vm181_vm1, %v935_v32 }
 0x664   :  { %1248 = vrot.lane.b32.xlu0 %v6452_v4, %s5903_s15 }
 0x669   :  { %1246 = vrot.lane.b32.xlu1 %v6461_v8, %s5903_s15 }
 0x66c   :  { %v924_v9 = vpop.xlane.xlu2 %923  ;;  %v1050_v3 = vpop.permute.xlu0 %1049 }
 0x66d   :  { %5589 = vrcp.f32 %v924_v9 }
 0x673   :  { %v5590_v26 = vpop.eup %5589 }
 0x674   :  { %v936_v33 = vmul.f32 %v5590_v26, %v6408_v43  ;;  %v437_v43 = vld [vmem:[%s8298_s4 + $0x10] sm:$0xff]  ;;  %v1038_v29 = vpop.permute.xlu2 %1037 }
 0x675   :  { %1019 = vmatpush.msrb.mxu3 %v437_v43 }
 0x676   :  { %5071 = vmatmul.msk.f32.gmra.mxu2 %vm181_vm1, %v936_v33 }
 0x67c   :  { %v1245_v19 = vpop.permute.xlu2 %1244 }
 0x684   :  { %v740_v37 = vpop.f32.mrf.mxu2 }
 0x685   :  { %5054 = vmatmul.msk.f32.vlgmr.msra.gmra.mxu3 %vm451_vm15, %v740_v37 }
 0x68c   :  { %v743_v38 = vpop.f32.mrf.mxu2 }
 0x68d   :  { %5055 = vmatmul.msk.f32.gmra.mxu3 %vm451_vm15, %v743_v38 }
 0x694   :  { %v746_v46 = vpop.f32.mrf.mxu2 }
 0x695   :  { %5056 = vmatmul.msk.f32.gmra.mxu3 %vm451_vm15, %v746_v46 }
 0x6a3   :  { %v927_v16 = vpop.xlane.xlu1 %926 }
 0x6a4   :  { %5591 = vrcp.f32 %v927_v16 }
 0x6aa   :  { %v5592_v27 = vpop.eup %5591 }
 0x6ab   :  { %v930_v47 = vpop.xlane.xlu0 %929  ;;  %v937_v36 = vmul.f32 %v5592_v27, %v5584_v1 }
 0x6ac   :  { %5593 = vrcp.f32 %v930_v47 }
 0x6ad   :  { %5072 = vmatmul.msk.f32.gmra.mxu2 %vm181_vm1, %v937_v36 }
 0x6af   :  { %v749_v49 = vpop.f32.mrf.mxu2 }
 0x6b0   :  { %5057 = vmatmul.msk.f32.gmra.mxu3 %vm451_vm15, %v749_v49 }
 0x6b2   :  { %v5594_v50 = vpop.eup %5593 }
 0x6b3   :  { %v938_v54 = vmul.f32 %v5594_v50, %v5586_v56 }
 0x6b5   :  { %5073 = vmatmul.msk.f32.gmra.mxu2 %vm181_vm1, %v938_v54 }
 0x6bb   :  { %v1052_v44 = vpop.permute.xlu1 %1051 }
 0x6bc   :  { %5078 = vmatpush.xpose.msk.msra.mxu0 %vm451_vm15, %v1052_v44 }
 0x6be   :  { %v1048_v55 = vpop.permute.xlu0 %1047 }
 0x6c0   :  { %5079 = vmatpush.xpose.msk.msra.mxu0 %vm451_vm15, %v1050_v3 }
 0x6c3   :  { %v1046_v57 = vpop.permute.xlu1 %1045 }
 0x6c4   :  { %5080 = vmatpush.xpose.msk.msra.mxu0 %vm451_vm15, %v1048_v55 }
 0x6c6   :  { %v1040_v59 = vpop.permute.xlu0 %1039 }
 0x6c8   :  { %5081 = vmatpush.xpose.msk.msra.mxu0 %vm451_vm15, %v1046_v57 }
 0x6cb   :  { %v1042_v60 = vpop.permute.xlu1 %1041  ;;  %5082 = vmatmul.msk.f32.vlgmr.msra.gmra.mxu0 %vm451_vm15, %v1038_v29 }
 0x6ce   :  { %v1044_v63 = vpop.permute.xlu0 %1043 }
 0x6d3   :  { %v1251_v52 = vpop.permute.xlu1 %1250  ;;  %5083 = vmatmul.msk.f32.gmra.mxu0 %vm451_vm15, %v1040_v59 }
 0x6d4   :  { %5094 = vmatpush.xpose.msk.msra.mxu3 %vm451_vm15, %v1251_v52 }
 0x6d6   :  { %v1249_v5 = vpop.permute.xlu0 %1248 }
 0x6d8   :  { %5095 = vmatpush.xpose.msk.msra.mxu3 %vm451_vm15, %v1249_v5 }
 0x6db   :  { %v1247_v61 = vpop.permute.xlu1 %1246  ;;  %5084 = vmatmul.msk.f32.gmra.mxu0 %vm451_vm15, %v1042_v60 }
 0x6dc   :  { %5096 = vmatpush.xpose.msk.msra.mxu3 %vm451_vm15, %v1247_v61 }
 0x6e0   :  { %5097 = vmatpush.xpose.msk.msra.mxu3 %vm451_vm15, %v1245_v19 }
 0x6e3   :  { %5085 = vmatmul.msk.f32.gmra.mxu0 %vm451_vm15, %v1044_v63 }
 0x6e6   :  { %v980_v34 = vpop.f32.mrf.mxu2 }
 0x6e7   :  { %5074 = vmatmul.msk.f32.vlgmr.msrb.gmra.mxu3 %vm451_vm15, %v980_v34 }
 0x6e8   :  { %1579 = vmatpush.msrb.mxu3 %v436_v6 }
 0x6f9   :  { %v983_v0 = vpop.f32.mrf.mxu2 }
 0x6fa   :  { %5075 = vmatmul.msk.f32.gmra.mxu3 %vm451_vm15, %v983_v0 }
 0x708   :  { %v6514_v13 = vpop.f32.mrf.mxu3 }
 0x710   :  { %v6520_v17 = vpop.f32.mrf.mxu3 }
 0x730   :  { %v986_v41 = vpop.f32.mrf.mxu2 }
 0x731   :  { %5076 = vmatmul.msk.f32.gmra.mxu3 %vm451_vm15, %v986_v41 }
 0x738   :  { %v989_v10 = vpop.f32.mrf.mxu2 }
 0x739   :  { %5077 = vmatmul.msk.f32.gmra.mxu3 %vm451_vm15, %v989_v10 }
 0x741   :  { %5098 = vmatmul.msk.f32.vlgmr.msra.gmra.mxu3 %vm451_vm15, %v6423_v58 }
 0x742   :  { %1819 = vmatpush.msra.mxu3 %v437_v43 }
 0x748   :  { %v1086_v1 = vpop.f32.mrf.mxu0 }
 0x749   :  { %5099 = vmatmul.msk.f32.gmra.mxu3 %vm451_vm15, %v6461_v8  ;;  %v1098_v11 = vsel %vm181_vm1, %v1086_v1, -inf }
 0x74a   :  { %1099 = vmax.xlane.f32.xlu0 %v1098_v11 }
 0x750   :  { %v1089_v51 = vpop.f32.mrf.mxu0 }
 0x751   :  { %5100 = vmatmul.msk.f32.gmra.mxu3 %vm451_vm15, %v6452_v4  ;;  %v1101_v14 = vsel %vm181_vm1, %v1089_v51, -inf }
 0x752   :  { %1102 = vmax.xlane.f32.xlu1 %v1101_v14 }
 0x758   :  { %v1092_v15 = vpop.f32.mrf.mxu0 }
 0x759   :  { %5101 = vmatmul.msk.f32.gmra.mxu3 %vm451_vm15, %v6446_v28  ;;  %v1104_v56 = vsel %vm181_vm1, %v1092_v15, -inf }
 0x75a   :  { %1105 = vmax.xlane.f32.xlu2 %v1104_v56 }
 0x760   :  { %v1095_v12 = vpop.f32.mrf.mxu0 }
 0x761   :  { %v1107_v18 = vsel %vm181_vm1, %v1095_v12, -inf }
 0x762   :  { %1108 = vmax.xlane.f32.xlu0 %v1107_v18 }
 0x772   :  { %5399 = vrot.lane.b32.xlu2 %v6178_v24, %s5913_s27  ;;  %v6524_v24 = vpop.f32.mrf.mxu3 }
 0x776   :  { %5404 = vrot.lane.b32.xlu0 %v6184_v25, %s5913_s27 }
 0x77a   :  { %1406 = vrot.lane.b32.xlu2 %v6452_v4, %s5905_s21  ;;  %v6528_v25 = vpop.f32.mrf.mxu3 }
 0x782   :  { %1404 = vrot.lane.b32.xlu2 %v6461_v8, %s5905_s21  ;;  %v6532_v20 = vpop.f32.mrf.mxu3 }
 0x78a   :  { %1402 = vrot.lane.b32.xlu2 %v6423_v58, %s5905_s21  ;;  %v6536_v21 = vpop.f32.mrf.mxu3 }
 0x792   :  { %1394 = vrot.lane.b32.xlu2 %v6423_v58, %s5906_s1 }
 0x79a   :  { %1398 = vrot.lane.b32.xlu2 %v6452_v4, %s5906_s1 }
 0x7a2   :  { %1646 = vrot.lane.b32.xlu2 %v6452_v4, %s5907_s2 }
 0x7aa   :  { %1644 = vrot.lane.b32.xlu2 %v6461_v8, %s5907_s2 }
 0x7b2   :  { %1642 = vrot.lane.b32.xlu2 %v6423_v58, %s5907_s2 }
 0x7b4   :  { %v6540_v31 = vpop.f32.mrf.mxu3 }
 0x7ba   :  { %1634 = vrot.lane.b32.xlu2 %v6423_v58, %s5908_s30 }
 0x7bc   :  { %v6544_v9 = vpop.f32.mrf.mxu3 }
 0x7bd   :  { %v1100_v32 = vpop.xlane.xlu0 %1099 }
 0x7be   :  { %v1110_v6 = vsub.f32 %v1086_v1, %v1100_v32 }
 0x7c0   :  { %v1114_v26 = vmul.f32 1.442695, %v1110_v6 }
 0x7c2   :  { %5595 = vpow2.f32 %v1114_v26 }
 0x7c4   :  { %v6547_v16 = vpop.f32.mrf.mxu3 }
 0x7c5   :  { %v1103_v33 = vpop.xlane.xlu1 %1102  ;;  %v1297_v6 = vsel %vm181_vm1, %v6547_v16, -inf }
 0x7c6   :  { %v1111_v37 = vsub.f32 %v1089_v51, %v1103_v33 }
 0x7c8   :  { %v5596_v38 = vpop.eup %5595  ;;  %v1116_v46 = vmul.f32 1.442695, %v1111_v37 }
 0x7c9   :  { %v1122_v3 = vsel %vm181_vm1, %v5596_v38, 0.0 }
 0x7ca   :  { %5597 = vpow2.f32 %v1116_v46  ;;  %1123 = vadd.xlane.f32.xlu1 %v1122_v3 }
 0x7cc   :  { %v6550_v50 = vpop.f32.mrf.mxu3 }
 0x7cd   :  { %v1106_v27 = vpop.xlane.xlu2 %1105  ;;  %v1300_v14 = vsel %vm181_vm1, %v6550_v50, -inf }
 0x7ce   :  { %v1112_v47 = vsub.f32 %v1092_v15, %v1106_v27 }
 0x7d0   :  { %v5598_v36 = vpop.eup %5597  ;;  %v1118_v43 = vmul.f32 1.442695, %v1112_v47 }
 0x7d1   :  { %v1125_v49 = vsel %vm181_vm1, %v5598_v36, 0.0 }
 0x7d2   :  { %5599 = vpow2.f32 %v1118_v43  ;;  %1126 = vadd.xlane.f32.xlu1 %v1125_v49 }
 0x7d4   :  { %v1291_v52 = vpop.f32.mrf.mxu3 }
 0x7d5   :  { %v1109_v54 = vpop.xlane.xlu0 %1108  ;;  %v5400_v44 = vpop.permute.xlu2 %5399  ;;  %v1303_v19 = vsel %vm181_vm1, %v1291_v52, -inf }
 0x7d6   :  { %v1113_v55 = vsub.f32 %v1095_v12, %v1109_v54  ;;  %v5401_v57 = vunpack.i.l.bf16 %v5400_v44  ;;  %v5402_v60 = vunpack.i.h.bf16 %v5400_v44  ;;  %v6581_v44 = vpack.i.bf16 %v6452_v4, %v6446_v28 }
 0x7d8   :  { %v5600_v59 = vpop.eup %5599  ;;  %v1120_v29 = vmul.f32 1.442695, %v1113_v55  ;;  %1178 = vmatpush.msra.mxu1 %v5401_v57 }
 0x7d9   :  { %v1128_v63 = vsel %vm181_vm1, %v5600_v59, 0.0 }
 0x7da   :  { %5601 = vpow2.f32 %v1120_v29  ;;  %1129 = vadd.xlane.f32.xlu1 %v1128_v63  ;;  %1179 = vmatpush.msra.mxu1 %v5402_v60 }
 0x7dc   :  { %v6569_v15 = vpop.f32.mrf.mxu3 }
 0x7dd   :  { %v1407_v10 = vpop.permute.xlu2 %1406  ;;  %v1306_v12 = vsel %vm181_vm1, %v6569_v15, -inf }
 0x7e0   :  { %v5602_v5 = vpop.eup %5601 }
 0x7e1   :  { %v1131_v61 = vsel %vm181_vm1, %v5602_v5, 0.0 }
 0x7e2   :  { %1132 = vadd.xlane.f32.xlu0 %v1131_v61 }
 0x7e3   :  { %1304 = vmax.xlane.f32.xlu2 %v1303_v19 }
 0x7e5   :  { %v1405_v1 = vpop.permute.xlu2 %1404 }
 0x7e8   :  { %v5405_v34 = vpop.permute.xlu0 %5404 }
 0x7e9   :  { %v5406_v0 = vunpack.i.l.bf16 %v5405_v34  ;;  %v5407_v41 = vunpack.i.h.bf16 %v5405_v34 }
 0x7eb   :  { %1180 = vmatpush.msra.mxu1 %v5406_v0 }
 0x7ed   :  { %1181 = vmatpush.msra.mxu1 %v5407_v41  ;;  %v1403_v11 = vpop.permute.xlu2 %1402 }
 0x7f3   :  { %1408 = vrot.lane.b32.xlu1 %v6446_v28, %s5905_s21 }
 0x7f5   :  { %v1395_v51 = vpop.permute.xlu2 %1394 }
 0x7f6   :  { %1400 = vrot.lane.b32.xlu0 %v6446_v28, %s5906_s1 }
 0x7fb   :  { %1396 = vrot.lane.b32.xlu1 %v6461_v8, %s5906_s1 }
 0x7fd   :  { %v1399_v56 = vpop.permute.xlu2 %1398 }
 0x803   :  { %1648 = vrot.lane.b32.xlu1 %v6446_v28, %s5907_s2 }
 0x805   :  { %v1647_v18 = vpop.permute.xlu2 %1646 }
 0x80b   :  { %1636 = vrot.lane.b32.xlu1 %v6461_v8, %s5908_s30 }
 0x80d   :  { %v1645_v32 = vpop.permute.xlu2 %1644 }
 0x813   :  { %1638 = vrot.lane.b32.xlu1 %v6452_v4, %s5908_s30 }
 0x815   :  { %v1643_v37 = vpop.permute.xlu2 %1642 }
 0x81d   :  { %v1635_v49 = vpop.permute.xlu2 %1634 }
 0x820   :  { %1301 = vmax.xlane.f32.xlu0 %v1300_v14  ;;  %v6613_v14 = vld [vmem:[%s8298_s4 + $0x18] sm:$0xff] }
 0x821   :  { %1222 = vmatpush.msrb.mxu2 %v6613_v14 }
 0x828   :  { %1307 = vmax.xlane.f32.xlu0 %v1306_v12 }
 0x83c   :  { %1640 = vrot.lane.b32.xlu0 %v6446_v28, %s5908_s30 }
 0x83d   :  { %v1124_v26 = vpop.xlane.xlu1 %1123  ;;  %1298 = vmax.xlane.f32.xlu1 %v1297_v6 }
 0x83e   :  { %5603 = vrcp.f32 %v1124_v26 }
 0x844   :  { %v5604_v33 = vpop.eup %5603 }
 0x845   :  { %v1138_v46 = vmul.f32 %v5604_v33, %v5596_v38  ;;  %v1127_v3 = vpop.xlane.xlu1 %1126 }
 0x846   :  { %5605 = vrcp.f32 %v1127_v3 }
 0x847   :  { %5086 = vmatmul.msk.f32.vlgmr.msra.gmra.mxu1 %vm181_vm1, %v1138_v46 }
 0x84c   :  { %v5606_v27 = vpop.eup %5605 }
 0x84d   :  { %v1130_v47 = vpop.xlane.xlu1 %1129  ;;  %v1139_v43 = vmul.f32 %v5606_v27, %v5598_v36 }
 0x84e   :  { %5607 = vrcp.f32 %v1130_v47 }
 0x84f   :  { %5087 = vmatmul.msk.f32.gmra.mxu1 %vm181_vm1, %v1139_v43 }
 0x854   :  { %v5608_v54 = vpop.eup %5607 }
 0x855   :  { %v1133_v55 = vpop.xlane.xlu0 %1132  ;;  %v1140_v57 = vmul.f32 %v5608_v54, %v5600_v59 }
 0x856   :  { %5609 = vrcp.f32 %v1133_v55  ;;  %5409 = vrot.lane.b32.xlu1 %v6581_v44, %s5904_s20  ;;  %v1305_v38 = vpop.xlane.xlu2 %1304 }
 0x857   :  { %v1311_v29 = vsub.f32 %v1291_v52, %v1305_v38  ;;  %5088 = vmatmul.msk.f32.gmra.mxu1 %vm181_vm1, %v1140_v57 }
 0x859   :  { %v1317_v36 = vmul.f32 1.442695, %v1311_v29 }
 0x85b   :  { %5611 = vpow2.f32 %v1317_v36 }
 0x85c   :  { %v5610_v60 = vpop.eup %5609 }
 0x85d   :  { %v1141_v63 = vmul.f32 %v5610_v60, %v5602_v5 }
 0x85f   :  { %5089 = vmatmul.msk.f32.gmra.mxu1 %vm181_vm1, %v1141_v63 }
 0x861   :  { %v6587_v61 = vpop.eup %5611 }
 0x862   :  { %v1327_v59 = vsel %vm181_vm1, %v6587_v61, 0.0 }
 0x865   :  { %v1409_v19 = vpop.permute.xlu1 %1408 }
 0x866   :  { %5106 = vmatpush.xpose.msk.msrb.mxu1 %vm451_vm15, %v1409_v19  ;;  %1328 = vadd.xlane.f32.xlu0 %v1327_v59 }
 0x868   :  { %v1401_v5 = vpop.permute.xlu0 %1400 }
 0x86a   :  { %5107 = vmatpush.xpose.msk.msrb.mxu1 %vm451_vm15, %v1407_v10 }
 0x86d   :  { %v1397_v52 = vpop.permute.xlu1 %1396 }
 0x86e   :  { %5108 = vmatpush.xpose.msk.msrb.mxu1 %vm451_vm15, %v1405_v1 }
 0x872   :  { %5109 = vmatpush.xpose.msk.msrb.mxu1 %vm451_vm15, %v1403_v11 }
 0x875   :  { %v1649_v34 = vpop.permute.xlu1 %1648  ;;  %5110 = vmatmul.msk.f32.vlgmr.msrb.gmra.mxu1 %vm451_vm15, %v1395_v51 }
 0x876   :  { %5126 = vmatpush.xpose.msk.msra.mxu1 %vm451_vm15, %v1649_v34 }
 0x87a   :  { %5127 = vmatpush.xpose.msk.msra.mxu1 %vm451_vm15, %v1647_v18 }
 0x87d   :  { %5111 = vmatmul.msk.f32.gmra.mxu1 %vm451_vm15, %v1397_v52  ;;  %v1637_v1 = vpop.permute.xlu1 %1636 }
 0x87e   :  { %5128 = vmatpush.xpose.msk.msra.mxu1 %vm451_vm15, %v1645_v32 }
 0x882   :  { %5129 = vmatpush.xpose.msk.msra.mxu1 %vm451_vm15, %v1643_v37 }
 0x885   :  { %5112 = vmatmul.msk.f32.gmra.mxu1 %vm451_vm15, %v1399_v56  ;;  %v1639_v56 = vpop.permute.xlu1 %1638 }
 0x88d   :  { %5113 = vmatmul.msk.f32.gmra.mxu1 %vm451_vm15, %v1401_v5 }
 0x893   :  { %v1302_v0 = vpop.xlane.xlu0 %1301 }
 0x894   :  { %v1310_v41 = vsub.f32 %v6550_v50, %v1302_v0 }
 0x895   :  { %5130 = vmatmul.msk.f32.vlgmr.msra.gmra.mxu1 %vm451_vm15, %v1635_v49 }
 0x896   :  { %v1315_v10 = vmul.f32 1.442695, %v1310_v41 }
 0x898   :  { %5613 = vpow2.f32 %v1315_v10 }
 0x89b   :  { %v1308_v50 = vpop.xlane.xlu0 %1307 }
 0x89c   :  { %v1312_v54 = vsub.f32 %v6569_v15, %v1308_v50 }
 0x89d   :  { %5131 = vmatmul.msk.f32.gmra.mxu1 %vm451_vm15, %v1637_v1 }
 0x89e   :  { %v6606_v11 = vpop.eup %5613  ;;  %v1319_v55 = vmul.f32 1.442695, %v1312_v54 }
 0x89f   :  { %v1324_v51 = vsel %vm181_vm1, %v6606_v11, 0.0 }
 0x8a0   :  { %1325 = vadd.xlane.f32.xlu1 %v1324_v51 }
 0x8a5   :  { %5132 = vmatmul.msk.f32.gmra.mxu1 %vm451_vm15, %v1639_v56 }
 0x8ae   :  { %v1641_v12 = vpop.permute.xlu0 %1640 }
 0x8af   :  { %5133 = vmatmul.msk.f32.gmra.mxu1 %vm451_vm15, %v1641_v12 }
 0x8b0   :  { %v1299_v18 = vpop.xlane.xlu1 %1298 }
 0x8b1   :  { %v1309_v32 = vsub.f32 %v6547_v16, %v1299_v18  ;;  %v6624_v16 = vpack.i.bf16 %v6423_v58, %v6461_v8 }
 0x8b3   :  { %v1313_v6 = vmul.f32 1.442695, %v1309_v32 }
 0x8b5   :  { %5615 = vpow2.f32 %v1313_v6 }
 0x8b6   :  { %5617 = vpow2.f32 %v1319_v55 }
 0x8bb   :  { %v5616_v26 = vpop.eup %5615 }
 0x8bc   :  { %v1321_v33 = vsel %vm181_vm1, %v5616_v26, 0.0  ;;  %v6632_v29 = vpop.eup %5617 }
 0x8bd   :  { %1322 = vadd.xlane.f32.xlu2 %v1321_v33  ;;  %v1330_v63 = vsel %vm181_vm1, %v6632_v29, 0.0 }
 0x8c4   :  { %v1183_v37 = vpop.f32.mrf.mxu1 }
 0x8c5   :  { %5090 = vmatmul.msk.f32.vlgmr.msrb.gmra.mxu2 %vm451_vm15, %v1183_v37 }
 0x8c8   :  { %v5410_v46 = vpop.permute.xlu1 %5409 }
 0x8c9   :  { %v5411_v3 = vunpack.i.l.bf16 %v5410_v46  ;;  %v5412_v27 = vunpack.i.h.bf16 %v5410_v46  ;;  %v5899_v46 = vld [vmem:[%s8298_s4] sm:$0xff] }
 0x8cb   :  { %1377 = vmatpush.msrb.mxu0 %v5411_v3 }
 0x8cc   :  { %v1186_v47 = vpop.f32.mrf.mxu1 }
 0x8cd   :  { %5091 = vmatmul.msk.f32.gmra.mxu2 %vm451_vm15, %v1186_v47  ;;  %1378 = vmatpush.msrb.mxu0 %v5412_v27 }
 0x8d4   :  { %v1189_v43 = vpop.f32.mrf.mxu1 }
 0x8d5   :  { %5092 = vmatmul.msk.f32.gmra.mxu2 %vm451_vm15, %v1189_v43  ;;  %5414 = vrot.lane.b32.xlu2 %v6624_v16, %s5904_s20 }
 0x8d9   :  { %v1329_v3 = vpop.xlane.xlu0 %1328 }
 0x8dc   :  { %v1192_v49 = vpop.f32.mrf.mxu1 }
 0x8dd   :  { %5093 = vmatmul.msk.f32.gmra.mxu2 %vm451_vm15, %v1192_v49 }
 0x8f2   :  { %v1443_v57 = vpop.f32.mrf.mxu1 }
 0x8f3   :  { %v1455_v38 = vsel %vm181_vm1, %v1443_v57, -inf }
 0x8f4   :  { %1456 = vmax.xlane.f32.xlu1 %v1455_v38 }
 0x8fa   :  { %v1446_v36 = vpop.f32.mrf.mxu1 }
 0x8fb   :  { %v1458_v60 = vsel %vm181_vm1, %v1446_v36, -inf }
 0x8fc   :  { %1459 = vmax.xlane.f32.xlu0 %v1458_v60 }
 0x8fe   :  { %1331 = vadd.xlane.f32.xlu2 %v1330_v63 }
 0x902   :  { %v6637_v19 = vpop.f32.mrf.mxu1 }
 0x903   :  { %v1461_v15 = vsel %vm181_vm1, %v6637_v19, -inf }
 0x904   :  { %1462 = vmax.xlane.f32.xlu1 %v1461_v15 }
 0x90a   :  { %v1452_v59 = vpop.f32.mrf.mxu1 }
 0x90b   :  { %v1464_v52 = vsel %vm181_vm1, %v1452_v59, -inf }
 0x90c   :  { %1465 = vmax.xlane.f32.xlu0 %v1464_v52 }
 0x912   :  { %v6642_v34 = vpop.f32.mrf.mxu1 }
 0x913   :  { %v1695_v5 = vsel %vm181_vm1, %v6642_v34, -inf  ;;  %v1326_v12 = vpop.xlane.xlu1 %1325 }
 0x914   :  { %1696 = vmax.xlane.f32.xlu1 %v1695_v5 }
 0x91a   :  { %v6646_v0 = vpop.f32.mrf.mxu1 }
 0x91b   :  { %v1698_v41 = vsel %vm181_vm1, %v6646_v0, -inf }
 0x91c   :  { %1699 = vmax.xlane.f32.xlu2 %v1698_v41 }
 0x922   :  { %v6650_v10 = vpop.f32.mrf.mxu1 }
 0x923   :  { %v1701_v1 = vsel %vm181_vm1, %v6650_v10, -inf }
 0x924   :  { %1702 = vmax.xlane.f32.xlu0 %v1701_v1 }
 0x92c   :  { %v6654_v51 = vpop.f32.mrf.mxu1 }
 0x92d   :  { %v1704_v56 = vsel %vm181_vm1, %v6654_v51, -inf }
 0x92e   :  { %1705 = vmax.xlane.f32.xlu0 %v1704_v56 }
 0x930   :  { %v1323_v50 = vpop.xlane.xlu2 %1322 }
 0x931   :  { %5619 = vrcp.f32 %v1323_v50 }
 0x932   :  { %5621 = vrcp.f32 %v1326_v12 }
 0x933   :  { %5623 = vrcp.f32 %v1329_v3 }
 0x934   :  { %5419 = vrot.lane.b32.xlu2 %v6581_v44, %s5909_s17 }
 0x937   :  { %v5620_v32 = vpop.eup %5619 }
 0x938   :  { %v5415_v18 = vpop.permute.xlu2 %5414  ;;  %v1337_v37 = vmul.f32 %v5620_v32, %v5616_v26  ;;  %v5622_v27 = vpop.eup %5621 }
 0x939   :  { %v5416_v6 = vunpack.i.l.bf16 %v5415_v18  ;;  %v5417_v33 = vunpack.i.h.bf16 %v5415_v18  ;;  %v1338_v47 = vmul.f32 %v5622_v27, %v6606_v11  ;;  %v5624_v26 = vpop.eup %5623 }
 0x93a   :  { %v1339_v43 = vmul.f32 %v5624_v26, %v6587_v61 }
 0x93b   :  { %1379 = vmatpush.msrb.mxu0 %v5416_v6 }
 0x93c   :  { %1849 = vrot.lane.b32.xlu2 %v6452_v4, %s5911_s19 }
 0x93d   :  { %1380 = vmatpush.msrb.mxu0 %v5417_v33 }
 0x93e   :  { %5102 = vmatmul.msk.f32.vlgmr.msrb.gmra.mxu0 %vm181_vm1, %v1337_v37 }
 0x93f   :  { %1620 = vmatpush.msra.mxu0 %v5899_v46 }
 0x944   :  { %1847 = vrot.lane.b32.xlu2 %v6461_v8, %s5911_s19 }
 0x946   :  { %5103 = vmatmul.msk.f32.gmra.mxu0 %vm181_vm1, %v1338_v47 }
 0x948   :  { %v6697_v46 = vpop.f32.mrf.mxu2 }
 0x94e   :  { %5104 = vmatmul.msk.f32.gmra.mxu0 %vm181_vm1, %v1339_v43 }
 0x950   :  { %v1227_v43 = vpop.f32.mrf.mxu2 }
 0x967   :  { %v1457_v49 = vpop.xlane.xlu1 %1456 }
 0x968   :  { %v1467_v54 = vsub.f32 %v1443_v57, %v1457_v49 }
 0x96a   :  { %v1471_v55 = vmul.f32 1.442695, %v1467_v54 }
 0x96c   :  { %5625 = vpow2.f32 %v1471_v55 }
 0x96f   :  { %v1460_v38 = vpop.xlane.xlu0 %1459 }
 0x970   :  { %v1468_v60 = vsub.f32 %v1446_v36, %v1460_v38 }
 0x971   :  { %v1332_v63 = vpop.xlane.xlu2 %1331 }
 0x972   :  { %v6672_v15 = vpop.eup %5625  ;;  %v1473_v52 = vmul.f32 1.442695, %v1468_v60  ;;  %5627 = vrcp.f32 %v1332_v63  ;;  %v6707_v60 = vpop.f32.mrf.mxu2 }
 0x973   :  { %v1479_v11 = vsel %vm181_vm1, %v6672_v15, 0.0 }
 0x974   :  { %5629 = vpow2.f32 %v1473_v52  ;;  %1480 = vadd.xlane.f32.xlu1 %v1479_v11  ;;  %v826_v52 = vadd.f32 %v6494_v42, %v6520_v17 }
 0x977   :  { %v1463_v6 = vpop.xlane.xlu1 %1462 }
 0x978   :  { %v5628_v5 = vpop.eup %5627  ;;  %v1469_v33 = vsub.f32 %v6637_v19, %v1463_v6 }
 0x979   :  { %v1340_v61 = vmul.f32 %v5628_v5, %v6632_v29 }
 0x97a   :  { %v6677_v41 = vpop.eup %5629  ;;  %v1475_v37 = vmul.f32 1.442695, %v1469_v33 }
 0x97b   :  { %5105 = vmatmul.msk.f32.gmra.mxu0 %vm181_vm1, %v1340_v61  ;;  %v1482_v57 = vsel %vm181_vm1, %v6677_v41, 0.0 }
 0x97c   :  { %1483 = vadd.xlane.f32.xlu0 %v1482_v57  ;;  %v6722_v57 = vld [vmem:[%s8297_s7] sm:$0xf] }
 0x97d   :  { %v6725_v42 = vperm.slane %v6722_v57, 1 }
 0x97f   :  { %v1466_v36 = vpop.xlane.xlu0 %1465 }
 0x980   :  { %v1470_v1 = vsub.f32 %v1452_v59, %v1466_v36 }
 0x982   :  { %v1477_v56 = vmul.f32 1.442695, %v1470_v1 }
 0x984   :  { %5631 = vpow2.f32 %v1477_v56  ;;  %v1233_v56 = vpop.f32.mrf.mxu2 }
 0x985   :  { %5633 = vpow2.f32 %v1475_v37 }
 0x987   :  { %v1697_v27 = vpop.xlane.xlu1 %1696 }
 0x988   :  { %v1707_v26 = vsub.f32 %v6642_v34, %v1697_v27 }
 0x98a   :  { %v6682_v50 = vpop.eup %5631  ;;  %v1711_v55 = vmul.f32 1.442695, %v1707_v26 }
 0x98b   :  { %v1488_v12 = vsel %vm181_vm1, %v6682_v50, 0.0  ;;  %v6699_v3 = vpop.eup %5633 }
 0x98c   :  { %1489 = vadd.xlane.f32.xlu2 %v1488_v12  ;;  %v1485_v47 = vsel %vm181_vm1, %v6699_v3, 0.0  ;;  %5635 = vpow2.f32 %v1711_v55 }
 0x98d   :  { %5424 = vrot.lane.b32.xlu1 %v6624_v16, %s5909_s17 }
 0x98f   :  { %v1700_v29 = vpop.xlane.xlu2 %1699 }
 0x990   :  { %1851 = vrot.lane.b32.xlu0 %v6446_v28, %s5911_s19  ;;  %v1708_v38 = vsub.f32 %v6646_v0, %v1700_v29 }
 0x992   :  { %v1713_v34 = vmul.f32 1.442695, %v1708_v38  ;;  %v6712_v11 = vpop.eup %5635 }
 0x993   :  { %v1719_v0 = vsel %vm181_vm1, %v6712_v11, 0.0 }
 0x997   :  { %v5420_v18 = vpop.permute.xlu2 %5419 }
 0x998   :  { %v5421_v32 = vunpack.i.l.bf16 %v5420_v18  ;;  %1845 = vrot.lane.b32.xlu0 %v6423_v58, %s5911_s19  ;;  %v5422_v59 = vunpack.i.h.bf16 %v5420_v18 }
 0x99a   :  { %1535 = vmatpush.msra.mxu2 %v5421_v32 }
 0x99c   :  { %1536 = vmatpush.msra.mxu2 %v5422_v59 }
 0x9a0   :  { %1837 = vrot.lane.b32.xlu0 %v6423_v58, %s5912_s22  ;;  %v1703_v58 = vpop.xlane.xlu0 %1702 }
 0x9a1   :  { %v1709_v49 = vsub.f32 %v6650_v10, %v1703_v58  ;;  %v1034_v10 = vadd.f32 %v6536_v21, %v826_v52  ;;  %v832_v21 = vadd.f32 %v6351_v2, %v6528_v25  ;;  %v823_v58 = vadd.f32 %v6491_v7, %v6514_v13 }
 0x9a3   :  { %v1715_v19 = vmul.f32 1.442695, %v1709_v49  ;;  %v1237_v5 = vadd.f32 %v1227_v43, %v1034_v10  ;;  %v1036_v29 = vadd.f32 %v6544_v9, %v832_v21  ;;  %v1033_v55 = vadd.f32 %v6532_v20, %v823_v58 }
 0x9a4   :  { %5429 = vrot.lane.b32.xlu2 %v6581_v44, %s5910_s18 }
 0x9a5   :  { %5637 = vpow2.f32 %v1715_v19  ;;  %v2042_v36 = vadd.f32 %v6725_v42, %v1237_v5  ;;  %v1239_v18 = vadd.f32 %v1233_v56, %v1036_v29 }
 0x9a6   :  { %5639 = vpow2.f32 %v1713_v34 }
 0x9a7   :  { %v6739_v32 = vadd.f32 %v2042_v36, %v6062_v35  ;;  %v2044_v25 = vadd.f32 %v6725_v42, %v1239_v18 }
 0x9a8   :  { %v1706_v9 = vpop.xlane.xlu0 %1705 }
 0x9a9   :  { %v2060_v59 = vsel %vm181_vm1, %v6739_v32, 0.0  ;;  %v6747_v6 = vadd.f32 %v2044_v25, %v6072_v45  ;;  %v1710_v45 = vsub.f32 %v6654_v51, %v1706_v9 }
 0x9ab   :  { %v6715_v61 = vpop.eup %5637  ;;  %v2066_v35 = vsel %vm181_vm1, %v6747_v6, 0.0  ;;  %v1717_v26 = vmul.f32 1.442695, %v1710_v45 }
 0x9ac   :  { %v1725_v1 = vsel %vm181_vm1, %v6715_v61, 0.0  ;;  %v6733_v12 = vpop.eup %5639 }
 0x9ad   :  { %v1722_v2 = vsel %vm181_vm1, %v6733_v12, 0.0 }
 0x9b7   :  { %1486 = vadd.xlane.f32.xlu1 %v1485_v47 }
 0x9bb   :  { %v1382_v54 = vpop.f32.mrf.mxu0 }
 0x9bc   :  { %5122 = vmatmul.msk.f32.vlgmr.msra.gmra.mxu0 %vm451_vm15, %v1382_v54  ;;  %v829_v54 = vadd.f32 %v6348_v62, %v6524_v24 }
 0x9be   :  { %v1035_v38 = vadd.f32 %v6540_v31, %v829_v54 }
 0x9c0   :  { %v1238_v13 = vadd.f32 %v6707_v60, %v1035_v38 }
 0x9c3   :  { %v1385_v63 = vpop.f32.mrf.mxu0 }
 0x9c4   :  { %5123 = vmatmul.msk.f32.gmra.mxu0 %vm451_vm15, %v1385_v63  ;;  %v1236_v63 = vadd.f32 %v6697_v46, %v1033_v55  ;;  %v2043_v46 = vadd.f32 %v6725_v42, %v1238_v13 }
 0x9c6   :  { %v2041_v24 = vadd.f32 %v6725_v42, %v1236_v63 }
 0x9c8   :  { %v6780_v5 = vadd.f32 %v2041_v24, %v6057_v30 }
 0x9ca   :  { %1720 = vadd.xlane.f32.xlu0 %v1719_v0  ;;  %v6784_v0 = vadd.f32 %v2043_v46, %v6067_v40 }
 0x9cb   :  { %v1388_v17 = vpop.f32.mrf.mxu0 }
 0x9cc   :  { %5124 = vmatmul.msk.f32.gmra.mxu0 %vm451_vm15, %v1388_v17  ;;  %v2057_v17 = vsel %vm181_vm1, %v6780_v5, 0.0  ;;  %v2063_v21 = vsel %vm181_vm1, %v6784_v0, 0.0 }
 0x9cd   :  { %1726 = vadd.xlane.f32.xlu2 %v1725_v1 }
 0x9d0   :  { %1839 = vrot.lane.b32.xlu1 %v6461_v8, %s5912_s22  ;;  %v1850_v8 = vpop.permute.xlu2 %1849 }
 0x9d2   :  { %1723 = vadd.xlane.f32.xlu0 %v1722_v2 }
 0x9d5   :  { %2061 = vadd.xlane.f32.xlu2 %v2060_v59 }
 0x9d8   :  { %5434 = vrot.lane.b32.xlu1 %v6624_v16, %s5910_s18  ;;  %v1848_v33 = vpop.permute.xlu2 %1847 }
 0x9dd   :  { %2067 = vadd.xlane.f32.xlu2 %v2066_v35 }
 0x9e0   :  { %1841 = vrot.lane.b32.xlu1 %v6452_v4, %s5912_s22 }
 0x9e6   :  { %1843 = vrot.lane.b32.xlu0 %v6446_v28, %s5912_s22 }
 0x9e7   :  { %v1481_v37 = vpop.xlane.xlu1 %1480 }
 0x9e8   :  { %5641 = vrcp.f32 %v1481_v37 }
 0x9e9   :  { %5643 = vpow2.f32 %v1717_v26 }
 0x9ee   :  { %v5642_v49 = vpop.eup %5641 }
 0x9ef   :  { %v1484_v47 = vpop.xlane.xlu0 %1483  ;;  %v1495_v7 = vmul.f32 %v5642_v49, %v6672_v15  ;;  %v6770_v62 = vpop.eup %5643 }
 0x9f0   :  { %5645 = vrcp.f32 %v1484_v47  ;;  %v1728_v15 = vsel %vm181_vm1, %v6770_v62, 0.0 }
 0x9f6   :  { %v5646_v52 = vpop.eup %5645 }
 0x9f7   :  { %v1496_v10 = vmul.f32 %v5646_v52, %v6677_v41 }
 0x9f8   :  { %v1391_v27 = vpop.f32.mrf.mxu0 }
 0x9f9   :  { %5125 = vmatmul.msk.f32.gmra.mxu0 %vm451_vm15, %v1391_v27 }
 0x9ff   :  { %v5425_v43 = vpop.permute.xlu1 %5424  ;;  %v1490_v4 = vpop.xlane.xlu2 %1489 }
 0xa00   :  { %v5426_v28 = vunpack.i.l.bf16 %v5425_v43  ;;  %v5427_v51 = vunpack.i.h.bf16 %v5425_v43 }
 0xa02   :  { %1537 = vmatpush.msra.mxu2 %v5426_v28  ;;  %v1852_v19 = vpop.permute.xlu0 %1851 }
 0xa03   :  { %5142 = vmatpush.xpose.msk.msrb.mxu0 %vm451_vm15, %v1852_v19 }
 0xa04   :  { %1538 = vmatpush.msra.mxu2 %v5427_v51 }
 0xa05   :  { %5114 = vmatmul.msk.f32.vlgmr.msra.gmra.mxu2 %vm181_vm1, %v1495_v7 }
 0xa07   :  { %v5430_v20 = vpop.permute.xlu2 %5429  ;;  %5143 = vmatpush.xpose.msk.msrb.mxu0 %vm451_vm15, %v1850_v8 }
 0xa08   :  { %v5431_v31 = vunpack.i.l.bf16 %v5430_v20  ;;  %v5432_v34 = vunpack.i.h.bf16 %v5430_v20 }
 0xa0a   :  { %1775 = vmatpush.msrb.mxu2 %v5431_v31  ;;  %1729 = vadd.xlane.f32.xlu1 %v1728_v15  ;;  %v1846_v60 = vpop.permute.xlu0 %1845 }
 0xa0b   :  { %5144 = vmatpush.xpose.msk.msrb.mxu0 %vm451_vm15, %v1848_v33 }
 0xa0c   :  { %1776 = vmatpush.msrb.mxu2 %v5432_v34 }
 0xa0d   :  { %5115 = vmatmul.msk.f32.gmra.mxu2 %vm181_vm1, %v1496_v10 }
 0xa0f   :  { %5145 = vmatpush.xpose.msk.msrb.mxu0 %vm451_vm15, %v1846_v60 }
 0xa10   :  { %2058 = vadd.xlane.f32.xlu0 %v2057_v17 }
 0xa12   :  { %2064 = vadd.xlane.f32.xlu1 %v2063_v21  ;;  %v1838_v41 = vpop.permute.xlu0 %1837 }
 0xa13   :  { %5146 = vmatmul.msk.f32.vlgmr.msrb.gmra.mxu0 %vm451_vm15, %v1838_v41 }
 0xa2a   :  { %v1487_v30 = vpop.xlane.xlu1 %1486 }
 0xa2b   :  { %5647 = vrcp.f32 %v1487_v30 }
 0xa2c   :  { %5649 = vrcp.f32 %v1490_v4 }
 0xa31   :  { %v5648_v36 = vpop.eup %5647 }
 0xa32   :  { %v1497_v40 = vmul.f32 %v5648_v36, %v6699_v3  ;;  %v5650_v1 = vpop.eup %5649 }
 0xa33   :  { %v1498_v56 = vmul.f32 %v5650_v1, %v6682_v50 }
 0xa34   :  { %5116 = vmatmul.msk.f32.gmra.mxu2 %vm181_vm1, %v1497_v40 }
 0xa39   :  { %v6813_v49 = vpop.f32.mrf.mxu0 }
 0xa3c   :  { %5117 = vmatmul.msk.f32.gmra.mxu2 %vm181_vm1, %v1498_v56 }
 0xa3d   :  { %v1721_v29 = vpop.xlane.xlu0 %1720 }
 0xa3e   :  { %5651 = vrcp.f32 %v1721_v29 }
 0xa40   :  { %v1727_v18 = vpop.xlane.xlu2 %1726 }
 0xa42   :  { %v1840_v2 = vpop.permute.xlu1 %1839 }
 0xa43   :  { %5147 = vmatmul.msk.f32.gmra.mxu0 %vm451_vm15, %v1840_v2 }
 0xa44   :  { %v5652_v9 = vpop.eup %5651 }
 0xa45   :  { %v1724_v35 = vpop.xlane.xlu0 %1723  ;;  %v1735_v45 = vmul.f32 %v5652_v9, %v6712_v11 }
 0xa46   :  { %5653 = vrcp.f32 %v1724_v35 }
 0xa47   :  { %5655 = vrcp.f32 %v1727_v18 }
 0xa48   :  { %v2062_v25 = vpop.xlane.xlu2 %2061 }
 0xa49   :  { %v2082_v59 = vmul.f32 %v2062_v25, %v6076_v53 }
 0xa4a   :  { %v5435_v8 = vpop.permute.xlu1 %5434 }
 0xa4b   :  { %v6799_v3 = vsub.f32 %v6739_v32, %v2082_v59  ;;  %v5436_v33 = vunpack.i.l.bf16 %v5435_v8  ;;  %v5437_v50 = vunpack.i.h.bf16 %v5435_v8  ;;  %v2236_v8 = vld [vmem:[%s8299_s5 + $0x18] sm:$0xff] }
 0xa4c   :  { %v5654_v26 = vpop.eup %5653 }
 0xa4d   :  { %1777 = vmatpush.msrb.mxu2 %v5436_v33  ;;  %v2098_v37 = vmul.f32 %v6799_v3, %v6799_v3  ;;  %v1736_v58 = vmul.f32 %v5654_v26, %v6733_v12  ;;  %v5656_v4 = vpop.eup %5655  ;;  %v2235_v33 = vld [vmem:[%s8299_s5 + $0x10] sm:$0xff] }
 0xa4e   :  { %v1737_v11 = vmul.f32 %v5656_v4, %v6715_v61 }
 0xa4f   :  { %1778 = vmatpush.msrb.mxu2 %v5437_v50  ;;  %v2108_v27 = vsel %vm181_vm1, %v2098_v37, 0.0  ;;  %v2233_v37 = vld [vmem:[%s8299_s5] sm:$0xff] }
 0xa50   :  { %5134 = vmatmul.msk.f32.vlgmr.msrb.gmra.mxu2 %vm181_vm1, %v1735_v45  ;;  %2109 = vadd.xlane.f32.xlu2 %v2108_v27  ;;  %v2068_v20 = vpop.xlane.xlu2 %2067 }
 0xa51   :  { %2022 = vmatpush.msra.mxu2 %v6613_v14  ;;  %v6815_v14 = vpop.f32.mrf.mxu0  ;;  %v2084_v31 = vmul.f32 %v2068_v20, %v6076_v53 }
 0xa52   :  { %v1842_v47 = vpop.permute.xlu1 %1841 }
 0xa53   :  { %5148 = vmatmul.msk.f32.gmra.mxu0 %vm451_vm15, %v1842_v47  ;;  %v6839_v60 = vsub.f32 %v6747_v6, %v2084_v31 }
 0xa55   :  { %v2100_v21 = vmul.f32 %v6839_v60, %v6839_v60 }
 0xa57   :  { %v2114_v41 = vsel %vm181_vm1, %v2100_v21, 0.0 }
 0xa58   :  { %5135 = vmatmul.msk.f32.gmra.mxu2 %vm181_vm1, %v1736_v58  ;;  %v1844_v43 = vpop.permute.xlu0 %1843 }
 0xa59   :  { %v6817_v54 = vpop.f32.mrf.mxu0 }
 0xa5b   :  { %5149 = vmatmul.msk.f32.gmra.mxu0 %vm451_vm15, %v1844_v43 }
 0xa60   :  { %5136 = vmatmul.msk.f32.gmra.mxu2 %vm181_vm1, %v1737_v11 }
 0xa76   :  { %v6826_v7 = vpop.f32.mrf.mxu0 }
 0xa7d   :  { %v1730_v28 = vpop.xlane.xlu1 %1729 }
 0xa7e   :  { %5657 = vrcp.f32 %v1730_v28 }
 0xa83   :  { %v2059_v55 = vpop.xlane.xlu0 %2058 }
 0xa84   :  { %v5658_v12 = vpop.eup %5657  ;;  %v2081_v51 = vmul.f32 %v2059_v55, %v6076_v53 }
 0xa85   :  { %v2065_v19 = vpop.xlane.xlu1 %2064  ;;  %v1738_v38 = vmul.f32 %v5658_v12, %v6770_v62 }
 0xa86   :  { %v6822_v63 = vsub.f32 %v6780_v5, %v2081_v51  ;;  %v2083_v61 = vmul.f32 %v2065_v19, %v6076_v53 }
 0xa87   :  { %5137 = vmatmul.msk.f32.gmra.mxu2 %vm181_vm1, %v1738_v38 }
 0xa88   :  { %v1540_v13 = vpop.f32.mrf.mxu2  ;;  %v2097_v24 = vmul.f32 %v6822_v63, %v6822_v63  ;;  %v6832_v52 = vsub.f32 %v6784_v0, %v2083_v61 }
 0xa89   :  { %5118 = vmatmul.msk.f32.vlgmr.msrb.gmra.mxu3 %vm451_vm15, %v1540_v13 }
 0xa8a   :  { %v2105_v62 = vsel %vm181_vm1, %v2097_v24, 0.0  ;;  %v2099_v46 = vmul.f32 %v6832_v52, %v6832_v52  ;;  %2274 = vmatpush.msrb.mxu3 %v2236_v8 }
 0xa8b   :  { %2106 = vadd.xlane.f32.xlu1 %v2105_v62 }
 0xa8c   :  { %v2111_v17 = vsel %vm181_vm1, %v2099_v46, 0.0  ;;  %2275 = vmatpush.msrb.mxu3 %v2235_v33 }
 0xa90   :  { %v1543_v15 = vpop.f32.mrf.mxu2  ;;  %v1886_v34 = vpop.f32.mrf.mxu0 }
 0xa91   :  { %5119 = vmatmul.msk.f32.gmra.mxu3 %vm451_vm15, %v1543_v15  ;;  %v1898_v10 = vsel %vm181_vm1, %v1886_v34, -inf }
 0xa92   :  { %1899 = vmax.xlane.f32.xlu0 %v1898_v10 }
 0xa93   :  { %2112 = vadd.xlane.f32.xlu1 %v2111_v17 }
 0xa9a   :  { %2115 = vadd.xlane.f32.xlu0 %v2114_v41 }
 0xab7   :  { %v1546_v30 = vpop.f32.mrf.mxu2 }
 0xab8   :  { %5120 = vmatmul.msk.f32.gmra.mxu3 %vm451_vm15, %v1546_v30 }
 0xabf   :  { %v1549_v36 = vpop.f32.mrf.mxu2 }
 0xac0   :  { %5121 = vmatmul.msk.f32.gmra.mxu3 %vm451_vm15, %v1549_v36  ;;  %v6849_v40 = vpop.f32.mrf.mxu0 }
 0xac1   :  { %v1901_v1 = vsel %vm181_vm1, %v6849_v40, -inf }
 0xac2   :  { %1902 = vmax.xlane.f32.xlu2 %v1901_v1 }
 0xac3   :  { %v2110_v9 = vpop.xlane.xlu2 %2109 }
 0xac4   :  { %v2130_v50 = vmul.f32 %v2110_v9, %v6076_v53 }
 0xac6   :  { %v2138_v45 = vadd.f32 1e-05, %v2130_v50 }
 0xac8   :  { %5659 = vrsqrt.f32 %v2138_v45  ;;  %vm2161_vm3 = vweird.f32 %v2138_v45 }
 0xace   :  { %v5660_v26 = vpop.eup %5659 }
 0xacf   :  { %v2156_v58 = vmul.f32 %v5660_v26, %v2138_v45  ;;  %vm2162_vm2 = vweird.f32 %v5660_v26 }
 0xad0   :  { %v6853_v56 = vpop.f32.mrf.mxu0  ;;  %vm2163_vm4 = vmor %vm2161_vm3, %vm2162_vm2 }
 0xad1   :  { %v1904_v29 = vsel %vm181_vm1, %v6853_v56, -inf  ;;  %v2157_v51 = vmul.f32 %v5660_v26, %v2156_v58 }
 0xad2   :  { %1905 = vmax.xlane.f32.xlu1 %v1904_v29 }
 0xad3   :  { %v1780_v18 = vpop.f32.mrf.mxu2  ;;  %v2158_v24 = vmul.f32 0.5, %v2157_v51 }
 0xad4   :  { %5138 = vmatmul.msk.f32.vlgmr.msra.gmra.mxu3 %vm451_vm15, %v1780_v18 }
 0xad5   :  { %v2159_v17 = vsub.f32 1.5, %v2158_v24 }
 0xad7   :  { %v2160_v18 = vmul.f32 %v5660_v26, %v2159_v17  ;;  %v2390_v17 = vld [vmem:[%s8300_s6 + $0x78] sm:$0xff] }
 0xad8   :  { %v6858_v2 = vpop.f32.mrf.mxu0  ;;  %2392 = vmatpush.msra.mxu0 %v2390_v17 }
 0xad9   :  { %v1907_v25 = vsel %vm181_vm1, %v6858_v2, -inf  ;;  %v2164_v9 = vsel %vm2163_vm4, %v5660_v26, %v2160_v18  ;;  %v2384_v18 = vld [vmem:[%s8300_s6 + $0x48] sm:$0xff] }
 0xada   :  { %1908 = vmax.xlane.f32.xlu2 %v1907_v25  ;;  %v2226_v50 = vmul.f32 %v2164_v9, %v6799_v3  ;;  %v2381_v9 = vld [vmem:[%s8300_s6 + $0x30] sm:$0xff] }
 0xadb   :  { %v1783_v59 = vpop.f32.mrf.mxu2 }
 0xadc   :  { %5139 = vmatmul.msk.f32.gmra.mxu3 %vm451_vm15, %v1783_v59 }
 0xae3   :  { %v1786_v35 = vpop.f32.mrf.mxu2 }
 0xae4   :  { %5140 = vmatmul.msk.f32.gmra.mxu3 %vm451_vm15, %v1786_v35 }
 0xaeb   :  { %5439 = vrot.lane.b32.xlu1 %v6581_v44, %s5913_s27  ;;  %v2234_v44 = vld [vmem:[%s8299_s5 + $0x8] sm:$0xff] }
 0xaec   :  { %2276 = vmatpush.msrb.mxu3 %v2234_v44 }
 0xaee   :  { %2277 = vmatpush.msrb.mxu3 %v2233_v37 }
 0xaf2   :  { %5444 = vrot.lane.b32.xlu2 %v6624_v16, %s5913_s27 }
 0xafe   :  { %v2107_v16 = vpop.xlane.xlu1 %2106 }
 0xaff   :  { %v2129_v27 = vmul.f32 %v2107_v16, %v6076_v53 }
 0xb01   :  { %v2137_v47 = vadd.f32 1e-05, %v2129_v27 }
 0xb03   :  { %5661 = vrsqrt.f32 %v2137_v47  ;;  %vm2151_vm14 = vweird.f32 %v2137_v47 }
 0xb05   :  { %v1900_v43 = vpop.xlane.xlu0 %1899 }
 0xb06   :  { %v1910_v4 = vsub.f32 %v1886_v34, %v1900_v43  ;;  %v2113_v11 = vpop.xlane.xlu1 %2112 }
 0xb07   :  { %v2131_v28 = vmul.f32 %v2113_v11, %v6076_v53 }
 0xb08   :  { %v1914_v55 = vmul.f32 1.442695, %v1910_v4 }
 0xb09   :  { %v5662_v12 = vpop.eup %5661  ;;  %v2139_v19 = vadd.f32 1e-05, %v2131_v28 }
 0xb0a   :  { %v2146_v38 = vmul.f32 %v5662_v12, %v2137_v47  ;;  %5663 = vpow2.f32 %v1914_v55  ;;  %v1789_v61 = vpop.f32.mrf.mxu2  ;;  %vm2152_vm13 = vweird.f32 %v5662_v12 }
 0xb0b   :  { %5665 = vrsqrt.f32 %v2139_v19  ;;  %5141 = vmatmul.msk.f32.gmra.mxu3 %vm451_vm15, %v1789_v61  ;;  %vm2153_vm0 = vmor %vm2151_vm14, %vm2152_vm13  ;;  %vm2171_vm6 = vweird.f32 %v2139_v19 }
 0xb0c   :  { %v2147_v13 = vmul.f32 %v5662_v12, %v2146_v38  ;;  %v6908_v38 = vpop.f32.mrf.mxu3 }
 0xb0d   :  { %v2116_v20 = vpop.xlane.xlu0 %2115 }
 0xb0e   :  { %v2148_v62 = vmul.f32 0.5, %v2147_v13  ;;  %v2132_v31 = vmul.f32 %v2116_v20, %v6076_v53 }
 0xb10   :  { %v6885_v46 = vpop.eup %5663  ;;  %v2149_v15 = vsub.f32 1.5, %v2148_v62  ;;  %v2140_v34 = vadd.f32 1e-05, %v2132_v31 }
 0xb11   :  { %v5666_v10 = vpop.eup %5665  ;;  %v1922_v21 = vsel %vm181_vm1, %v6885_v46, 0.0 }
 0xb12   :  { %v2150_v41 = vmul.f32 %v5662_v12, %v2149_v15  ;;  %v2166_v30 = vmul.f32 %v5666_v10, %v2139_v19  ;;  %5667 = vrsqrt.f32 %v2140_v34  ;;  %1923 = vadd.xlane.f32.xlu0 %v1922_v21  ;;  %vm2172_vm5 = vweird.f32 %v5666_v10  ;;  %v2389_v21 = vld [vmem:[%s8300_s6 + $0x70] sm:$0xff] }
 0xb13   :  { %vm2173_vm7 = vmor %vm2171_vm6, %vm2172_vm5  ;;  %vm2181_vm9 = vweird.f32 %v2140_v34  ;;  %2393 = vmatpush.msra.mxu0 %v2389_v21 }
 0xb14   :  { %v2154_v36 = vsel %vm2153_vm0, %v5662_v12, %v2150_v41  ;;  %v2167_v1 = vmul.f32 %v5666_v10, %v2166_v30  ;;  %v6914_v13 = vpop.f32.mrf.mxu3  ;;  %v2388_v41 = vld [vmem:[%s8300_s6 + $0x68] sm:$0xff]  ;;  %v2387_v30 = vld [vmem:[%s8300_s6 + $0x60] sm:$0xff] }
 0xb15   :  { %v2225_v29 = vmul.f32 %v2154_v36, %v6822_v63  ;;  %2394 = vmatpush.msra.mxu0 %v2388_v41 }
 0xb16   :  { %v2168_v25 = vmul.f32 0.5, %v2167_v1  ;;  %v2386_v1 = vld [vmem:[%s8300_s6 + $0x58] sm:$0xff] }
 0xb17   :  { %5158 = vmatmul.msk.f32.vlgmr.msrb.gmra.mxu3 %vm181_vm1, %v2225_v29  ;;  %2395 = vmatpush.msra.mxu0 %v2387_v30  ;;  %v2385_v29 = vld [vmem:[%s8300_s6 + $0x50] sm:$0xff] }
 0xb18   :  { %v5668_v59 = vpop.eup %5667  ;;  %v2169_v8 = vsub.f32 1.5, %v2168_v25 }
 0xb19   :  { %v2176_v35 = vmul.f32 %v5668_v59, %v2140_v34  ;;  %vm2182_vm8 = vweird.f32 %v5668_v59  ;;  %2396 = vmatpush.msra.mxu0 %v2386_v1 }
 0xb1a   :  { %v2170_v44 = vmul.f32 %v5666_v10, %v2169_v8  ;;  %vm2183_vm10 = vmor %vm2181_vm9, %vm2182_vm8 }
 0xb1b   :  { %v2177_v33 = vmul.f32 %v5668_v59, %v2176_v35  ;;  %2397 = vmatpush.msra.mxu0 %v2385_v29  ;;  %v2382_v35 = vld [vmem:[%s8300_s6 + $0x38] sm:$0xff] }
 0xb1c   :  { %v2174_v16 = vsel %vm2173_vm7, %v5666_v10, %v2170_v44 }
 0xb1d   :  { %v2178_v37 = vmul.f32 0.5, %v2177_v33  ;;  %v2227_v27 = vmul.f32 %v2174_v16, %v6832_v52  ;;  %2398 = vmatpush.msra.mxu0 %v2384_v18  ;;  %v2380_v33 = vld [vmem:[%s8300_s6 + $0x28] sm:$0xff] }
 0xb1f   :  { %5159 = vmatmul.msk.f32.gmra.mxu3 %vm181_vm1, %v2226_v50  ;;  %v2179_v63 = vsub.f32 1.5, %v2178_v37  ;;  %v2379_v50 = vld [vmem:[%s8300_s6 + $0x20] sm:$0xff]  ;;  %v2378_v37 = vld [vmem:[%s8300_s6 + $0x18] sm:$0xff] }
 0xb21   :  { %v2180_v47 = vmul.f32 %v5668_v59, %v2179_v63 }
 0xb23   :  { %v2184_v45 = vsel %vm2183_vm10, %v5668_v59, %v2180_v47  ;;  %v2383_v59 = vld [vmem:[%s8300_s6 + $0x40] sm:$0xff]  ;;  %v2376_v47 = vld [vmem:[%s8300_s6 + $0x8] sm:$0xff] }
 0xb24   :  { %v2228_v3 = vmul.f32 %v2184_v45, %v6839_v60  ;;  %2399 = vmatpush.msra.mxu0 %v2383_v59  ;;  %v2375_v45 = vld [vmem:[%s8300_s6] sm:$0xff] }
 0xb26   :  { %2400 = vmatpush.msra.mxu0 %v2382_v35 }
 0xb27   :  { %5160 = vmatmul.msk.f32.gmra.mxu3 %vm181_vm1, %v2227_v27  ;;  %v2377_v27 = vld [vmem:[%s8300_s6 + $0x10] sm:$0xff] }
 0xb28   :  { %2401 = vmatpush.msra.mxu0 %v2381_v9 }
 0xb2a   :  { %2402 = vmatpush.msra.mxu0 %v2380_v33 }
 0xb2c   :  { %2403 = vmatpush.msra.mxu0 %v2379_v50 }
 0xb2e   :  { %2404 = vmatpush.msra.mxu0 %v2378_v37 }
 0xb2f   :  { %5161 = vmatmul.msk.f32.gmra.mxu3 %vm181_vm1, %v2228_v3 }
 0xb30   :  { %2405 = vmatpush.msra.mxu0 %v2377_v27 }
 0xb32   :  { %2406 = vmatpush.msra.mxu0 %v2376_v47 }
 0xb34   :  { %2407 = vmatpush.msra.mxu0 %v2375_v45 }
 0xb35   :  { %v1903_v26 = vpop.xlane.xlu2 %1902 }
 0xb36   :  { %v1911_v58 = vsub.f32 %v6849_v40, %v1903_v26 }
 0xb38   :  { %v1916_v43 = vmul.f32 1.442695, %v1911_v58 }
 0xb3a   :  { %5669 = vpow2.f32 %v1916_v43 }
 0xb3b   :  { %v6916_v15 = vpop.f32.mrf.mxu3 }
 0xb40   :  { %v6898_v4 = vpop.eup %5669 }
 0xb41   :  { %v1925_v52 = vsel %vm181_vm1, %v6898_v4, 0.0 }
 0xb42   :  { %1926 = vadd.xlane.f32.xlu0 %v1925_v52 }
 0xb43   :  { %v6918_v10 = vpop.f32.mrf.mxu3 }
 0xb45   :  { %v1906_v11 = vpop.xlane.xlu1 %1905 }
 0xb46   :  { %v1912_v28 = vsub.f32 %v6853_v56, %v1906_v11 }
 0xb48   :  { %v1918_v55 = vmul.f32 1.442695, %v1912_v28 }
 0xb4a   :  { %5671 = vpow2.f32 %v1918_v55 }
 0xb4d   :  { %v1909_v12 = vpop.xlane.xlu2 %1908 }
 0xb4e   :  { %v1913_v60 = vsub.f32 %v6858_v2, %v1909_v12 }
 0xb50   :  { %v6904_v51 = vpop.eup %5671  ;;  %v1920_v19 = vmul.f32 1.442695, %v1913_v60 }
 0xb51   :  { %v1928_v40 = vsel %vm181_vm1, %v6904_v51, 0.0 }
 0xb52   :  { %5673 = vpow2.f32 %v1920_v19  ;;  %1929 = vadd.xlane.f32.xlu0 %v1928_v40 }
 0xb55   :  { %v5445_v20 = vpop.permute.xlu2 %5444 }
 0xb56   :  { %v5446_v31 = vunpack.i.l.bf16 %v5445_v20  ;;  %v5447_v34 = vunpack.i.h.bf16 %v5445_v20 }
 0xb57   :  { %v6932_v36 = vpop.f32.mrf.mxu3 }
 0xb58   :  { %v6910_v61 = vpop.eup %5673 }
 0xb59   :  { %v1931_v56 = vsel %vm181_vm1, %v6910_v61, 0.0 }
 0xb5a   :  { %1932 = vadd.xlane.f32.xlu0 %v1931_v56 }
 0xb5d   :  { %v5440_v24 = vpop.permute.xlu1 %5439 }
 0xb5e   :  { %v5441_v2 = vunpack.i.l.bf16 %v5440_v24  ;;  %v5442_v62 = vunpack.i.h.bf16 %v5440_v24 }
 0xb5f   :  { %v6943_v25 = vpop.f32.mrf.mxu3 }
 0xb60   :  { %1978 = vmatpush.msrb.mxu1 %v5441_v2 }
 0xb62   :  { %1979 = vmatpush.msrb.mxu1 %v5442_v62 }
 0xb64   :  { %1980 = vmatpush.msrb.mxu1 %v5446_v31 }
 0xb66   :  { %1981 = vmatpush.msrb.mxu1 %v5447_v34 }
 0xb67   :  { %v6960_v44 = vpop.f32.mrf.mxu3 }
 0xb85   :  { %v1924_v8 = vpop.xlane.xlu0 %1923 }
 0xb86   :  { %5675 = vrcp.f32 %v1924_v8 }
 0xb8c   :  { %v5676_v63 = vpop.eup %5675 }
 0xb8d   :  { %v1938_v16 = vmul.f32 %v5676_v63, %v6885_v46  ;;  %v6979_v46 = vperm.slane %v6722_v57, 2 }
 0xb8e   :  { %v6976_v3 = vpop.f32.mrf.mxu3 }
 0xb8f   :  { %5150 = vmatmul.msk.f32.vlgmr.msrb.gmra.mxu1 %vm181_vm1, %v1938_v16 }
 0xb9a   :  { %v2279_v26 = vpop.f32.mrf.mxu3 }
 0xb9b   :  { %v2280_v58 = vadd.f32 %v2279_v26, %v6979_v46 }
 0xb9d   :  { %v2311_v43 = vmul.f32 0.044715, %v2280_v58  ;;  %v2303_v17 = vmul.f32 0.5, %v2280_v58 }
 0xb9f   :  { %v2319_v52 = vmul.f32 %v2311_v43, %v2280_v58 }
 0xba1   :  { %v2327_v11 = vmul.f32 %v2319_v52, %v2280_v58 }
 0xba2   :  { %v2282_v28 = vpop.f32.mrf.mxu3 }
 0xba3   :  { %v2335_v55 = vadd.f32 %v2327_v11, %v2280_v58  ;;  %v2283_v12 = vadd.f32 %v2282_v28, %v6979_v46 }
 0xba5   :  { %v2343_v60 = vmul.f32 0.7978846, %v2335_v55  ;;  %v2312_v19 = vmul.f32 0.044715, %v2283_v12  ;;  %v2304_v50 = vmul.f32 0.5, %v2283_v12 }
 0xba7   :  { %5677 = vtanh.f32 %v2343_v60  ;;  %v2320_v40 = vmul.f32 %v2312_v19, %v2283_v12 }
 0xba9   :  { %v2328_v56 = vmul.f32 %v2320_v40, %v2283_v12 }
 0xbaa   :  { %v2285_v24 = vpop.f32.mrf.mxu3 }
 0xbab   :  { %v2286_v2 = vadd.f32 %v2285_v24, %v6979_v46  ;;  %v2336_v20 = vadd.f32 %v2328_v56, %v2283_v12 }
 0xbad   :  { %v5678_v62 = vpop.eup %5677  ;;  %v2313_v31 = vmul.f32 0.044715, %v2286_v2  ;;  %v2344_v34 = vmul.f32 0.7978846, %v2336_v20  ;;  %v2305_v52 = vmul.f32 0.5, %v2286_v2 }
 0xbae   :  { %v2359_v21 = vadd.f32 1.0, %v5678_v62 }
 0xbaf   :  { %5679 = vtanh.f32 %v2344_v34  ;;  %v2321_v41 = vmul.f32 %v2313_v31, %v2286_v2  ;;  %v6993_v31 = vperm.slane %v6722_v57, 3 }
 0xbb0   :  { %v2367_v30 = vmul.f32 %v2359_v21, %v2303_v17 }
 0xbb1   :  { %v2329_v1 = vmul.f32 %v2321_v41, %v2286_v2 }
 0xbb2   :  { %v2288_v29 = vpop.f32.mrf.mxu3  ;;  %2408 = vmatmul.f32.vlgmr.msra.gmra.mxu0 %v2367_v30 }
 0xbb3   :  { %v2289_v18 = vadd.f32 %v2288_v29, %v6979_v46  ;;  %v2337_v59 = vadd.f32 %v2329_v1, %v2286_v2 }
 0xbb5   :  { %v5680_v35 = vpop.eup %5679  ;;  %v2314_v8 = vmul.f32 0.044715, %v2289_v18  ;;  %v1927_v9 = vpop.xlane.xlu0 %1926  ;;  %v2345_v33 = vmul.f32 0.7978846, %v2337_v59  ;;  %v2306_v60 = vmul.f32 0.5, %v2289_v18 }
 0xbb6   :  { %5681 = vrcp.f32 %v1927_v9  ;;  %v2360_v37 = vadd.f32 1.0, %v5680_v35 }
 0xbb7   :  { %5683 = vtanh.f32 %v2345_v33  ;;  %v2322_v63 = vmul.f32 %v2314_v8, %v2289_v18 }
 0xbb8   :  { %v2368_v16 = vmul.f32 %v2360_v37, %v2304_v50 }
 0xbb9   :  { %v2330_v27 = vmul.f32 %v2322_v63, %v2289_v18 }
 0xbba   :  { %2411 = vmatmul.f32.gmra.mxu0 %v2368_v16 }
 0xbbb   :  { %v2338_v47 = vadd.f32 %v2330_v27, %v2289_v18 }
 0xbbc   :  { %v5682_v45 = vpop.eup %5681 }
 0xbbd   :  { %v5684_v26 = vpop.eup %5683  ;;  %v1939_v58 = vmul.f32 %v5682_v45, %v6898_v4  ;;  %v2346_v43 = vmul.f32 0.7978846, %v2338_v47 }
 0xbbe   :  { %v2361_v11 = vadd.f32 1.0, %v5684_v26 }
 0xbbf   :  { %5151 = vmatmul.msk.f32.gmra.mxu1 %vm181_vm1, %v1939_v58  ;;  %5685 = vtanh.f32 %v2346_v43 }
 0xbc0   :  { %v2369_v28 = vmul.f32 %v2361_v11, %v2305_v52  ;;  %v1626_v52 = vadd.f32 %v6815_v14, %v6914_v13  ;;  %v1629_v14 = vadd.f32 %v6817_v54, %v6916_v15 }
 0xbc2   :  { %2414 = vmatmul.f32.gmra.mxu0 %v2369_v28  ;;  %v1834_v28 = vadd.f32 %v6943_v25, %v1626_v52  ;;  %v1835_v13 = vadd.f32 %v6960_v44, %v1629_v14 }
 0xbc5   :  { %v5686_v55 = vpop.eup %5685  ;;  %v1930_v12 = vpop.xlane.xlu0 %1929 }
 0xbc6   :  { %5687 = vrcp.f32 %v1930_v12  ;;  %v2362_v19 = vadd.f32 1.0, %v5686_v55 }
 0xbc8   :  { %v2370_v40 = vmul.f32 %v2362_v19, %v2306_v60 }
 0xbca   :  { %2417 = vmatmul.f32.gmra.mxu0 %v2370_v40 }
 0xbcc   :  { %v5688_v56 = vpop.eup %5687 }
 0xbcd   :  { %v1933_v24 = vpop.xlane.xlu0 %1932  ;;  %v1940_v20 = vmul.f32 %v5688_v56, %v6904_v51 }
 0xbce   :  { %5689 = vrcp.f32 %v1933_v24 }
 0xbcf   :  { %5152 = vmatmul.msk.f32.gmra.mxu1 %vm181_vm1, %v1940_v20 }
 0xbd4   :  { %v5690_v4 = vpop.eup %5689 }
 0xbd5   :  { %v1941_v2 = vmul.f32 %v5690_v4, %v6910_v61 }
 0xbd7   :  { %5153 = vmatmul.msk.f32.gmra.mxu1 %vm181_vm1, %v1941_v2 }
 0xc0c   :  { %v1983_v62 = vpop.f32.mrf.mxu1 }
 0xc0d   :  { %5154 = vmatmul.msk.f32.vlgmr.msra.gmra.mxu2 %vm451_vm15, %v1983_v62 }
 0xc2f   :  { %v2409_v34 = vpop.f32.mrf.mxu0 }
 0xc30   :  { %v2410_v17 = vadd.f32 %v2409_v34, %v6993_v31 }
 0xc32   :  { %v6997_v21 = vadd.f32 %v2410_v17, %v6780_v5 }
 0xc34   :  { %v2443_v51 = vsel %vm181_vm1, %v6997_v21, 0.0 }
 0xc35   :  { %2444 = vadd.xlane.f32.xlu2 %v2443_v51 }
 0xc37   :  { %v2412_v41 = vpop.f32.mrf.mxu0 }
 0xc38   :  { %v2413_v61 = vadd.f32 %v2412_v41, %v6993_v31 }
 0xc3a   :  { %v7003_v30 = vadd.f32 %v2413_v61, %v6739_v32 }
 0xc3c   :  { %v1986_v1 = vpop.f32.mrf.mxu1  ;;  %v2446_v57 = vsel %vm181_vm1, %v7003_v30, 0.0 }
 0xc3d   :  { %2447 = vadd.xlane.f32.xlu1 %v2446_v57  ;;  %5155 = vmatmul.msk.f32.gmra.mxu2 %vm451_vm15, %v1986_v1 }
 0xc3f   :  { %v2415_v29 = vpop.f32.mrf.mxu0 }
 0xc40   :  { %v2416_v5 = vadd.f32 %v2415_v29, %v6993_v31 }
 0xc42   :  { %v7010_v18 = vadd.f32 %v2416_v5, %v6784_v0  ;;  %v1623_v0 = vadd.f32 %v6813_v49, %v6908_v38 }
 0xc44   :  { %v2449_v59 = vsel %vm181_vm1, %v7010_v18, 0.0  ;;  %v1833_v37 = vadd.f32 %v6932_v36, %v1623_v0 }
 0xc45   :  { %2450 = vadd.xlane.f32.xlu0 %v2449_v59 }
 0xc47   :  { %v2418_v35 = vpop.f32.mrf.mxu0 }
 0xc48   :  { %v2419_v32 = vadd.f32 %v2418_v35, %v6993_v31 }
 0xc4a   :  { %v7016_v8 = vadd.f32 %v2419_v32, %v6747_v6  ;;  %v5170_v32 = vld [vmem:[%s8296_s3 + $0x38] sm:$0xff] }
 0xc4b   :  { %2661 = vmatpush.msra.mxu1 %v5170_v32 }
 0xc4c   :  { %v1989_v9 = vpop.f32.mrf.mxu1  ;;  %v2452_v33 = vsel %vm181_vm1, %v7016_v8, 0.0 }
 0xc4d   :  { %2453 = vadd.xlane.f32.xlu0 %v2452_v33  ;;  %5156 = vmatmul.msk.f32.gmra.mxu2 %vm451_vm15, %v1989_v9  ;;  %v5169_v9 = vld [vmem:[%s8296_s3 + $0x30] sm:$0xff]  ;;  %v5168_v33 = vld [vmem:[%s8296_s3 + $0x28] sm:$0xff] }
 0xc4e   :  { %2662 = vmatpush.msra.mxu1 %v5169_v9 }
 0xc50   :  { %2663 = vmatpush.msra.mxu1 %v5168_v33 }
 0xc54   :  { %v1992_v50 = vpop.f32.mrf.mxu1 }
 0xc55   :  { %5157 = vmatmul.msk.f32.gmra.mxu2 %vm451_vm15, %v1992_v50  ;;  %v5167_v50 = vld [vmem:[%s8296_s3 + $0x20] sm:$0xff] }
 0xc56   :  { %2664 = vmatpush.msra.mxu1 %v5167_v50 }
 0xc90   :  { %v2024_v63 = vpop.f32.mrf.mxu2 }
 0xc91   :  { %v2036_v16 = vadd.f32 %v2024_v63, %v1833_v37 }
 0xc93   :  { %v2045_v6 = vadd.f32 %v6725_v42, %v2036_v16 }
 0xc95   :  { %v7027_v27 = vadd.f32 %v2045_v6, %v6238_v48 }
 0xc97   :  { %v2069_v47 = vsel %vm181_vm1, %v7027_v27, 0.0 }
 0xc98   :  { %2070 = vadd.xlane.f32.xlu0 %v2069_v47 }
 0xca8   :  { %v2445_v45 = vpop.xlane.xlu2 %2444 }
 0xca9   :  { %v2467_v26 = vmul.f32 %v2445_v45, %v6076_v53 }
 0xcab   :  { %v7033_v58 = vsub.f32 %v6997_v21, %v2467_v26 }
 0xcad   :  { %v2483_v49 = vmul.f32 %v7033_v58, %v7033_v58 }
 0xcaf   :  { %v2491_v38 = vsel %vm181_vm1, %v2483_v49, 0.0 }
 0xcb0   :  { %2492 = vadd.xlane.f32.xlu2 %v2491_v38  ;;  %v2448_v25 = vpop.xlane.xlu1 %2447 }
 0xcb1   :  { %v2468_v4 = vmul.f32 %v2448_v25, %v6076_v53 }
 0xcb3   :  { %v7066_v17 = vsub.f32 %v7003_v30, %v2468_v4 }
 0xcb8   :  { %v2451_v36 = vpop.xlane.xlu0 %2450 }
 0xcb9   :  { %v2469_v48 = vmul.f32 %v2451_v36, %v6076_v53 }
 0xcbb   :  { %v7040_v43 = vsub.f32 %v7010_v18, %v2469_v48 }
 0xcbd   :  { %v2485_v11 = vmul.f32 %v7040_v43, %v7040_v43 }
 0xcbf   :  { %v2497_v55 = vsel %vm181_vm1, %v2485_v11, 0.0 }
 0xcc0   :  { %2498 = vadd.xlane.f32.xlu2 %v2497_v55  ;;  %v2027_v12 = vpop.f32.mrf.mxu2  ;;  %v2454_v15 = vpop.xlane.xlu0 %2453 }
 0xcc1   :  { %v2037_v60 = vadd.f32 %v2027_v12, %v1834_v28  ;;  %v2470_v41 = vmul.f32 %v2454_v15, %v6076_v53 }
 0xcc3   :  { %v2046_v19 = vadd.f32 %v6725_v42, %v2037_v60 }
 0xcc5   :  { %v7050_v40 = vadd.f32 %v2046_v19, %v6269_v22  ;;  %v1632_v22 = vadd.f32 %v6826_v7, %v6918_v10  ;;  %v7078_v10 = vsub.f32 %v7016_v8, %v2470_v41 }
 0xcc7   :  { %v2072_v56 = vsel %vm181_vm1, %v7050_v40, 0.0  ;;  %v1836_v34 = vadd.f32 %v6976_v3, %v1632_v22  ;;  %v2486_v57 = vmul.f32 %v7078_v10, %v7078_v10 }
 0xcc8   :  { %2073 = vadd.xlane.f32.xlu0 %v2072_v56 }
 0xcd0   :  { %v2030_v24 = vpop.f32.mrf.mxu2 }
 0xcd1   :  { %v2038_v20 = vadd.f32 %v2030_v24, %v1835_v13 }
 0xcd3   :  { %v2047_v2 = vadd.f32 %v6725_v42, %v2038_v20 }
 0xcd5   :  { %v7062_v62 = vadd.f32 %v2047_v2, %v6271_v23  ;;  %v2484_v23 = vmul.f32 %v7066_v17, %v7066_v17 }
 0xcd7   :  { %v2075_v54 = vsel %vm181_vm1, %v7062_v62, 0.0  ;;  %v2494_v3 = vsel %vm181_vm1, %v2484_v23, 0.0 }
 0xcd8   :  { %2076 = vadd.xlane.f32.xlu0 %v2075_v54  ;;  %v2033_v44 = vpop.f32.mrf.mxu2 }
 0xcd9   :  { %v2039_v51 = vadd.f32 %v2033_v44, %v1836_v34 }
 0xcdb   :  { %v2048_v61 = vadd.f32 %v6725_v42, %v2039_v51  ;;  %v2500_v42 = vsel %vm181_vm1, %v2486_v57, 0.0 }
 0xcdd   :  { %v7075_v7 = vadd.f32 %v2048_v61, %v6281_v39 }
 0xcdf   :  { %v2078_v1 = vsel %vm181_vm1, %v7075_v7, 0.0 }
 0xce0   :  { %2495 = vadd.xlane.f32.xlu0 %v2494_v3  ;;  %2079 = vadd.xlane.f32.xlu1 %v2078_v1 }
 0xce8   :  { %2501 = vadd.xlane.f32.xlu1 %v2500_v42 }
 0xd0b   :  { %v2071_v29 = vpop.xlane.xlu0 %2070 }
 0xd0c   :  { %v2085_v39 = vmul.f32 %v2071_v29, %v6076_v53 }
 0xd0e   :  { %v7088_v5 = vsub.f32 %v7027_v27, %v2085_v39 }
 0xd10   :  { %v2101_v59 = vmul.f32 %v7088_v5, %v7088_v5 }
 0xd12   :  { %v2117_v35 = vsel %vm181_vm1, %v2101_v59, 0.0 }
 0xd13   :  { %2118 = vadd.xlane.f32.xlu0 %v2117_v35 }
 0xd23   :  { %v2493_v0 = vpop.xlane.xlu2 %2492 }
 0xd24   :  { %v2515_v37 = vmul.f32 %v2493_v0, %v6076_v53 }
 0xd26   :  { %v2523_v63 = vadd.f32 1e-05, %v2515_v37 }
 0xd28   :  { %5691 = vrsqrt.f32 %v2523_v63  ;;  %vm2537_vm12 = vweird.f32 %v2523_v63 }
 0xd2e   :  { %v5692_v16 = vpop.eup %5691 }
 0xd2f   :  { %v2532_v6 = vmul.f32 %v5692_v16, %v2523_v63  ;;  %vm2538_vm11 = vweird.f32 %v5692_v16 }
 0xd30   :  { %vm2539_vm13 = vmor %vm2537_vm12, %vm2538_vm11 }
 0xd31   :  { %v2533_v47 = vmul.f32 %v5692_v16, %v2532_v6 }
 0xd33   :  { %v2534_v45 = vmul.f32 0.5, %v2533_v47  ;;  %v2499_v12 = vpop.xlane.xlu2 %2498 }
 0xd34   :  { %v2517_v60 = vmul.f32 %v2499_v12, %v6076_v53 }
 0xd35   :  { %v2535_v26 = vsub.f32 1.5, %v2534_v45 }
 0xd36   :  { %v2525_v56 = vadd.f32 1e-05, %v2517_v60 }
 0xd37   :  { %v2536_v49 = vmul.f32 %v5692_v16, %v2535_v26 }
 0xd38   :  { %5693 = vrsqrt.f32 %v2525_v56  ;;  %vm2557_vm4 = vweird.f32 %v2525_v56 }
 0xd39   :  { %v2540_v38 = vsel %vm2539_vm13, %v5692_v16, %v2536_v49 }
 0xd3a   :  { %v2611_v36 = vmul.f32 %v2540_v38, %v7033_v58 }
 0xd3b   :  { %v2074_v48 = vpop.xlane.xlu0 %2073 }
 0xd3c   :  { %v2086_v52 = vmul.f32 %v2074_v48, %v6076_v53  ;;  %5171 = vmatmul.msk.f32.vlgmr.msra.gmra.mxu1 %vm181_vm1, %v2611_v36 }
 0xd3e   :  { %v7110_v11 = vsub.f32 %v7050_v40, %v2086_v52  ;;  %v5694_v54 = vpop.eup %5693 }
 0xd3f   :  { %v2552_v51 = vmul.f32 %v5694_v54, %v2525_v56  ;;  %vm2558_vm3 = vweird.f32 %v5694_v54 }
 0xd40   :  { %v2102_v28 = vmul.f32 %v7110_v11, %v7110_v11  ;;  %vm2559_vm5 = vmor %vm2557_vm4, %vm2558_vm3 }
 0xd41   :  { %v2553_v1 = vmul.f32 %v5694_v54, %v2552_v51 }
 0xd42   :  { %v2120_v55 = vsel %vm181_vm1, %v2102_v28, 0.0 }
 0xd43   :  { %2121 = vadd.xlane.f32.xlu2 %v2120_v55  ;;  %v2554_v29 = vmul.f32 0.5, %v2553_v1 }
 0xd45   :  { %v2555_v32 = vsub.f32 1.5, %v2554_v29 }
 0xd47   :  { %v2556_v63 = vmul.f32 %v5694_v54, %v2555_v32 }
 0xd49   :  { %v2560_v47 = vsel %vm2559_vm5, %v5694_v54, %v2556_v63 }
 0xd4a   :  { %v2613_v45 = vmul.f32 %v2560_v47, %v7040_v43 }
 0xd4b   :  { %v2077_v19 = vpop.xlane.xlu0 %2076 }
 0xd4c   :  { %v2087_v58 = vmul.f32 %v2077_v19, %v6076_v53 }
 0xd4e   :  { %v7118_v14 = vsub.f32 %v7062_v62, %v2087_v58 }
 0xd50   :  { %v2103_v13 = vmul.f32 %v7118_v14, %v7118_v14 }
 0xd52   :  { %v2123_v25 = vsel %vm181_vm1, %v2103_v13, 0.0 }
 0xd53   :  { %v2496_v24 = vpop.xlane.xlu0 %2495  ;;  %2124 = vadd.xlane.f32.xlu1 %v2123_v25  ;;  %v2080_v20 = vpop.xlane.xlu1 %2079 }
 0xd54   :  { %v2516_v4 = vmul.f32 %v2496_v24, %v6076_v53  ;;  %v2088_v2 = vmul.f32 %v2080_v20, %v6076_v53 }
 0xd56   :  { %v2524_v22 = vadd.f32 1e-05, %v2516_v4  ;;  %v7126_v34 = vsub.f32 %v7075_v7, %v2088_v2 }
 0xd58   :  { %5695 = vrsqrt.f32 %v2524_v22  ;;  %v2104_v15 = vmul.f32 %v7126_v34, %v7126_v34  ;;  %vm2547_vm0 = vweird.f32 %v2524_v22 }
 0xd5a   :  { %v2126_v44 = vsel %vm181_vm1, %v2104_v15, 0.0 }
 0xd5b   :  { %2127 = vadd.xlane.f32.xlu0 %v2126_v44  ;;  %v2502_v41 = vpop.xlane.xlu1 %2501 }
 0xd5c   :  { %v2518_v61 = vmul.f32 %v2502_v41, %v6076_v53 }
 0xd5e   :  { %v5696_v23 = vpop.eup %5695  ;;  %v2526_v3 = vadd.f32 1e-05, %v2518_v61 }
 0xd5f   :  { %v2542_v57 = vmul.f32 %v5696_v23, %v2524_v22  ;;  %vm2548_vm14 = vweird.f32 %v5696_v23 }
 0xd60   :  { %5697 = vrsqrt.f32 %v2526_v3  ;;  %vm2549_vm2 = vmor %vm2547_vm0, %vm2548_vm14  ;;  %vm2567_vm7 = vweird.f32 %v2526_v3 }
 0xd61   :  { %v2543_v42 = vmul.f32 %v5696_v23, %v2542_v57 }
 0xd63   :  { %v2544_v39 = vmul.f32 0.5, %v2543_v42 }
 0xd65   :  { %v2545_v59 = vsub.f32 1.5, %v2544_v39 }
 0xd66   :  { %v5698_v35 = vpop.eup %5697 }
 0xd67   :  { %v2546_v9 = vmul.f32 %v5696_v23, %v2545_v59  ;;  %v2562_v33 = vmul.f32 %v5698_v35, %v2526_v3  ;;  %vm2568_vm6 = vweird.f32 %v5698_v35 }
 0xd68   :  { %vm2569_vm8 = vmor %vm2567_vm7, %vm2568_vm6 }
 0xd69   :  { %v2563_v50 = vmul.f32 %v5698_v35, %v2562_v33  ;;  %v2550_v0 = vsel %vm2549_vm2, %v5696_v23, %v2546_v9 }
 0xd6a   :  { %v2612_v37 = vmul.f32 %v2550_v0, %v7066_v17 }
 0xd6b   :  { %v2564_v16 = vmul.f32 0.5, %v2563_v50 }
 0xd6c   :  { %5172 = vmatmul.msk.f32.gmra.mxu1 %vm181_vm1, %v2612_v37 }
 0xd6d   :  { %v2565_v6 = vsub.f32 1.5, %v2564_v16  ;;  %v5166_v16 = vld [vmem:[%s8297_s7 + $0x4] sm:$0xf] }
 0xd6e   :  { %v7153_v47 = vperm.slane %v5166_v16, 0 }
 0xd6f   :  { %v2566_v26 = vmul.f32 %v5698_v35, %v2565_v6 }
 0xd71   :  { %v2570_v49 = vsel %vm2569_vm8, %v5698_v35, %v2566_v26 }
 0xd72   :  { %v2614_v17 = vmul.f32 %v2570_v49, %v7078_v10 }
 0xd74   :  { %5173 = vmatmul.msk.f32.gmra.mxu1 %vm181_vm1, %v2613_v45 }
 0xd7c   :  { %5174 = vmatmul.msk.f32.gmra.mxu1 %vm181_vm1, %v2614_v17 }
 0xd86   :  { %v2119_v38 = vpop.xlane.xlu0 %2118 }
 0xd87   :  { %v2133_v36 = vmul.f32 %v2119_v38, %v6076_v53 }
 0xd89   :  { %v2141_v48 = vadd.f32 1e-05, %v2133_v36 }
 0xd8b   :  { %5699 = vrsqrt.f32 %v2141_v48  ;;  %vm2191_vm10 = vweird.f32 %v2141_v48 }
 0xd91   :  { %v5700_v52 = vpop.eup %5699 }
 0xd92   :  { %v2186_v28 = vmul.f32 %v5700_v52, %v2141_v48  ;;  %vm2192_vm9 = vweird.f32 %v5700_v52 }
 0xd93   :  { %vm2193_vm11 = vmor %vm2191_vm10, %vm2192_vm9 }
 0xd94   :  { %v2187_v55 = vmul.f32 %v5700_v52, %v2186_v28 }
 0xd96   :  { %v2188_v43 = vmul.f32 0.5, %v2187_v55 }
 0xd98   :  { %v2189_v12 = vsub.f32 1.5, %v2188_v43 }
 0xd9a   :  { %v2190_v60 = vmul.f32 %v5700_v52, %v2189_v12 }
 0xd9c   :  { %v2194_v19 = vsel %vm2193_vm11, %v5700_v52, %v2190_v60 }
 0xd9d   :  { %v2229_v58 = vmul.f32 %v2194_v19, %v7088_v5 }
 0xd9f   :  { %5162 = vmatmul.msk.f32.gmra.mxu3 %vm181_vm1, %v2229_v58 }
 0xdb6   :  { %v2122_v10 = vpop.xlane.xlu2 %2121 }
 0xdb7   :  { %v2134_v56 = vmul.f32 %v2122_v10, %v6076_v53 }
 0xdb9   :  { %v2142_v13 = vadd.f32 1e-05, %v2134_v56  ;;  %v2666_v0 = vpop.f32.mrf.mxu1 }
 0xdba   :  { %v7161_v49 = vadd.f32 %v2666_v0, %v7153_v47 }
 0xdbb   :  { %5701 = vrsqrt.f32 %v2142_v13  ;;  %vm2201_vm13 = vweird.f32 %v2142_v13 }
 0xdc1   :  { %v5702_v25 = vpop.eup %5701 }
 0xdc2   :  { %v2196_v24 = vmul.f32 %v5702_v25, %v2142_v13  ;;  %vm2202_vm12 = vweird.f32 %v5702_v25 }
 0xdc3   :  { %vm2203_vm14 = vmor %vm2201_vm13, %vm2202_vm12 }
 0xdc4   :  { %v2197_v20 = vmul.f32 %v5702_v25, %v2196_v24 }
 0xdc6   :  { %v2198_v4 = vmul.f32 0.5, %v2197_v20  ;;  %v2125_v2 = vpop.xlane.xlu1 %2124 }
 0xdc7   :  { %v2135_v22 = vmul.f32 %v2125_v2, %v6076_v53 }
 0xdc8   :  { %v2199_v54 = vsub.f32 1.5, %v2198_v4 }
 0xdc9   :  { %v2143_v15 = vadd.f32 1e-05, %v2135_v22 }
 0xdca   :  { %v2200_v44 = vmul.f32 %v5702_v25, %v2199_v54 }
 0xdcb   :  { %5703 = vrsqrt.f32 %v2143_v15  ;;  %vm2211_vm2 = vweird.f32 %v2143_v15 }
 0xdcc   :  { %v2204_v5 = vsel %vm2203_vm14, %v5702_v25, %v2200_v44 }
 0xdcd   :  { %v2230_v51 = vmul.f32 %v2204_v5, %v7110_v11 }
 0xdce   :  { %v2128_v41 = vpop.xlane.xlu0 %2127 }
 0xdcf   :  { %v2136_v61 = vmul.f32 %v2128_v41, %v6076_v53  ;;  %5163 = vmatmul.msk.f32.gmra.mxu3 %vm181_vm1, %v2230_v51 }
 0xdd1   :  { %v5704_v23 = vpop.eup %5703  ;;  %v2144_v3 = vadd.f32 1e-05, %v2136_v61 }
 0xdd2   :  { %v2206_v1 = vmul.f32 %v5704_v23, %v2143_v15  ;;  %vm2212_vm0 = vweird.f32 %v5704_v23 }
 0xdd3   :  { %5705 = vrsqrt.f32 %v2144_v3  ;;  %vm2213_vm3 = vmor %vm2211_vm2, %vm2212_vm0  ;;  %vm2221_vm5 = vweird.f32 %v2144_v3 }
 0xdd4   :  { %v2207_v57 = vmul.f32 %v5704_v23, %v2206_v1 }
 0xdd6   :  { %v2208_v42 = vmul.f32 0.5, %v2207_v57 }
 0xdd8   :  { %v2209_v29 = vsub.f32 1.5, %v2208_v42 }
 0xdd9   :  { %v5706_v39 = vpop.eup %5705 }
 0xdda   :  { %v2210_v59 = vmul.f32 %v5704_v23, %v2209_v29  ;;  %v2216_v35 = vmul.f32 %v5706_v39, %v2144_v3  ;;  %vm2222_vm4 = vweird.f32 %v5706_v39 }
 0xddb   :  { %vm2223_vm6 = vmor %vm2221_vm5, %vm2222_vm4 }
 0xddc   :  { %v2217_v32 = vmul.f32 %v5706_v39, %v2216_v35  ;;  %v2214_v11 = vsel %vm2213_vm3, %v5704_v23, %v2210_v59 }
 0xddd   :  { %v2231_v9 = vmul.f32 %v2214_v11, %v7118_v14 }
 0xdde   :  { %v2218_v33 = vmul.f32 0.5, %v2217_v32 }
 0xddf   :  { %5164 = vmatmul.msk.f32.gmra.mxu3 %vm181_vm1, %v2231_v9 }
 0xde0   :  { %v2219_v50 = vsub.f32 1.5, %v2218_v33 }
 0xde2   :  { %v2220_v37 = vmul.f32 %v5706_v39, %v2219_v50 }
 0xde4   :  { %v2224_v63 = vsel %vm2223_vm6, %v5706_v39, %v2220_v37 }
 0xde5   :  { %v2232_v6 = vmul.f32 %v2224_v63, %v7126_v34 }
 0xde7   :  { %5165 = vmatmul.msk.f32.gmra.mxu3 %vm181_vm1, %v2232_v6 }
 0xde9   :  { %v2669_v14 = vpop.f32.mrf.mxu1 }
 0xdea   :  { %v7156_v45 = vadd.f32 %v2669_v14, %v7153_v47 }
 0xdec   :  { %2859 = vrot.lane.b32.xlu0 %v7156_v45, %s5905_s21 }
 0xdf1   :  { %v2672_v26 = vpop.f32.mrf.mxu1 }
 0xdf2   :  { %v7164_v17 = vadd.f32 %v2672_v26, %v7153_v47 }
 0xdf4   :  { %2861 = vrot.lane.b32.xlu1 %v7164_v17, %s5905_s21  ;;  %2849 = vrot.lane.b32.xlu0 %v7161_v49, %s5906_s1 }
 0xdf9   :  { %v2675_v34 = vpop.f32.mrf.mxu1 }
 0xdfa   :  { %v7171_v38 = vadd.f32 %v2675_v34, %v7153_v47 }
 0xdfc   :  { %2851 = vrot.lane.b32.xlu1 %v7156_v45, %s5906_s1  ;;  %3103 = vrot.lane.b32.xlu0 %v7171_v38, %s5907_s2 }
 0xdfd   :  { %2863 = vrot.lane.b32.xlu2 %v7171_v38, %s5905_s21 }
 0xe04   :  { %3101 = vrot.lane.b32.xlu1 %v7164_v17, %s5907_s2  ;;  %3099 = vrot.lane.b32.xlu0 %v7156_v45, %s5907_s2 }
 0xe05   :  { %2857 = vrot.lane.b32.xlu2 %v7161_v49, %s5905_s21 }
 0xe0c   :  { %3097 = vrot.lane.b32.xlu1 %v7161_v49, %s5907_s2  ;;  %3091 = vrot.lane.b32.xlu0 %v7156_v45, %s5908_s30 }
 0xe0d   :  { %2853 = vrot.lane.b32.xlu2 %v7164_v17, %s5906_s1 }
 0xe14   :  { %3093 = vrot.lane.b32.xlu1 %v7164_v17, %s5908_s30  ;;  %2705 = vrot.lane.b32.xlu0 %v7171_v38, %s5903_s15 }
 0xe15   :  { %2855 = vrot.lane.b32.xlu2 %v7171_v38, %s5906_s1 }
 0xe1c   :  { %2703 = vrot.lane.b32.xlu1 %v7164_v17, %s5903_s15  ;;  %2699 = vrot.lane.b32.xlu0 %v7161_v49, %s5903_s15 }
 0xe1d   :  { %3089 = vrot.lane.b32.xlu2 %v7161_v49, %s5908_s30 }
 0xe22   :  { %v2291_v36 = vpop.f32.mrf.mxu3 }
 0xe23   :  { %v2292_v48 = vadd.f32 %v2291_v36, %v6979_v46 }
 0xe25   :  { %v2315_v52 = vmul.f32 0.044715, %v2292_v48  ;;  %3095 = vrot.lane.b32.xlu2 %v7171_v38, %s5908_s30  ;;  %v2307_v19 = vmul.f32 0.5, %v2292_v48 }
 0xe27   :  { %v2323_v28 = vmul.f32 %v2315_v52, %v2292_v48 }
 0xe29   :  { %v2331_v55 = vmul.f32 %v2323_v28, %v2292_v48 }
 0xe2b   :  { %v2339_v43 = vadd.f32 %v2331_v55, %v2292_v48 }
 0xe2d   :  { %2701 = vrot.lane.b32.xlu2 %v7156_v45, %s5903_s15  ;;  %v2347_v12 = vmul.f32 0.7978846, %v2339_v43 }
 0xe2f   :  { %5707 = vtanh.f32 %v2347_v12 }
 0xe35   :  { %v5708_v60 = vpop.eup %5707 }
 0xe36   :  { %v2363_v58 = vadd.f32 1.0, %v5708_v60 }
 0xe38   :  { %v2371_v10 = vmul.f32 %v2363_v58, %v2307_v19 }
 0xe3a   :  { %2420 = vmatmul.f32.gmra.mxu0 %v2371_v10 }
 0xe52   :  { %v2294_v56 = vpop.f32.mrf.mxu3 }
 0xe53   :  { %v2295_v13 = vadd.f32 %v2294_v56, %v6979_v46 }
 0xe55   :  { %v2316_v25 = vmul.f32 0.044715, %v2295_v13  ;;  %v2308_v3 = vmul.f32 0.5, %v2295_v13 }
 0xe57   :  { %v2864_v24 = vpop.permute.xlu2 %2863  ;;  %v2324_v20 = vmul.f32 %v2316_v25, %v2295_v13 }
 0xe58   :  { %5195 = vmatpush.xpose.msk.msra.mxu3 %vm451_vm15, %v2864_v24 }
 0xe59   :  { %v2332_v4 = vmul.f32 %v2324_v20, %v2295_v13 }
 0xe5b   :  { %v2340_v2 = vadd.f32 %v2332_v4, %v2295_v13 }
 0xe5d   :  { %v2348_v22 = vmul.f32 0.7978846, %v2340_v2 }
 0xe5e   :  { %v2860_v54 = vpop.permute.xlu0 %2859 }
 0xe5f   :  { %v2858_v15 = vpop.permute.xlu2 %2857  ;;  %5709 = vtanh.f32 %v2348_v22 }
 0xe62   :  { %v2297_v44 = vpop.f32.mrf.mxu3 }
 0xe63   :  { %v2298_v5 = vadd.f32 %v2297_v44, %v6979_v46 }
 0xe65   :  { %v5710_v51 = vpop.eup %5709  ;;  %v2317_v41 = vmul.f32 0.044715, %v2298_v5  ;;  %v2309_v34 = vmul.f32 0.5, %v2298_v5 }
 0xe66   :  { %v2850_v61 = vpop.permute.xlu0 %2849  ;;  %v2862_v23 = vpop.permute.xlu1 %2861  ;;  %v2364_v1 = vadd.f32 1.0, %v5710_v51 }
 0xe67   :  { %5196 = vmatpush.xpose.msk.msra.mxu3 %vm451_vm15, %v2862_v23  ;;  %v2325_v57 = vmul.f32 %v2317_v41, %v2298_v5  ;;  %v2854_v29 = vpop.permute.xlu2 %2853 }
 0xe68   :  { %v2372_v42 = vmul.f32 %v2364_v1, %v2308_v3 }
 0xe69   :  { %v2333_v39 = vmul.f32 %v2325_v57, %v2298_v5 }
 0xe6a   :  { %v2300_v59 = vpop.f32.mrf.mxu3  ;;  %2423 = vmatmul.f32.gmra.mxu0 %v2372_v42 }
 0xe6b   :  { %v2301_v35 = vadd.f32 %v2300_v59, %v6979_v46  ;;  %5197 = vmatpush.xpose.msk.msra.mxu3 %vm451_vm15, %v2860_v54  ;;  %v2341_v32 = vadd.f32 %v2333_v39, %v2298_v5 }
 0xe6d   :  { %v2318_v11 = vmul.f32 0.044715, %v2301_v35  ;;  %v2349_v9 = vmul.f32 0.7978846, %v2341_v32  ;;  %v2310_v12 = vmul.f32 0.5, %v2301_v35 }
 0xe6e   :  { %v3104_v33 = vpop.permute.xlu0 %3103  ;;  %v2852_v50 = vpop.permute.xlu1 %2851 }
 0xe6f   :  { %5198 = vmatpush.xpose.msk.msra.mxu3 %vm451_vm15, %v2858_v15  ;;  %5711 = vtanh.f32 %v2349_v9  ;;  %v2326_v0 = vmul.f32 %v2318_v11, %v2301_v35  ;;  %v2856_v63 = vpop.permute.xlu2 %2855 }
 0xe71   :  { %v2334_v37 = vmul.f32 %v2326_v0, %v2301_v35 }
 0xe72   :  { %5199 = vmatmul.msk.f32.vlgmr.msra.gmra.mxu3 %vm451_vm15, %v2850_v61 }
 0xe73   :  { %5215 = vmatpush.xpose.msk.msrb.mxu3 %vm451_vm15, %v3104_v33  ;;  %v2342_v16 = vadd.f32 %v2334_v37, %v2301_v35 }
 0xe75   :  { %v5712_v6 = vpop.eup %5711  ;;  %v2350_v46 = vmul.f32 0.7978846, %v2342_v16 }
 0xe76   :  { %v3100_v14 = vpop.permute.xlu0 %3099  ;;  %v3102_v26 = vpop.permute.xlu1 %3101  ;;  %v2365_v36 = vadd.f32 1.0, %v5712_v6 }
 0xe77   :  { %5216 = vmatpush.xpose.msk.msrb.mxu3 %vm451_vm15, %v3102_v26  ;;  %5713 = vtanh.f32 %v2350_v46  ;;  %v3090_v28 = vpop.permute.xlu2 %3089 }
 0xe78   :  { %v2373_v48 = vmul.f32 %v2365_v36, %v2309_v34 }
 0xe7a   :  { %2426 = vmatmul.f32.gmra.mxu0 %v2373_v48  ;;  %5200 = vmatmul.msk.f32.gmra.mxu3 %vm451_vm15, %v2852_v50 }
 0xe7b   :  { %5217 = vmatpush.xpose.msk.msrb.mxu3 %vm451_vm15, %v3100_v14 }
 0xe7d   :  { %v5714_v52 = vpop.eup %5713 }
 0xe7e   :  { %v3092_v55 = vpop.permute.xlu0 %3091  ;;  %v3098_v43 = vpop.permute.xlu1 %3097  ;;  %v2366_v60 = vadd.f32 1.0, %v5714_v52 }
 0xe7f   :  { %5218 = vmatpush.xpose.msk.msrb.mxu3 %vm451_vm15, %v3098_v43  ;;  %v3096_v56 = vpop.permute.xlu2 %3095 }
 0xe80   :  { %v2374_v19 = vmul.f32 %v2366_v60, %v2310_v12 }
 0xe82   :  { %2429 = vmatmul.f32.gmra.mxu0 %v2374_v19  ;;  %5201 = vmatmul.msk.f32.gmra.mxu3 %vm451_vm15, %v2854_v29 }
 0xe86   :  { %v2706_v58 = vpop.permute.xlu0 %2705  ;;  %v3094_v10 = vpop.permute.xlu1 %3093 }
 0xe87   :  { %5183 = vmatpush.xpose.msk.msrb.mxu2 %vm451_vm15, %v2706_v58  ;;  %v2702_v25 = vpop.permute.xlu2 %2701 }
 0xe8a   :  { %5202 = vmatmul.msk.f32.gmra.mxu3 %vm451_vm15, %v2856_v63 }
 0xe8e   :  { %v2704_v13 = vpop.permute.xlu1 %2703  ;;  %v2700_v24 = vpop.permute.xlu0 %2699 }
 0xe8f   :  { %5184 = vmatpush.xpose.msk.msrb.mxu2 %vm451_vm15, %v2704_v13 }
 0xe92   :  { %5219 = vmatmul.msk.f32.vlgmr.msrb.gmra.mxu3 %vm451_vm15, %v3090_v28 }
 0xe93   :  { %5185 = vmatpush.xpose.msk.msrb.mxu2 %vm451_vm15, %v2702_v25 }
 0xe97   :  { %5186 = vmatpush.xpose.msk.msrb.mxu2 %vm451_vm15, %v2700_v24 }
 0xe9a   :  { %5187 = vmatmul.msk.f32.vlgmr.msrb.gmra.mxu2 %vm451_vm15, %v7161_v49  ;;  %5220 = vmatmul.msk.f32.gmra.mxu3 %vm451_vm15, %v3092_v55 }
 0xea2   :  { %5188 = vmatmul.msk.f32.gmra.mxu2 %vm451_vm15, %v7156_v45  ;;  %5221 = vmatmul.msk.f32.gmra.mxu3 %vm451_vm15, %v3094_v10 }
 0xeaa   :  { %5189 = vmatmul.msk.f32.gmra.mxu2 %vm451_vm15, %v7164_v17  ;;  %5222 = vmatmul.msk.f32.gmra.mxu3 %vm451_vm15, %v3096_v56 }
 0xeb2   :  { %5190 = vmatmul.msk.f32.gmra.mxu2 %vm451_vm15, %v7171_v38 }
 0xeb7   :  { %v2421_v20 = vpop.f32.mrf.mxu0 }
 0xeb8   :  { %v2422_v4 = vadd.f32 %v2421_v20, %v6993_v31 }
 0xeba   :  { %v7241_v2 = vadd.f32 %v2422_v4, %v7027_v27 }
 0xebc   :  { %v2455_v22 = vsel %vm181_vm1, %v7241_v2, 0.0 }
 0xebd   :  { %2456 = vadd.xlane.f32.xlu1 %v2455_v22 }
 0xee7   :  { %v2424_v54 = vpop.f32.mrf.mxu0 }
 0xee8   :  { %v2425_v15 = vadd.f32 %v2424_v54, %v6993_v31 }
 0xeea   :  { %v7247_v44 = vadd.f32 %v2425_v15, %v7050_v40 }
 0xeec   :  { %v2458_v5 = vsel %vm181_vm1, %v7247_v44, 0.0 }
 0xeed   :  { %2459 = vadd.xlane.f32.xlu2 %v2458_v5 }
 0xef5   :  { %v2898_v51 = vpop.f32.mrf.mxu3 }
 0xef6   :  { %v2910_v41 = vsel %vm181_vm1, %v2898_v51, -inf }
 0xef7   :  { %2911 = vmax.xlane.f32.xlu2 %v2910_v41  ;;  %v2427_v27 = vpop.f32.mrf.mxu0  ;;  %v7321_v41 = vpack.i.bf16 %v7161_v49, %v7156_v45 }
 0xef8   :  { %v2428_v39 = vadd.f32 %v2427_v27, %v6993_v31 }
 0xefa   :  { %v7269_v32 = vadd.f32 %v2428_v39, %v7062_v62 }
 0xefd   :  { %v2901_v61 = vpop.f32.mrf.mxu3 }
 0xefe   :  { %v2913_v23 = vsel %vm181_vm1, %v2901_v61, -inf }
 0xeff   :  { %2914 = vmax.xlane.f32.xlu0 %v2913_v23  ;;  %v2430_v3 = vpop.f32.mrf.mxu0 }
 0xf00   :  { %v2431_v57 = vadd.f32 %v2430_v3, %v6993_v31 }
 0xf02   :  { %v7259_v42 = vadd.f32 %v2431_v57, %v7075_v7  ;;  %v2461_v7 = vsel %vm181_vm1, %v7269_v32, 0.0 }
 0xf04   :  { %v2464_v59 = vsel %vm181_vm1, %v7259_v42, 0.0 }
 0xf05   :  { %v7253_v1 = vpop.f32.mrf.mxu3 }
 0xf06   :  { %v2916_v40 = vsel %vm181_vm1, %v7253_v1, -inf }
 0xf07   :  { %2917 = vmax.xlane.f32.xlu1 %v2916_v40  ;;  %v7332_v40 = vpack.i.bf16 %v7164_v17, %v7171_v38 }
 0xf0d   :  { %v7261_v29 = vpop.f32.mrf.mxu3 }
 0xf0e   :  { %v2919_v35 = vsel %vm181_vm1, %v7261_v29, -inf }
 0xf0f   :  { %2465 = vadd.xlane.f32.xlu1 %v2464_v59  ;;  %2920 = vmax.xlane.f32.xlu0 %v2919_v35 }
 0xf15   :  { %v7271_v11 = vpop.f32.mrf.mxu3 }
 0xf16   :  { %v3150_v9 = vsel %vm181_vm1, %v7271_v11, -inf }
 0xf17   :  { %2462 = vadd.xlane.f32.xlu0 %v2461_v7  ;;  %3151 = vmax.xlane.f32.xlu2 %v3150_v9 }
 0xf1d   :  { %v7277_v31 = vpop.f32.mrf.mxu3 }
 0xf1e   :  { %v3153_v33 = vsel %vm181_vm1, %v7277_v31, -inf }
 0xf1f   :  { %3154 = vmax.xlane.f32.xlu1 %v3153_v33 }
 0xf25   :  { %v7281_v50 = vpop.f32.mrf.mxu3 }
 0xf26   :  { %v3156_v62 = vsel %vm181_vm1, %v7281_v50, -inf }
 0xf27   :  { %3157 = vmax.xlane.f32.xlu0 %v3156_v62 }
 0xf30   :  { %v2457_v0 = vpop.xlane.xlu1 %2456 }
 0xf31   :  { %v2471_v37 = vmul.f32 %v2457_v0, %v6076_v53 }
 0xf33   :  { %v7287_v63 = vsub.f32 %v7241_v2, %v2471_v37 }
 0xf35   :  { %v2487_v16 = vmul.f32 %v7287_v63, %v7287_v63 }
 0xf37   :  { %v2503_v6 = vsel %vm181_vm1, %v2487_v16, 0.0 }
 0xf38   :  { %2504 = vadd.xlane.f32.xlu2 %v2503_v6 }
 0xf60   :  { %v2460_v46 = vpop.xlane.xlu2 %2459 }
 0xf61   :  { %v2472_v36 = vmul.f32 %v2460_v46, %v6076_v53  ;;  %v7350_v46 = vpop.f32.mrf.mxu2 }
 0xf63   :  { %v7296_v52 = vsub.f32 %v7247_v44, %v2472_v36 }
 0xf65   :  { %v2488_v12 = vmul.f32 %v7296_v52, %v7296_v52 }
 0xf67   :  { %v2506_v60 = vsel %vm181_vm1, %v2488_v12, 0.0 }
 0xf6a   :  { %v2912_v14 = vpop.xlane.xlu2 %2911 }
 0xf6b   :  { %v2922_v26 = vsub.f32 %v2898_v51, %v2912_v14  ;;  %v7317_v51 = vpop.f32.mrf.mxu3 }
 0xf6c   :  { %v3159_v23 = vsel %vm181_vm1, %v7317_v51, -inf }
 0xf6d   :  { %v2926_v34 = vmul.f32 1.442695, %v2922_v26 }
 0xf6f   :  { %5715 = vpow2.f32 %v2926_v34 }
 0xf72   :  { %v2915_v55 = vpop.xlane.xlu0 %2914 }
 0xf73   :  { %v2923_v54 = vsub.f32 %v2901_v61, %v2915_v55 }
 0xf75   :  { %v7293_v48 = vpop.eup %5715  ;;  %v2928_v5 = vmul.f32 1.442695, %v2923_v54 }
 0xf76   :  { %v2934_v28 = vsel %vm181_vm1, %v7293_v48, 0.0 }
 0xf77   :  { %2935 = vadd.xlane.f32.xlu1 %v2934_v28  ;;  %5717 = vpow2.f32 %v2928_v5 }
 0xf7a   :  { %v2918_v43 = vpop.xlane.xlu1 %2917 }
 0xf7b   :  { %v2924_v27 = vsub.f32 %v7253_v1, %v2918_v43 }
 0xf7d   :  { %v2930_v61 = vmul.f32 1.442695, %v2924_v27  ;;  %v7328_v57 = vpop.eup %5717 }
 0xf7e   :  { %v2937_v1 = vsel %vm181_vm1, %v7328_v57, 0.0 }
 0xf7f   :  { %2507 = vadd.xlane.f32.xlu1 %v2506_v60  ;;  %5719 = vpow2.f32 %v2930_v61 }
 0xf82   :  { %v2921_v19 = vpop.xlane.xlu0 %2920  ;;  %v2466_v58 = vpop.xlane.xlu1 %2465 }
 0xf83   :  { %v2474_v10 = vmul.f32 %v2466_v58, %v6076_v53  ;;  %v2925_v26 = vsub.f32 %v7261_v29, %v2921_v19  ;;  %v7354_v58 = vpop.f32.mrf.mxu2 }
 0xf85   :  { %v7305_v56 = vsub.f32 %v7259_v42, %v2474_v10  ;;  %v7341_v35 = vpop.eup %5719  ;;  %v2932_v55 = vmul.f32 1.442695, %v2925_v26 }
 0xf86   :  { %v2940_v7 = vsel %vm181_vm1, %v7341_v35, 0.0 }
 0xf87   :  { %v2490_v13 = vmul.f32 %v7305_v56, %v7305_v56 }
 0xf89   :  { %v2512_v25 = vsel %vm181_vm1, %v2490_v13, 0.0 }
 0xf8a   :  { %v2463_v24 = vpop.xlane.xlu0 %2462  ;;  %2513 = vadd.xlane.f32.xlu2 %v2512_v25  ;;  %v3152_v3 = vpop.xlane.xlu2 %3151 }
 0xf8b   :  { %v2473_v20 = vmul.f32 %v2463_v24, %v6076_v53  ;;  %v3162_v39 = vsub.f32 %v7271_v11, %v3152_v3  ;;  %v7368_v25 = vpop.f32.mrf.mxu2 }
 0xf8d   :  { %v7312_v4 = vsub.f32 %v7269_v32, %v2473_v20  ;;  %v3166_v59 = vmul.f32 1.442695, %v3162_v39 }
 0xf8f   :  { %v2489_v22 = vmul.f32 %v7312_v4, %v7312_v4  ;;  %5721 = vpow2.f32 %v3166_v59 }
 0xf91   :  { %v2509_v15 = vsel %vm181_vm1, %v2489_v22, 0.0 }
 0xf92   :  { %2510 = vadd.xlane.f32.xlu0 %v2509_v15  ;;  %v3155_v37 = vpop.xlane.xlu1 %3154 }
 0xf93   :  { %v3163_v14 = vsub.f32 %v7277_v31, %v3155_v37  ;;  %v7372_v24 = vpop.f32.mrf.mxu2 }
 0xf94   :  { %v2761_v20 = vsel %vm181_vm1, %v7372_v24, -inf }
 0xf95   :  { %v7346_v33 = vpop.eup %5721  ;;  %v3168_v28 = vmul.f32 1.442695, %v3163_v14 }
 0xf96   :  { %v3174_v0 = vsel %vm181_vm1, %v7346_v33, 0.0 }
 0xf98   :  { %5454 = vrot.lane.b32.xlu1 %v7321_v41, %s5909_s17 }
 0xf9a   :  { %3160 = vmax.xlane.f32.xlu0 %v3159_v23  ;;  %v3158_v22 = vpop.xlane.xlu0 %3157 }
 0xf9b   :  { %v3164_v54 = vsub.f32 %v7281_v50, %v3158_v22 }
 0xf9d   :  { %v3170_v15 = vmul.f32 1.442695, %v3164_v54 }
 0xfa0   :  { %5459 = vrot.lane.b32.xlu1 %v7332_v40, %s5910_s18 }
 0xfa2   :  { %2938 = vadd.xlane.f32.xlu0 %v2937_v1  ;;  %5449 = vrot.lane.b32.xlu2 %v7332_v40, %s5909_s17 }
 0xfaa   :  { %2941 = vadd.xlane.f32.xlu0 %v2940_v7 }
 0xfab   :  { %v2505_v9 = vpop.xlane.xlu2 %2504 }
 0xfac   :  { %v2519_v11 = vmul.f32 %v2505_v9, %v6076_v53 }
 0xfae   :  { %v2527_v62 = vadd.f32 1e-05, %v2519_v11 }
 0xfb0   :  { %5723 = vrsqrt.f32 %v2527_v62  ;;  %vm2577_vm8 = vweird.f32 %v2527_v62 }
 0xfb1   :  { %5725 = vpow2.f32 %v3168_v28 }
 0xfb2   :  { %3175 = vadd.xlane.f32.xlu0 %v3174_v0  ;;  %5727 = vpow2.f32 %v2932_v55 }
 0xfb3   :  { %5729 = vpow2.f32 %v3170_v15 }
 0xfb6   :  { %v5724_v16 = vpop.eup %5723 }
 0xfb7   :  { %v2572_v6 = vmul.f32 %v5724_v16, %v2527_v62  ;;  %vm2578_vm7 = vweird.f32 %v5724_v16  ;;  %v7358_v31 = vpop.eup %5725 }
 0xfb8   :  { %vm2579_vm9 = vmor %vm2577_vm8, %vm2578_vm7  ;;  %v7362_v29 = vpop.eup %5727  ;;  %v3177_v19 = vsel %vm181_vm1, %v7358_v31, 0.0 }
 0xfb9   :  { %v2573_v34 = vmul.f32 %v5724_v16, %v2572_v6  ;;  %v2943_v13 = vsel %vm181_vm1, %v7362_v29, 0.0  ;;  %v7377_v27 = vpop.eup %5729 }
 0xfba   :  { %v3180_v23 = vsel %vm181_vm1, %v7377_v27, 0.0 }
 0xfbb   :  { %v2574_v36 = vmul.f32 0.5, %v2573_v34 }
 0xfbd   :  { %v2575_v43 = vsub.f32 1.5, %v2574_v36 }
 0xfbf   :  { %v2576_v12 = vmul.f32 %v5724_v16, %v2575_v43 }
 0xfc1   :  { %v2580_v60 = vsel %vm2579_vm9, %v5724_v16, %v2576_v12 }
 0xfc2   :  { %v2615_v10 = vmul.f32 %v2580_v60, %v7287_v63  ;;  %v2755_v63 = vsel %vm181_vm1, %v7354_v58, -inf }
 0xfc4   :  { %5175 = vmatmul.msk.f32.gmra.mxu1 %vm181_vm1, %v2615_v10 }
 0xfc6   :  { %5464 = vrot.lane.b32.xlu0 %v7321_v41, %s5910_s18 }
 0xfca   :  { %3178 = vadd.xlane.f32.xlu1 %v3177_v19 }
 0xfcb   :  { %2944 = vadd.xlane.f32.xlu2 %v2943_v13 }
 0xfd2   :  { %2756 = vmax.xlane.f32.xlu1 %v2755_v63 }
 0xfda   :  { %2762 = vmax.xlane.f32.xlu1 %v2761_v20 }
 0xfea   :  { %v2936_v5 = vpop.xlane.xlu1 %2935 }
 0xff0   :  { %3181 = vadd.xlane.f32.xlu0 %v3180_v23 }
 0xff2   :  { %v2508_v61 = vpop.xlane.xlu1 %2507 }
 0xff3   :  { %v2520_v3 = vmul.f32 %v2508_v61, %v6076_v53  ;;  %5469 = vrot.lane.b32.xlu1 %v7332_v40, %s5904_s20 }
 0xff5   :  { %v2528_v39 = vadd.f32 1e-05, %v2520_v3 }
 0xff7   :  { %5731 = vrsqrt.f32 %v2528_v39  ;;  %vm2587_vm11 = vweird.f32 %v2528_v39 }
 0xffd   :  { %v5732_v1 = vpop.eup %5731  ;;  %v2514_v59 = vpop.xlane.xlu2 %2513 }
 0xffe   :  { %v2582_v50 = vmul.f32 %v5732_v1, %v2528_v39  ;;  %v2522_v7 = vmul.f32 %v2514_v59, %v6076_v53  ;;  %vm2588_vm10 = vweird.f32 %v5732_v1 }
 0xfff   :  { %vm2589_vm12 = vmor %vm2587_vm11, %vm2588_vm10 }
0x1000   :  { %v2583_v9 = vmul.f32 %v5732_v1, %v2582_v50  ;;  %v7385_v11 = vadd.f32 1e-05, %v2522_v7 }
0x1002   :  { %v2584_v62 = vmul.f32 0.5, %v2583_v9  ;;  %5733 = vrsqrt.f32 %v7385_v11  ;;  %vm2607_vm3 = vweird.f32 %v7385_v11 }
0x1003   :  { %5735 = vrcp.f32 %v2936_v5 }
0x1004   :  { %v2585_v0 = vsub.f32 1.5, %v2584_v62  ;;  %5474 = vrot.lane.b32.xlu0 %v7321_v41, %s5904_s20 }
0x1005   :  { %v2511_v37 = vpop.xlane.xlu0 %2510  ;;  %v5450_v16 = vpop.permute.xlu2 %5449 }
0x1006   :  { %v2586_v6 = vmul.f32 %v5732_v1, %v2585_v0  ;;  %v2521_v14 = vmul.f32 %v2511_v37, %v6076_v53  ;;  %v5451_v26 = vunpack.i.l.bf16 %v5450_v16  ;;  %v5452_v36 = vunpack.i.h.bf16 %v5450_v16 }
0x1008   :  { %v2529_v34 = vadd.f32 1e-05, %v2521_v14  ;;  %2990 = vmatpush.msrb.mxu0 %v5451_v26  ;;  %v2590_v28 = vsel %vm2589_vm12, %v5732_v1, %v2586_v6  ;;  %v5734_v43 = vpop.eup %5733 }
0x1009   :  { %v2616_v55 = vmul.f32 %v2590_v28, %v7296_v52  ;;  %v5736_v60 = vpop.eup %5735  ;;  %v2602_v19 = vmul.f32 %v5734_v43, %v7385_v11  ;;  %vm2608_vm2 = vweird.f32 %v5734_v43 }
0x100a   :  { %5737 = vrsqrt.f32 %v2529_v34  ;;  %2991 = vmatpush.msrb.mxu0 %v5452_v36  ;;  %v5455_v12 = vpop.permute.xlu1 %5454  ;;  %v2950_v20 = vmul.f32 %v5736_v60, %v7293_v48  ;;  %vm2597_vm14 = vweird.f32 %v2529_v34  ;;  %vm2609_vm4 = vmor %vm2607_vm3, %vm2608_vm2 }
0x100b   :  { %v5456_v10 = vunpack.i.l.bf16 %v5455_v12  ;;  %5176 = vmatmul.msk.f32.gmra.mxu1 %vm181_vm1, %v2616_v55  ;;  %v5457_v13 = vunpack.i.h.bf16 %v5455_v12  ;;  %v2603_v15 = vmul.f32 %v5734_v43, %v2602_v19 }
0x100d   :  { %v3161_v63 = vpop.xlane.xlu0 %3160  ;;  %2992 = vmatpush.msrb.mxu0 %v5456_v10  ;;  %v2604_v39 = vmul.f32 0.5, %v2603_v15 }
0x100e   :  { %v3165_v22 = vsub.f32 %v7317_v51, %v3161_v63 }
0x100f   :  { %2993 = vmatpush.msrb.mxu0 %v5457_v13  ;;  %v2605_v7 = vsub.f32 1.5, %v2604_v39 }
0x1010   :  { %v5738_v54 = vpop.eup %5737  ;;  %v3172_v52 = vmul.f32 1.442695, %v3165_v22  ;;  %5203 = vmatmul.msk.f32.vlgmr.msrb.gmra.mxu0 %vm181_vm1, %v2950_v20 }
0x1011   :  { %v2592_v5 = vmul.f32 %v5738_v54, %v2529_v34  ;;  %vm2598_vm13 = vweird.f32 %v5738_v54  ;;  %v2606_v6 = vmul.f32 %v5734_v43, %v2605_v7  ;;  %v2752_v34 = vsel %vm181_vm1, %v7350_v46, -inf }
0x1012   :  { %5739 = vpow2.f32 %v3172_v52  ;;  %v5460_v23 = vpop.permute.xlu1 %5459  ;;  %vm2599_vm0 = vmor %vm2597_vm14, %vm2598_vm13 }
0x1013   :  { %v2593_v61 = vmul.f32 %v5738_v54, %v2592_v5  ;;  %v5461_v3 = vunpack.i.l.bf16 %v5460_v23  ;;  %v5462_v59 = vunpack.i.h.bf16 %v5460_v23  ;;  %v2610_v36 = vsel %vm2609_vm4, %v5734_v43, %v2606_v6 }
0x1015   :  { %v2594_v1 = vmul.f32 0.5, %v2593_v61  ;;  %v2939_v50 = vpop.xlane.xlu0 %2938  ;;  %3230 = vmatpush.msra.mxu0 %v5461_v3  ;;  %v7423_v61 = vld [vmem:[%s8298_s4 + $0x28] sm:$0xff] }
0x1016   :  { %5741 = vrcp.f32 %v2939_v50  ;;  %3034 = vmatpush.msrb.mxu1 %v7423_v61 }
0x1017   :  { %v2595_v48 = vsub.f32 1.5, %v2594_v1  ;;  %3231 = vmatpush.msra.mxu0 %v5462_v59 }
0x1018   :  { %v7397_v51 = vpop.eup %5739 }
0x1019   :  { %v2596_v9 = vmul.f32 %v5738_v54, %v2595_v48  ;;  %v3183_v62 = vsel %vm181_vm1, %v7397_v51, 0.0 }
0x101a   :  { %3184 = vadd.xlane.f32.xlu2 %v3183_v62 }
0x101b   :  { %v2600_v0 = vsel %vm2599_vm0, %v5738_v54, %v2596_v9 }
0x101c   :  { %v5742_v37 = vpop.eup %5741  ;;  %v2617_v16 = vmul.f32 %v2600_v0, %v7312_v4  ;;  %v2618_v4 = vmul.f32 %v2610_v36, %v7305_v56 }
0x101d   :  { %v2942_v14 = vpop.xlane.xlu0 %2941  ;;  %v2951_v26 = vmul.f32 %v5742_v37, %v7328_v57  ;;  %v2758_v57 = vsel %vm181_vm1, %v7368_v25, -inf }
0x101e   :  { %5743 = vrcp.f32 %v2942_v14  ;;  %5177 = vmatmul.msk.f32.gmra.mxu1 %vm181_vm1, %v2617_v16 }
0x101f   :  { %5204 = vmatmul.msk.f32.gmra.mxu0 %vm181_vm1, %v2951_v26 }
0x1022   :  { %2753 = vmax.xlane.f32.xlu2 %v2752_v34 }
0x1024   :  { %v5744_v28 = vpop.eup %5743 }
0x1025   :  { %v2952_v55 = vmul.f32 %v5744_v28, %v7341_v35  ;;  %v3176_v11 = vpop.xlane.xlu0 %3175 }
0x1026   :  { %5178 = vmatmul.msk.f32.gmra.mxu1 %vm181_vm1, %v2618_v4 }
0x1027   :  { %5205 = vmatmul.msk.f32.gmra.mxu0 %vm181_vm1, %v2952_v55 }
0x102a   :  { %2759 = vmax.xlane.f32.xlu2 %v2758_v57 }
0x1038   :  { %v5465_v12 = vpop.permute.xlu0 %5464 }
0x1039   :  { %v5466_v60 = vunpack.i.l.bf16 %v5465_v12  ;;  %v5467_v10 = vunpack.i.h.bf16 %v5465_v12 }
0x103b   :  { %3232 = vmatpush.msra.mxu0 %v5466_v60 }
0x103d   :  { %3233 = vmatpush.msra.mxu0 %v5467_v10  ;;  %v3179_v35 = vpop.xlane.xlu1 %3178 }
0x103e   :  { %v2945_v43 = vpop.xlane.xlu2 %2944 }
0x103f   :  { %5745 = vrcp.f32 %v2945_v43  ;;  %v7457_v43 = vld [vmem:[%s8298_s4 + $0x30] sm:$0xff] }
0x1040   :  { %5747 = vrcp.f32 %v3176_v11  ;;  %3274 = vmatpush.msra.mxu1 %v7457_v43 }
0x1041   :  { %5749 = vrcp.f32 %v3179_v35  ;;  %v2678_v59 = vpop.f32.mrf.mxu1 }
0x1042   :  { %v7452_v60 = vadd.f32 %v2678_v59, %v7153_v47 }
0x1045   :  { %v5746_v19 = vpop.eup %5745  ;;  %v2757_v22 = vpop.xlane.xlu1 %2756 }
0x1046   :  { %v2953_v56 = vmul.f32 %v5746_v19, %v7362_v29  ;;  %v5748_v13 = vpop.eup %5747  ;;  %v2765_v37 = vsub.f32 %v7354_v58, %v2757_v22 }
0x1047   :  { %v3190_v63 = vmul.f32 %v5748_v13, %v7346_v33  ;;  %v5750_v20 = vpop.eup %5749 }
0x1048   :  { %5206 = vmatmul.msk.f32.gmra.mxu0 %vm181_vm1, %v2953_v56  ;;  %v3191_v54 = vmul.f32 %v5750_v20, %v7358_v31  ;;  %v2770_v14 = vmul.f32 1.442695, %v2765_v37 }
0x104d   :  { %v2763_v52 = vpop.xlane.xlu1 %2762 }
0x1050   :  { %5223 = vmatmul.msk.f32.vlgmr.msra.gmra.mxu0 %vm181_vm1, %v3190_v63 }
0x1058   :  { %5224 = vmatmul.msk.f32.gmra.mxu0 %vm181_vm1, %v3191_v54 }
0x1063   :  { %v3182_v15 = vpop.xlane.xlu0 %3181 }
0x1064   :  { %5751 = vrcp.f32 %v3182_v15 }
0x1065   :  { %v5470_v5 = vpop.permute.xlu1 %5469 }
0x1066   :  { %v5471_v29 = vunpack.i.l.bf16 %v5470_v5  ;;  %v5472_v23 = vunpack.i.h.bf16 %v5470_v5 }
0x1068   :  { %2832 = vmatpush.msra.mxu2 %v5471_v29 }
0x106a   :  { %v5752_v33 = vpop.eup %5751  ;;  %2833 = vmatpush.msra.mxu2 %v5472_v23 }
0x106b   :  { %v3192_v31 = vmul.f32 %v5752_v33, %v7377_v27 }
0x106d   :  { %5225 = vmatmul.msk.f32.gmra.mxu0 %vm181_vm1, %v3192_v31 }
0x1076   :  { %v5475_v3 = vpop.permute.xlu0 %5474 }
0x1077   :  { %v5476_v39 = vunpack.i.l.bf16 %v5475_v3  ;;  %v5477_v1 = vunpack.i.h.bf16 %v5475_v3 }
0x1079   :  { %2834 = vmatpush.msra.mxu2 %v5476_v39 }
0x107b   :  { %2835 = vmatpush.msra.mxu2 %v5477_v1 }
0x1088   :  { %v2681_v7 = vpop.f32.mrf.mxu1 }
0x1089   :  { %v7479_v20 = vadd.f32 %v2681_v7, %v7153_v47 }
0x108d   :  { %v3185_v50 = vpop.xlane.xlu2 %3184  ;;  %v2995_v48 = vpop.f32.mrf.mxu0 }
0x108e   :  { %5753 = vrcp.f32 %v3185_v50  ;;  %5207 = vmatmul.msk.f32.vlgmr.msrb.gmra.mxu1 %vm451_vm15, %v2995_v48 }
0x1094   :  { %v5754_v9 = vpop.eup %5753 }
0x1095   :  { %v2754_v62 = vpop.xlane.xlu2 %2753  ;;  %v3193_v0 = vmul.f32 %v5754_v9, %v7397_v51 }
0x1096   :  { %v2764_v27 = vsub.f32 %v7350_v46, %v2754_v62 }
0x1097   :  { %5226 = vmatmul.msk.f32.gmra.mxu0 %vm181_vm1, %v3193_v0 }
0x1098   :  { %v2768_v16 = vmul.f32 1.442695, %v2764_v27 }
0x109a   :  { %5755 = vpow2.f32 %v2768_v16 }
0x109b   :  { %v2684_v6 = vpop.f32.mrf.mxu1  ;;  %5757 = vpow2.f32 %v2770_v14 }
0x109c   :  { %v7434_v26 = vadd.f32 %v2684_v6, %v7153_v47  ;;  %v2998_v34 = vpop.f32.mrf.mxu0 }
0x109d   :  { %v2760_v36 = vpop.xlane.xlu2 %2759  ;;  %5208 = vmatmul.msk.f32.gmra.mxu1 %vm451_vm15, %v2998_v34 }
0x109e   :  { %3503 = vrot.lane.b32.xlu1 %v7434_v26, %s5903_s15  ;;  %v2766_v46 = vsub.f32 %v7368_v25, %v2760_v36  ;;  %v2767_v25 = vsub.f32 %v7372_v24, %v2763_v52 }
0x10a0   :  { %v5756_v51 = vpop.eup %5755  ;;  %v2772_v4 = vmul.f32 1.442695, %v2766_v46  ;;  %v2774_v10 = vmul.f32 1.442695, %v2767_v25 }
0x10a1   :  { %v2776_v58 = vsel %vm181_vm1, %v5756_v51, 0.0  ;;  %v5758_v11 = vpop.eup %5757 }
0x10a2   :  { %2777 = vadd.xlane.f32.xlu2 %v2776_v58  ;;  %5759 = vpow2.f32 %v2772_v4  ;;  %v2779_v12 = vsel %vm181_vm1, %v5758_v11, 0.0 }
0x10a3   :  { %v2687_v28 = vpop.f32.mrf.mxu1  ;;  %5761 = vpow2.f32 %v2774_v10 }
0x10a4   :  { %v7442_v55 = vadd.f32 %v2687_v28, %v7153_v47  ;;  %v3001_v57 = vpop.f32.mrf.mxu0 }
0x10a5   :  { %5209 = vmatmul.msk.f32.gmra.mxu1 %vm451_vm15, %v3001_v57 }
0x10a6   :  { %3505 = vrot.lane.b32.xlu0 %v7442_v55, %s5903_s15  ;;  %3306 = vrot.lane.b32.xlu1 %v7171_v38, %s5911_s19 }
0x10a8   :  { %v5760_v19 = vpop.eup %5759 }
0x10a9   :  { %v2782_v24 = vsel %vm181_vm1, %v5760_v19, 0.0  ;;  %v5762_v56 = vpop.eup %5761 }
0x10aa   :  { %2780 = vadd.xlane.f32.xlu2 %v2779_v12  ;;  %v2785_v35 = vsel %vm181_vm1, %v5762_v56, 0.0 }
0x10ae   :  { %3499 = vrot.lane.b32.xlu0 %v7452_v60, %s5903_s15  ;;  %3302 = vrot.lane.b32.xlu1 %v7156_v45, %s5911_s19 }
0x10b2   :  { %2783 = vadd.xlane.f32.xlu2 %v2782_v24 }
0x10b6   :  { %3304 = vrot.lane.b32.xlu0 %v7164_v17, %s5911_s19  ;;  %3292 = vrot.lane.b32.xlu1 %v7161_v49, %s5912_s22 }
0x10ba   :  { %2786 = vadd.xlane.f32.xlu2 %v2785_v35 }
0x10be   :  { %3300 = vrot.lane.b32.xlu0 %v7161_v49, %s5911_s19  ;;  %3298 = vrot.lane.b32.xlu1 %v7171_v38, %s5912_s22 }
0x10c5   :  { %v3004_v13 = vpop.f32.mrf.mxu0 }
0x10c6   :  { %3296 = vrot.lane.b32.xlu0 %v7164_v17, %s5912_s22  ;;  %5210 = vmatmul.msk.f32.gmra.mxu1 %vm451_vm15, %v3004_v13  ;;  %v7490_v17 = vld [vmem:[%s8298_s4 + $0x20] sm:$0xff] }
0x10c7   :  { %3075 = vmatpush.msrb.mxu2 %v7490_v17 }
0x10cd   :  { %v3235_v63 = vpop.f32.mrf.mxu0 }
0x10ce   :  { %5227 = vmatmul.msk.f32.vlgmr.msra.gmra.mxu1 %vm451_vm15, %v3235_v63  ;;  %v7546_v63 = vpack.i.bf16 %v7434_v26, %v7442_v55 }
0x10d2   :  { %3501 = vrot.lane.b32.xlu2 %v7479_v20, %s5903_s15 }
0x10d5   :  { %v3238_v22 = vpop.f32.mrf.mxu0 }
0x10d6   :  { %5228 = vmatmul.msk.f32.gmra.mxu1 %vm451_vm15, %v3238_v22  ;;  %v7552_v22 = vpack.i.bf16 %v7452_v60, %v7479_v20 }
0x10da   :  { %3294 = vrot.lane.b32.xlu2 %v7156_v45, %s5912_s22 }
0x10ea   :  { %v3241_v49 = vpop.f32.mrf.mxu0 }
0x10eb   :  { %5229 = vmatmul.msk.f32.gmra.mxu1 %vm451_vm15, %v3241_v49 }
0x110b   :  { %v7516_v27 = vpop.f32.mrf.mxu1 }
0x1110   :  { %v3504_v38 = vpop.permute.xlu1 %3503 }
0x1114   :  { %v3244_v47 = vpop.f32.mrf.mxu0 }
0x1115   :  { %v2778_v54 = vpop.xlane.xlu2 %2777  ;;  %5230 = vmatmul.msk.f32.gmra.mxu1 %vm451_vm15, %v3244_v47 }
0x1116   :  { %5763 = vrcp.f32 %v2778_v54 }
0x1118   :  { %v3506_v52 = vpop.permute.xlu0 %3505  ;;  %v3307_v29 = vpop.permute.xlu1 %3306 }
0x1119   :  { %5247 = vmatpush.xpose.msk.msrb.mxu1 %vm451_vm15, %v3506_v52 }
0x111a   :  { %v7518_v37 = vpop.f32.mrf.mxu1 }
0x111c   :  { %v5764_v45 = vpop.eup %5763 }
0x111d   :  { %v2792_v15 = vmul.f32 %v5764_v45, %v5756_v51  ;;  %v2781_v5 = vpop.xlane.xlu2 %2780  ;;  %5248 = vmatpush.xpose.msk.msrb.mxu1 %vm451_vm15, %v3504_v38 }
0x111e   :  { %5765 = vrcp.f32 %v2781_v5 }
0x111f   :  { %5191 = vmatmul.msk.f32.vlgmr.msra.gmra.mxu2 %vm181_vm1, %v2792_v15 }
0x1120   :  { %5231 = vmatpush.xpose.msk.msra.mxu2 %vm451_vm15, %v3307_v29  ;;  %v3500_v23 = vpop.permute.xlu0 %3499  ;;  %v3303_v59 = vpop.permute.xlu1 %3302 }
0x1122   :  { %v7520_v16 = vpop.f32.mrf.mxu1 }
0x1124   :  { %v5766_v33 = vpop.eup %5765 }
0x1125   :  { %v2784_v31 = vpop.xlane.xlu2 %2783  ;;  %v2793_v3 = vmul.f32 %v5766_v33, %v5758_v11 }
0x1126   :  { %5767 = vrcp.f32 %v2784_v31 }
0x1127   :  { %5192 = vmatmul.msk.f32.gmra.mxu2 %vm181_vm1, %v2793_v3 }
0x1128   :  { %v3305_v39 = vpop.permute.xlu0 %3304  ;;  %v3293_v11 = vpop.permute.xlu1 %3292 }
0x1129   :  { %5232 = vmatpush.xpose.msk.msra.mxu2 %vm451_vm15, %v3305_v39 }
0x112c   :  { %v5768_v1 = vpop.eup %5767 }
0x112d   :  { %v2787_v50 = vpop.xlane.xlu2 %2786  ;;  %5233 = vmatpush.xpose.msk.msra.mxu2 %vm451_vm15, %v3303_v59  ;;  %v2794_v48 = vmul.f32 %v5768_v1, %v5760_v19 }
0x112e   :  { %5769 = vrcp.f32 %v2787_v50 }
0x112f   :  { %5193 = vmatmul.msk.f32.gmra.mxu2 %vm181_vm1, %v2794_v48 }
0x1130   :  { %v3301_v7 = vpop.permute.xlu0 %3300  ;;  %v3299_v13 = vpop.permute.xlu1 %3298 }
0x1131   :  { %5234 = vmatpush.xpose.msk.msra.mxu2 %vm451_vm15, %v3301_v7 }
0x1134   :  { %v5770_v9 = vpop.eup %5769 }
0x1135   :  { %v3502_v62 = vpop.permute.xlu2 %3501  ;;  %v2795_v0 = vmul.f32 %v5770_v9, %v5762_v56 }
0x1136   :  { %5249 = vmatpush.xpose.msk.msrb.mxu1 %vm451_vm15, %v3502_v62 }
0x1137   :  { %5194 = vmatmul.msk.f32.gmra.mxu2 %vm181_vm1, %v2795_v0 }
0x1138   :  { %v3297_v24 = vpop.permute.xlu0 %3296 }
0x113a   :  { %5250 = vmatpush.xpose.msk.msrb.mxu1 %vm451_vm15, %v3500_v23 }
0x113d   :  { %5251 = vmatmul.msk.f32.vlgmr.msrb.gmra.mxu1 %vm451_vm15, %v7452_v60  ;;  %v3295_v10 = vpop.permute.xlu2 %3294 }
0x113e   :  { %3834 = vmatpush.msra.mxu1 %v7423_v61 }
0x1140   :  { %4074 = vmatpush.msrb.mxu1 %v7457_v43 }
0x1143   :  { %v7522_v61 = vpop.f32.mrf.mxu1 }
0x1145   :  { %5252 = vmatmul.msk.f32.gmra.mxu1 %vm451_vm15, %v7479_v20 }
0x114b   :  { %v7524_v6 = vpop.f32.mrf.mxu1 }
0x114d   :  { %5253 = vmatmul.msk.f32.gmra.mxu1 %vm451_vm15, %v7434_v26 }
0x1153   :  { %v7526_v14 = vpop.f32.mrf.mxu1 }
0x1155   :  { %5254 = vmatmul.msk.f32.gmra.mxu1 %vm451_vm15, %v7442_v55 }
0x1168   :  { %v7529_v36 = vpop.f32.mrf.mxu1 }
0x1192   :  { %v7532_v46 = vpop.f32.mrf.mxu1 }
0x11a2   :  { %v2837_v34 = vpop.f32.mrf.mxu2 }
0x11a3   :  { %5211 = vmatmul.msk.f32.vlgmr.msrb.gmra.mxu2 %vm451_vm15, %v2837_v34 }
0x11aa   :  { %v2840_v51 = vpop.f32.mrf.mxu2 }
0x11ab   :  { %5212 = vmatmul.msk.f32.gmra.mxu2 %vm451_vm15, %v2840_v51 }
0x11b2   :  { %v2843_v58 = vpop.f32.mrf.mxu2 }
0x11b3   :  { %5213 = vmatmul.msk.f32.gmra.mxu2 %vm451_vm15, %v2843_v58 }
0x11ba   :  { %v2846_v28 = vpop.f32.mrf.mxu2  ;;  %v3540_v4 = vpop.f32.mrf.mxu1 }
0x11bb   :  { %5214 = vmatmul.msk.f32.gmra.mxu2 %vm451_vm15, %v2846_v28  ;;  %v3552_v57 = vsel %vm181_vm1, %v3540_v4, -inf }
0x11bc   :  { %3553 = vmax.xlane.f32.xlu2 %v3552_v57 }
0x11c2   :  { %v3543_v25 = vpop.f32.mrf.mxu1 }
0x11c3   :  { %5235 = vmatmul.msk.f32.vlgmr.msra.gmra.mxu2 %vm451_vm15, %v3293_v11  ;;  %v3555_v12 = vsel %vm181_vm1, %v3543_v25, -inf }
0x11c4   :  { %3556 = vmax.xlane.f32.xlu0 %v3555_v12 }
0x11ca   :  { %v3546_v43 = vpop.f32.mrf.mxu1 }
0x11cb   :  { %5236 = vmatmul.msk.f32.gmra.mxu2 %vm451_vm15, %v3295_v10  ;;  %v3558_v19 = vsel %vm181_vm1, %v3546_v43, -inf }
0x11cc   :  { %3559 = vmax.xlane.f32.xlu1 %v3558_v19 }
0x11d2   :  { %v3549_v56 = vpop.f32.mrf.mxu1 }
0x11d3   :  { %5237 = vmatmul.msk.f32.gmra.mxu2 %vm451_vm15, %v3297_v24  ;;  %v3561_v35 = vsel %vm181_vm1, %v3549_v56, -inf }
0x11d4   :  { %3562 = vmax.xlane.f32.xlu2 %v3561_v35 }
0x11db   :  { %5238 = vmatmul.msk.f32.gmra.mxu2 %vm451_vm15, %v3299_v13 }
0x11e5   :  { %5479 = vrot.lane.b32.xlu1 %v7546_v63, %s5904_s20 }
0x11ec   :  { %5484 = vrot.lane.b32.xlu2 %v7552_v22, %s5904_s20 }
0x1226   :  { %v7556_v49 = vpop.f32.mrf.mxu2 }
0x122e   :  { %v7558_v47 = vpop.f32.mrf.mxu2 }
0x122f   :  { %v3554_v38 = vpop.xlane.xlu2 %3553 }
0x1230   :  { %v3564_v54 = vsub.f32 %v3540_v4, %v3554_v38 }
0x1232   :  { %v3568_v52 = vmul.f32 1.442695, %v3564_v54 }
0x1234   :  { %5771 = vpow2.f32 %v3568_v52 }
0x1236   :  { %v7560_v45 = vpop.f32.mrf.mxu2 }
0x1237   :  { %v3557_v15 = vpop.xlane.xlu0 %3556 }
0x1238   :  { %v3565_v5 = vsub.f32 %v3543_v25, %v3557_v15 }
0x123a   :  { %v5772_v29 = vpop.eup %5771  ;;  %v3570_v23 = vmul.f32 1.442695, %v3565_v5 }
0x123b   :  { %v3576_v33 = vsel %vm181_vm1, %v5772_v29, 0.0 }
0x123c   :  { %5773 = vpow2.f32 %v3570_v23  ;;  %3577 = vadd.xlane.f32.xlu0 %v3576_v33 }
0x123e   :  { %v7563_v31 = vpop.f32.mrf.mxu2 }
0x123f   :  { %v3560_v3 = vpop.xlane.xlu1 %3559 }
0x1240   :  { %v3566_v39 = vsub.f32 %v3546_v43, %v3560_v3 }
0x1242   :  { %v5774_v1 = vpop.eup %5773  ;;  %v3572_v59 = vmul.f32 1.442695, %v3566_v39 }
0x1243   :  { %v3579_v50 = vsel %vm181_vm1, %v5774_v1, 0.0 }
0x1244   :  { %5775 = vpow2.f32 %v3572_v59  ;;  %3580 = vadd.xlane.f32.xlu0 %v3579_v50 }
0x1246   :  { %v3341_v48 = vpop.f32.mrf.mxu2 }
0x1247   :  { %v3563_v7 = vpop.xlane.xlu2 %3562  ;;  %v3353_v9 = vsel %vm181_vm1, %v3341_v48, -inf }
0x1248   :  { %v3567_v62 = vsub.f32 %v3549_v56, %v3563_v7  ;;  %3354 = vmax.xlane.f32.xlu2 %v3353_v9 }
0x124a   :  { %v7567_v0 = vpop.eup %5775  ;;  %v3574_v34 = vmul.f32 1.442695, %v3567_v62 }
0x124b   :  { %v3582_v51 = vsel %vm181_vm1, %v7567_v0, 0.0 }
0x124c   :  { %5777 = vpow2.f32 %v3574_v34  ;;  %3583 = vadd.xlane.f32.xlu0 %v3582_v51 }
0x124e   :  { %v3344_v58 = vpop.f32.mrf.mxu2 }
0x124f   :  { %v3356_v28 = vsel %vm181_vm1, %v3344_v58, -inf  ;;  %v5485_v10 = vpop.permute.xlu2 %5484 }
0x1250   :  { %3357 = vmax.xlane.f32.xlu1 %v3356_v28  ;;  %v5486_v24 = vunpack.i.l.bf16 %v5485_v10  ;;  %v5487_v56 = vunpack.i.h.bf16 %v5485_v10 }
0x1252   :  { %v7572_v4 = vpop.eup %5777 }
0x1253   :  { %v3585_v57 = vsel %vm181_vm1, %v7572_v4, 0.0 }
0x1254   :  { %3586 = vadd.xlane.f32.xlu0 %v3585_v57 }
0x1256   :  { %v7576_v11 = vpop.f32.mrf.mxu2 }
0x1257   :  { %v5480_v25 = vpop.permute.xlu1 %5479  ;;  %v3359_v19 = vsel %vm181_vm1, %v7576_v11, -inf }
0x1258   :  { %v5481_v12 = vunpack.i.l.bf16 %v5480_v25  ;;  %v5482_v43 = vunpack.i.h.bf16 %v5480_v25 }
0x125a   :  { %3632 = vmatpush.msrb.mxu2 %v5481_v12 }
0x125c   :  { %3633 = vmatpush.msrb.mxu2 %v5482_v43  ;;  %3360 = vmax.xlane.f32.xlu0 %v3359_v19 }
0x125e   :  { %3634 = vmatpush.msrb.mxu2 %v5486_v24  ;;  %v3350_v35 = vpop.f32.mrf.mxu2 }
0x125f   :  { %v3362_v13 = vsel %vm181_vm1, %v3350_v35, -inf }
0x1260   :  { %5494 = vrot.lane.b32.xlu2 %v7321_v41, %s5913_s27  ;;  %3635 = vmatpush.msrb.mxu2 %v5487_v56 }
0x1262   :  { %3875 = vmatpush.msra.mxu2 %v7490_v17 }
0x1264   :  { %3363 = vmax.xlane.f32.xlu0 %v3362_v13 }
0x1268   :  { %3661 = vrot.lane.b32.xlu2 %v7434_v26, %s5905_s21 }
0x1270   :  { %3659 = vrot.lane.b32.xlu2 %v7479_v20, %s5905_s21 }
0x1278   :  { %3657 = vrot.lane.b32.xlu2 %v7452_v60, %s5905_s21 }
0x1280   :  { %3651 = vrot.lane.b32.xlu2 %v7479_v20, %s5906_s1 }
0x1288   :  { %3903 = vrot.lane.b32.xlu2 %v7442_v55, %s5907_s2 }
0x1290   :  { %3901 = vrot.lane.b32.xlu2 %v7434_v26, %s5907_s2 }
0x1298   :  { %3899 = vrot.lane.b32.xlu2 %v7479_v20, %s5907_s2 }
0x12a0   :  { %3897 = vrot.lane.b32.xlu2 %v7452_v60, %s5907_s2 }
0x12a8   :  { %3891 = vrot.lane.b32.xlu2 %v7479_v20, %s5908_s30 }
0x12af   :  { %v3578_v41 = vpop.xlane.xlu0 %3577 }
0x12b0   :  { %5779 = vrcp.f32 %v3578_v41  ;;  %4098 = vrot.lane.b32.xlu2 %v7442_v55, %s5912_s22 }
0x12b6   :  { %v5780_v17 = vpop.eup %5779 }
0x12b7   :  { %v3592_v38 = vmul.f32 %v5780_v17, %v5772_v29  ;;  %v3581_v54 = vpop.xlane.xlu0 %3580 }
0x12b8   :  { %5781 = vrcp.f32 %v3581_v54 }
0x12b9   :  { %5255 = vmatmul.msk.f32.vlgmr.msrb.gmra.mxu2 %vm181_vm1, %v3592_v38 }
0x12bb   :  { %v3355_v52 = vpop.xlane.xlu2 %3354 }
0x12bc   :  { %v3365_v15 = vsub.f32 %v3341_v48, %v3355_v52 }
0x12be   :  { %v5782_v5 = vpop.eup %5781  ;;  %v3369_v23 = vmul.f32 1.442695, %v3365_v15 }
0x12bf   :  { %v3584_v33 = vpop.xlane.xlu0 %3583  ;;  %v3593_v3 = vmul.f32 %v5782_v5, %v5774_v1 }
0x12c0   :  { %5783 = vpow2.f32 %v3369_v23 }
0x12c1   :  { %5785 = vrcp.f32 %v3584_v33  ;;  %5256 = vmatmul.msk.f32.gmra.mxu2 %vm181_vm1, %v3593_v3 }
0x12c3   :  { %v3358_v39 = vpop.xlane.xlu1 %3357 }
0x12c4   :  { %v3366_v59 = vsub.f32 %v3344_v58, %v3358_v39 }
0x12c6   :  { %v7606_v50 = vpop.eup %5783  ;;  %v3371_v7 = vmul.f32 1.442695, %v3366_v59 }
0x12c7   :  { %v5786_v29 = vpop.eup %5785  ;;  %v3587_v9 = vpop.xlane.xlu0 %3586  ;;  %v3377_v62 = vsel %vm181_vm1, %v7606_v50, 0.0 }
0x12c8   :  { %5787 = vpow2.f32 %v3371_v7  ;;  %3378 = vadd.xlane.f32.xlu0 %v3377_v62  ;;  %v3594_v48 = vmul.f32 %v5786_v29, %v7567_v0 }
0x12c9   :  { %5789 = vrcp.f32 %v3587_v9 }
0x12ca   :  { %5257 = vmatmul.msk.f32.gmra.mxu2 %vm181_vm1, %v3594_v48 }
0x12ce   :  { %v7612_v1 = vpop.eup %5787 }
0x12cf   :  { %v5790_v34 = vpop.eup %5789  ;;  %v3361_v51 = vpop.xlane.xlu0 %3360  ;;  %v3380_v58 = vsel %vm181_vm1, %v7612_v1, 0.0 }
0x12d0   :  { %3381 = vadd.xlane.f32.xlu1 %v3380_v58  ;;  %v3595_v28 = vmul.f32 %v5790_v34, %v7572_v4  ;;  %v3367_v43 = vsub.f32 %v7576_v11, %v3361_v51  ;;  %v5495_v11 = vpop.permute.xlu2 %5494 }
0x12d1   :  { %v5496_v52 = vunpack.i.l.bf16 %v5495_v11 }
0x12d2   :  { %5258 = vmatmul.msk.f32.gmra.mxu2 %vm181_vm1, %v3595_v28  ;;  %v3373_v19 = vmul.f32 1.442695, %v3367_v43 }
0x12d7   :  { %v3364_v57 = vpop.xlane.xlu0 %3363 }
0x12d8   :  { %v3368_v25 = vsub.f32 %v3350_v35, %v3364_v57  ;;  %v3662_v56 = vpop.permute.xlu2 %3661 }
0x12da   :  { %v3375_v12 = vmul.f32 1.442695, %v3368_v25 }
0x12dc   :  { %5791 = vpow2.f32 %v3375_v12  ;;  %5489 = vrot.lane.b32.xlu0 %v7332_v40, %s5913_s27 }
0x12dd   :  { %5793 = vpow2.f32 %v3373_v19 }
0x12e0   :  { %v3660_v13 = vpop.permute.xlu2 %3659 }
0x12e2   :  { %v7620_v0 = vpop.eup %5791 }
0x12e3   :  { %v3386_v10 = vsel %vm181_vm1, %v7620_v0, 0.0  ;;  %v7627_v4 = vpop.eup %5793 }
0x12e4   :  { %3387 = vadd.xlane.f32.xlu1 %v3386_v10  ;;  %v3383_v40 = vsel %vm181_vm1, %v7627_v4, 0.0 }
0x12e8   :  { %v3658_v5 = vpop.permute.xlu2 %3657 }
0x12f0   :  { %v3652_v39 = vpop.permute.xlu2 %3651 }
0x12f8   :  { %v3904_v7 = vpop.permute.xlu2 %3903 }
0x12fd   :  { %3663 = vrot.lane.b32.xlu1 %v7442_v55, %s5905_s21 }
0x1300   :  { %v3902_v9 = vpop.permute.xlu2 %3901 }
0x1305   :  { %3649 = vrot.lane.b32.xlu1 %v7452_v60, %s5906_s1 }
0x1306   :  { %3384 = vadd.xlane.f32.xlu0 %v3383_v40 }
0x1308   :  { %v3900_v48 = vpop.permute.xlu2 %3899 }
0x130d   :  { %3653 = vrot.lane.b32.xlu1 %v7434_v26, %s5906_s1 }
0x1310   :  { %v3898_v57 = vpop.permute.xlu2 %3897 }
0x1315   :  { %4104 = vrot.lane.b32.xlu1 %v7434_v26, %s5911_s19 }
0x131a   :  { %4106 = vrot.lane.b32.xlu0 %v7442_v55, %s5911_s19 }
0x131d   :  { %4102 = vrot.lane.b32.xlu1 %v7479_v20, %s5911_s19 }
0x1322   :  { %3655 = vrot.lane.b32.xlu0 %v7442_v55, %s5906_s1 }
0x1325   :  { %4100 = vrot.lane.b32.xlu1 %v7452_v60, %s5911_s19 }
0x132a   :  { %4092 = vrot.lane.b32.xlu0 %v7452_v60, %s5912_s22 }
0x132d   :  { %3889 = vrot.lane.b32.xlu1 %v7452_v60, %s5908_s30 }
0x1332   :  { %4094 = vrot.lane.b32.xlu0 %v7479_v20, %s5912_s22 }
0x1335   :  { %4096 = vrot.lane.b32.xlu1 %v7434_v26, %s5912_s22 }
0x133a   :  { %3893 = vrot.lane.b32.xlu0 %v7434_v26, %s5908_s30 }
0x133b   :  { %v3379_v60 = vpop.xlane.xlu0 %3378 }
0x133c   :  { %v3637_v24 = vpop.f32.mrf.mxu2  ;;  %5795 = vrcp.f32 %v3379_v60 }
0x133d   :  { %3895 = vrot.lane.b32.xlu1 %v7442_v55, %s5908_s30  ;;  %5275 = vmatmul.msk.f32.vlgmr.msra.gmra.mxu2 %vm451_vm15, %v3637_v24  ;;  %v5497_v55 = vunpack.i.h.bf16 %v5495_v11  ;;  %v3892_v11 = vpop.permute.xlu2 %3891 }
0x1342   :  { %v5796_v54 = vpop.eup %5795 }
0x1343   :  { %v3382_v26 = vpop.xlane.xlu1 %3381  ;;  %v3393_v23 = vmul.f32 %v5796_v54, %v7606_v50 }
0x1344   :  { %v3640_v35 = vpop.f32.mrf.mxu2  ;;  %5797 = vrcp.f32 %v3382_v26 }
0x1345   :  { %5276 = vmatmul.msk.f32.gmra.mxu2 %vm451_vm15, %v3640_v35  ;;  %v7694_v35 = vld [vmem:[%s8298_s4 + $0x38] sm:$0xff] }
0x1346   :  { %3477 = vmatpush.msrb.mxu0 %v7694_v35 }
0x134a   :  { %v5798_v33 = vpop.eup %5797 }
0x134b   :  { %v3394_v3 = vmul.f32 %v5798_v33, %v7612_v1 }
0x134d   :  { %v3643_v20 = vpop.f32.mrf.mxu2 }
0x134e   :  { %5277 = vmatmul.msk.f32.gmra.mxu2 %vm451_vm15, %v3643_v20  ;;  %v5490_v41 = vpop.permute.xlu0 %5489 }
0x134f   :  { %v5491_v17 = vunpack.i.l.bf16 %v5490_v41  ;;  %v5492_v38 = vunpack.i.h.bf16 %v5490_v41 }
0x1351   :  { %3433 = vmatpush.msra.mxu3 %v5491_v17 }
0x1353   :  { %3434 = vmatpush.msra.mxu3 %v5492_v38 }
0x1355   :  { %v3646_v15 = vpop.f32.mrf.mxu2  ;;  %3435 = vmatpush.msra.mxu3 %v5496_v52 }
0x1356   :  { %5278 = vmatmul.msk.f32.gmra.mxu2 %vm451_vm15, %v3646_v15 }
0x1357   :  { %3436 = vmatpush.msra.mxu3 %v5497_v55  ;;  %v3388_v59 = vpop.xlane.xlu1 %3387 }
0x1358   :  { %5239 = vmatmul.msk.f32.vlgmr.msra.gmra.mxu3 %vm181_vm1, %v3393_v23 }
0x1360   :  { %5240 = vmatmul.msk.f32.gmra.mxu3 %vm181_vm1, %v3394_v3 }
0x136f   :  { %v3664_v29 = vpop.permute.xlu1 %3663 }
0x1370   :  { %5259 = vmatpush.xpose.msk.msrb.mxu3 %vm451_vm15, %v3664_v29 }
0x1374   :  { %5260 = vmatpush.xpose.msk.msrb.mxu3 %vm451_vm15, %v3662_v56  ;;  %v4099_v56 = vpop.permute.xlu2 %4098 }
0x1377   :  { %v3650_v50 = vpop.permute.xlu1 %3649 }
0x1378   :  { %5261 = vmatpush.xpose.msk.msrb.mxu3 %vm451_vm15, %v3660_v13 }
0x1379   :  { %v3385_v62 = vpop.xlane.xlu0 %3384 }
0x137a   :  { %5799 = vrcp.f32 %v3385_v62 }
0x137b   :  { %5801 = vrcp.f32 %v3388_v59 }
0x137c   :  { %5262 = vmatpush.xpose.msk.msrb.mxu3 %vm451_vm15, %v3658_v5 }
0x137f   :  { %v3654_v1 = vpop.permute.xlu1 %3653 }
0x1380   :  { %5279 = vmatpush.xpose.msk.msra.mxu3 %vm451_vm15, %v3904_v7  ;;  %v5800_v34 = vpop.eup %5799 }
0x1381   :  { %v3395_v51 = vmul.f32 %v5800_v34, %v7627_v4  ;;  %v5802_v58 = vpop.eup %5801 }
0x1382   :  { %v3396_v25 = vmul.f32 %v5802_v58, %v7620_v0 }
0x1383   :  { %5241 = vmatmul.msk.f32.gmra.mxu3 %vm181_vm1, %v3395_v51 }
0x1384   :  { %5280 = vmatpush.xpose.msk.msra.mxu3 %vm451_vm15, %v3902_v9 }
0x1387   :  { %v4105_v28 = vpop.permute.xlu1 %4104 }
0x1388   :  { %5281 = vmatpush.xpose.msk.msra.mxu3 %vm451_vm15, %v3900_v48 }
0x138b   :  { %5242 = vmatmul.msk.f32.gmra.mxu3 %vm181_vm1, %v3396_v25 }
0x138c   :  { %5282 = vmatpush.xpose.msk.msra.mxu3 %vm451_vm15, %v3898_v57  ;;  %v4107_v12 = vpop.permute.xlu0 %4106 }
0x138d   :  { %5295 = vmatpush.xpose.msk.msrb.mxu2 %vm451_vm15, %v4107_v12 }
0x138f   :  { %v4103_v10 = vpop.permute.xlu1 %4102 }
0x1391   :  { %5296 = vmatpush.xpose.msk.msrb.mxu2 %vm451_vm15, %v4105_v28 }
0x1393   :  { %5263 = vmatmul.msk.f32.vlgmr.msrb.gmra.mxu3 %vm451_vm15, %v3650_v50 }
0x1394   :  { %v3656_v43 = vpop.permute.xlu0 %3655 }
0x1395   :  { %5297 = vmatpush.xpose.msk.msrb.mxu2 %vm451_vm15, %v4103_v10 }
0x1397   :  { %v4101_v19 = vpop.permute.xlu1 %4100 }
0x1399   :  { %5298 = vmatpush.xpose.msk.msrb.mxu2 %vm451_vm15, %v4101_v19 }
0x139b   :  { %5264 = vmatmul.msk.f32.gmra.mxu3 %vm451_vm15, %v3652_v39 }
0x139c   :  { %v4093_v4 = vpop.permute.xlu0 %4092 }
0x139d   :  { %5299 = vmatmul.msk.f32.vlgmr.msrb.gmra.mxu2 %vm451_vm15, %v4093_v4 }
0x139f   :  { %v3890_v0 = vpop.permute.xlu1 %3889 }
0x13a3   :  { %5265 = vmatmul.msk.f32.gmra.mxu3 %vm451_vm15, %v3654_v1 }
0x13a4   :  { %v4095_v40 = vpop.permute.xlu0 %4094 }
0x13a5   :  { %5300 = vmatmul.msk.f32.gmra.mxu2 %vm451_vm15, %v4095_v40 }
0x13a7   :  { %v4097_v24 = vpop.permute.xlu1 %4096 }
0x13ab   :  { %5266 = vmatmul.msk.f32.gmra.mxu3 %vm451_vm15, %v3656_v43 }
0x13ac   :  { %v3894_v60 = vpop.permute.xlu0 %3893 }
0x13ad   :  { %5301 = vmatmul.msk.f32.gmra.mxu2 %vm451_vm15, %v4097_v24 }
0x13af   :  { %v3896_v13 = vpop.permute.xlu1 %3895 }
0x13b3   :  { %5283 = vmatmul.msk.f32.vlgmr.msra.gmra.mxu3 %vm451_vm15, %v3890_v0 }
0x13b5   :  { %5302 = vmatmul.msk.f32.gmra.mxu2 %vm451_vm15, %v4099_v56 }
0x13bb   :  { %5284 = vmatmul.msk.f32.gmra.mxu3 %vm451_vm15, %v3892_v11 }
0x13c0   :  { %v7712_v29 = vpop.f32.mrf.mxu2 }
0x13c3   :  { %5285 = vmatmul.msk.f32.gmra.mxu3 %vm451_vm15, %v3894_v60 }
0x13c8   :  { %v7718_v62 = vpop.f32.mrf.mxu2 }
0x13cb   :  { %5286 = vmatmul.msk.f32.gmra.mxu3 %vm451_vm15, %v3896_v13 }
0x13d1   :  { %v7722_v48 = vpop.f32.mrf.mxu2 }
0x13d9   :  { %v7728_v1 = vpop.f32.mrf.mxu2 }
0x13db   :  { %v3438_v20 = vpop.f32.mrf.mxu3 }
0x13dc   :  { %5243 = vmatmul.msk.f32.vlgmr.msrb.gmra.mxu0 %vm451_vm15, %v3438_v20 }
0x13e3   :  { %v3441_v41 = vpop.f32.mrf.mxu3 }
0x13e4   :  { %5244 = vmatmul.msk.f32.gmra.mxu0 %vm451_vm15, %v3441_v41 }
0x1406   :  { %v3444_v17 = vpop.f32.mrf.mxu3 }
0x1407   :  { %5245 = vmatmul.msk.f32.gmra.mxu0 %vm451_vm15, %v3444_v17 }
0x140e   :  { %v3447_v38 = vpop.f32.mrf.mxu3 }
0x140f   :  { %5246 = vmatmul.msk.f32.gmra.mxu0 %vm451_vm15, %v3447_v38 }
0x1416   :  { %v3698_v26 = vpop.f32.mrf.mxu3 }
0x1417   :  { %v3710_v54 = vsel %vm181_vm1, %v3698_v26, -inf }
0x1418   :  { %3711 = vmax.xlane.f32.xlu0 %v3710_v54 }
0x141e   :  { %v3701_v52 = vpop.f32.mrf.mxu3 }
0x141f   :  { %v3713_v55 = vsel %vm181_vm1, %v3701_v52, -inf }
0x1420   :  { %3714 = vmax.xlane.f32.xlu2 %v3713_v55  ;;  %v7730_v34 = vpop.f32.mrf.mxu2 }
0x1426   :  { %v3704_v15 = vpop.f32.mrf.mxu3 }
0x1427   :  { %v3716_v5 = vsel %vm181_vm1, %v3704_v15, -inf }
0x1428   :  { %3717 = vmax.xlane.f32.xlu1 %v3716_v5  ;;  %v7732_v51 = vpop.f32.mrf.mxu2 }
0x142e   :  { %v3707_v23 = vpop.f32.mrf.mxu3 }
0x142f   :  { %v3719_v33 = vsel %vm181_vm1, %v3707_v23, -inf }
0x1430   :  { %3720 = vmax.xlane.f32.xlu0 %v3719_v33  ;;  %v7734_v58 = vpop.f32.mrf.mxu2 }
0x1431   :  { %v4159_v28 = vsel %vm181_vm1, %v7734_v58, -inf }
0x1436   :  { %v3938_v3 = vpop.f32.mrf.mxu3 }
0x1437   :  { %v3950_v39 = vsel %vm181_vm1, %v3938_v3, -inf }
0x1438   :  { %3951 = vmax.xlane.f32.xlu1 %v3950_v39  ;;  %v7738_v57 = vpop.f32.mrf.mxu2 }
0x1439   :  { %v4162_v25 = vsel %vm181_vm1, %v7738_v57, -inf }
0x143e   :  { %v7708_v59 = vpop.f32.mrf.mxu3 }
0x143f   :  { %v3953_v7 = vsel %vm181_vm1, %v7708_v59, -inf }
0x1440   :  { %3954 = vmax.xlane.f32.xlu2 %v3953_v7 }
0x1446   :  { %v7714_v9 = vpop.f32.mrf.mxu3 }
0x1447   :  { %v3956_v50 = vsel %vm181_vm1, %v7714_v9, -inf }
0x1448   :  { %3957 = vmax.xlane.f32.xlu0 %v3956_v50  ;;  %v4153_v50 = vsel %vm181_vm1, %v7730_v34, -inf }
0x144e   :  { %v7746_v56 = vpop.f32.mrf.mxu3 }
0x144f   :  { %v3959_v13 = vsel %vm181_vm1, %v7746_v56, -inf }
0x1451   :  { %5504 = vrot.lane.b32.xlu1 %v7552_v22, %s5909_s17 }
0x1459   :  { %5509 = vrot.lane.b32.xlu1 %v7546_v63, %s5913_s27 }
0x145c   :  { %5499 = vrot.lane.b32.xlu0 %v7546_v63, %s5909_s17 }
0x1483   :  { %4160 = vmax.xlane.f32.xlu1 %v4159_v28 }
0x148b   :  { %v3712_v12 = vpop.xlane.xlu0 %3711  ;;  %4163 = vmax.xlane.f32.xlu1 %v4162_v25 }
0x148c   :  { %v3722_v10 = vsub.f32 %v3698_v26, %v3712_v12 }
0x148e   :  { %v3726_v43 = vmul.f32 1.442695, %v3722_v10 }
0x1490   :  { %5803 = vpow2.f32 %v3726_v43 }
0x1493   :  { %v3715_v19 = vpop.xlane.xlu2 %3714 }
0x1494   :  { %v3723_v0 = vsub.f32 %v3701_v52, %v3715_v19 }
0x1496   :  { %v7742_v4 = vpop.eup %5803  ;;  %v3728_v11 = vmul.f32 1.442695, %v3723_v0 }
0x1497   :  { %v3734_v40 = vsel %vm181_vm1, %v7742_v4, 0.0 }
0x1498   :  { %3735 = vadd.xlane.f32.xlu2 %v3734_v40  ;;  %5805 = vpow2.f32 %v3728_v11 }
0x149b   :  { %v3718_v24 = vpop.xlane.xlu1 %3717 }
0x149c   :  { %v3724_v60 = vsub.f32 %v3704_v15, %v3718_v24 }
0x149e   :  { %v3730_v20 = vmul.f32 1.442695, %v3724_v60  ;;  %v7750_v17 = vpop.eup %5805 }
0x149f   :  { %v3737_v54 = vsel %vm181_vm1, %v7750_v17, 0.0 }
0x14a0   :  { %3960 = vmax.xlane.f32.xlu2 %v3959_v13  ;;  %5807 = vpow2.f32 %v3730_v20 }
0x14a3   :  { %v3721_v41 = vpop.xlane.xlu0 %3720 }
0x14a4   :  { %v3725_v38 = vsub.f32 %v3707_v23, %v3721_v41  ;;  %5514 = vrot.lane.b32.xlu1 %v7546_v63, %s5910_s18 }
0x14a6   :  { %v3732_v26 = vmul.f32 1.442695, %v3725_v38  ;;  %v7756_v55 = vpop.eup %5807 }
0x14a7   :  { %v3740_v23 = vsel %vm181_vm1, %v7756_v55, 0.0 }
0x14a8   :  { %5809 = vpow2.f32 %v3732_v26  ;;  %3738 = vadd.xlane.f32.xlu2 %v3737_v54 }
0x14ab   :  { %v3952_v52 = vpop.xlane.xlu1 %3951 }
0x14ac   :  { %v3962_v15 = vsub.f32 %v3938_v3, %v3952_v52  ;;  %v4156_v3 = vsel %vm181_vm1, %v7732_v51, -inf }
0x14ae   :  { %v7758_v5 = vpop.eup %5809  ;;  %v3966_v33 = vmul.f32 1.442695, %v3962_v15 }
0x14af   :  { %v3743_v63 = vsel %vm181_vm1, %v7758_v5, 0.0 }
0x14b0   :  { %5811 = vpow2.f32 %v3966_v33  ;;  %3741 = vadd.xlane.f32.xlu2 %v3740_v23  ;;  %3744 = vadd.xlane.f32.xlu0 %v3743_v63 }
0x14b3   :  { %v7779_v26 = vpop.xlane.xlu2 %3954 }
0x14b6   :  { %v7764_v39 = vpop.eup %5811 }
0x14b7   :  { %v3974_v7 = vsel %vm181_vm1, %v7764_v39, 0.0 }
0x14b8   :  { %3975 = vadd.xlane.f32.xlu2 %v3974_v7  ;;  %4157 = vmax.xlane.f32.xlu0 %v4156_v3 }
0x14bb   :  { %v3958_v25 = vpop.xlane.xlu0 %3957 }
0x14c0   :  { %4154 = vmax.xlane.f32.xlu2 %v4153_v50 }
0x14c3   :  { %v5505_v28 = vpop.permute.xlu1 %5504 }
0x14c4   :  { %v5506_v11 = vunpack.i.l.bf16 %v5505_v28  ;;  %v5507_v24 = vunpack.i.h.bf16 %v5505_v28 }
0x14cb   :  { %v5510_v12 = vpop.permute.xlu1 %5509 }
0x14cc   :  { %v5511_v10 = vunpack.i.l.bf16 %v5510_v12  ;;  %5524 = vrot.lane.b32.xlu0 %v7552_v22, %s5910_s18  ;;  %v5512_v43 = vunpack.i.h.bf16 %v5510_v12 }
0x14ce   :  { %4233 = vmatpush.msrb.mxu3 %v5511_v10  ;;  %v5500_v19 = vpop.permute.xlu0 %5499 }
0x14cf   :  { %v5501_v0 = vunpack.i.l.bf16 %v5500_v19  ;;  %v5502_v40 = vunpack.i.h.bf16 %v5500_v19 }
0x14d0   :  { %4234 = vmatpush.msrb.mxu3 %v5512_v43 }
0x14d1   :  { %3790 = vmatpush.msra.mxu0 %v5501_v0 }
0x14d3   :  { %3791 = vmatpush.msra.mxu0 %v5502_v40 }
0x14d5   :  { %3792 = vmatpush.msra.mxu0 %v5506_v11  ;;  %v3964_v11 = vsub.f32 %v7714_v9, %v3958_v25 }
0x14d7   :  { %3793 = vmatpush.msra.mxu0 %v5507_v24 }
0x14f6   :  { %v4161_v60 = vpop.xlane.xlu1 %4160 }
0x14f7   :  { %v4167_v13 = vsub.f32 %v7734_v58, %v4161_v60 }
0x14f9   :  { %v4173_v20 = vmul.f32 1.442695, %v4167_v13  ;;  %v3970_v13 = vmul.f32 1.442695, %v3964_v11 }
0x14fb   :  { %5813 = vpow2.f32 %v4173_v20 }
0x14fe   :  { %v4164_v52 = vpop.xlane.xlu1 %4163 }
0x1501   :  { %v7775_v41 = vpop.eup %5813 }
0x1502   :  { %v4183_v38 = vsel %vm181_vm1, %v7775_v41, 0.0 }
0x1503   :  { %4184 = vadd.xlane.f32.xlu0 %v4183_v38  ;;  %v3479_v38 = vpop.f32.mrf.mxu0 }
0x150b   :  { %v3736_v54 = vpop.xlane.xlu2 %3735 }
0x150c   :  { %5815 = vrcp.f32 %v3736_v54 }
0x1512   :  { %v5816_v15 = vpop.eup %5815 }
0x1513   :  { %v3750_v33 = vmul.f32 %v5816_v15, %v7742_v4  ;;  %v3961_v23 = vpop.xlane.xlu2 %3960 }
0x1515   :  { %5267 = vmatmul.msk.f32.vlgmr.msra.gmra.mxu0 %vm181_vm1, %v3750_v33 }
0x1516   :  { %v5515_v58 = vpop.permute.xlu1 %5514 }
0x1517   :  { %v5516_v63 = vunpack.i.l.bf16 %v5515_v58  ;;  %v5517_v7 = vunpack.i.h.bf16 %v5515_v58  ;;  %v3965_v58 = vsub.f32 %v7746_v56, %v3961_v23  ;;  %v3081_v56 = vadd.f32 %v7558_v47, %v7518_v37  ;;  %v7823_v37 = vld [vmem:[%s8297_s7 + $0x4] sm:$0xf] }
0x1518   :  { %v7826_v47 = vperm.slane %v7823_v37, 1 }
0x1519   :  { %4030 = vmatpush.msrb.mxu0 %v5516_v63 }
0x151b   :  { %v3739_v3 = vpop.xlane.xlu2 %3738  ;;  %4031 = vmatpush.msrb.mxu0 %v5517_v7 }
0x151c   :  { %5817 = vrcp.f32 %v3739_v3 }
0x1522   :  { %v5818_v50 = vpop.eup %5817 }
0x1523   :  { %v3742_v28 = vpop.xlane.xlu2 %3741  ;;  %v3745_v12 = vpop.xlane.xlu0 %3744  ;;  %v3751_v10 = vmul.f32 %v5818_v50, %v7750_v17 }
0x1524   :  { %5819 = vrcp.f32 %v3742_v28  ;;  %v3972_v28 = vmul.f32 1.442695, %v3965_v58 }
0x1525   :  { %5268 = vmatmul.msk.f32.gmra.mxu0 %vm181_vm1, %v3751_v10  ;;  %5821 = vrcp.f32 %v3745_v12 }
0x152a   :  { %v5820_v43 = vpop.eup %5819 }
0x152b   :  { %v3976_v4 = vpop.xlane.xlu2 %3975  ;;  %v4158_v19 = vpop.xlane.xlu0 %4157  ;;  %v3752_v0 = vmul.f32 %v5820_v43, %v7756_v55 }
0x152c   :  { %v4166_v40 = vsub.f32 %v7732_v51, %v4158_v19  ;;  %v5822_v60 = vpop.eup %5821  ;;  %v4168_v51 = vsub.f32 %v7738_v57, %v4164_v52 }
0x152d   :  { %5269 = vmatmul.msk.f32.gmra.mxu0 %vm181_vm1, %v3752_v0  ;;  %v3753_v20 = vmul.f32 %v5822_v60, %v7758_v5  ;;  %v3087_v0 = vadd.f32 %v7563_v31, %v7522_v61 }
0x152e   :  { %v4171_v24 = vmul.f32 1.442695, %v4166_v40  ;;  %v4175_v25 = vmul.f32 1.442695, %v4168_v51 }
0x152f   :  { %v3291_v11 = vadd.f32 %v7532_v46, %v3087_v0 }
0x1530   :  { %5823 = vpow2.f32 %v4171_v24 }
0x1531   :  { %5825 = vpow2.f32 %v3970_v13 }
0x1533   :  { %v4155_v17 = vpop.xlane.xlu2 %4154 }
0x1534   :  { %v4165_v54 = vsub.f32 %v7730_v34, %v4155_v17  ;;  %v3482_v34 = vpop.f32.mrf.mxu0 }
0x1535   :  { %5270 = vmatmul.msk.f32.gmra.mxu0 %vm181_vm1, %v3753_v20  ;;  %v3078_v20 = vadd.f32 %v7556_v49, %v7516_v27 }
0x1536   :  { %v7792_v15 = vpop.eup %5823  ;;  %v4169_v55 = vmul.f32 1.442695, %v4165_v54 }
0x1537   :  { %v4180_v9 = vsel %vm181_vm1, %v7792_v15, 0.0  ;;  %v7797_v33 = vpop.eup %5825  ;;  %v3288_v54 = vadd.f32 %v7524_v6, %v3078_v20 }
0x1538   :  { %5827 = vpow2.f32 %v4169_v55  ;;  %4181 = vadd.xlane.f32.xlu1 %v4180_v9  ;;  %v3980_v52 = vsel %vm181_vm1, %v7797_v33, 0.0 }
0x1539   :  { %5829 = vrcp.f32 %v3976_v4  ;;  %v3289_v4 = vadd.f32 %v7526_v14, %v3081_v56  ;;  %v3491_v51 = vadd.f32 %v3479_v38, %v3288_v54 }
0x153a   :  { %5831 = vpow2.f32 %v4175_v25 }
0x153b   :  { %5833 = vpow2.f32 %v3972_v28  ;;  %v3492_v19 = vadd.f32 %v3482_v34, %v3289_v4  ;;  %v4296_v55 = vadd.f32 %v7826_v47, %v3491_v51 }
0x153c   :  { %v3485_v23 = vpop.f32.mrf.mxu0 }
0x153e   :  { %v7799_v5 = vpop.eup %5827  ;;  %v5525_v63 = vpop.permute.xlu0 %5524 }
0x153f   :  { %v5830_v7 = vpop.eup %5829  ;;  %v5526_v3 = vunpack.i.l.bf16 %v5525_v63  ;;  %v4177_v57 = vsel %vm181_vm1, %v7799_v5, 0.0  ;;  %v5527_v50 = vunpack.i.h.bf16 %v5525_v63 }
0x1540   :  { %4178 = vadd.xlane.f32.xlu2 %v4177_v57  ;;  %3981 = vadd.xlane.f32.xlu1 %v3980_v52  ;;  %v3990_v12 = vmul.f32 %v5830_v7, %v7764_v39  ;;  %v7807_v10 = vpop.eup %5831 }
0x1541   :  { %4032 = vmatpush.msrb.mxu0 %v5526_v3  ;;  %v4186_v43 = vsel %vm181_vm1, %v7807_v10, 0.0  ;;  %v7816_v39 = vpop.eup %5833 }
0x1542   :  { %v3983_v40 = vsel %vm181_vm1, %v7816_v39, 0.0 }
0x1543   :  { %4033 = vmatpush.msrb.mxu0 %v5527_v50 }
0x1544   :  { %5287 = vmatmul.msk.f32.vlgmr.msrb.gmra.mxu0 %vm181_vm1, %v3990_v12  ;;  %v3488_v14 = vpop.f32.mrf.mxu0 }
0x1545   :  { %4277 = vmatpush.msra.mxu0 %v7694_v35  ;;  %v4297_v35 = vadd.f32 %v7826_v47, %v3492_v19  ;;  %v3494_v61 = vadd.f32 %v3488_v14, %v3291_v11 }
0x1547   :  { %v7833_v24 = vadd.f32 %v4297_v35, %v7003_v30  ;;  %v4299_v31 = vadd.f32 %v7826_v47, %v3494_v61  ;;  %v3963_v30 = vsub.f32 %v7708_v59, %v7779_v26  ;;  %v7856_v59 = vadd.f32 %v4296_v55, %v6997_v21  ;;  %v5312_v55 = vld [vmem:[%s8299_s5 + $0x28] sm:$0xff] }
0x1548   :  { %4187 = vadd.xlane.f32.xlu1 %v4186_v43 }
0x1549   :  { %v4315_v60 = vsel %vm181_vm1, %v7833_v24, 0.0  ;;  %v7841_v13 = vadd.f32 %v4299_v31, %v7016_v8  ;;  %v3968_v46 = vmul.f32 1.442695, %v3963_v30  ;;  %v3084_v8 = vadd.f32 %v7560_v45, %v7520_v16 }
0x154a   :  { %v4312_v6 = vsel %vm181_vm1, %v7856_v59, 0.0 }
0x154b   :  { %v4321_v17 = vsel %vm181_vm1, %v7841_v13, 0.0  ;;  %5835 = vpow2.f32 %v3968_v46  ;;  %v3290_v25 = vadd.f32 %v7529_v36, %v3084_v8 }
0x154d   :  { %v3493_v26 = vadd.f32 %v3485_v23, %v3290_v25 }
0x154f   :  { %v4298_v27 = vadd.f32 %v7826_v47, %v3493_v26 }
0x1550   :  { %3984 = vadd.xlane.f32.xlu1 %v3983_v40 }
0x1551   :  { %v7862_v49 = vadd.f32 %v4298_v27, %v7010_v18 }
0x1553   :  { %v4318_v16 = vsel %vm181_vm1, %v7862_v49, 0.0 }
0x1558   :  { %5519 = vrot.lane.b32.xlu2 %v7552_v22, %s5913_s27  ;;  %4316 = vadd.xlane.f32.xlu1 %v4315_v60  ;;  %v5836_v22 = vpop.eup %5835 }
0x1559   :  { %v3977_v9 = vsel %vm181_vm1, %v5836_v22, 0.0 }
0x1560   :  { %4322 = vadd.xlane.f32.xlu1 %v4321_v17 }
0x1576   :  { %v4185_v28 = vpop.xlane.xlu0 %4184 }
0x1581   :  { %3978 = vadd.xlane.f32.xlu2 %v3977_v9  ;;  %v5311_v9 = vld [vmem:[%s8299_s5 + $0x20] sm:$0xff] }
0x1589   :  { %4313 = vadd.xlane.f32.xlu2 %v4312_v6 }
0x1591   :  { %4319 = vadd.xlane.f32.xlu2 %v4318_v16 }
0x1592   :  { %v3795_v45 = vpop.f32.mrf.mxu0 }
0x1593   :  { %5271 = vmatmul.msk.f32.vlgmr.msra.gmra.mxu1 %vm451_vm15, %v3795_v45 }
0x15a2   :  { %v3798_v36 = vpop.f32.mrf.mxu0 }
0x15a3   :  { %5272 = vmatmul.msk.f32.gmra.mxu1 %vm451_vm15, %v3798_v36 }
0x15aa   :  { %v3801_v21 = vpop.f32.mrf.mxu0 }
0x15ab   :  { %5273 = vmatmul.msk.f32.gmra.mxu1 %vm451_vm15, %v3801_v21  ;;  %v4182_v18 = vpop.xlane.xlu1 %4181 }
0x15b2   :  { %v3804_v38 = vpop.f32.mrf.mxu0 }
0x15b3   :  { %5274 = vmatmul.msk.f32.gmra.mxu1 %vm451_vm15, %v3804_v38  ;;  %v4179_v34 = vpop.xlane.xlu2 %4178  ;;  %v3982_v52 = vpop.xlane.xlu1 %3981 }
0x15b4   :  { %5837 = vrcp.f32 %v4179_v34 }
0x15b5   :  { %5839 = vrcp.f32 %v4182_v18 }
0x15b6   :  { %5841 = vrcp.f32 %v4185_v28 }
0x15ba   :  { %v5838_v63 = vpop.eup %5837 }
0x15bb   :  { %v5520_v58 = vpop.permute.xlu2 %5519  ;;  %v4193_v57 = vmul.f32 %v5838_v63, %v7799_v5  ;;  %v5840_v12 = vpop.eup %5839 }
0x15bc   :  { %v5521_v7 = vunpack.i.l.bf16 %v5520_v58  ;;  %v5522_v3 = vunpack.i.h.bf16 %v5520_v58  ;;  %v4194_v56 = vmul.f32 %v5840_v12, %v7792_v15  ;;  %v4188_v23 = vpop.xlane.xlu1 %4187  ;;  %v5842_v43 = vpop.eup %5841 }
0x15bd   :  { %5843 = vrcp.f32 %v4188_v23  ;;  %v4195_v4 = vmul.f32 %v5842_v43, %v7775_v41 }
0x15be   :  { %4235 = vmatpush.msrb.mxu3 %v5521_v7 }
0x15c0   :  { %4236 = vmatpush.msrb.mxu3 %v5522_v3 }
0x15c1   :  { %v4035_v50 = vpop.f32.mrf.mxu0  ;;  %5303 = vmatmul.msk.f32.vlgmr.msrb.gmra.mxu3 %vm181_vm1, %v4193_v57 }
0x15c2   :  { %5291 = vmatmul.msk.f32.vlgmr.msrb.gmra.mxu1 %vm451_vm15, %v4035_v50 }
0x15c3   :  { %v5844_v5 = vpop.eup %5843 }
0x15c4   :  { %v4196_v19 = vmul.f32 %v5844_v5, %v7807_v10  ;;  %v3985_v41 = vpop.xlane.xlu1 %3984 }
0x15c9   :  { %5304 = vmatmul.msk.f32.gmra.mxu3 %vm181_vm1, %v4194_v56 }
0x15d1   :  { %5305 = vmatmul.msk.f32.gmra.mxu3 %vm181_vm1, %v4195_v4 }
0x15d9   :  { %5306 = vmatmul.msk.f32.gmra.mxu3 %vm181_vm1, %v4196_v19 }
0x15f4   :  { %v3979_v0 = vpop.xlane.xlu2 %3978 }
0x15f5   :  { %5845 = vrcp.f32 %v3979_v0  ;;  %v5338_v0 = vld [vmem:[%s8300_s6 + $0xf8] sm:$0xff] }
0x15f6   :  { %5847 = vrcp.f32 %v3982_v52  ;;  %4649 = vmatpush.msra.mxu2 %v5338_v0 }
0x15f7   :  { %5849 = vrcp.f32 %v3985_v41 }
0x15fb   :  { %v5846_v35 = vpop.eup %5845 }
0x15fc   :  { %v4314_v40 = vpop.xlane.xlu2 %4313  ;;  %v3991_v15 = vmul.f32 %v5846_v35, %v5836_v22  ;;  %v5848_v61 = vpop.eup %5847  ;;  %v5313_v22 = vld [vmem:[%s8299_s5 + $0x30] sm:$0xff]  ;;  %v5336_v35 = vld [vmem:[%s8300_s6 + $0xe8] sm:$0xff] }
0x15fd   :  { %v4336_v14 = vmul.f32 %v4314_v40, %v6076_v53  ;;  %v3992_v60 = vmul.f32 %v5848_v61, %v7797_v33  ;;  %v5850_v17 = vpop.eup %5849  ;;  %v7891_v33 = vpop.xlane.xlu1 %4316  ;;  %v5334_v40 = vld [vmem:[%s8300_s6 + $0xd8] sm:$0xff]  ;;  %v5331_v61 = vld [vmem:[%s8300_s6 + $0xc0] sm:$0xff] }
0x15fe   :  { %5288 = vmatmul.msk.f32.gmra.mxu0 %vm181_vm1, %v3991_v15  ;;  %v3993_v30 = vmul.f32 %v5850_v17, %v7816_v39  ;;  %v5314_v39 = vld [vmem:[%s8299_s5 + $0x38] sm:$0xff]  ;;  %v5333_v15 = vld [vmem:[%s8300_s6 + $0xd0] sm:$0xff] }
0x15ff   :  { %v4344_v11 = vsub.f32 %v7856_v59, %v4336_v14  ;;  %4530 = vmatpush.msra.mxu1 %v5314_v39  ;;  %v5332_v14 = vld [vmem:[%s8300_s6 + $0xc8] sm:$0xff] }
0x1601   :  { %v4352_v31 = vmul.f32 %v4344_v11, %v4344_v11  ;;  %4531 = vmatpush.msra.mxu1 %v5313_v22 }
0x1603   :  { %v4360_v10 = vsel %vm181_vm1, %v4352_v31, 0.0  ;;  %4532 = vmatpush.msra.mxu1 %v5312_v55 }
0x1604   :  { %4361 = vadd.xlane.f32.xlu1 %v4360_v10 }
0x1605   :  { %v7899_v8 = vpop.xlane.xlu1 %4322  ;;  %4533 = vmatpush.msra.mxu1 %v5311_v9 }
0x1606   :  { %5289 = vmatmul.msk.f32.gmra.mxu0 %vm181_vm1, %v3992_v60  ;;  %v5330_v60 = vld [vmem:[%s8300_s6 + $0xb8] sm:$0xff] }
0x160e   :  { %5290 = vmatmul.msk.f32.gmra.mxu0 %vm181_vm1, %v3993_v30  ;;  %v5329_v30 = vld [vmem:[%s8300_s6 + $0xb0] sm:$0xff] }
0x1610   :  { %v3836_v3 = vpop.f32.mrf.mxu1 }
0x1611   :  { %v3878_v12 = vadd.f32 %v7712_v29, %v3836_v3  ;;  %v5337_v29 = vld [vmem:[%s8300_s6 + $0xf0] sm:$0xff] }
0x1612   :  { %4650 = vmatpush.msra.mxu2 %v5337_v29 }
0x1614   :  { %4651 = vmatpush.msra.mxu2 %v5336_v35 }
0x1620   :  { %v3839_v57 = vpop.f32.mrf.mxu1 }
0x1621   :  { %v3881_v41 = vadd.f32 %v7718_v62, %v3839_v57  ;;  %v4337_v62 = vmul.f32 %v7891_v33, %v6076_v53  ;;  %v5326_v33 = vld [vmem:[%s8300_s6 + $0x98] sm:$0xff] }
0x1623   :  { %v7967_v9 = vsub.f32 %v7833_v24, %v4337_v62 }
0x1628   :  { %v3842_v52 = vpop.f32.mrf.mxu1 }
0x1630   :  { %v3845_v50 = vpop.f32.mrf.mxu1 }
0x163f   :  { %v4076_v28 = vpop.f32.mrf.mxu1 }
0x1640   :  { %v4088_v56 = vadd.f32 %v4076_v28, %v3878_v12 }
0x1644   :  { %v4238_v46 = vpop.f32.mrf.mxu3 }
0x1645   :  { %5307 = vmatmul.msk.f32.vlgmr.msra.gmra.mxu0 %vm451_vm15, %v4238_v46 }
0x164c   :  { %v4241_v20 = vpop.f32.mrf.mxu3 }
0x164d   :  { %5308 = vmatmul.msk.f32.gmra.mxu0 %vm451_vm15, %v4241_v20  ;;  %v5328_v20 = vld [vmem:[%s8300_s6 + $0xa8] sm:$0xff] }
0x1654   :  { %v4244_v54 = vpop.f32.mrf.mxu3 }
0x1655   :  { %5309 = vmatmul.msk.f32.gmra.mxu0 %vm451_vm15, %v4244_v54  ;;  %v5327_v54 = vld [vmem:[%s8300_s6 + $0xa0] sm:$0xff] }
0x165c   :  { %v4247_v51 = vpop.f32.mrf.mxu3 }
0x165d   :  { %5310 = vmatmul.msk.f32.gmra.mxu0 %vm451_vm15, %v4247_v51  ;;  %v3884_v51 = vadd.f32 %v7722_v48, %v3842_v52  ;;  %v5325_v48 = vld [vmem:[%s8300_s6 + $0x90] sm:$0xff] }
0x1677   :  { %v4362_v25 = vpop.xlane.xlu1 %4361 }
0x1678   :  { %v4384_v26 = vmul.f32 %v4362_v25, %v6076_v53 }
0x167a   :  { %v4392_v27 = vadd.f32 1e-05, %v4384_v26 }
0x167b   :  { %v4038_v6 = vpop.f32.mrf.mxu0 }
0x167c   :  { %5851 = vrsqrt.f32 %v4392_v27  ;;  %5292 = vmatmul.msk.f32.gmra.mxu1 %vm451_vm15, %v4038_v6  ;;  %vm4406_vm6 = vweird.f32 %v4392_v27  ;;  %v5324_v6 = vld [vmem:[%s8300_s6 + $0x88] sm:$0xff] }
0x1682   :  { %v5852_v16 = vpop.eup %5851 }
0x1683   :  { %v4401_v45 = vmul.f32 %v5852_v16, %v4392_v27  ;;  %v4041_v36 = vpop.f32.mrf.mxu0  ;;  %vm4407_vm5 = vweird.f32 %v5852_v16 }
0x1684   :  { %5293 = vmatmul.msk.f32.gmra.mxu1 %vm451_vm15, %v4041_v36  ;;  %vm4408_vm7 = vmor %vm4406_vm6, %vm4407_vm5  ;;  %v4353_v36 = vmul.f32 %v7967_v9, %v7967_v9 }
0x1685   :  { %v4402_v21 = vmul.f32 %v5852_v16, %v4401_v45 }
0x1686   :  { %v4363_v3 = vsel %vm181_vm1, %v4353_v36, 0.0 }
0x1687   :  { %v4403_v38 = vmul.f32 0.5, %v4402_v21  ;;  %v5323_v21 = vld [vmem:[%s8300_s6 + $0x80] sm:$0xff] }
0x1689   :  { %v4404_v34 = vsub.f32 1.5, %v4403_v38  ;;  %v4339_v38 = vmul.f32 %v7899_v8, %v6076_v53 }
0x168b   :  { %v4405_v18 = vmul.f32 %v5852_v16, %v4404_v34  ;;  %v4044_v58 = vpop.f32.mrf.mxu0  ;;  %v3887_v34 = vadd.f32 %v7728_v1, %v3845_v50  ;;  %v7997_v52 = vsub.f32 %v7841_v13, %v4339_v38  ;;  %v8001_v50 = vperm.slane %v7823_v37, 2 }
0x168c   :  { %5294 = vmatmul.msk.f32.gmra.mxu1 %vm451_vm15, %v4044_v58 }
0x168d   :  { %v4409_v63 = vsel %vm4408_vm7, %v5852_v16, %v4405_v18  ;;  %v4355_v12 = vmul.f32 %v7997_v52, %v7997_v52 }
0x168e   :  { %v4480_v7 = vmul.f32 %v4409_v63, %v4344_v11 }
0x1694   :  { %5315 = vmatmul.msk.f32.vlgmr.msra.gmra.mxu1 %vm181_vm1, %v4480_v7 }
0x16c2   :  { %v4279_v23 = vpop.f32.mrf.mxu0 }
0x16c3   :  { %v4291_v43 = vadd.f32 %v4279_v23, %v4088_v56 }
0x16c5   :  { %v4300_v4 = vadd.f32 %v7826_v47, %v4291_v43 }
0x16c7   :  { %v7915_v5 = vadd.f32 %v4300_v4, %v7241_v2  ;;  %v5335_v2 = vld [vmem:[%s8300_s6 + $0xe0] sm:$0xff] }
0x16c8   :  { %4652 = vmatpush.msra.mxu2 %v5335_v2 }
0x16c9   :  { %v4324_v19 = vsel %vm181_vm1, %v7915_v5, 0.0 }
0x16ca   :  { %4325 = vadd.xlane.f32.xlu2 %v4324_v19  ;;  %4653 = vmatpush.msra.mxu2 %v5334_v40  ;;  %v4282_v11 = vpop.f32.mrf.mxu0  ;;  %v4369_v19 = vsel %vm181_vm1, %v4355_v12, 0.0 }
0x16cc   :  { %4654 = vmatpush.msra.mxu2 %v5333_v15 }
0x16ce   :  { %4655 = vmatpush.msra.mxu2 %v5332_v14 }
0x16d0   :  { %4656 = vmatpush.msra.mxu2 %v5331_v61 }
0x16d2   :  { %4657 = vmatpush.msra.mxu2 %v5330_v60  ;;  %v4285_v22 = vpop.f32.mrf.mxu0 }
0x16d4   :  { %4658 = vmatpush.msra.mxu2 %v5329_v30 }
0x16d6   :  { %4659 = vmatpush.msra.mxu2 %v5328_v20 }
0x16d8   :  { %4660 = vmatpush.msra.mxu2 %v5327_v54 }
0x16da   :  { %4661 = vmatpush.msra.mxu2 %v5326_v33  ;;  %v4288_v8 = vpop.f32.mrf.mxu0 }
0x16dc   :  { %4662 = vmatpush.msra.mxu2 %v5325_v48 }
0x16de   :  { %4663 = vmatpush.msra.mxu2 %v5324_v6 }
0x16e0   :  { %4664 = vmatpush.msra.mxu2 %v5323_v21 }
0x16f9   :  { %v4079_v31 = vpop.f32.mrf.mxu1 }
0x16fa   :  { %v4089_v10 = vadd.f32 %v4079_v31, %v3881_v41 }
0x16fc   :  { %v4292_v17 = vadd.f32 %v4282_v11, %v4089_v10 }
0x16fe   :  { %v4301_v46 = vadd.f32 %v7826_v47, %v4292_v17 }
0x1700   :  { %v7961_v39 = vadd.f32 %v4301_v46, %v7247_v44  ;;  %v4320_v44 = vpop.xlane.xlu2 %4319 }
0x1701   :  { %v4082_v55 = vpop.f32.mrf.mxu1  ;;  %v4338_v16 = vmul.f32 %v4320_v44, %v6076_v53 }
0x1702   :  { %v4090_v25 = vadd.f32 %v4082_v55, %v3884_v51  ;;  %v4327_v26 = vsel %vm181_vm1, %v7961_v39, 0.0 }
0x1703   :  { %4328 = vadd.xlane.f32.xlu0 %v4327_v26  ;;  %v7991_v63 = vsub.f32 %v7862_v49, %v4338_v16 }
0x1704   :  { %v4293_v27 = vadd.f32 %v4285_v22, %v4090_v25 }
0x1705   :  { %v4354_v28 = vmul.f32 %v7991_v63, %v7991_v63 }
0x1706   :  { %v4302_v45 = vadd.f32 %v7826_v47, %v4293_v27 }
0x1707   :  { %v4366_v4 = vsel %vm181_vm1, %v4354_v28, 0.0 }
0x1708   :  { %v7988_v18 = vadd.f32 %v4302_v45, %v7269_v32 }
0x1709   :  { %v4085_v58 = vpop.f32.mrf.mxu1 }
0x170a   :  { %v4091_v7 = vadd.f32 %v4085_v58, %v3887_v34  ;;  %v4330_v57 = vsel %vm181_vm1, %v7988_v18, 0.0 }
0x170b   :  { %4364 = vadd.xlane.f32.xlu0 %v4363_v3  ;;  %4331 = vadd.xlane.f32.xlu2 %v4330_v57 }
0x170c   :  { %v4294_v1 = vadd.f32 %v4288_v8, %v4091_v7 }
0x170e   :  { %v4303_v32 = vadd.f32 %v7826_v47, %v4294_v1 }
0x1710   :  { %v8008_v56 = vadd.f32 %v4303_v32, %v7259_v42 }
0x1711   :  { %v4535_v23 = vpop.f32.mrf.mxu1 }
0x1712   :  { %v4536_v43 = vadd.f32 %v4535_v23, %v8001_v50  ;;  %v4333_v47 = vsel %vm181_vm1, %v8008_v56, 0.0 }
0x1713   :  { %4367 = vadd.xlane.f32.xlu2 %v4366_v4  ;;  %4334 = vadd.xlane.f32.xlu1 %v4333_v47 }
0x1714   :  { %v4567_v0 = vmul.f32 0.044715, %v4536_v43  ;;  %4370 = vadd.xlane.f32.xlu0 %v4369_v19  ;;  %v4559_v15 = vmul.f32 0.5, %v4536_v43 }
0x1716   :  { %v4575_v29 = vmul.f32 %v4567_v0, %v4536_v43 }
0x1718   :  { %v4583_v35 = vmul.f32 %v4575_v29, %v4536_v43 }
0x171a   :  { %v4591_v2 = vadd.f32 %v4583_v35, %v4536_v43 }
0x171c   :  { %v4599_v40 = vmul.f32 0.7978846, %v4591_v2 }
0x171e   :  { %5853 = vtanh.f32 %v4599_v40 }
0x1724   :  { %v5854_v42 = vpop.eup %5853 }
0x1725   :  { %v4615_v14 = vadd.f32 1.0, %v5854_v42 }
0x1727   :  { %v4623_v11 = vmul.f32 %v4615_v14, %v4559_v15 }
0x1729   :  { %4665 = vmatmul.f32.vlgmr.msra.gmra.mxu2 %v4623_v11 }
0x173d   :  { %v4326_v41 = vpop.xlane.xlu2 %4325 }
0x173e   :  { %v4340_v61 = vmul.f32 %v4326_v41, %v6076_v53 }
0x1740   :  { %v8017_v31 = vsub.f32 %v7915_v5, %v4340_v61 }
0x1742   :  { %v4356_v10 = vmul.f32 %v8017_v31, %v8017_v31 }
0x1744   :  { %v4372_v60 = vsel %vm181_vm1, %v4356_v10, 0.0  ;;  %v8053_v10 = vperm.slane %v7823_v37, 3 }
0x1745   :  { %4373 = vadd.xlane.f32.xlu1 %v4372_v60 }
0x1776   :  { %v4329_v17 = vpop.xlane.xlu0 %4328 }
0x1777   :  { %v4341_v30 = vmul.f32 %v4329_v17, %v6076_v53 }
0x1779   :  { %v8024_v62 = vsub.f32 %v7961_v39, %v4341_v30 }
0x177b   :  { %v4357_v46 = vmul.f32 %v8024_v62, %v8024_v62 }
0x177d   :  { %v4375_v20 = vsel %vm181_vm1, %v4357_v46, 0.0 }
0x177e   :  { %v4365_v54 = vpop.xlane.xlu0 %4364  ;;  %4376 = vadd.xlane.f32.xlu2 %v4375_v20  ;;  %v4332_v51 = vpop.xlane.xlu2 %4331 }
0x177f   :  { %v4385_v33 = vmul.f32 %v4365_v54, %v6076_v53  ;;  %v4342_v22 = vmul.f32 %v4332_v51, %v6076_v53 }
0x1781   :  { %v4393_v55 = vadd.f32 1e-05, %v4385_v33  ;;  %v8032_v25 = vsub.f32 %v7988_v18, %v4342_v22 }
0x1783   :  { %5855 = vrsqrt.f32 %v4393_v55  ;;  %v4358_v26 = vmul.f32 %v8032_v25, %v8032_v25  ;;  %vm4416_vm8 = vweird.f32 %v4393_v55 }
0x1785   :  { %v4378_v48 = vsel %vm181_vm1, %v4358_v26, 0.0 }
0x1786   :  { %v4368_v44 = vpop.xlane.xlu2 %4367  ;;  %4379 = vadd.xlane.f32.xlu0 %v4378_v48  ;;  %v4335_v27 = vpop.xlane.xlu1 %4334 }
0x1787   :  { %v4386_v6 = vmul.f32 %v4368_v44, %v6076_v53  ;;  %v4371_v16 = vpop.xlane.xlu0 %4370  ;;  %v4343_v45 = vmul.f32 %v4335_v27, %v6076_v53 }
0x1788   :  { %v4387_v36 = vmul.f32 %v4371_v16, %v6076_v53 }
0x1789   :  { %v5856_v21 = vpop.eup %5855  ;;  %v4394_v38 = vadd.f32 1e-05, %v4386_v6  ;;  %v8041_v34 = vsub.f32 %v8008_v56, %v4343_v45 }
0x178a   :  { %v4411_v58 = vmul.f32 %v5856_v21, %v4393_v55  ;;  %v4395_v7 = vadd.f32 1e-05, %v4387_v36  ;;  %vm4417_vm15 = vweird.f32 %v5856_v21 }
0x178b   :  { %5857 = vrsqrt.f32 %v4394_v38  ;;  %v4359_v3 = vmul.f32 %v8041_v34, %v8041_v34  ;;  %vm4418_vm9 = vmor %vm4416_vm8, %vm4417_vm15  ;;  %vm4426_vm11 = vweird.f32 %v4394_v38 }
0x178c   :  { %v4412_v57 = vmul.f32 %v5856_v21, %v4411_v58  ;;  %5859 = vrsqrt.f32 %v4395_v7  ;;  %vm4436_vm14 = vweird.f32 %v4395_v7 }
0x178d   :  { %v4381_v8 = vsel %vm181_vm1, %v4359_v3, 0.0 }
0x178e   :  { %v4413_v1 = vmul.f32 0.5, %v4412_v57  ;;  %4382 = vadd.xlane.f32.xlu1 %v4381_v8 }
0x1790   :  { %v4414_v32 = vsub.f32 1.5, %v4413_v1 }
0x1791   :  { %v5858_v28 = vpop.eup %5857 }
0x1792   :  { %v5860_v12 = vpop.eup %5859  ;;  %v4415_v23 = vmul.f32 %v5856_v21, %v4414_v32  ;;  %v4421_v43 = vmul.f32 %v5858_v28, %v4394_v38  ;;  %vm4427_vm10 = vweird.f32 %v5858_v28 }
0x1793   :  { %v4431_v4 = vmul.f32 %v5860_v12, %v4395_v7  ;;  %vm4428_vm12 = vmor %vm4426_vm11, %vm4427_vm10  ;;  %vm4437_vm13 = vweird.f32 %v5860_v12 }
0x1794   :  { %v4422_v47 = vmul.f32 %v5858_v28, %v4421_v43  ;;  %v4419_v19 = vsel %vm4418_vm9, %v5856_v21, %v4415_v23  ;;  %vm4438_vm0 = vmor %vm4436_vm14, %vm4437_vm13 }
0x1795   :  { %v4432_v0 = vmul.f32 %v5860_v12, %v4431_v4  ;;  %v4481_v29 = vmul.f32 %v4419_v19, %v7967_v9 }
0x1796   :  { %v4423_v35 = vmul.f32 0.5, %v4422_v47 }
0x1797   :  { %v4433_v2 = vmul.f32 0.5, %v4432_v0  ;;  %5316 = vmatmul.msk.f32.gmra.mxu1 %vm181_vm1, %v4481_v29 }
0x1798   :  { %v4424_v40 = vsub.f32 1.5, %v4423_v35 }
0x1799   :  { %v4434_v15 = vsub.f32 1.5, %v4433_v2 }
0x179a   :  { %v4425_v42 = vmul.f32 %v5858_v28, %v4424_v40 }
0x179b   :  { %v4435_v41 = vmul.f32 %v5860_v12, %v4434_v15 }
0x179c   :  { %v4429_v14 = vsel %vm4428_vm12, %v5858_v28, %v4425_v42 }
0x179d   :  { %v4482_v11 = vmul.f32 %v4429_v14, %v7991_v63  ;;  %v4439_v9 = vsel %vm4438_vm0, %v5860_v12, %v4435_v41 }
0x179e   :  { %v4483_v61 = vmul.f32 %v4439_v9, %v7997_v52 }
0x179f   :  { %5317 = vmatmul.msk.f32.gmra.mxu1 %vm181_vm1, %v4482_v11 }
0x17a7   :  { %5318 = vmatmul.msk.f32.gmra.mxu1 %vm181_vm1, %v4483_v61 }
0x17ac   :  { %v4666_v60 = vpop.f32.mrf.mxu2 }
0x17ad   :  { %v4667_v17 = vadd.f32 %v4666_v60, %v8053_v10 }
0x17af   :  { %v8057_v30 = vadd.f32 %v4667_v17, %v7856_v59 }
0x17b1   :  { %v4698_v63 = vsel %vm181_vm1, %v8057_v30, 0.0 }
0x17b2   :  { %4699 = vadd.xlane.f32.xlu2 %v4698_v63 }
0x17b8   :  { %v4374_v46 = vpop.xlane.xlu1 %4373 }
0x17b9   :  { %v4388_v20 = vmul.f32 %v4374_v46, %v6076_v53 }
0x17bb   :  { %v4396_v54 = vadd.f32 1e-05, %v4388_v20 }
0x17bd   :  { %5861 = vrsqrt.f32 %v4396_v54  ;;  %vm4446_vm3 = vweird.f32 %v4396_v54 }
0x17c3   :  { %v5862_v52 = vpop.eup %5861 }
0x17c4   :  { %v4441_v51 = vmul.f32 %v5862_v52, %v4396_v54  ;;  %vm4447_vm2 = vweird.f32 %v5862_v52 }
0x17c5   :  { %vm4448_vm4 = vmor %vm4446_vm3, %vm4447_vm2 }
0x17c6   :  { %v4442_v33 = vmul.f32 %v5862_v52, %v4441_v51 }
0x17c8   :  { %v4443_v37 = vmul.f32 0.5, %v4442_v33 }
0x17ca   :  { %v4444_v22 = vsub.f32 1.5, %v4443_v37 }
0x17cc   :  { %v4445_v55 = vmul.f32 %v5862_v52, %v4444_v22 }
0x17ce   :  { %v4449_v59 = vsel %vm4448_vm4, %v5862_v52, %v4445_v55 }
0x17cf   :  { %v4484_v26 = vmul.f32 %v4449_v59, %v8017_v31 }
0x17d1   :  { %5319 = vmatmul.msk.f32.gmra.mxu1 %vm181_vm1, %v4484_v26 }
0x17f1   :  { %v4377_v48 = vpop.xlane.xlu2 %4376 }
0x17f2   :  { %v4389_v44 = vmul.f32 %v4377_v48, %v6076_v53 }
0x17f4   :  { %v4397_v27 = vadd.f32 1e-05, %v4389_v44 }
0x17f6   :  { %5863 = vrsqrt.f32 %v4397_v27  ;;  %vm4456_vm6 = vweird.f32 %v4397_v27 }
0x17f9   :  { %v4380_v6 = vpop.xlane.xlu0 %4379 }
0x17fa   :  { %v4390_v16 = vmul.f32 %v4380_v6, %v6076_v53 }
0x17fc   :  { %v5864_v45 = vpop.eup %5863  ;;  %v4398_v36 = vadd.f32 1e-05, %v4390_v16 }
0x17fd   :  { %v4451_v21 = vmul.f32 %v5864_v45, %v4397_v27  ;;  %vm4457_vm5 = vweird.f32 %v5864_v45 }
0x17fe   :  { %5865 = vrsqrt.f32 %v4398_v36  ;;  %vm4458_vm7 = vmor %vm4456_vm6, %vm4457_vm5  ;;  %vm4466_vm8 = vweird.f32 %v4398_v36 }
0x17ff   :  { %v4452_v38 = vmul.f32 %v5864_v45, %v4451_v21 }
0x1801   :  { %v4453_v58 = vmul.f32 0.5, %v4452_v38  ;;  %v4383_v7 = vpop.xlane.xlu1 %4382 }
0x1802   :  { %v4391_v3 = vmul.f32 %v4383_v7, %v6076_v53 }
0x1803   :  { %v4454_v31 = vsub.f32 1.5, %v4453_v58 }
0x1804   :  { %v5866_v57 = vpop.eup %5865  ;;  %v4399_v8 = vadd.f32 1e-05, %v4391_v3 }
0x1805   :  { %v4455_v1 = vmul.f32 %v5864_v45, %v4454_v31  ;;  %v4461_v32 = vmul.f32 %v5866_v57, %v4398_v36  ;;  %vm4467_vm15 = vweird.f32 %v5866_v57 }
0x1806   :  { %5867 = vrsqrt.f32 %v4399_v8  ;;  %vm4468_vm9 = vmor %vm4466_vm8, %vm4467_vm15  ;;  %vm4476_vm11 = vweird.f32 %v4399_v8 }
0x1807   :  { %v4462_v28 = vmul.f32 %v5866_v57, %v4461_v32  ;;  %v4459_v12 = vsel %vm4458_vm7, %v5864_v45, %v4455_v1 }
0x1808   :  { %v4485_v23 = vmul.f32 %v4459_v12, %v8024_v62 }
0x1809   :  { %v4463_v43 = vmul.f32 0.5, %v4462_v28 }
0x180a   :  { %5320 = vmatmul.msk.f32.gmra.mxu1 %vm181_vm1, %v4485_v23 }
0x180b   :  { %v4464_v4 = vsub.f32 1.5, %v4463_v43 }
0x180c   :  { %v5868_v47 = vpop.eup %5867 }
0x180d   :  { %v4465_v19 = vmul.f32 %v5866_v57, %v4464_v4  ;;  %v4471_v0 = vmul.f32 %v5868_v47, %v4399_v8  ;;  %vm4477_vm10 = vweird.f32 %v5868_v47 }
0x180e   :  { %vm4478_vm12 = vmor %vm4476_vm11, %vm4477_vm10 }
0x180f   :  { %v4472_v29 = vmul.f32 %v5868_v47, %v4471_v0  ;;  %v4469_v35 = vsel %vm4468_vm9, %v5866_v57, %v4465_v19 }
0x1810   :  { %v4486_v2 = vmul.f32 %v4469_v35, %v8032_v25 }
0x1811   :  { %v4473_v40 = vmul.f32 0.5, %v4472_v29 }
0x1812   :  { %5321 = vmatmul.msk.f32.gmra.mxu1 %vm181_vm1, %v4486_v2 }
0x1813   :  { %v4474_v42 = vsub.f32 1.5, %v4473_v40 }
0x1814   :  { %v4538_v62 = vpop.f32.mrf.mxu1 }
0x1815   :  { %v4475_v15 = vmul.f32 %v5868_v47, %v4474_v42  ;;  %v4539_v14 = vadd.f32 %v4538_v62, %v8001_v50 }
0x1817   :  { %v4568_v11 = vmul.f32 0.044715, %v4539_v14  ;;  %v4479_v41 = vsel %vm4478_vm12, %v5868_v47, %v4475_v15  ;;  %v4560_v59 = vmul.f32 0.5, %v4539_v14 }
0x1818   :  { %v4487_v9 = vmul.f32 %v4479_v41, %v8041_v34 }
0x1819   :  { %v4576_v61 = vmul.f32 %v4568_v11, %v4539_v14 }
0x181a   :  { %5322 = vmatmul.msk.f32.gmra.mxu1 %vm181_vm1, %v4487_v9 }
0x181b   :  { %v4584_v60 = vmul.f32 %v4576_v61, %v4539_v14 }
0x181c   :  { %v4541_v25 = vpop.f32.mrf.mxu1 }
0x181d   :  { %v4542_v17 = vadd.f32 %v4541_v25, %v8001_v50  ;;  %v4592_v63 = vadd.f32 %v4584_v60, %v4539_v14 }
0x181f   :  { %v4569_v46 = vmul.f32 0.044715, %v4542_v17  ;;  %v4600_v20 = vmul.f32 0.7978846, %v4592_v63  ;;  %v4561_v36 = vmul.f32 0.5, %v4542_v17 }
0x1821   :  { %5869 = vtanh.f32 %v4600_v20  ;;  %v4577_v54 = vmul.f32 %v4569_v46, %v4542_v17 }
0x1823   :  { %v4585_v52 = vmul.f32 %v4577_v54, %v4542_v17 }
0x1824   :  { %v4544_v51 = vpop.f32.mrf.mxu1 }
0x1825   :  { %v4545_v33 = vadd.f32 %v4544_v51, %v8001_v50  ;;  %v4593_v37 = vadd.f32 %v4585_v52, %v4542_v17 }
0x1827   :  { %v5870_v22 = vpop.eup %5869  ;;  %v4570_v55 = vmul.f32 0.044715, %v4545_v33  ;;  %v4601_v34 = vmul.f32 0.7978846, %v4593_v37  ;;  %v4562_v7 = vmul.f32 0.5, %v4545_v33 }
0x1828   :  { %v4616_v26 = vadd.f32 1.0, %v5870_v22 }
0x1829   :  { %5871 = vtanh.f32 %v4601_v34  ;;  %v4578_v48 = vmul.f32 %v4570_v55, %v4545_v33 }
0x182a   :  { %v4624_v44 = vmul.f32 %v4616_v26, %v4560_v59 }
0x182b   :  { %v4586_v27 = vmul.f32 %v4578_v48, %v4545_v33 }
0x182c   :  { %4668 = vmatmul.f32.gmra.mxu2 %v4624_v44 }
0x182d   :  { %v4594_v6 = vadd.f32 %v4586_v27, %v4545_v33 }
0x182f   :  { %v5872_v16 = vpop.eup %5871  ;;  %v4602_v45 = vmul.f32 0.7978846, %v4594_v6 }
0x1830   :  { %v4617_v21 = vadd.f32 1.0, %v5872_v16 }
0x1831   :  { %5873 = vtanh.f32 %v4602_v45 }
0x1832   :  { %v4625_v38 = vmul.f32 %v4617_v21, %v4561_v36 }
0x1834   :  { %4671 = vmatmul.f32.gmra.mxu2 %v4625_v38 }
0x1837   :  { %v5874_v58 = vpop.eup %5873 }
0x1838   :  { %v4618_v3 = vadd.f32 1.0, %v5874_v58 }
0x183a   :  { %v4626_v31 = vmul.f32 %v4618_v3, %v4562_v7  ;;  %v4700_v3 = vpop.xlane.xlu2 %4699 }
0x183c   :  { %4674 = vmatmul.f32.gmra.mxu2 %v4626_v31 }
0x184e   :  { %v4547_v57 = vpop.f32.mrf.mxu1 }
0x184f   :  { %v4548_v8 = vadd.f32 %v4547_v57, %v8001_v50  ;;  %v4722_v57 = vmul.f32 %v4700_v3, %v6076_v53 }
0x1851   :  { %v4571_v1 = vmul.f32 0.044715, %v4548_v8  ;;  %v4563_v4 = vmul.f32 0.5, %v4548_v8 }
0x1853   :  { %v4579_v32 = vmul.f32 %v4571_v1, %v4548_v8 }
0x1855   :  { %v4587_v28 = vmul.f32 %v4579_v32, %v4548_v8 }
0x1857   :  { %v4595_v12 = vadd.f32 %v4587_v28, %v4548_v8 }
0x1859   :  { %v4603_v23 = vmul.f32 0.7978846, %v4595_v12 }
0x185b   :  { %5875 = vtanh.f32 %v4603_v23 }
0x1861   :  { %v5876_v43 = vpop.eup %5875 }
0x1862   :  { %v4619_v47 = vadd.f32 1.0, %v5876_v43 }
0x1864   :  { %v4627_v19 = vmul.f32 %v4619_v47, %v4563_v4 }
0x1866   :  { %4677 = vmatmul.f32.gmra.mxu2 %v4627_v19 }
0x1887   :  { %v4550_v0 = vpop.f32.mrf.mxu1 }
0x1888   :  { %v4551_v29 = vadd.f32 %v4550_v0, %v8001_v50 }
0x188a   :  { %v4572_v35 = vmul.f32 0.044715, %v4551_v29  ;;  %v4564_v20 = vmul.f32 0.5, %v4551_v29 }
0x188c   :  { %v4580_v2 = vmul.f32 %v4572_v35, %v4551_v29 }
0x188e   :  { %v4588_v40 = vmul.f32 %v4580_v2, %v4551_v29 }
0x188f   :  { %v4553_v42 = vpop.f32.mrf.mxu1 }
0x1890   :  { %v4554_v62 = vadd.f32 %v4553_v42, %v8001_v50  ;;  %v4596_v15 = vadd.f32 %v4588_v40, %v4551_v29 }
0x1892   :  { %v4573_v14 = vmul.f32 0.044715, %v4554_v62  ;;  %v4604_v11 = vmul.f32 0.7978846, %v4596_v15  ;;  %v4565_v34 = vmul.f32 0.5, %v4554_v62 }
0x1894   :  { %5877 = vtanh.f32 %v4604_v11  ;;  %v4581_v41 = vmul.f32 %v4573_v14, %v4554_v62 }
0x1896   :  { %v4589_v9 = vmul.f32 %v4581_v41, %v4554_v62  ;;  %v4880_v41 = vld [vmem:[%s8301_s8 + $0x30] sm:$0xff] }
0x1897   :  { %v4556_v61 = vpop.f32.mrf.mxu1  ;;  %4924 = vmatpush.msra.mxu3 %v4880_v41 }
0x1898   :  { %v4557_v60 = vadd.f32 %v4556_v61, %v8001_v50  ;;  %v4597_v25 = vadd.f32 %v4589_v9, %v4554_v62 }
0x189a   :  { %v5878_v17 = vpop.eup %5877  ;;  %v4574_v63 = vmul.f32 0.044715, %v4557_v60  ;;  %v4605_v46 = vmul.f32 0.7978846, %v4597_v25  ;;  %v4566_v48 = vmul.f32 0.5, %v4557_v60  ;;  %v4879_v25 = vld [vmem:[%s8301_s8 + $0x28] sm:$0xff] }
0x189b   :  { %v4620_v54 = vadd.f32 1.0, %v5878_v17 }
0x189c   :  { %5879 = vtanh.f32 %v4605_v46  ;;  %v4582_v52 = vmul.f32 %v4574_v63, %v4557_v60  ;;  %v4877_v46 = vld [vmem:[%s8301_s8 + $0x18] sm:$0xff] }
0x189d   :  { %v4628_v51 = vmul.f32 %v4620_v54, %v4564_v20 }
0x189e   :  { %v4590_v33 = vmul.f32 %v4582_v52, %v4557_v60  ;;  %v4875_v52 = vld [vmem:[%s8301_s8 + $0x8] sm:$0xff] }
0x189f   :  { %4680 = vmatmul.f32.gmra.mxu2 %v4628_v51 }
0x18a0   :  { %v4598_v37 = vadd.f32 %v4590_v33, %v4557_v60  ;;  %v4878_v60 = vld [vmem:[%s8301_s8 + $0x20] sm:$0xff] }
0x18a1   :  { %4925 = vmatpush.msra.mxu3 %v4878_v60 }
0x18a2   :  { %v5880_v22 = vpop.eup %5879  ;;  %v4606_v55 = vmul.f32 0.7978846, %v4598_v37 }
0x18a3   :  { %v4621_v59 = vadd.f32 1.0, %v5880_v22 }
0x18a4   :  { %5881 = vtanh.f32 %v4606_v55 }
0x18a5   :  { %v4629_v26 = vmul.f32 %v4621_v59, %v4565_v34 }
0x18a7   :  { %4683 = vmatmul.f32.gmra.mxu2 %v4629_v26 }
0x18aa   :  { %v5882_v50 = vpop.eup %5881 }
0x18ab   :  { %v4622_v44 = vadd.f32 1.0, %v5882_v50 }
0x18ad   :  { %v4630_v27 = vmul.f32 %v4622_v44, %v4566_v48 }
0x18af   :  { %v4669_v6 = vpop.f32.mrf.mxu2  ;;  %4686 = vmatmul.f32.gmra.mxu2 %v4630_v27 }
0x18b0   :  { %v4670_v16 = vadd.f32 %v4669_v6, %v8053_v10 }
0x18b2   :  { %v4691_v45 = vadd.f32 %v4670_v16, %v7833_v24  ;;  %v8090_v24 = vsub.f32 %v8057_v30, %v4722_v57 }
0x18b4   :  { %v4701_v36 = vsel %vm181_vm1, %v4691_v45, 0.0 }
0x18b5   :  { %4702 = vadd.xlane.f32.xlu0 %v4701_v36 }
0x18b7   :  { %v4672_v21 = vpop.f32.mrf.mxu2 }
0x18b8   :  { %v4673_v38 = vadd.f32 %v4672_v21, %v8053_v10 }
0x18ba   :  { %v4692_v58 = vadd.f32 %v4673_v38, %v7862_v49  ;;  %v4738_v49 = vmul.f32 %v8090_v24, %v8090_v24 }
0x18bc   :  { %v4704_v7 = vsel %vm181_vm1, %v4692_v58, 0.0  ;;  %v4746_v28 = vsel %vm181_vm1, %v4738_v49, 0.0 }
0x18bd   :  { %4705 = vadd.xlane.f32.xlu1 %v4704_v7 }
0x18bf   :  { %v4675_v31 = vpop.f32.mrf.mxu2 }
0x18c0   :  { %v4676_v8 = vadd.f32 %v4675_v31, %v8053_v10 }
0x18c2   :  { %v4693_v1 = vadd.f32 %v4676_v8, %v7841_v13 }
0x18c4   :  { %v4707_v32 = vsel %vm181_vm1, %v4693_v1, 0.0 }
0x18c5   :  { %4708 = vadd.xlane.f32.xlu2 %v4707_v32 }
0x18cd   :  { %4747 = vadd.xlane.f32.xlu2 %v4746_v28 }
0x18e9   :  { %v4678_v12 = vpop.f32.mrf.mxu2 }
0x18ea   :  { %v4679_v23 = vadd.f32 %v4678_v12, %v8053_v10 }
0x18ec   :  { %v8098_v43 = vadd.f32 %v4679_v23, %v7915_v5 }
0x18ee   :  { %v4710_v13 = vsel %vm181_vm1, %v8098_v43, 0.0 }
0x18ef   :  { %4711 = vadd.xlane.f32.xlu0 %v4710_v13 }
0x1922   :  { %v4681_v30 = vpop.f32.mrf.mxu2 }
0x1923   :  { %v4682_v4 = vadd.f32 %v4681_v30, %v8053_v10 }
0x1925   :  { %v8104_v47 = vadd.f32 %v4682_v4, %v7961_v39 }
0x1927   :  { %v4713_v19 = vsel %vm181_vm1, %v8104_v47, 0.0 }
0x1928   :  { %v4703_v0 = vpop.xlane.xlu0 %4702  ;;  %4714 = vadd.xlane.f32.xlu1 %v4713_v19 }
0x1929   :  { %v4723_v29 = vmul.f32 %v4703_v0, %v6076_v53 }
0x192a   :  { %v4684_v35 = vpop.f32.mrf.mxu2 }
0x192b   :  { %v8109_v5 = vsub.f32 %v4691_v45, %v4723_v29  ;;  %v4685_v2 = vadd.f32 %v4684_v35, %v8053_v10 }
0x192d   :  { %v8113_v40 = vadd.f32 %v4685_v2, %v7988_v18  ;;  %v4739_v42 = vmul.f32 %v8109_v5, %v8109_v5  ;;  %v4881_v18 = vld [vmem:[%s8301_s8 + $0x38] sm:$0xff] }
0x192e   :  { %4965 = vmatpush.msrb.mxu0 %v4881_v18 }
0x192f   :  { %v4749_v39 = vsel %vm181_vm1, %v4739_v42, 0.0  ;;  %v4716_v62 = vsel %vm181_vm1, %v8113_v40, 0.0 }
0x1930   :  { %4750 = vadd.xlane.f32.xlu1 %v4749_v39  ;;  %4717 = vadd.xlane.f32.xlu0 %v4716_v62  ;;  %v4706_v15 = vpop.xlane.xlu1 %4705 }
0x1931   :  { %v4724_v14 = vmul.f32 %v4706_v15, %v6076_v53  ;;  %4966 = vmatpush.msrb.mxu0 %v4879_v25 }
0x1932   :  { %v4687_v11 = vpop.f32.mrf.mxu2 }
0x1933   :  { %v8127_v9 = vsub.f32 %v4692_v58, %v4724_v14  ;;  %v4688_v61 = vadd.f32 %v4687_v11, %v8053_v10  ;;  %v4876_v10 = vld [vmem:[%s8301_s8 + $0x10] sm:$0xff]  ;;  %4967 = vmatpush.msrb.mxu0 %v4877_v46 }
0x1934   :  { %4926 = vmatpush.msra.mxu3 %v4876_v10 }
0x1935   :  { %v8137_v17 = vadd.f32 %v4688_v61, %v8008_v56  ;;  %v4740_v63 = vmul.f32 %v8127_v9, %v8127_v9  ;;  %v4874_v56 = vld [vmem:[%s8301_s8] sm:$0xff]  ;;  %4968 = vmatpush.msrb.mxu0 %v4875_v52 }
0x1936   :  { %4927 = vmatpush.msra.mxu3 %v4874_v56 }
0x1937   :  { %v4719_v20 = vsel %vm181_vm1, %v8137_v17, 0.0  ;;  %v4752_v54 = vsel %vm181_vm1, %v4740_v63, 0.0 }
0x1938   :  { %v4709_v51 = vpop.xlane.xlu2 %4708  ;;  %4720 = vadd.xlane.f32.xlu2 %v4719_v20  ;;  %4753 = vadd.xlane.f32.xlu0 %v4752_v54 }
0x1939   :  { %v4725_v33 = vmul.f32 %v4709_v51, %v6076_v53 }
0x193b   :  { %v8157_v37 = vsub.f32 %v4693_v1, %v4725_v33 }
0x193d   :  { %v4741_v22 = vmul.f32 %v8157_v37, %v8157_v37 }
0x193f   :  { %v4755_v55 = vsel %vm181_vm1, %v4741_v22, 0.0 }
0x1940   :  { %v4748_v34 = vpop.xlane.xlu2 %4747  ;;  %4756 = vadd.xlane.f32.xlu1 %v4755_v55 }
0x1941   :  { %v4770_v59 = vmul.f32 %v4748_v34, %v6076_v53 }
0x1943   :  { %v4778_v26 = vadd.f32 1e-05, %v4770_v59 }
0x1945   :  { %5883 = vrsqrt.f32 %v4778_v26  ;;  %vm4792_vm14 = vweird.f32 %v4778_v26 }
0x194b   :  { %v5884_v50 = vpop.eup %5883 }
0x194c   :  { %v4787_v48 = vmul.f32 %v5884_v50, %v4778_v26  ;;  %vm4793_vm13 = vweird.f32 %v5884_v50 }
0x194d   :  { %vm4794_vm0 = vmor %vm4792_vm14, %vm4793_vm13 }
0x194e   :  { %v4788_v44 = vmul.f32 %v5884_v50, %v4787_v48 }
0x1950   :  { %v4789_v27 = vmul.f32 0.5, %v4788_v44 }
0x1952   :  { %v4790_v6 = vsub.f32 1.5, %v4789_v27 }
0x1954   :  { %v4791_v16 = vmul.f32 %v5884_v50, %v4790_v6 }
0x1956   :  { %v4795_v45 = vsel %vm4794_vm0, %v5884_v50, %v4791_v16 }
0x1957   :  { %v4866_v36 = vmul.f32 %v4795_v45, %v8090_v24 }
0x1959   :  { %5339 = vmatmul.msk.f32.vlgmr.msra.gmra.mxu3 %vm181_vm1, %v4866_v36  ;;  %5347 = vmatmul.msk.f32.vlgmr.msrb.gmra.mxu0 %vm181_vm1, %v4866_v36 }
0x1962   :  { %v4712_v21 = vpop.xlane.xlu0 %4711 }
0x1963   :  { %v4726_v38 = vmul.f32 %v4712_v21, %v6076_v53 }
0x1965   :  { %v8168_v58 = vsub.f32 %v8098_v43, %v4726_v38 }
0x1967   :  { %v4742_v7 = vmul.f32 %v8168_v58, %v8168_v58 }
0x1969   :  { %v4758_v3 = vsel %vm181_vm1, %v4742_v7, 0.0 }
0x196a   :  { %4759 = vadd.xlane.f32.xlu2 %v4758_v3 }
0x199b   :  { %v4715_v31 = vpop.xlane.xlu1 %4714 }
0x199c   :  { %v4727_v57 = vmul.f32 %v4715_v31, %v6076_v53 }
0x199e   :  { %v8175_v8 = vsub.f32 %v8104_v47, %v4727_v57 }
0x19a0   :  { %v4743_v1 = vmul.f32 %v8175_v8, %v8175_v8 }
0x19a2   :  { %v4761_v24 = vsel %vm181_vm1, %v4743_v1, 0.0 }
0x19a3   :  { %v4718_v32 = vpop.xlane.xlu0 %4717  ;;  %4762 = vadd.xlane.f32.xlu0 %v4761_v24  ;;  %v4751_v49 = vpop.xlane.xlu1 %4750 }
0x19a4   :  { %v4728_v28 = vmul.f32 %v4718_v32, %v6076_v53  ;;  %v4771_v12 = vmul.f32 %v4751_v49, %v6076_v53 }
0x19a6   :  { %v8183_v23 = vsub.f32 %v8113_v40, %v4728_v28  ;;  %v4779_v43 = vadd.f32 1e-05, %v4771_v12 }
0x19a8   :  { %5885 = vrsqrt.f32 %v4779_v43  ;;  %v4744_v13 = vmul.f32 %v8183_v23, %v8183_v23  ;;  %vm4802_vm3 = vweird.f32 %v4779_v43 }
0x19aa   :  { %v4764_v30 = vsel %vm181_vm1, %v4744_v13, 0.0 }
0x19ab   :  { %4765 = vadd.xlane.f32.xlu1 %v4764_v30  ;;  %v4721_v4 = vpop.xlane.xlu2 %4720  ;;  %v4754_v47 = vpop.xlane.xlu0 %4753 }
0x19ac   :  { %v4729_v19 = vmul.f32 %v4721_v4, %v6076_v53  ;;  %v4772_v0 = vmul.f32 %v4754_v47, %v6076_v53 }
0x19ae   :  { %v5886_v29 = vpop.eup %5885  ;;  %v8191_v35 = vsub.f32 %v8137_v17, %v4729_v19  ;;  %v4780_v2 = vadd.f32 1e-05, %v4772_v0 }
0x19af   :  { %v4797_v40 = vmul.f32 %v5886_v29, %v4779_v43  ;;  %vm4803_vm2 = vweird.f32 %v5886_v29 }
0x19b0   :  { %5887 = vrsqrt.f32 %v4780_v2  ;;  %v4745_v42 = vmul.f32 %v8191_v35, %v8191_v35  ;;  %vm4804_vm4 = vmor %vm4802_vm3, %vm4803_vm2  ;;  %vm4812_vm6 = vweird.f32 %v4780_v2 }
0x19b1   :  { %v4798_v39 = vmul.f32 %v5886_v29, %v4797_v40 }
0x19b2   :  { %v4767_v62 = vsel %vm181_vm1, %v4745_v42, 0.0 }
0x19b3   :  { %v4799_v15 = vmul.f32 0.5, %v4798_v39  ;;  %4768 = vadd.xlane.f32.xlu2 %v4767_v62  ;;  %v4757_v14 = vpop.xlane.xlu1 %4756 }
0x19b4   :  { %v4773_v11 = vmul.f32 %v4757_v14, %v6076_v53 }
0x19b5   :  { %v4800_v41 = vsub.f32 1.5, %v4799_v15 }
0x19b6   :  { %v5888_v18 = vpop.eup %5887  ;;  %v4781_v61 = vadd.f32 1e-05, %v4773_v11 }
0x19b7   :  { %v4801_v60 = vmul.f32 %v5886_v29, %v4800_v41  ;;  %v4807_v25 = vmul.f32 %v5888_v18, %v4780_v2  ;;  %vm4813_vm5 = vweird.f32 %v5888_v18 }
0x19b8   :  { %5889 = vrsqrt.f32 %v4781_v61  ;;  %vm4814_vm7 = vmor %vm4812_vm6, %vm4813_vm5  ;;  %vm4822_vm8 = vweird.f32 %v4781_v61 }
0x19b9   :  { %v4808_v17 = vmul.f32 %v5888_v18, %v4807_v25  ;;  %v4805_v63 = vsel %vm4804_vm4, %v5886_v29, %v4801_v60 }
0x19ba   :  { %v4867_v10 = vmul.f32 %v4805_v63, %v8109_v5 }
0x19bb   :  { %v4809_v46 = vmul.f32 0.5, %v4808_v17 }
0x19bc   :  { %5340 = vmatmul.msk.f32.gmra.mxu3 %vm181_vm1, %v4867_v10  ;;  %5348 = vmatmul.msk.f32.gmra.mxu0 %vm181_vm1, %v4867_v10 }
0x19bd   :  { %v4810_v20 = vsub.f32 1.5, %v4809_v46 }
0x19be   :  { %v5890_v54 = vpop.eup %5889 }
0x19bf   :  { %v4811_v56 = vmul.f32 %v5888_v18, %v4810_v20  ;;  %v4817_v52 = vmul.f32 %v5890_v54, %v4781_v61  ;;  %vm4823_vm15 = vweird.f32 %v5890_v54 }
0x19c0   :  { %vm4824_vm9 = vmor %vm4822_vm8, %vm4823_vm15 }
0x19c1   :  { %v4818_v51 = vmul.f32 %v5890_v54, %v4817_v52  ;;  %v4815_v33 = vsel %vm4814_vm7, %v5888_v18, %v4811_v56 }
0x19c2   :  { %v4868_v22 = vmul.f32 %v4815_v33, %v8127_v9  ;;  %v4882_v9 = vld [vmem:[%s8302_s9] sm:$0x3] }
0x19c3   :  { %v4819_v55 = vmul.f32 0.5, %v4818_v51  ;;  %v8209_v50 = vperm.slane %v4882_v9, 1  ;;  %v8215_v27 = vperm.slane %v4882_v9, 0 }
0x19c4   :  { %5341 = vmatmul.msk.f32.gmra.mxu3 %vm181_vm1, %v4868_v22  ;;  %5349 = vmatmul.msk.f32.gmra.mxu0 %vm181_vm1, %v4868_v22 }
0x19c5   :  { %v4820_v5 = vsub.f32 1.5, %v4819_v55 }
0x19c7   :  { %v4821_v34 = vmul.f32 %v5890_v54, %v4820_v5 }
0x19c9   :  { %v4825_v59 = vsel %vm4824_vm9, %v5890_v54, %v4821_v34 }
0x19ca   :  { %v4869_v26 = vmul.f32 %v4825_v59, %v8157_v37 }
0x19cc   :  { %5342 = vmatmul.msk.f32.gmra.mxu3 %vm181_vm1, %v4869_v26  ;;  %5350 = vmatmul.msk.f32.gmra.mxu0 %vm181_vm1, %v4869_v26 }
0x19d6   :  { %v4970_v48 = vpop.f32.mrf.mxu0 }
0x19d7   :  { %v4971_v44 = vadd.f32 %v4970_v48, %v8209_v50 }
0x19d9   :  { %4995 = vst [vmem:[%s8303_s10 + $0x8] sm:$0xff] %v4971_v44 }
0x19dc   :  { %v4929_v37 = vpop.f32.mrf.mxu3 }
0x19dd   :  { %v4930_v6 = vadd.f32 %v4929_v37, %v8215_v27  ;;  %v4760_v16 = vpop.xlane.xlu2 %4759 }
0x19de   :  { %v4774_v45 = vmul.f32 %v4760_v16, %v6076_v53 }
0x19df   :  { %4994 = vst [vmem:[%s8303_s10] sm:$0xff] %v4930_v6 }
0x19e0   :  { %v4782_v36 = vadd.f32 1e-05, %v4774_v45 }
0x19e2   :  { %5891 = vrsqrt.f32 %v4782_v36  ;;  %vm4832_vm11 = vweird.f32 %v4782_v36 }
0x19e8   :  { %v5892_v21 = vpop.eup %5891 }
0x19e9   :  { %v4827_v38 = vmul.f32 %v5892_v21, %v4782_v36  ;;  %vm4833_vm10 = vweird.f32 %v5892_v21 }
0x19ea   :  { %vm4834_vm12 = vmor %vm4832_vm11, %vm4833_vm10 }
0x19eb   :  { %v4828_v7 = vmul.f32 %v5892_v21, %v4827_v38 }
0x19ed   :  { %v4829_v3 = vmul.f32 0.5, %v4828_v7 }
0x19ef   :  { %v4830_v31 = vsub.f32 1.5, %v4829_v3 }
0x19f1   :  { %v4831_v57 = vmul.f32 %v5892_v21, %v4830_v31 }
0x19f3   :  { %v4835_v1 = vsel %vm4834_vm12, %v5892_v21, %v4831_v57 }
0x19f4   :  { %v4870_v24 = vmul.f32 %v4835_v1, %v8168_v58 }
0x19f6   :  { %5343 = vmatmul.msk.f32.gmra.mxu3 %vm181_vm1, %v4870_v24  ;;  %5351 = vmatmul.msk.f32.gmra.mxu0 %vm181_vm1, %v4870_v24 }
0x1a16   :  { %v4763_v32 = vpop.xlane.xlu0 %4762 }
0x1a17   :  { %v4775_v49 = vmul.f32 %v4763_v32, %v6076_v53 }
0x1a19   :  { %v4783_v28 = vadd.f32 1e-05, %v4775_v49 }
0x1a1b   :  { %5893 = vrsqrt.f32 %v4783_v28  ;;  %vm4842_vm14 = vweird.f32 %v4783_v28 }
0x1a1e   :  { %v4766_v12 = vpop.xlane.xlu1 %4765 }
0x1a1f   :  { %v4776_v43 = vmul.f32 %v4766_v12, %v6076_v53 }
0x1a21   :  { %v5894_v13 = vpop.eup %5893  ;;  %v4784_v30 = vadd.f32 1e-05, %v4776_v43 }
0x1a22   :  { %v4837_v4 = vmul.f32 %v5894_v13, %v4783_v28  ;;  %vm4843_vm13 = vweird.f32 %v5894_v13 }
0x1a23   :  { %5895 = vrsqrt.f32 %v4784_v30  ;;  %vm4844_vm0 = vmor %vm4842_vm14, %vm4843_vm13  ;;  %vm4852_vm3 = vweird.f32 %v4784_v30 }
0x1a24   :  { %v4838_v47 = vmul.f32 %v5894_v13, %v4837_v4 }
0x1a26   :  { %v4839_v19 = vmul.f32 0.5, %v4838_v47  ;;  %v4769_v0 = vpop.xlane.xlu2 %4768 }
0x1a27   :  { %v4777_v58 = vmul.f32 %v4769_v0, %v6076_v53 }
0x1a28   :  { %v4840_v29 = vsub.f32 1.5, %v4839_v19 }
0x1a29   :  { %v5896_v2 = vpop.eup %5895  ;;  %v4785_v40 = vadd.f32 1e-05, %v4777_v58 }
0x1a2a   :  { %v4841_v42 = vmul.f32 %v5894_v13, %v4840_v29  ;;  %v4847_v39 = vmul.f32 %v5896_v2, %v4784_v30  ;;  %vm4853_vm2 = vweird.f32 %v5896_v2 }
0x1a2b   :  { %5897 = vrsqrt.f32 %v4785_v40  ;;  %vm4854_vm4 = vmor %vm4852_vm3, %vm4853_vm2  ;;  %vm4862_vm6 = vweird.f32 %v4785_v40 }
0x1a2c   :  { %v4848_v62 = vmul.f32 %v5896_v2, %v4847_v39  ;;  %v4845_v15 = vsel %vm4844_vm0, %v5894_v13, %v4841_v42 }
0x1a2d   :  { %v4871_v14 = vmul.f32 %v4845_v15, %v8175_v8 }
0x1a2e   :  { %v4849_v11 = vmul.f32 0.5, %v4848_v62 }
0x1a2f   :  { %5344 = vmatmul.msk.f32.gmra.mxu3 %vm181_vm1, %v4871_v14  ;;  %5352 = vmatmul.msk.f32.gmra.mxu0 %vm181_vm1, %v4871_v14 }
0x1a30   :  { %v4850_v41 = vsub.f32 1.5, %v4849_v11 }
0x1a31   :  { %v5898_v53 = vpop.eup %5897 }
0x1a32   :  { %v4851_v18 = vmul.f32 %v5896_v2, %v4850_v41  ;;  %v4857_v61 = vmul.f32 %v5898_v53, %v4785_v40  ;;  %vm4863_vm5 = vweird.f32 %v5898_v53 }
0x1a33   :  { %vm4864_vm7 = vmor %vm4862_vm6, %vm4863_vm5 }
0x1a34   :  { %v4858_v60 = vmul.f32 %v5898_v53, %v4857_v61  ;;  %v4855_v25 = vsel %vm4854_vm4, %v5896_v2, %v4851_v18 }
0x1a35   :  { %v4872_v17 = vmul.f32 %v4855_v25, %v8183_v23 }
0x1a36   :  { %v4859_v63 = vmul.f32 0.5, %v4858_v60 }
0x1a37   :  { %5345 = vmatmul.msk.f32.gmra.mxu3 %vm181_vm1, %v4872_v17  ;;  %5353 = vmatmul.msk.f32.gmra.mxu0 %vm181_vm1, %v4872_v17 }
0x1a38   :  { %v4860_v8 = vsub.f32 1.5, %v4859_v63 }
0x1a39   :  { %v4973_v10 = vpop.f32.mrf.mxu0 }
0x1a3a   :  { %v4861_v46 = vmul.f32 %v5898_v53, %v4860_v8  ;;  %v4974_v20 = vadd.f32 %v4973_v10, %v8209_v50 }
0x1a3c   :  { %4997 = vst [vmem:[%s8303_s10 + $0x18] sm:$0xff] %v4974_v20  ;;  %v4865_v54 = vsel %vm4864_vm7, %v5898_v53, %v4861_v46 }
0x1a3d   :  { %v4873_v23 = vmul.f32 %v4865_v54, %v8191_v35 }
0x1a3f   :  { %v4932_v56 = vpop.f32.mrf.mxu3  ;;  %5346 = vmatmul.msk.f32.gmra.mxu3 %vm181_vm1, %v4873_v23  ;;  %5354 = vmatmul.msk.f32.gmra.mxu0 %vm181_vm1, %v4873_v23 }
0x1a40   :  { %v4933_v52 = vadd.f32 %v4932_v56, %v8215_v27 }
0x1a41   :  { %v4976_v51 = vpop.f32.mrf.mxu0 }
0x1a42   :  { %4996 = vst [vmem:[%s8303_s10 + $0x10] sm:$0xff] %v4933_v52  ;;  %v4977_v33 = vadd.f32 %v4976_v51, %v8209_v50 }
0x1a44   :  { %4999 = vst [vmem:[%s8303_s10 + $0x28] sm:$0xff] %v4977_v33 }
0x1a47   :  { %v4935_v22 = vpop.f32.mrf.mxu3 }
0x1a48   :  { %v4936_v35 = vadd.f32 %v4935_v22, %v8215_v27 }
0x1a49   :  { %v4979_v55 = vpop.f32.mrf.mxu0 }
0x1a4a   :  { %4998 = vst [vmem:[%s8303_s10 + $0x20] sm:$0xff] %v4936_v35  ;;  %v4980_v5 = vadd.f32 %v4979_v55, %v8209_v50 }
0x1a4c   :  { %5001 = vst [vmem:[%s8303_s10 + $0x38] sm:$0xff] %v4980_v5 }
0x1a4f   :  { %v4938_v34 = vpop.f32.mrf.mxu3 }
0x1a50   :  { %v4939_v59 = vadd.f32 %v4938_v34, %v8215_v27 }
0x1a52   :  { %5000 = vst [vmem:[%s8303_s10 + $0x30] sm:$0xff] %v4939_v59 }
0x1a73   :  { %v4982_v26 = vpop.f32.mrf.mxu0 }
0x1a74   :  { %v4983_v9 = vadd.f32 %v4982_v26, %v8209_v50 }
0x1a76   :  { %5003 = vst [vmem:[%s8303_s10 + $0x48] sm:$0xff] %v4983_v9 }
0x1a79   :  { %v4941_v48 = vpop.f32.mrf.mxu3 }
0x1a7a   :  { %v4942_v44 = vadd.f32 %v4941_v48, %v8215_v27 }
0x1a7c   :  { %5002 = vst [vmem:[%s8303_s10 + $0x40] sm:$0xff] %v4942_v44 }
0x1aac   :  { %v4985_v37 = vpop.f32.mrf.mxu0 }
0x1aad   :  { %v4986_v6 = vadd.f32 %v4985_v37, %v8209_v50 }
0x1aaf   :  { %5005 = vst [vmem:[%s8303_s10 + $0x58] sm:$0xff] %v4986_v6 }
0x1ab2   :  { %v4944_v16 = vpop.f32.mrf.mxu3 }
0x1ab3   :  { %v4945_v45 = vadd.f32 %v4944_v16, %v8215_v27 }
0x1ab4   :  { %v4988_v36 = vpop.f32.mrf.mxu0 }
0x1ab5   :  { %5004 = vst [vmem:[%s8303_s10 + $0x50] sm:$0xff] %v4945_v45  ;;  %v4989_v21 = vadd.f32 %v4988_v36, %v8209_v50 }
0x1ab7   :  { %5007 = vst [vmem:[%s8303_s10 + $0x68] sm:$0xff] %v4989_v21 }
0x1aba   :  { %v4947_v38 = vpop.f32.mrf.mxu3 }
0x1abb   :  { %v4948_v7 = vadd.f32 %v4947_v38, %v8215_v27 }
0x1abc   :  { %v4991_v3 = vpop.f32.mrf.mxu0 }
0x1abd   :  { %5006 = vst [vmem:[%s8303_s10 + $0x60] sm:$0xff] %v4948_v7  ;;  %v4992_v31 = vadd.f32 %v4991_v3, %v8209_v50 }
0x1abf   :  { %5009 = vst [vmem:[%s8303_s10 + $0x78] sm:$0xff] %v4992_v31 }
0x1ac2   :  { %v4950_v57 = vpop.f32.mrf.mxu3 }
0x1ac3   :  { %v4951_v1 = vadd.f32 %v4950_v57, %v8215_v27 }
0x1ac5   :  { %5008 = vst [vmem:[%s8303_s10 + $0x70] sm:$0xff] %v4951_v1 }

</bundles_post_ra>
